<compile_context>
chip_gen: v7x
topology: tpu7x:2x2x1
jax: 0.10.0
libtpu: 0.0.40
codegen_flags: <defaults>
</compile_context>

<pallas_src>
import functools

import jax
import jax.numpy as jnp
from jax import lax
from jax.experimental import pallas as pl
from jax.experimental.pallas import tpu as pltpu


def _prelu(y, a):
    return jnp.where(y >= 0.0, y, a * y)


def _round_up(x, m):
    return ((x + m - 1) // m) * m


def _dims(H, W):
    Wpad = W + 4                       # 2 left + 2 right zero columns
    Hp0 = H + 2                        # rows per output parity plane
    Np0 = Hp0 * Wpad                   # valid lanes per parity plane
    Npr = _round_up(Np0, 128)          # lane-dense compute/store width
    # enough padded rows that every tap slice [off, off+Npr) stays in bounds
    rows_pad = max(H + 5, -(-(2 * Wpad + 2 + Npr) // Wpad))
    Lp = rows_pad * Wpad               # padded + flattened activation length
    return Wpad, Hp0, Np0, Npr, rows_pad, Lp


# ----------------------------- fused Pallas kernel ---------------------------

def _make_fused_kernel(H, W):
    Wpad, Hp0, Np0, Npr, rows_pad, Lp = _dims(H, W)

    def kernel(x_ref, w1_ref, w2_ref, w3_ref, alpha_ref, out_ref, p_ref):
        # PReLU slopes as SMEM scalars (splat on the scalar path, no XLU).
        a1 = alpha_ref[0]
        a2 = alpha_ref[1]
        a3 = alpha_ref[2]

        # ---- conv1 (1x1) + bias + pad-mask + PReLU: one MXU matmul ----------
        # x rows = [x0,x1,x2, mask, ones]; w1 rows 0..63 = [W1 | b1 | 0],
        # row 64 = [0 0 0 0 1] -> p row 64 == 1 everywhere (bias lane).
        y1 = jnp.dot(w1_ref[...], x_ref[...],
                     preferred_element_type=jnp.float32)          # (65, Lp)
        p_ref[...] = _prelu(y1, a1)                               # pad pixels stay 0

        # ---- polyphase ConvTranspose2d: 9 taps, 8 output rows batched -------
        # acc rows r = ph*4 + pw*2 + co for r<8; row 8 is the constant-1 lane
        # (conv-transpose bias b2 is folded into tap 0 via p row 64).
        acc = jnp.zeros((9, Npr), jnp.float32)
        for dh in range(3):
            for dw in range(3):
                off = (2 - dh) * Wpad + (2 - dw)
                acc = acc + jnp.dot(
                    w2_ref[dh * 3 + dw], p_ref[:, off:off + Npr],
                    preferred_element_type=jnp.float32)           # (9, Npr)
        v4 = _prelu(acc, a2)                                      # row 8 stays 1

        # ---- conv3 (1x1, 2->6) + bias + PReLU for all 4 parities ------------
        # block-diagonal (32, 9) weight; column 8 carries b3 (ones row of v4).
        v5 = jnp.dot(w3_ref[...], v4,
                     preferred_element_type=jnp.float32)          # (32, Npr)
        out_ref[...] = _prelu(v5, a3)

    return kernel


# --------------------------- one-time parameter prep -------------------------

def prepare_params(params, H, W):
    (w1, b1, a1, w2, b2, a2, w3, b3, a3) = params
    Wpad, Hp0, Np0, Npr, rows_pad, Lp = _dims(H, W)

    # conv1: (65, 5) = [[W1 | b1 | 0], [0 0 0 0 1]].
    w1_aug = jnp.zeros((65, 5), jnp.float32)
    w1_aug = w1_aug.at[:64, :3].set(w1[:, :, 0, 0])
    w1_aug = w1_aug.at[:64, 3].set(b1)
    w1_aug = w1_aug.at[64, 4].set(1.0)

    # ConvTranspose2d taps: w2tap[t=dh*3+dw, r=ph*4+pw*2+co, ci]
    #   = w2[ci, co, 2*dh+ph, 2*dw+pw] (zero where the tap leaves the 5x5).
    w2t = jnp.transpose(w2, (2, 3, 1, 0))                          # (5,5,co,ci)
    w2t = jnp.pad(w2t, ((0, 1), (0, 1), (0, 0), (0, 0)))           # (6,6,co,ci)
    w2t = w2t.reshape(3, 2, 3, 2, 2, 64)                           # [dh,ph,dw,pw,co,ci]
    w2core = jnp.transpose(w2t, (0, 2, 1, 3, 4, 5)).reshape(9, 8, 64)
    w2tap = jnp.zeros((9, 9, 65), jnp.float32)
    w2tap = w2tap.at[:, :8, :64].set(w2core)
    w2tap = w2tap.at[0, :8, 64].set(jnp.tile(b2, 4))               # fold b2 (x ones row)
    w2tap = w2tap.at[0, 8, 64].set(1.0)                            # ones row for conv3 bias

    # conv3: block-diagonal (32, 9); rows r = parity*8 + co (co padded 6->8),
    # column 8 carries b3 (multiplies the constant-1 row of v4).
    w3m = w3[:, :, 0, 0]                                           # (6, 2)
    w3big = jnp.zeros((32, 9), jnp.float32)
    for par in range(4):
        w3big = w3big.at[par * 8:par * 8 + 6, par * 2:par * 2 + 2].set(w3m)
        w3big = w3big.at[par * 8:par * 8 + 6, 8].set(b3)

    # constant padded-input template: channels [0, 0, 0, mask, ones].
    base = jnp.zeros((5, rows_pad, Wpad), jnp.float32)
    base = base.at[3, 2:H + 2, 2:W + 2].set(1.0)
    base = base.at[4].set(1.0)

    return dict(w1_aug=w1_aug, w2tap=w2tap, w3big=w3big, base=base,
                alphas=jnp.stack([a1[0], a2[0], a3[0]]))


# ------------------------------- forward pass --------------------------------

def model_forward(x_nchw, prep, H, W):
    Wpad, Hp0, Np0, Npr, rows_pad, Lp = _dims(H, W)
    OH, OW = 2 * H + 3, 2 * W + 3

    # One dynamic-update-slice builds the padded 5-channel input
    # (pad + mask + ones in a single fused op; the reshape is free).
    xaug = prep["base"].at[0:3, 2:H + 2, 2:W + 2].set(x_nchw[0]).reshape(5, Lp)

    kernel = _make_fused_kernel(H, W)
    out = pl.pallas_call(
        kernel,
        out_shape=jax.ShapeDtypeStruct((32, Npr), jnp.float32),
        grid=(1,),
        in_specs=[
            pl.BlockSpec((5, Lp), lambda i: (0, 0)),                    # xaug
            pl.BlockSpec((65, 5), lambda i: (0, 0)),                    # w1_aug
            pl.BlockSpec((9, 9, 65), lambda i: (0, 0, 0)),              # w2tap
            pl.BlockSpec((32, 9), lambda i: (0, 0)),                    # w3big
            pl.BlockSpec(memory_space=pltpu.MemorySpace.SMEM),          # alphas
        ],
        out_specs=pl.BlockSpec((32, Npr), lambda i: (0, 0)),
        scratch_shapes=[pltpu.VMEM((65, Lp), jnp.float32)],             # conv1 act.
    )(xaug, prep["w1_aug"], prep["w2tap"], prep["w3big"], prep["alphas"])

    # Interleave the 4 parity planes back to NCHW (one fused transpose/crop).
    arr = out[:, :Np0].reshape(2, 2, 8, Hp0, Wpad)[:, :, :6, :, :W + 2]
    arr = jnp.transpose(arr, (2, 3, 0, 4, 1)).reshape(6, 2 * Hp0, 2 * (W + 2))
    return arr[None, :, :OH, :OW]


# ------------------------------ pure-JAX reference ----------------------------

def model_forward_ref(x, params):
    (w1, b1, a1, w2, b2, a2, w3, b3, a3) = params
    dn = ('NCHW', 'OIHW', 'NCHW')
    prec = lax.Precision.HIGHEST
    v1 = lax.conv_general_dilated(x, w1, (1, 1), 'VALID',
                                  dimension_numbers=dn, precision=prec)
    v2 = _prelu(v1 + b1[None, :, None, None], a1[0])
    # conv_transpose == conv of lhs-dilated input with spatially flipped kernel
    w2_oihw = jnp.transpose(w2, (1, 0, 2, 3))[:, :, ::-1, ::-1]
    v3 = lax.conv_general_dilated(v2, w2_oihw, (1, 1), [(4, 4), (4, 4)],
                                  lhs_dilation=(2, 2), dimension_numbers=dn,
                                  precision=prec)
    v4 = _prelu(v3 + b2[None, :, None, None], a2[0])
    v5 = lax.conv_general_dilated(v4, w3, (1, 1), 'VALID',
                                  dimension_numbers=dn, precision=prec)
    v6 = _prelu(v5 + b3[None, :, None, None], a3[0])
    return v6


# ----------------------------------- main -------------------------------------

if __name__ == "__main__":
    key = jax.random.PRNGKey(0)
    ks = jax.random.split(key, 7)

    # deterministic synthetic parameters (torch layouts)
    w1 = jax.random.normal(ks[0], (64, 3, 1, 1), jnp.float32) * 0.2   # Conv2d(3,64,1)
    b1 = jax.random.normal(ks[1], (64,), jnp.float32) * 0.1
    w2 = jax.random.normal(ks[2], (64, 2, 5, 5), jnp.float32) * 0.05  # ConvT(64,2,5,s2)
    b2 = jax.random.normal(ks[3], (2,), jnp.float32) * 0.1
    w3 = jax.random.normal(ks[4], (6, 2, 1, 1), jnp.float32) * 0.2    # Conv2d(2,6,1)
    b3 = jax.random.normal(ks[5], (6,), jnp.float32) * 0.1
    a1 = jnp.array([0.25], jnp.float32)   # nn.PReLU() default init
    a2 = jnp.array([0.25], jnp.float32)
    a3 = jnp.array([0.25], jnp.float32)
    params = (w1, b1, a1, w2, b2, a2, w3, b3, a3)

    # input consistent with the module's NCHW (1, 3, 32, 32) signature
    H = W = 32
    x1 = jax.random.normal(ks[6], (1, 3, H, W), jnp.float32)

    prep = prepare_params(params, H, W)              # one-time hoisted weight prep
    fwd = jax.jit(functools.partial(model_forward, H=H, W=W))

    out = jax.block_until_ready(fwd(x1, prep))

    ref = jax.block_until_ready(model_forward_ref(x1, params))
    assert out.shape == (1, 6, 2 * H + 3, 2 * W + 3), out.shape
    err = float(jnp.max(jnp.abs(out - ref)))
    assert err < 5e-3, f"max abs error {err}"

    print("KERNEL_OK")
</pallas_src>

<mosaic_0001>
module attributes {stable_mosaic.version = 11 : i64} {
  func.func @kernel(%arg0: i32, %arg1: memref<5x1368xf32, #tpu.memory_space<vmem>>, %arg2: memref<65x5xf32, #tpu.memory_space<vmem>>, %arg3: memref<9x9x65xf32, #tpu.memory_space<vmem>>, %arg4: memref<32x9xf32, #tpu.memory_space<vmem>>, %arg5: memref<3xf32, #tpu.memory_space<smem>>, %arg6: memref<32x1280xf32, #tpu.memory_space<vmem>>, %arg7: memref<65x1368xf32, #tpu.memory_space<vmem>>) attributes {dimension_semantics = [#tpu.dimension_semantics<arbitrary>], iteration_bounds = array<i64: 1>, scalar_prefetch = 0 : i64, scratch_operands = 1 : i64, tpu.core_type = #tpu.core_type<tc>, window_params = [{pipeline_mode = #tpu.pipeline_mode<synchronous>, transform_indices = @transform_0, window_bounds = array<i64: 5, 1368>}, {pipeline_mode = #tpu.pipeline_mode<synchronous>, transform_indices = @transform_1, window_bounds = array<i64: 65, 5>}, {pipeline_mode = #tpu.pipeline_mode<synchronous>, transform_indices = @transform_2, window_bounds = array<i64: 9, 9, 65>}, {pipeline_mode = #tpu.pipeline_mode<synchronous>, transform_indices = @transform_3, window_bounds = array<i64: 32, 9>}, {transform_indices = @transform_4, window_bounds = array<i64: 3>}, {pipeline_mode = #tpu.pipeline_mode<synchronous>, transform_indices = @transform_5, window_bounds = array<i64: 32, 1280>}]} {
    %c0 = arith.constant 0 : index
    %0 = memref.load %arg5[%c0] : memref<3xf32, #tpu.memory_space<smem>>
    %c1 = arith.constant 1 : index
    %1 = memref.load %arg5[%c1] : memref<3xf32, #tpu.memory_space<smem>>
    %c2 = arith.constant 2 : index
    %2 = memref.load %arg5[%c2] : memref<3xf32, #tpu.memory_space<smem>>
    %c0_0 = arith.constant 0 : index
    %c0_1 = arith.constant 0 : index
    %3 = vector.load %arg2[%c0_0, %c0_1] : memref<65x5xf32, #tpu.memory_space<vmem>>, vector<65x5xf32>
    %c0_2 = arith.constant 0 : index
    %c0_3 = arith.constant 0 : index
    %4 = vector.load %arg1[%c0_2, %c0_3] : memref<5x1368xf32, #tpu.memory_space<vmem>>, vector<5x1368xf32>
    %cst = arith.constant dense<0.000000e+00> : vector<65x1368xf32>
    %5 = tpu.matmul %3, %4, %cst {dimension_numbers = #tpu.dot_dimension_numbers<[1], [0], [0], [1], [0, 0, 1, 1], [], []>} : vector<65x5xf32>, vector<5x1368xf32>, vector<65x1368xf32> -> vector<65x1368xf32>
    %cst_4 = arith.constant 0.000000e+00 : f32
    %6 = vector.broadcast %cst_4 : f32 to vector<65x1368xf32>
    %7 = arith.cmpf oge, %5, %6 : vector<65x1368xf32>
    %8 = vector.broadcast %0 : f32 to vector<65x1368xf32>
    %9 = arith.mulf %8, %5 : vector<65x1368xf32>
    %10 = arith.select %7, %5, %9 : vector<65x1368xi1>, vector<65x1368xf32>
    %c0_5 = arith.constant 0 : index
    %c0_6 = arith.constant 0 : index
    %11 = vector.load %arg7[%c0_5, %c0_6] : memref<65x1368xf32, #tpu.memory_space<vmem>>, vector<65x1368xf32>
    tpu.vector_store %arg7[%c0_5, %c0_6], %10 {strides = array<i32>} : memref<65x1368xf32, #tpu.memory_space<vmem>>, vector<65x1368xf32>,
    %cst_7 = arith.constant 0.000000e+00 : f32
    %12 = vector.broadcast %cst_7 : f32 to vector<9x1280xf32>
    %c0_8 = arith.constant 0 : index
    %c0_9 = arith.constant 0 : index
    %c0_10 = arith.constant 0 : index
    %13 = vector.load %arg3[%c0_8, %c0_9, %c0_10] : memref<9x9x65xf32, #tpu.memory_space<vmem>>, vector<1x9x65xf32>
    %14 = vector.shape_cast %13 : vector<1x9x65xf32> to vector<9x65xf32>
    %c0_11 = arith.constant 0 : index
    %c74 = arith.constant 74 : index
    %15 = vector.load %arg7[%c0_11, %c74] : memref<65x1368xf32, #tpu.memory_space<vmem>>, vector<65x1280xf32>
    %cst_12 = arith.constant dense<0.000000e+00> : vector<9x1280xf32>
    %16 = tpu.matmul %14, %15, %cst_12 {dimension_numbers = #tpu.dot_dimension_numbers<[1], [0], [0], [1], [0, 0, 1, 1], [], []>} : vector<9x65xf32>, vector<65x1280xf32>, vector<9x1280xf32> -> vector<9x1280xf32>
    %17 = arith.addf %12, %16 : vector<9x1280xf32>
    %c1_13 = arith.constant 1 : index
    %c0_14 = arith.constant 0 : index
    %c0_15 = arith.constant 0 : index
    %18 = vector.load %arg3[%c1_13, %c0_14, %c0_15] : memref<9x9x65xf32, #tpu.memory_space<vmem>>, vector<1x9x65xf32>
    %19 = vector.shape_cast %18 : vector<1x9x65xf32> to vector<9x65xf32>
    %c0_16 = arith.constant 0 : index
    %c73 = arith.constant 73 : index
    %20 = vector.load %arg7[%c0_16, %c73] : memref<65x1368xf32, #tpu.memory_space<vmem>>, vector<65x1280xf32>
    %cst_17 = arith.constant dense<0.000000e+00> : vector<9x1280xf32>
    %21 = tpu.matmul %19, %20, %cst_17 {dimension_numbers = #tpu.dot_dimension_numbers<[1], [0], [0], [1], [0, 0, 1, 1], [], []>} : vector<9x65xf32>, vector<65x1280xf32>, vector<9x1280xf32> -> vector<9x1280xf32>
    %22 = arith.addf %17, %21 : vector<9x1280xf32>
    %c2_18 = arith.constant 2 : index
    %c0_19 = arith.constant 0 : index
    %c0_20 = arith.constant 0 : index
    %23 = vector.load %arg3[%c2_18, %c0_19, %c0_20] : memref<9x9x65xf32, #tpu.memory_space<vmem>>, vector<1x9x65xf32>
    %24 = vector.shape_cast %23 : vector<1x9x65xf32> to vector<9x65xf32>
    %c0_21 = arith.constant 0 : index
    %c72 = arith.constant 72 : index
    %25 = vector.load %arg7[%c0_21, %c72] : memref<65x1368xf32, #tpu.memory_space<vmem>>, vector<65x1280xf32>
    %cst_22 = arith.constant dense<0.000000e+00> : vector<9x1280xf32>
    %26 = tpu.matmul %24, %25, %cst_22 {dimension_numbers = #tpu.dot_dimension_numbers<[1], [0], [0], [1], [0, 0, 1, 1], [], []>} : vector<9x65xf32>, vector<65x1280xf32>, vector<9x1280xf32> -> vector<9x1280xf32>
    %27 = arith.addf %22, %26 : vector<9x1280xf32>
    %c3 = arith.constant 3 : index
    %c0_23 = arith.constant 0 : index
    %c0_24 = arith.constant 0 : index
    %28 = vector.load %arg3[%c3, %c0_23, %c0_24] : memref<9x9x65xf32, #tpu.memory_space<vmem>>, vector<1x9x65xf32>
    %29 = vector.shape_cast %28 : vector<1x9x65xf32> to vector<9x65xf32>
    %c0_25 = arith.constant 0 : index
    %c38 = arith.constant 38 : index
    %30 = vector.load %arg7[%c0_25, %c38] : memref<65x1368xf32, #tpu.memory_space<vmem>>, vector<65x1280xf32>
    %cst_26 = arith.constant dense<0.000000e+00> : vector<9x1280xf32>
    %31 = tpu.matmul %29, %30, %cst_26 {dimension_numbers = #tpu.dot_dimension_numbers<[1], [0], [0], [1], [0, 0, 1, 1], [], []>} : vector<9x65xf32>, vector<65x1280xf32>, vector<9x1280xf32> -> vector<9x1280xf32>
    %32 = arith.addf %27, %31 : vector<9x1280xf32>
    %c4 = arith.constant 4 : index
    %c0_27 = arith.constant 0 : index
    %c0_28 = arith.constant 0 : index
    %33 = vector.load %arg3[%c4, %c0_27, %c0_28] : memref<9x9x65xf32, #tpu.memory_space<vmem>>, vector<1x9x65xf32>
    %34 = vector.shape_cast %33 : vector<1x9x65xf32> to vector<9x65xf32>
    %c0_29 = arith.constant 0 : index
    %c37 = arith.constant 37 : index
    %35 = vector.load %arg7[%c0_29, %c37] : memref<65x1368xf32, #tpu.memory_space<vmem>>, vector<65x1280xf32>
    %cst_30 = arith.constant dense<0.000000e+00> : vector<9x1280xf32>
    %36 = tpu.matmul %34, %35, %cst_30 {dimension_numbers = #tpu.dot_dimension_numbers<[1], [0], [0], [1], [0, 0, 1, 1], [], []>} : vector<9x65xf32>, vector<65x1280xf32>, vector<9x1280xf32> -> vector<9x1280xf32>
    %37 = arith.addf %32, %36 : vector<9x1280xf32>
    %c5 = arith.constant 5 : index
    %c0_31 = arith.constant 0 : index
    %c0_32 = arith.constant 0 : index
    %38 = vector.load %arg3[%c5, %c0_31, %c0_32] : memref<9x9x65xf32, #tpu.memory_space<vmem>>, vector<1x9x65xf32>
    %39 = vector.shape_cast %38 : vector<1x9x65xf32> to vector<9x65xf32>
    %c0_33 = arith.constant 0 : index
    %c36 = arith.constant 36 : index
    %40 = vector.load %arg7[%c0_33, %c36] : memref<65x1368xf32, #tpu.memory_space<vmem>>, vector<65x1280xf32>
    %cst_34 = arith.constant dense<0.000000e+00> : vector<9x1280xf32>
    %41 = tpu.matmul %39, %40, %cst_34 {dimension_numbers = #tpu.dot_dimension_numbers<[1], [0], [0], [1], [0, 0, 1, 1], [], []>} : vector<9x65xf32>, vector<65x1280xf32>, vector<9x1280xf32> -> vector<9x1280xf32>
    %42 = arith.addf %37, %41 : vector<9x1280xf32>
    %c6 = arith.constant 6 : index
    %c0_35 = arith.constant 0 : index
    %c0_36 = arith.constant 0 : index
    %43 = vector.load %arg3[%c6, %c0_35, %c0_36] : memref<9x9x65xf32, #tpu.memory_space<vmem>>, vector<1x9x65xf32>
    %44 = vector.shape_cast %43 : vector<1x9x65xf32> to vector<9x65xf32>
    %c0_37 = arith.constant 0 : index
    %c2_38 = arith.constant 2 : index
    %45 = vector.load %arg7[%c0_37, %c2_38] : memref<65x1368xf32, #tpu.memory_space<vmem>>, vector<65x1280xf32>
    %cst_39 = arith.constant dense<0.000000e+00> : vector<9x1280xf32>
    %46 = tpu.matmul %44, %45, %cst_39 {dimension_numbers = #tpu.dot_dimension_numbers<[1], [0], [0], [1], [0, 0, 1, 1], [], []>} : vector<9x65xf32>, vector<65x1280xf32>, vector<9x1280xf32> -> vector<9x1280xf32>
    %47 = arith.addf %42, %46 : vector<9x1280xf32>
    %c7 = arith.constant 7 : index
    %c0_40 = arith.constant 0 : index
    %c0_41 = arith.constant 0 : index
    %48 = vector.load %arg3[%c7, %c0_40, %c0_41] : memref<9x9x65xf32, #tpu.memory_space<vmem>>, vector<1x9x65xf32>
    %49 = vector.shape_cast %48 : vector<1x9x65xf32> to vector<9x65xf32>
    %c0_42 = arith.constant 0 : index
    %c1_43 = arith.constant 1 : index
    %50 = vector.load %arg7[%c0_42, %c1_43] : memref<65x1368xf32, #tpu.memory_space<vmem>>, vector<65x1280xf32>
    %cst_44 = arith.constant dense<0.000000e+00> : vector<9x1280xf32>
    %51 = tpu.matmul %49, %50, %cst_44 {dimension_numbers = #tpu.dot_dimension_numbers<[1], [0], [0], [1], [0, 0, 1, 1], [], []>} : vector<9x65xf32>, vector<65x1280xf32>, vector<9x1280xf32> -> vector<9x1280xf32>
    %52 = arith.addf %47, %51 : vector<9x1280xf32>
    %c8 = arith.constant 8 : index
    %c0_45 = arith.constant 0 : index
    %c0_46 = arith.constant 0 : index
    %53 = vector.load %arg3[%c8, %c0_45, %c0_46] : memref<9x9x65xf32, #tpu.memory_space<vmem>>, vector<1x9x65xf32>
    %54 = vector.shape_cast %53 : vector<1x9x65xf32> to vector<9x65xf32>
    %c0_47 = arith.constant 0 : index
    %c0_48 = arith.constant 0 : index
    %55 = vector.load %arg7[%c0_47, %c0_48] : memref<65x1368xf32, #tpu.memory_space<vmem>>, vector<65x1280xf32>
    %cst_49 = arith.constant dense<0.000000e+00> : vector<9x1280xf32>
    %56 = tpu.matmul %54, %55, %cst_49 {dimension_numbers = #tpu.dot_dimension_numbers<[1], [0], [0], [1], [0, 0, 1, 1], [], []>} : vector<9x65xf32>, vector<65x1280xf32>, vector<9x1280xf32> -> vector<9x1280xf32>
    %57 = arith.addf %52, %56 : vector<9x1280xf32>
    %cst_50 = arith.constant 0.000000e+00 : f32
    %58 = vector.broadcast %cst_50 : f32 to vector<9x1280xf32>
    %59 = arith.cmpf oge, %57, %58 : vector<9x1280xf32>
    %60 = vector.broadcast %1 : f32 to vector<9x1280xf32>
    %61 = arith.mulf %60, %57 : vector<9x1280xf32>
    %62 = arith.select %59, %57, %61 : vector<9x1280xi1>, vector<9x1280xf32>
    %c0_51 = arith.constant 0 : index
    %c0_52 = arith.constant 0 : index
    %63 = vector.load %arg4[%c0_51, %c0_52] : memref<32x9xf32, #tpu.memory_space<vmem>>, vector<32x9xf32>
    %cst_53 = arith.constant dense<0.000000e+00> : vector<32x1280xf32>
    %64 = tpu.matmul %63, %62, %cst_53 {dimension_numbers = #tpu.dot_dimension_numbers<[1], [0], [0], [1], [0, 0, 1, 1], [], []>} : vector<32x9xf32>, vector<9x1280xf32>, vector<32x1280xf32> -> vector<32x1280xf32>
    %cst_54 = arith.constant 0.000000e+00 : f32
    %65 = vector.broadcast %cst_54 : f32 to vector<32x1280xf32>
    %66 = arith.cmpf oge, %64, %65 : vector<32x1280xf32>
    %67 = vector.broadcast %2 : f32 to vector<32x1280xf32>
    %68 = arith.mulf %67, %64 : vector<32x1280xf32>
    %69 = arith.select %66, %64, %68 : vector<32x1280xi1>, vector<32x1280xf32>
    %c0_55 = arith.constant 0 : index
    %c0_56 = arith.constant 0 : index
    %70 = vector.load %arg6[%c0_55, %c0_56] : memref<32x1280xf32, #tpu.memory_space<vmem>>, vector<32x1280xf32>
    tpu.vector_store %arg6[%c0_55, %c0_56], %69 {strides = array<i32>} : memref<32x1280xf32, #tpu.memory_space<vmem>>, vector<32x1280xf32>,
    return
  }
  func.func @transform_0(%arg0: i32) -> (i32, i32) {
    %c0_i32 = arith.constant 0 : i32
    %c0_i32_0 = arith.constant 0 : i32
    %c0_i32_1 = arith.constant 0 : i32
    return %c0_i32, %c0_i32_0 : i32, i32
  }
  func.func @transform_1(%arg0: i32) -> (i32, i32) {
    %c0_i32 = arith.constant 0 : i32
    %c0_i32_0 = arith.constant 0 : i32
    %c0_i32_1 = arith.constant 0 : i32
    return %c0_i32, %c0_i32_0 : i32, i32
  }
  func.func @transform_2(%arg0: i32) -> (i32, i32, i32) {
    %c0_i32 = arith.constant 0 : i32
    %c0_i32_0 = arith.constant 0 : i32
    %c0_i32_1 = arith.constant 0 : i32
    %c0_i32_2 = arith.constant 0 : i32
    return %c0_i32, %c0_i32_0, %c0_i32_1 : i32, i32, i32
  }
  func.func @transform_3(%arg0: i32) -> (i32, i32) {
    %c0_i32 = arith.constant 0 : i32
    %c0_i32_0 = arith.constant 0 : i32
    %c0_i32_1 = arith.constant 0 : i32
    return %c0_i32, %c0_i32_0 : i32, i32
  }
  func.func @transform_4(%arg0: i32) -> i32 {
    %c0_i32 = arith.constant 0 : i32
    %c0_i32_0 = arith.constant 0 : i32
    return %c0_i32 : i32
  }
  func.func @transform_5(%arg0: i32) -> (i32, i32) {
    %c0_i32 = arith.constant 0 : i32
    %c0_i32_0 = arith.constant 0 : i32
    %c0_i32_1 = arith.constant 0 : i32
    return %c0_i32, %c0_i32_0 : i32, i32
  }
}

</mosaic_0001>

<bundles_post_ra>
// kernel: model_forward.1
= control target key start
LH: loop header
LB: loop body
LE: loop exit
PB: predicated region body
PF: predicated region fallthrough
CT: control target
= control target key end

     0   :  { %10 = vsyncpa [#allocation4], 0  ;;  %s18230_s0 = inlined_call_operand.vmem [shape: f32[5,1368], index: 0, kind: input, shape index: {}]   ;;  %s18231_s1 = inlined_call_operand.vmem [shape: f32[65,5], index: 1, kind: input, shape index: {}]   ;;  %s18232_s2 = inlined_call_operand.hbm [shape: f32[9,9,65], index: 2, kind: input, shape index: {}]   ;;  %s18233_s3 = inlined_call_operand.vmem [shape: f32[32,9], index: 3, kind: input, shape index: {}]   ;;  %s18234_s4 = inlined_call_operand.hbm [shape: f32[3], index: 4, kind: input, shape index: {}]   ;;  %s18235_s5 = inlined_call_operand.vmem [shape: f32[32,1280], index: 5, kind: output, shape index: {}]  }
   0x1   :  { %11 = vsyncpa [#allocation5], 0  ;;  %s12286_s18 = smov [#allocation3]   ;;  %s12250_s22 = scalar_lea.hbm %s18232_s2, 2304 }
   0x2   :  { %s21_s19 = sshll.u32 %s12286_s18, 4  ;;  %p12251_p0 = scmp.ne.s32.totalorder %s18232_s2, %s12250_s22  ;;  %s22_s19 = int_to_ptr.vmem [resolvable:$true] %s21_s19 }
   0x3   :  { %p12254_p1 = scmp.lt.u32.totalorder %s12250_s22, %s18232_s2 }
   0x5   :  { %p12256_p2 = pnand %p12254_p1, %p12251_p0 }
   0x7   :  { %12259 = shalt.err (!%p12256_p2)
}
   0x8   :  { %s12260_s27 = scalar_lea.vmem %s22_s19, 2304  ;;  %p12265_p4 = scmp.lt.s32.totalorder %s22_s19, %s22_s19 }
   0x9   :  { %p12261_p3 = scmp.ne.s32.totalorder %s22_s19, %s12260_s27  ;;  %p12266_p5 = scmp.lt.s32.totalorder %s12260_s27, %s12260_s27 }
   0xb   :  { %p12267_p6 = por %p12266_p5, %p12265_p4 }
   0xd   :  { %p12268_p7 = pnand %p12267_p6, %p12261_p3 }
   0xf   :  { %12271 = shalt.err (!%p12268_p7)
}
  0x10   :  { %s12287_s28 = smov 128   ;;  %s12288_s29 = smov 8  }
  0x11   :  { %27 = dma.hbm_to_vmem [thread:$0]  %s18232_s2, 2304, %s22_s19, [#allocation4], %s12287_s28, %s12287_s28, %s12288_s29  }
  0x12   :  { %s12272_s9 = scalar_lea.hbm %s18234_s4, 16 }
  0x13   :  { %p12273_p8 = scmp.ne.s32.totalorder %s18234_s4, %s12272_s9  ;;  %p12276_p9 = scmp.lt.u32.totalorder %s12272_s9, %s18234_s4 }
  0x15   :  { %p12278_p10 = pnand %p12276_p9, %p12273_p8 }
  0x17   :  { %12281 = shalt.err (!%p12278_p10)
}
  0x18   :  { %s12289_s14 = smov [#allocation6]  }
  0x19   :  { %37 = dma.hbm_to_smem %s18234_s4, 16, %s12289_s14, [#allocation5]  }
  0x1a   :  { %12282 = dma.done.wait [#allocation4], 2304  }
  0x1b   :  { %12283 = vsyncadd [#allocation4], 4294964992 }
  0x1c   :  { %12284 = dma.done.wait [#allocation5], 16  }
  0x1d   :  { %12285 = vsyncadd [#allocation5], 4294967280 }
  0x1e   :  { %44 = sfence }
  0x1f   :  { %v58_v0 = vld [vmem:[%s18230_s0 + $0x8] sm:$0x1f]  ;;  %vm96_vm0 = vcmask 1044480   ;;  %v57_v2 = vld [vmem:[%s18230_s0] sm:$0x1f]  ;;  %vm68_vm1 = vcmask 39936  }
  0x20   :  { %v62_v1 = vld [vmem:[%s18230_s0 + $0x28] sm:$0x1f]  ;;  %9073 = vmatprep.subr.msk.mxu1 %vm96_vm0, %v58_v0  ;;  %v12369_v3 = vld [vmem:[%s18230_s0 + $0x20] sm:$0x1f]  ;;  %v18236_v5 = vmov 0.0   ;;  %v12416_v11 = vld [vmem:[%s18231_s1 + $0x10] sm:$0xff] }
  0x21   :  { %9095 = vmatprep.subr.msk.mxu0 %vm96_vm0, %v62_v1  ;;  %v12374_v4 = vld [vmem:[%s18231_s1] sm:$0xff]  ;;  %9074 = vmatpush1.msk.msra.mxu1 %vm96_vm0, %v57_v2  ;;  %v12388_v6 = vld [vmem:[%s18231_s1 + $0x8] sm:$0xff]  ;;  %v60_v7 = vld [vmem:[%s18230_s0 + $0x18] sm:$0x1f]  ;;  %vm12291_vm2 = vmmov 0   ;;  %s12292_s27 = smov 55  }
  0x22   :  { %194 = vmatprep.mubr.f32.mxu1 %v18236_v5  ;;  %9096 = vmatpush1.msk.msra.mxu0 %vm96_vm0, %v12369_v3  ;;  %v59_v8 = vld [vmem:[%s18230_s0 + $0x10] sm:$0x1f]  ;;  %v66_v9 = vld [vmem:[%s18230_s0 + $0x48] sm:$0x1f]  ;;  %v65_v10 = vld [vmem:[%s18230_s0 + $0x40] sm:$0x1f] }
  0x23   :  { %432 = vmatprep.mubr.f32.mxu0 %v18236_v5  ;;  %9075 = vmatmul.mubr.msk.f32.vlgmr.msra.gmra.mrb[0].mxu1 %vm68_vm1, %v12374_v4  ;;  %v12428_v12 = vld [vmem:[%s18231_s1 + $0x18] sm:$0xff]  ;;  %v12439_v13 = vld [vmem:[%s18231_s1 + $0x20] sm:$0xff]  ;;  %v12450_v14 = vld [vmem:[%s18231_s1 + $0x28] sm:$0xff]  ;;  %s12293_s28 = smov 54   ;;  %s12294_s29 = smov 56  }
  0x24   :  { %9097 = vmatmul.mubr.msk.f32.vlgmr.msra.gmra.mrb[0].mxu0 %vm68_vm1, %v12374_v4  ;;  %200 = vmatprep.mubr.f32.mxu1 %v18236_v5  ;;  %v12461_v15 = vld [vmem:[%s18231_s1 + $0x30] sm:$0xff]  ;;  %v12472_v16 = vld [vmem:[%s18231_s1 + $0x38] sm:$0xff]  ;;  %v12483_v17 = vld [vmem:[%s18231_s1 + $0x40] sm:$0x1]  ;;  %s12295_s30 = smov 90   ;;  %s12296_s6 = smov 91  }
  0x25   :  { %438 = vmatprep.mubr.f32.mxu0 %v18236_v5  ;;  %9084 = vmatprep.subr.msk.mxu1 %vm96_vm0, %v60_v7  ;;  %v64_v18 = vld [vmem:[%s18230_s0 + $0x38] sm:$0x1f]  ;;  %v63_v19 = vld [vmem:[%s18230_s0 + $0x30] sm:$0x1f]  ;;  %s12297_s7 = smov 92   ;;  %s12298_s8 = smov 126  }
  0x26   :  { %9117 = vmatprep.subr.msk.mxu0 %vm96_vm0, %v66_v9  ;;  %9085 = vmatpush1.msk.msra.mxu1 %vm96_vm0, %v59_v8  ;;  %v67_v20 = vld [vmem:[%s18230_s0 + $0x50] sm:$0x1f]  ;;  %s45_s0 = sld [smem:[#allocation6]]  ;;  %s12299_s9 = smov 127  }
  0x27   :  { %9118 = vmatpush1.msk.msra.mxu0 %vm96_vm0, %v65_v10  ;;  %9076 = vmatmul.mubr.msk.f32.gmra.mrb[2].mxu1 %vm68_vm1, %v12388_v6  ;;  %s9071_s10 = sld [smem:[#allocation6 + $0x1]] }
  0x28   :  { %9098 = vmatmul.mubr.msk.f32.gmra.mrb[2].mxu0 %vm68_vm1, %v12388_v6  ;;  %206 = vmatprep.mubr.f32.mxu1 %v18236_v5 }
  0x29   :  { %444 = vmatprep.mubr.f32.mxu0 %v18236_v5  ;;  %10137 = vmatprep.subr.msk.mxu1 %vm96_vm0, %v62_v1 }
  0x2b   :  { %9077 = vmatmul.mubr.msk.f32.gmra.mrb[4].mxu1 %vm68_vm1, %v12416_v11 }
  0x2c   :  { %9099 = vmatmul.mubr.msk.f32.gmra.mrb[4].mxu0 %vm68_vm1, %v12416_v11  ;;  %212 = vmatprep.mubr.f32.mxu1 %v18236_v5  ;;  %v12624_v21 = vstv %s45_s0 }
  0x2d   :  { %450 = vmatprep.mubr.f32.mxu0 %v18236_v5 }
  0x2f   :  { %9078 = vmatmul.mubr.msk.f32.gmra.mrb[6].mxu1 %vm68_vm1, %v12428_v12 }
  0x30   :  { %9100 = vmatmul.mubr.msk.f32.gmra.mrb[6].mxu0 %vm68_vm1, %v12428_v12  ;;  %218 = vmatprep.mubr.f32.mxu1 %v18236_v5 }
  0x31   :  { %456 = vmatprep.mubr.f32.mxu0 %v18236_v5 }
  0x33   :  { %9079 = vmatmul.mubr.msk.f32.gmra.mrb[8].mxu1 %vm68_vm1, %v12439_v13 }
  0x34   :  { %9101 = vmatmul.mubr.msk.f32.gmra.mrb[8].mxu0 %vm68_vm1, %v12439_v13  ;;  %224 = vmatprep.mubr.f32.mxu1 %v18236_v5 }
  0x35   :  { %462 = vmatprep.mubr.f32.mxu0 %v18236_v5 }
  0x37   :  { %9080 = vmatmul.mubr.msk.f32.gmra.mrb[10].mxu1 %vm68_vm1, %v12450_v14 }
  0x38   :  { %9102 = vmatmul.mubr.msk.f32.gmra.mrb[10].mxu0 %vm68_vm1, %v12450_v14  ;;  %230 = vmatprep.mubr.f32.mxu1 %v18236_v5 }
  0x39   :  { %468 = vmatprep.mubr.f32.mxu0 %v18236_v5 }
  0x3b   :  { %9081 = vmatmul.mubr.msk.f32.gmra.mrb[12].mxu1 %vm68_vm1, %v12461_v15 }
  0x3c   :  { %9103 = vmatmul.mubr.msk.f32.gmra.mrb[12].mxu0 %vm68_vm1, %v12461_v15  ;;  %236 = vmatprep.mubr.f32.mxu1 %v18236_v5 }
  0x3d   :  { %474 = vmatprep.mubr.f32.mxu0 %v18236_v5 }
  0x3f   :  { %9082 = vmatmul.mubr.msk.f32.gmra.mrb[14].mxu1 %vm68_vm1, %v12472_v16 }
  0x40   :  { %9104 = vmatmul.mubr.msk.f32.gmra.mrb[14].mxu0 %vm68_vm1, %v12472_v16  ;;  %242 = vmatprep.mubr.f32.mxu1 %v18236_v5 }
  0x41   :  { %670 = vmatprep.mubr.f32.mxu0 %v18236_v5 }
  0x43   :  { %9083 = vmatmul.mubr.msk.f32.gmra.mrb[16].mxu1 %vm68_vm1, %v12483_v17 }
  0x44   :  { %9119 = vmatmul.mubr.msk.f32.vlgmr.msra.gmra.mrb[16].mxu0 %vm68_vm1, %v12374_v4  ;;  %313 = vmatprep.mubr.f32.mxu1 %v18236_v5 }
  0x45   :  { %676 = vmatprep.mubr.f32.mxu0 %v18236_v5 }
  0x47   :  { %9086 = vmatmul.mubr.msk.f32.vlgmr.msra.gmra.mrb[18].mxu1 %vm68_vm1, %v12374_v4 }
  0x48   :  { %9120 = vmatmul.mubr.msk.f32.gmra.mrb[18].mxu0 %vm68_vm1, %v12388_v6  ;;  %319 = vmatprep.mubr.f32.mxu1 %v18236_v5 }
  0x49   :  { %10138 = vmatpush1.msk.msra.mxu1 %vm96_vm0, %v12369_v3  ;;  %682 = vmatprep.mubr.f32.mxu0 %v18236_v5 }
  0x4a   :  { %9106 = vmatprep.subr.msk.mxu1 %vm96_vm0, %v64_v18 }
  0x4b   :  { %9087 = vmatmul.mubr.msk.f32.gmra.mrb[20].mxu1 %vm68_vm1, %v12388_v6 }
  0x4c   :  { %9121 = vmatmul.mubr.msk.f32.gmra.mrb[20].mxu0 %vm68_vm1, %v12416_v11  ;;  %325 = vmatprep.mubr.f32.mxu1 %v18236_v5 }
  0x4d   :  { %688 = vmatprep.mubr.f32.mxu0 %v18236_v5 }
  0x4f   :  { %9088 = vmatmul.mubr.msk.f32.gmra.mrb[22].mxu1 %vm68_vm1, %v12416_v11 }
  0x50   :  { %9122 = vmatmul.mubr.msk.f32.gmra.mrb[22].mxu0 %vm68_vm1, %v12428_v12  ;;  %331 = vmatprep.mubr.f32.mxu1 %v18236_v5 }
  0x51   :  { %694 = vmatprep.mubr.f32.mxu0 %v18236_v5 }
  0x53   :  { %9089 = vmatmul.mubr.msk.f32.gmra.mrb[24].mxu1 %vm68_vm1, %v12428_v12 }
  0x54   :  { %9123 = vmatmul.mubr.msk.f32.gmra.mrb[24].mxu0 %vm68_vm1, %v12439_v13  ;;  %337 = vmatprep.mubr.f32.mxu1 %v18236_v5 }
  0x55   :  { %700 = vmatprep.mubr.f32.mxu0 %v18236_v5 }
  0x57   :  { %9090 = vmatmul.mubr.msk.f32.gmra.mrb[26].mxu1 %vm68_vm1, %v12439_v13 }
  0x58   :  { %9124 = vmatmul.mubr.msk.f32.gmra.mrb[26].mxu0 %vm68_vm1, %v12450_v14  ;;  %343 = vmatprep.mubr.f32.mxu1 %v18236_v5 }
  0x59   :  { %706 = vmatprep.mubr.f32.mxu0 %v18236_v5 }
  0x5b   :  { %9091 = vmatmul.mubr.msk.f32.gmra.mrb[28].mxu1 %vm68_vm1, %v12450_v14 }
  0x5c   :  { %9125 = vmatmul.mubr.msk.f32.gmra.mrb[28].mxu0 %vm68_vm1, %v12461_v15  ;;  %349 = vmatprep.mubr.f32.mxu1 %v18236_v5 }
  0x5d   :  { %712 = vmatprep.mubr.f32.mxu0 %v18236_v5 }
  0x5f   :  { %9092 = vmatmul.mubr.msk.f32.gmra.mrb[30].mxu1 %vm68_vm1, %v12461_v15 }
  0x60   :  { %9126 = vmatmul.mubr.msk.f32.gmra.mrb[30].mxu0 %vm68_vm1, %v12472_v16  ;;  %355 = vmatprep.mubr.f32.mxu1 %v18236_v5 }
  0x61   :  { %718 = vmatprep.mubr.f32.mxu0 %v18236_v5 }
  0x63   :  { %9093 = vmatmul.mubr.msk.f32.gmra.mrb[32].mxu1 %vm68_vm1, %v12472_v16 }
  0x64   :  { %9127 = vmatmul.mubr.msk.f32.gmra.mrb[32].mxu0 %vm68_vm1, %v12483_v17  ;;  %361 = vmatprep.mubr.f32.mxu1 %v18236_v5 }
  0x65   :  { %1898 = vmatprep.mubr.f32.mxu0 %v18236_v5 }
  0x67   :  { %9094 = vmatmul.mubr.msk.f32.gmra.mrb[34].mxu1 %vm68_vm1, %v12483_v17 }
  0x68   :  { %480 = vmatprep.mubr.f32.mxu1 %v18236_v5 }
  0x6b   :  { %9105 = vmatmul.mubr.msk.f32.vlgmr.msra.gmra.mrb[36].mxu1 %vm68_vm1, %v12483_v17 }
  0x6c   :  { %9107 = vmatpush1.msk.msra.mxu1 %vm96_vm0, %v63_v19  ;;  %551 = vmatprep.mubr.f32.mxu1 %v18236_v5 }
  0x6d   :  { %9358 = vmatprep.subr.mxu1 %v18236_v5 }
  0x6f   :  { %9108 = vmatmul.mubr.msk.f32.vlgmr.msra.gmra.mrb[38].mxu1 %vm68_vm1, %v12374_v4 }
  0x70   :  { %557 = vmatprep.mubr.f32.mxu1 %v18236_v5  ;;  %9359 = vmatpush3.msk.msra.mxu1 %vm96_vm0, %v67_v20 }
  0x73   :  { %9109 = vmatmul.mubr.msk.f32.gmra.mrb[40].mxu1 %vm68_vm1, %v12388_v6 }
  0x74   :  { %563 = vmatprep.mubr.f32.mxu1 %v18236_v5 }
  0x77   :  { %9110 = vmatmul.mubr.msk.f32.gmra.mrb[42].mxu1 %vm68_vm1, %v12416_v11 }
  0x78   :  { %569 = vmatprep.mubr.f32.mxu1 %v18236_v5 }
  0x7b   :  { %9111 = vmatmul.mubr.msk.f32.gmra.mrb[44].mxu1 %vm68_vm1, %v12428_v12 }
  0x7c   :  { %575 = vmatprep.mubr.f32.mxu1 %v18236_v5 }
  0x7f   :  { %9112 = vmatmul.mubr.msk.f32.gmra.mrb[46].mxu1 %vm68_vm1, %v12439_v13 }
  0x80   :  { %581 = vmatprep.mubr.f32.mxu1 %v18236_v5 }
  0x83   :  { %9113 = vmatmul.mubr.msk.f32.gmra.mrb[48].mxu1 %vm68_vm1, %v12450_v14 }
  0x84   :  { %587 = vmatprep.mubr.f32.mxu1 %v18236_v5 }
  0x87   :  { %9114 = vmatmul.mubr.msk.f32.gmra.mrb[50].mxu1 %vm68_vm1, %v12461_v15 }
  0x88   :  { %593 = vmatprep.mubr.f32.mxu1 %v18236_v5 }
  0x8b   :  { %9115 = vmatmul.mubr.msk.f32.gmra.mrb[52].mxu1 %vm68_vm1, %v12472_v16 }
  0x8c   :  { %599 = vmatprep.mubr.f32.mxu1 %v18236_v5 }
  0x8f   :  { %9116 = vmatmul.mubr.msk.f32.gmra.mrb[54].mxu1 %vm68_vm1, %v12483_v17 }
  0x90   :  { %9360 = vmatprep.mubr.msk.f32.mxu1 %vm12291_vm2, %v18236_v5 }
  0x93   :  { %9361 = vmatmul.mubr.msk.f32.vlgmr.msra.gmra.mrb[56].mxu1 %vm68_vm1, %v12374_v4 }
  0x94   :  { %9363 = vmatprep.mubr.msk.f32.mxu1 %vm12291_vm2, %v18236_v5 }
  0x97   :  { %9364 = vmatmul.mubr.msk.f32.gmra.mrb[58].mxu1 %vm68_vm1, %v12388_v6 }
  0x98   :  { %9366 = vmatprep.mubr.msk.f32.mxu1 %vm12291_vm2, %v18236_v5 }
  0x9b   :  { %9367 = vmatmul.mubr.msk.f32.gmra.mrb[60].mxu1 %vm68_vm1, %v12416_v11 }
  0x9c   :  { %9369 = vmatprep.mubr.msk.f32.mxu1 %vm12291_vm2, %v18236_v5 }
  0x9f   :  { %9370 = vmatmul.mubr.msk.f32.gmra.mrb[62].mxu1 %vm68_vm1, %v12428_v12 }
  0xa0   :  { %9372 = vmatprep.mubr.msk.f32.mxu1 %vm12291_vm2, %v18236_v5 }
  0xa3   :  { %9373 = vmatmul.mubr.msk.f32.gmra.mrb[64].mxu1 %vm68_vm1, %v12439_v13 }
  0xa4   :  { %9375 = vmatprep.mubr.msk.f32.mxu1 %vm12291_vm2, %v18236_v5 }
  0xa7   :  { %9376 = vmatmul.mubr.msk.f32.gmra.mrb[66].mxu1 %vm68_vm1, %v12450_v14 }
  0xa8   :  { %9378 = vmatprep.mubr.msk.f32.mxu1 %vm12291_vm2, %v18236_v5 }
  0xab   :  { %9379 = vmatmul.mubr.msk.f32.gmra.mrb[68].mxu1 %vm68_vm1, %v12461_v15 }
  0xac   :  { %9381 = vmatprep.mubr.msk.f32.mxu1 %vm12291_vm2, %v18236_v5 }
  0xaf   :  { %9382 = vmatmul.mubr.msk.f32.gmra.mrb[70].mxu1 %vm68_vm1, %v12472_v16 }
  0xb0   :  { %9384 = vmatprep.mubr.msk.f32.mxu1 %vm12291_vm2, %v18236_v5 }
  0xb3   :  { %9385 = vmatmul.mubr.msk.f32.gmra.mrb[72].mxu1 %vm68_vm1, %v12483_v17 }
  0xb4   :  { %1975 = vmatprep.mubr.f32.mxu1 %v18236_v5 }
  0xf6   :  { %v196_v22 = vpop.f32.mrb[0].mxu1 }
  0xf7   :  { %v434_v23 = vpop.f32.mrb[0].mxu0  ;;  %vm835_vm3 = vcmp.ge.f32.partialorder %v196_v22, 0.0  ;;  %v935_v24 = vmul.f32 %v12624_v21, %v196_v22  ;;  %v198_v26 = vpop.f32.mrb[1].mxu1 }
  0xf8   :  { %vm839_vm4 = vcmp.ge.f32.partialorder %v434_v23, 0.0  ;;  %v939_v25 = vmul.f32 %v12624_v21, %v434_v23  ;;  %v436_v27 = vpop.f32.mrb[1].mxu0  ;;  %vm836_vm5 = vcmp.ge.f32.partialorder %v198_v26, 0.0  ;;  %v936_v28 = vmul.f32 %v12624_v21, %v198_v26 }
  0xf9   :  { %vm840_vm6 = vcmp.ge.f32.partialorder %v436_v27, 0.0  ;;  %v940_v29 = vmul.f32 %v12624_v21, %v436_v27  ;;  %v1034_v30 = vsel %vm835_vm3, %v196_v22, %v935_v24 }
  0xfa   :  { %v1038_v31 = vsel %vm839_vm4, %v434_v23, %v939_v25  ;;  %1133 = vst [vmem:[#allocation2] sm:$0xff] %v1034_v30  ;;  %v1035_v32 = vsel %vm836_vm5, %v198_v26, %v936_v28  ;;  %v202_v34 = vpop.f32.mrb[2].mxu1 }
  0xfb   :  { %1137 = vst [vmem:[#allocation2 + $0x20] sm:$0xff] %v1038_v31  ;;  %v1039_v33 = vsel %vm840_vm6, %v436_v27, %v940_v29  ;;  %v440_v35 = vpop.f32.mrb[2].mxu0  ;;  %1134 = vst [vmem:[#allocation2 + $0x8] sm:$0xff] %v1035_v32  ;;  %vm846_vm7 = vcmp.ge.f32.partialorder %v202_v34, 0.0  ;;  %v946_v36 = vmul.f32 %v12624_v21, %v202_v34  ;;  %v204_v38 = vpop.f32.mrb[3].mxu1  ;;  %v12638_v45 = vpack.i.bf16 %v1035_v32, %v1034_v30 }
  0xfc   :  { %1138 = vst [vmem:[#allocation2 + $0x28] sm:$0xff] %v1039_v33  ;;  %vm850_vm8 = vcmp.ge.f32.partialorder %v440_v35, 0.0  ;;  %v950_v37 = vmul.f32 %v12624_v21, %v440_v35  ;;  %v442_v39 = vpop.f32.mrb[3].mxu0  ;;  %vm847_vm9 = vcmp.ge.f32.partialorder %v204_v38, 0.0  ;;  %v947_v40 = vmul.f32 %v12624_v21, %v204_v38 }
  0xfd   :  { %vm851_vm10 = vcmp.ge.f32.partialorder %v442_v39, 0.0  ;;  %v951_v41 = vmul.f32 %v12624_v21, %v442_v39  ;;  %v1045_v42 = vsel %vm846_vm7, %v202_v34, %v946_v36  ;;  %v12636_v44 = vpack.i.bf16 %v1039_v33, %v1038_v31  ;;  %10315 = vrot.lane.b32.xlu0 %v12638_v45, %s12292_s27 }
  0xfe   :  { %v12634_v43 = vsel %vm850_vm8, %v440_v35, %v950_v37  ;;  %1145 = vst [vmem:[#allocation2 + $0x58] sm:$0xff] %v1045_v42  ;;  %v12641_v46 = vsel %vm847_vm9, %v204_v38, %v947_v40  ;;  %v208_v48 = vpop.f32.mrb[4].mxu1 }
  0xff   :  { %1149 = vst [vmem:[#allocation2 + $0x78] sm:$0xff] %v12634_v43  ;;  %v1050_v47 = vsel %vm851_vm10, %v442_v39, %v951_v41  ;;  %v446_v49 = vpop.f32.mrb[4].mxu0  ;;  %v12644_v50 = vpack.i.bf16 %v12634_v43, %v1038_v31  ;;  %1146 = vst [vmem:[#allocation2 + $0x60] sm:$0xff] %v12641_v46  ;;  %vm857_vm11 = vcmp.ge.f32.partialorder %v208_v48, 0.0  ;;  %v957_v51 = vmul.f32 %v12624_v21, %v208_v48  ;;  %v210_v52 = vpop.f32.mrb[5].mxu1 }
 0x100   :  { %1150 = vst [vmem:[#allocation2 + $0x80] sm:$0xff] %v1050_v47  ;;  %vm861_vm12 = vcmp.ge.f32.partialorder %v446_v49, 0.0  ;;  %v961_v53 = vmul.f32 %v12624_v21, %v446_v49  ;;  %v448_v54 = vpop.f32.mrb[5].mxu0  ;;  %10320 = vrot.lane.b32.xlu1 %v12636_v44, %s12292_s27  ;;  %vm858_vm13 = vcmp.ge.f32.partialorder %v210_v52, 0.0  ;;  %v958_v55 = vmul.f32 %v12624_v21, %v210_v52 }
 0x101   :  { %18785 = vst [vmem:[#allocation9_spill] sm:$0xff] %v12644_v50  ;;  %vm862_vm14 = vcmp.ge.f32.partialorder %v448_v54, 0.0  ;;  %v962_v56 = vmul.f32 %v12624_v21, %v448_v54  ;;  %v1056_v57 = vsel %vm857_vm11, %v208_v48, %v957_v51  ;;  %10335 = vrot.lane.b32.xlu0 %v12638_v45, %s12294_s29 }
 0x102   :  { %v12655_v58 = vsel %vm861_vm12, %v446_v49, %v961_v53  ;;  %1156 = vst [vmem:[#allocation2 + $0xb0] sm:$0xff] %v1056_v57  ;;  %v1057_v59 = vsel %vm858_vm13, %v210_v52, %v958_v55  ;;  %v214_v60 = vpop.f32.mrb[6].mxu1 }
 0x103   :  { %1160 = vst [vmem:[#allocation2 + $0xd0] sm:$0xff] %v12655_v58  ;;  %v12658_v61 = vsel %vm862_vm14, %v448_v54, %v962_v56  ;;  %v452_v62 = vpop.f32.mrb[6].mxu0  ;;  %1157 = vst [vmem:[#allocation2 + $0xb8] sm:$0xff] %v1057_v59  ;;  %vm868_vm15 = vcmp.ge.f32.partialorder %v214_v60, 0.0  ;;  %v968_v63 = vmul.f32 %v12624_v21, %v214_v60  ;;  %v216_v0 = vpop.f32.mrb[7].mxu1  ;;  %v12679_v20 = vpack.i.bf16 %v1057_v59, %v1056_v57 }
 0x104   :  { %1161 = vst [vmem:[#allocation2 + $0xd8] sm:$0xff] %v12658_v61  ;;  %vm872_vm0 = vcmp.ge.f32.partialorder %v452_v62, 0.0  ;;  %v972_v1 = vmul.f32 %v12624_v21, %v452_v62  ;;  %v454_v2 = vpop.f32.mrb[7].mxu0  ;;  %10325 = vrot.lane.b32.xlu1 %v12638_v45, %s12293_s28  ;;  %vm869_vm1 = vcmp.ge.f32.partialorder %v216_v0, 0.0  ;;  %v969_v3 = vmul.f32 %v12624_v21, %v216_v0 }
 0x105   :  { %vm873_vm2 = vcmp.ge.f32.partialorder %v454_v2, 0.0  ;;  %v973_v4 = vmul.f32 %v12624_v21, %v454_v2  ;;  %v1067_v6 = vsel %vm868_vm15, %v214_v60, %v968_v63  ;;  %10340 = vrot.lane.b32.xlu0 %v12636_v44, %s12294_s29  ;;  %v12698_v34 = vpack.i.bf16 %v12658_v61, %v12655_v58 }
 0x106   :  { %v1071_v7 = vsel %vm872_vm0, %v452_v62, %v972_v1  ;;  %1167 = vst [vmem:[#allocation2 + $0x108] sm:$0xff] %v1067_v6  ;;  %v1068_v8 = vsel %vm869_vm1, %v216_v0, %v969_v3  ;;  %v220_v10 = vpop.f32.mrb[8].mxu1 }
 0x107   :  { %1171 = vst [vmem:[#allocation2 + $0x128] sm:$0xff] %v1071_v7  ;;  %v1072_v9 = vsel %vm873_vm2, %v454_v2, %v973_v4  ;;  %v458_v11 = vpop.f32.mrb[8].mxu0  ;;  %1168 = vst [vmem:[#allocation2 + $0x110] sm:$0xff] %v1068_v8  ;;  %vm879_vm3 = vcmp.ge.f32.partialorder %v220_v10, 0.0  ;;  %v979_v12 = vmul.f32 %v12624_v21, %v220_v10  ;;  %v222_v13 = vpop.f32.mrb[9].mxu1 }
 0x108   :  { %1172 = vst [vmem:[#allocation2 + $0x130] sm:$0xff] %v1072_v9  ;;  %10330 = vrot.lane.b32.xlu1 %v12636_v44, %s12293_s28  ;;  %vm883_vm4 = vcmp.ge.f32.partialorder %v458_v11, 0.0  ;;  %v983_v14 = vmul.f32 %v12624_v21, %v458_v11  ;;  %v460_v15 = vpop.f32.mrb[9].mxu0  ;;  %vm880_vm5 = vcmp.ge.f32.partialorder %v222_v13, 0.0  ;;  %v980_v16 = vmul.f32 %v12624_v21, %v222_v13 }
 0x109   :  { %vm884_vm6 = vcmp.ge.f32.partialorder %v460_v15, 0.0  ;;  %v984_v17 = vmul.f32 %v12624_v21, %v460_v15  ;;  %v1078_v18 = vsel %vm879_vm3, %v220_v10, %v979_v12  ;;  %10365 = vrot.lane.b32.xlu0 %v12679_v20, %s12293_s28 }
 0x10a   :  { %v12677_v19 = vsel %vm883_vm4, %v458_v11, %v983_v14  ;;  %1178 = vst [vmem:[#allocation2 + $0x160] sm:$0xff] %v1078_v18  ;;  %v12681_v22 = vsel %vm880_vm5, %v222_v13, %v980_v16  ;;  %v226_v23 = vpop.f32.mrb[10].mxu1 }
 0x10b   :  { %1182 = vst [vmem:[#allocation2 + $0x180] sm:$0xff] %v12677_v19  ;;  %v12684_v24 = vsel %vm884_vm6, %v460_v15, %v984_v17  ;;  %v464_v25 = vpop.f32.mrb[10].mxu0  ;;  %1179 = vst [vmem:[#allocation2 + $0x168] sm:$0xff] %v12681_v22  ;;  %vm890_vm7 = vcmp.ge.f32.partialorder %v226_v23, 0.0  ;;  %v990_v26 = vmul.f32 %v12624_v21, %v226_v23  ;;  %v228_v27 = vpop.f32.mrb[11].mxu1  ;;  %v12701_v35 = vpack.i.bf16 %v12681_v22, %v1078_v18 }
 0x10c   :  { %10345 = vrot.lane.b32.xlu1 %v12638_v45, %s12295_s30  ;;  %1183 = vst [vmem:[#allocation2 + $0x188] sm:$0xff] %v12684_v24  ;;  %vm894_vm8 = vcmp.ge.f32.partialorder %v464_v25, 0.0  ;;  %v994_v28 = vmul.f32 %v12624_v21, %v464_v25  ;;  %v466_v29 = vpop.f32.mrb[11].mxu0  ;;  %vm891_vm9 = vcmp.ge.f32.partialorder %v228_v27, 0.0  ;;  %v991_v30 = vmul.f32 %v12624_v21, %v228_v27 }
 0x10d   :  { %vm895_vm10 = vcmp.ge.f32.partialorder %v466_v29, 0.0  ;;  %v995_v31 = vmul.f32 %v12624_v21, %v466_v29  ;;  %v1089_v32 = vsel %vm890_vm7, %v226_v23, %v990_v26  ;;  %10370 = vrot.lane.b32.xlu0 %v12698_v34, %s12293_s28 }
 0x10e   :  { %v1093_v33 = vsel %vm894_vm8, %v464_v25, %v994_v28  ;;  %1189 = vst [vmem:[#allocation2 + $0x1b8] sm:$0xff] %v1089_v32  ;;  %v1090_v36 = vsel %vm891_vm9, %v228_v27, %v991_v30  ;;  %v232_v37 = vpop.f32.mrb[12].mxu1 }
 0x10f   :  { %1193 = vst [vmem:[#allocation2 + $0x1d8] sm:$0xff] %v1093_v33  ;;  %v1094_v38 = vsel %vm895_vm10, %v466_v29, %v995_v31  ;;  %v470_v39 = vpop.f32.mrb[12].mxu0  ;;  %1190 = vst [vmem:[#allocation2 + $0x1c0] sm:$0xff] %v1090_v36  ;;  %vm901_vm11 = vcmp.ge.f32.partialorder %v232_v37, 0.0  ;;  %v1001_v40 = vmul.f32 %v12624_v21, %v232_v37  ;;  %v234_v41 = vpop.f32.mrb[13].mxu1  ;;  %v10399_v31 = vpack.i.bf16 %v12684_v24, %v12677_v19 }
 0x110   :  { %1194 = vst [vmem:[#allocation2 + $0x1e0] sm:$0xff] %v1094_v38  ;;  %10350 = vrot.lane.b32.xlu1 %v12636_v44, %s12295_s30  ;;  %vm905_vm12 = vcmp.ge.f32.partialorder %v470_v39, 0.0  ;;  %v1005_v42 = vmul.f32 %v12624_v21, %v470_v39  ;;  %v472_v45 = vpop.f32.mrb[13].mxu0  ;;  %vm902_vm13 = vcmp.ge.f32.partialorder %v234_v41, 0.0  ;;  %v1002_v47 = vmul.f32 %v12624_v21, %v234_v41 }
 0x111   :  { %vm906_vm14 = vcmp.ge.f32.partialorder %v472_v45, 0.0  ;;  %v1006_v48 = vmul.f32 %v12624_v21, %v472_v45  ;;  %v1100_v49 = vsel %vm901_vm11, %v232_v37, %v1001_v40  ;;  %10385 = vrot.lane.b32.xlu0 %v12679_v20, %s12295_s30 }
 0x112   :  { %v12711_v51 = vsel %vm905_vm12, %v470_v39, %v1005_v42  ;;  %1200 = vst [vmem:[#allocation2 + $0x210] sm:$0xff] %v1100_v49  ;;  %v12713_v52 = vsel %vm902_vm13, %v234_v41, %v1002_v47  ;;  %v238_v44 = vpop.f32.mrb[14].mxu1 }
 0x113   :  { %1204 = vst [vmem:[#allocation2 + $0x230] sm:$0xff] %v12711_v51  ;;  %v12716_v53 = vsel %vm906_vm14, %v472_v45, %v1006_v48  ;;  %v476_v54 = vpop.f32.mrb[14].mxu0  ;;  %1201 = vst [vmem:[#allocation2 + $0x218] sm:$0xff] %v12713_v52  ;;  %vm912_vm15 = vcmp.ge.f32.partialorder %v238_v44, 0.0  ;;  %v1012_v55 = vmul.f32 %v12624_v21, %v238_v44  ;;  %v240_v56 = vpop.f32.mrb[15].mxu1  ;;  %v12729_v63 = vpack.i.bf16 %v12713_v52, %v1100_v49 }
 0x114   :  { %10355 = vrot.lane.b32.xlu1 %v12679_v20, %s12292_s27  ;;  %1205 = vst [vmem:[#allocation2 + $0x238] sm:$0xff] %v12716_v53  ;;  %vm916_vm0 = vcmp.ge.f32.partialorder %v476_v54, 0.0  ;;  %v1016_v57 = vmul.f32 %v12624_v21, %v476_v54  ;;  %v478_v58 = vpop.f32.mrb[15].mxu0  ;;  %vm913_vm1 = vcmp.ge.f32.partialorder %v240_v56, 0.0  ;;  %v1013_v59 = vmul.f32 %v12624_v21, %v240_v56 }
 0x115   :  { %vm917_vm2 = vcmp.ge.f32.partialorder %v478_v58, 0.0  ;;  %v1017_v60 = vmul.f32 %v12624_v21, %v478_v58  ;;  %v1111_v61 = vsel %vm912_vm15, %v238_v44, %v1012_v55  ;;  %10390 = vrot.lane.b32.xlu0 %v12698_v34, %s12295_s30 }
 0x116   :  { %v1115_v62 = vsel %vm916_vm0, %v476_v54, %v1016_v57  ;;  %1211 = vst [vmem:[#allocation2 + $0x268] sm:$0xff] %v1111_v61  ;;  %v1112_v0 = vsel %vm913_vm1, %v240_v56, %v1013_v59  ;;  %v244_v1 = vpop.f32.mrb[16].mxu1  ;;  %v12731_v4 = vld [vmem:[#allocation2 + $0x1d8] sm:$0xff] }
 0x117   :  { %1215 = vst [vmem:[#allocation2 + $0x288] sm:$0xff] %v1115_v62  ;;  %v1116_v2 = vsel %vm917_vm2, %v478_v58, %v1017_v60  ;;  %v672_v3 = vpop.f32.mrb[16].mxu0  ;;  %1212 = vst [vmem:[#allocation2 + $0x270] sm:$0xff] %v1112_v0  ;;  %vm923_vm3 = vcmp.ge.f32.partialorder %v244_v1, 0.0  ;;  %v1023_v6 = vmul.f32 %v12624_v21, %v244_v1  ;;  %v246_v7 = vpop.f32.mrb[17].mxu1  ;;  %v12745_v14 = vpack.i.bf16 %v12731_v4, %v12677_v19 }
 0x118   :  { %10360 = vrot.lane.b32.xlu1 %v12698_v34, %s12292_s27  ;;  %1216 = vst [vmem:[#allocation2 + $0x290] sm:$0xff] %v1116_v2  ;;  %vm843_vm4 = vcmp.ge.f32.partialorder %v672_v3, 0.0  ;;  %v943_v8 = vmul.f32 %v12624_v21, %v672_v3  ;;  %v674_v9 = vpop.f32.mrb[17].mxu0  ;;  %vm924_vm5 = vcmp.ge.f32.partialorder %v246_v7, 0.0  ;;  %v1024_v10 = vmul.f32 %v12624_v21, %v246_v7 }
 0x119   :  { %vm844_vm6 = vcmp.ge.f32.partialorder %v674_v9, 0.0  ;;  %v944_v11 = vmul.f32 %v12624_v21, %v674_v9  ;;  %v1122_v12 = vsel %vm923_vm3, %v244_v1, %v1023_v6  ;;  %18786 = vst [vmem:[#allocation10_spill] sm:$0xff] %v12745_v14  ;;  %10395 = vrot.lane.b32.xlu0 %v12701_v35, %s12292_s27 }
 0x11a   :  { %v12741_v13 = vsel %vm843_vm4, %v672_v3, %v943_v8  ;;  %1222 = vst [vmem:[#allocation2 + $0x2c0] sm:$0x1] %v1122_v12  ;;  %v1123_v15 = vsel %vm924_vm5, %v246_v7, %v1024_v10  ;;  %v315_v16 = vpop.f32.mrb[18].mxu1 }
 0x11b   :  { %1141 = vst [vmem:[#allocation2 + $0x40] sm:$0xff] %v12741_v13  ;;  %v12748_v17 = vsel %vm844_vm6, %v674_v9, %v944_v11  ;;  %v678_v18 = vpop.f32.mrb[18].mxu0  ;;  %1223 = vst [vmem:[#allocation2 + $0x2c8] sm:$0x1] %v1123_v15  ;;  %vm837_vm7 = vcmp.ge.f32.partialorder %v315_v16, 0.0  ;;  %v937_v23 = vmul.f32 %v12624_v21, %v315_v16  ;;  %v317_v25 = vpop.f32.mrb[19].mxu1 }
 0x11c   :  { %10375 = vrot.lane.b32.xlu1 %v12679_v20, %s12294_s29  ;;  %1142 = vst [vmem:[#allocation2 + $0x48] sm:$0xff] %v12748_v17  ;;  %vm854_vm8 = vcmp.ge.f32.partialorder %v678_v18, 0.0  ;;  %v954_v26 = vmul.f32 %v12624_v21, %v678_v18  ;;  %v680_v27 = vpop.f32.mrb[19].mxu0  ;;  %vm838_vm9 = vcmp.ge.f32.partialorder %v317_v25, 0.0  ;;  %v938_v28 = vmul.f32 %v12624_v21, %v317_v25 }
 0x11d   :  { %vm855_vm10 = vcmp.ge.f32.partialorder %v680_v27, 0.0  ;;  %v955_v29 = vmul.f32 %v12624_v21, %v680_v27  ;;  %v1036_v30 = vsel %vm837_vm7, %v315_v16, %v937_v23  ;;  %10400 = vrot.lane.b32.xlu0 %v10399_v31, %s12292_s27 }
 0x11e   :  { %v1053_v20 = vsel %vm854_vm8, %v678_v18, %v954_v26  ;;  %1135 = vst [vmem:[#allocation2 + $0x10] sm:$0xff] %v1036_v30  ;;  %v12761_v32 = vsel %vm838_vm9, %v317_v25, %v938_v28  ;;  %v321_v33 = vpop.f32.mrb[20].mxu1  ;;  %v1270_v18 = vld [vmem:[#allocation2 + $0x110] sm:$0xff] }
 0x11f   :  { %1153 = vst [vmem:[#allocation2 + $0x98] sm:$0xff] %v1053_v20  ;;  %v1054_v36 = vsel %vm855_vm10, %v680_v27, %v955_v29  ;;  %v684_v37 = vpop.f32.mrb[20].mxu0  ;;  %1136 = vst [vmem:[#allocation2 + $0x18] sm:$0xff] %v12761_v32  ;;  %vm848_vm11 = vcmp.ge.f32.partialorder %v321_v33, 0.0  ;;  %v948_v38 = vmul.f32 %v12624_v21, %v321_v33  ;;  %v323_v39 = vpop.f32.mrb[21].mxu1  ;;  %v12769_v19 = vpack.i.bf16 %v12761_v32, %v1036_v30 }
 0x120   :  { %10380 = vrot.lane.b32.xlu1 %v12698_v34, %s12294_s29  ;;  %1154 = vst [vmem:[#allocation2 + $0xa0] sm:$0xff] %v1054_v36  ;;  %vm865_vm12 = vcmp.ge.f32.partialorder %v684_v37, 0.0  ;;  %v686_v24 = vpop.f32.mrb[21].mxu0  ;;  %vm849_vm13 = vcmp.ge.f32.partialorder %v323_v39, 0.0  ;;  %v949_v40 = vmul.f32 %v12624_v21, %v323_v39  ;;  %v965_v41 = vmul.f32 %v12624_v21, %v684_v37 }
 0x121   :  { %vm866_vm14 = vcmp.ge.f32.partialorder %v686_v24, 0.0  ;;  %v12773_v42 = vsel %vm848_vm11, %v321_v33, %v948_v38  ;;  %v966_v45 = vmul.f32 %v12624_v21, %v686_v24  ;;  %10415 = vrot.lane.b32.xlu0 %v12701_v35, %s12294_s29  ;;  %v12834_v38 = vpack.i.bf16 %v12716_v53, %v12711_v51 }
 0x122   :  { %1147 = vst [vmem:[#allocation2 + $0x68] sm:$0xff] %v12773_v42  ;;  %v1048_v34 = vsel %vm849_vm13, %v323_v39, %v949_v40  ;;  %v327_v47 = vpop.f32.mrb[22].mxu1  ;;  %v12777_v48 = vsel %vm865_vm12, %v684_v37, %v965_v41 }
 0x123   :  { %v690_v49 = vpop.f32.mrb[22].mxu0  ;;  %1148 = vst [vmem:[#allocation2 + $0x70] sm:$0xff] %v1048_v34  ;;  %vm859_vm15 = vcmp.ge.f32.partialorder %v327_v47, 0.0  ;;  %v959_v44 = vmul.f32 %v12624_v21, %v327_v47  ;;  %v329_v54 = vpop.f32.mrb[23].mxu1  ;;  %1164 = vst [vmem:[#allocation2 + $0xf0] sm:$0xff] %v12777_v48  ;;  %v12785_v55 = vsel %vm866_vm14, %v686_v24, %v966_v45  ;;  %v12792_v61 = vpack.i.bf16 %v12634_v43, %v1048_v34 }
 0x124   :  { %10405 = vrot.lane.b32.xlu1 %v12701_v35, %s12293_s28  ;;  %vm876_vm0 = vcmp.ge.f32.partialorder %v690_v49, 0.0  ;;  %v692_v56 = vpop.f32.mrb[23].mxu0  ;;  %vm860_vm1 = vcmp.ge.f32.partialorder %v329_v54, 0.0  ;;  %v960_v57 = vmul.f32 %v12624_v21, %v329_v54  ;;  %1165 = vst [vmem:[#allocation2 + $0xf8] sm:$0xff] %v12785_v55  ;;  %v976_v58 = vmul.f32 %v12624_v21, %v690_v49 }
 0x125   :  { %vm877_vm2 = vcmp.ge.f32.partialorder %v692_v56, 0.0  ;;  %v1058_v59 = vsel %vm859_vm15, %v327_v47, %v959_v44  ;;  %v977_v60 = vmul.f32 %v12624_v21, %v692_v56  ;;  %10420 = vrot.lane.b32.xlu0 %v10399_v31, %s12294_s29  ;;  %v12811_v23 = vpack.i.bf16 %v1048_v34, %v12761_v32 }
 0x126   :  { %v1255_v62 = vld [vmem:[#allocation2 + $0x98] sm:$0xff]  ;;  %1158 = vst [vmem:[#allocation2 + $0xc0] sm:$0xff] %v1058_v59  ;;  %v12794_v0 = vsel %vm860_vm1, %v329_v54, %v960_v57  ;;  %v333_v1 = vpop.f32.mrb[24].mxu1  ;;  %v1075_v2 = vsel %vm876_vm0, %v690_v49, %v976_v58 }
 0x127   :  { %v696_v3 = vpop.f32.mrb[24].mxu0  ;;  %v12797_v6 = vpack.i.bf16 %v1255_v62, %v12741_v13  ;;  %1159 = vst [vmem:[#allocation2 + $0xc8] sm:$0xff] %v12794_v0  ;;  %vm870_vm3 = vcmp.ge.f32.partialorder %v333_v1, 0.0  ;;  %v970_v7 = vmul.f32 %v12624_v21, %v333_v1  ;;  %v335_v8 = vpop.f32.mrb[25].mxu1  ;;  %1175 = vst [vmem:[#allocation2 + $0x148] sm:$0xff] %v1075_v2  ;;  %v1076_v43 = vsel %vm877_vm2, %v692_v56, %v977_v60 }
 0x128   :  { %10410 = vrot.lane.b32.xlu1 %v10399_v31, %s12293_s28  ;;  %vm887_vm4 = vcmp.ge.f32.partialorder %v696_v3, 0.0  ;;  %v698_v9 = vpop.f32.mrb[25].mxu0  ;;  %vm871_vm5 = vcmp.ge.f32.partialorder %v335_v8, 0.0  ;;  %v971_v10 = vmul.f32 %v12624_v21, %v335_v8  ;;  %1176 = vst [vmem:[#allocation2 + $0x150] sm:$0xff] %v1076_v43  ;;  %v987_v11 = vmul.f32 %v12624_v21, %v696_v3  ;;  %18788 = vst [vmem:[#allocation12_spill] sm:$0xff] %v12811_v23 }
 0x129   :  { %18787 = vst [vmem:[#allocation11_spill] sm:$0xff] %v12797_v6  ;;  %v12807_v12 = vpack.i.bf16 %v12794_v0, %v1058_v59  ;;  %v1069_v15 = vsel %vm870_vm3, %v333_v1, %v970_v7  ;;  %vm888_vm6 = vcmp.ge.f32.partialorder %v698_v9, 0.0  ;;  %v988_v16 = vmul.f32 %v12624_v21, %v698_v9  ;;  %10435 = vrot.lane.b32.xlu0 %v12729_v63, %s12293_s28  ;;  %v1292_v59 = vld [vmem:[#allocation2 + $0x1c0] sm:$0xff] }
 0x12a   :  { %1169 = vst [vmem:[#allocation2 + $0x118] sm:$0xff] %v1069_v15  ;;  %v12813_v25 = vsel %vm871_vm5, %v335_v8, %v971_v10  ;;  %v339_v26 = vpop.f32.mrb[26].mxu1  ;;  %v12815_v27 = vsel %vm887_vm4, %v696_v3, %v987_v11  ;;  %v12817_v29 = vpack.i.bf16 %v1069_v15, %v1270_v18  ;;  %v1324_v1 = vld [vmem:[#allocation2 + $0x2c0] sm:$0x1]  ;;  %v12877_v18 = vpack.i.bf16 %v12748_v17, %v12741_v13 }
 0x12b   :  { %v702_v28 = vpop.f32.mrb[26].mxu0  ;;  %1170 = vst [vmem:[#allocation2 + $0x120] sm:$0xff] %v12813_v25  ;;  %vm881_vm7 = vcmp.ge.f32.partialorder %v339_v26, 0.0  ;;  %v981_v30 = vmul.f32 %v12624_v21, %v339_v26  ;;  %v341_v31 = vpop.f32.mrb[27].mxu1  ;;  %1186 = vst [vmem:[#allocation2 + $0x1a0] sm:$0xff] %v12815_v27  ;;  %v12827_v20 = vsel %vm888_vm6, %v698_v9, %v988_v16 }
 0x12c   :  { %18789 = vst [vmem:[#allocation13_spill] sm:$0xff] %v12817_v29  ;;  %10425 = vrot.lane.b32.xlu1 %v12729_v63, %s12292_s27  ;;  %vm898_vm8 = vcmp.ge.f32.partialorder %v702_v28, 0.0  ;;  %v704_v32 = vpop.f32.mrb[27].mxu0  ;;  %vm882_vm9 = vcmp.ge.f32.partialorder %v341_v31, 0.0  ;;  %v982_v33 = vmul.f32 %v12624_v21, %v341_v31  ;;  %1187 = vst [vmem:[#allocation2 + $0x1a8] sm:$0xff] %v12827_v20  ;;  %v998_v36 = vmul.f32 %v12624_v21, %v702_v28 }
 0x12d   :  { %vm899_vm10 = vcmp.ge.f32.partialorder %v704_v32, 0.0  ;;  %v1080_v37 = vsel %vm881_vm7, %v339_v26, %v981_v30  ;;  %v999_v39 = vmul.f32 %v12624_v21, %v704_v32  ;;  %10440 = vrot.lane.b32.xlu0 %v12834_v38, %s12293_s28 }
 0x12e   :  { %1180 = vst [vmem:[#allocation2 + $0x170] sm:$0xff] %v1080_v37  ;;  %v12837_v24 = vsel %vm882_vm9, %v341_v31, %v982_v33  ;;  %v345_v40 = vpop.f32.mrb[28].mxu1  ;;  %v1097_v41 = vsel %vm898_vm8, %v702_v28, %v998_v36  ;;  %v12840_v34 = vpack.i.bf16 %v1080_v37, %v12681_v22  ;;  %v12880_v28 = vld [vmem:[#allocation2 + $0x270] sm:$0xff] }
 0x12f   :  { %v708_v45 = vpop.f32.mrb[28].mxu0  ;;  %1181 = vst [vmem:[#allocation2 + $0x178] sm:$0xff] %v12837_v24  ;;  %vm892_vm11 = vcmp.ge.f32.partialorder %v345_v40, 0.0  ;;  %v992_v47 = vmul.f32 %v12624_v21, %v345_v40  ;;  %v347_v49 = vpop.f32.mrb[29].mxu1  ;;  %1197 = vst [vmem:[#allocation2 + $0x1f8] sm:$0xff] %v1097_v41  ;;  %v1098_v53 = vsel %vm899_vm10, %v704_v32, %v999_v39  ;;  %v12852_v56 = vpack.i.bf16 %v12837_v24, %v1080_v37 }
 0x130   :  { %18790 = vst [vmem:[#allocation14_spill] sm:$0xff] %v12840_v34  ;;  %10430 = vrot.lane.b32.xlu1 %v12834_v38, %s12292_s27  ;;  %vm909_vm12 = vcmp.ge.f32.partialorder %v708_v45, 0.0  ;;  %v710_v44 = vpop.f32.mrb[29].mxu0  ;;  %vm893_vm13 = vcmp.ge.f32.partialorder %v347_v49, 0.0  ;;  %v993_v22 = vmul.f32 %v12624_v21, %v347_v49  ;;  %1198 = vst [vmem:[#allocation2 + $0x200] sm:$0xff] %v1098_v53  ;;  %v1009_v54 = vmul.f32 %v12624_v21, %v708_v45 }
 0x131   :  { %v1091_v57 = vsel %vm892_vm11, %v345_v40, %v992_v47  ;;  %vm910_vm14 = vcmp.ge.f32.partialorder %v710_v44, 0.0  ;;  %v1010_v58 = vmul.f32 %v12624_v21, %v710_v44  ;;  %1613 = vrot.lane.b32.xlu0 %v1324_v1, %s12292_s27 }
 0x132   :  { %1191 = vst [vmem:[#allocation2 + $0x1c8] sm:$0xff] %v1091_v57  ;;  %v12855_v60 = vsel %vm893_vm13, %v347_v49, %v993_v22  ;;  %v351_v62 = vpop.f32.mrb[30].mxu1  ;;  %v12857_v2 = vsel %vm909_vm12, %v708_v45, %v1009_v54  ;;  %v12859_v7 = vpack.i.bf16 %v1091_v57, %v1292_v59  ;;  %v1277_v57 = vld [vmem:[#allocation2 + $0x148] sm:$0xff] }
 0x133   :  { %v714_v3 = vpop.f32.mrb[30].mxu0  ;;  %1192 = vst [vmem:[#allocation2 + $0x1d0] sm:$0xff] %v12855_v60  ;;  %vm903_vm15 = vcmp.ge.f32.partialorder %v351_v62, 0.0  ;;  %v1003_v8 = vmul.f32 %v12624_v21, %v351_v62  ;;  %v353_v43 = vpop.f32.mrb[31].mxu1  ;;  %1208 = vst [vmem:[#allocation2 + $0x250] sm:$0xff] %v12857_v2  ;;  %v12868_v9 = vsel %vm910_vm14, %v710_v44, %v1010_v58 }
 0x134   :  { %18791 = vst [vmem:[#allocation15_spill] sm:$0xff] %v12859_v7  ;;  %10445 = vrot.lane.b32.xlu1 %v12729_v63, %s12294_s29  ;;  %vm920_vm0 = vcmp.ge.f32.partialorder %v714_v3, 0.0  ;;  %v716_v10 = vpop.f32.mrb[31].mxu0  ;;  %vm904_vm1 = vcmp.ge.f32.partialorder %v353_v43, 0.0  ;;  %v1004_v11 = vmul.f32 %v12624_v21, %v353_v43  ;;  %1209 = vst [vmem:[#allocation2 + $0x258] sm:$0xff] %v12868_v9  ;;  %v1020_v15 = vmul.f32 %v12624_v21, %v714_v3 }
 0x135   :  { %vm921_vm2 = vcmp.ge.f32.partialorder %v716_v10, 0.0  ;;  %v12873_v16 = vsel %vm903_vm15, %v351_v62, %v1003_v8  ;;  %v1021_v26 = vmul.f32 %v12624_v21, %v716_v10  ;;  %3178 = vrot.lane.b32.xlu0 %v1324_v1, %s12294_s29  ;;  %v10664_v53 = vpack.i.bf16 %v12868_v9, %v12857_v2 }
 0x136   :  { %1202 = vst [vmem:[#allocation2 + $0x220] sm:$0xff] %v12873_v16  ;;  %v12883_v30 = vsel %vm904_vm1, %v353_v43, %v1004_v11  ;;  %v357_v31 = vpop.f32.mrb[32].mxu1  ;;  %v1119_v32 = vsel %vm920_vm0, %v714_v3, %v1020_v15  ;;  %v1299_v58 = vld [vmem:[#allocation2 + $0x1f8] sm:$0xff]  ;;  %v12924_v15 = vpack.i.bf16 %v1277_v57, %v12777_v48 }
 0x137   :  { %v720_v33 = vpop.f32.mrb[32].mxu0  ;;  %1203 = vst [vmem:[#allocation2 + $0x228] sm:$0xff] %v12883_v30  ;;  %vm914_vm3 = vcmp.ge.f32.partialorder %v357_v31, 0.0  ;;  %v1014_v13 = vmul.f32 %v12624_v21, %v357_v31  ;;  %v359_v17 = vpop.f32.mrb[33].mxu1  ;;  %1219 = vst [vmem:[#allocation2 + $0x2a8] sm:$0xff] %v1119_v32  ;;  %v1120_v39 = vsel %vm921_vm2, %v716_v10, %v1021_v26  ;;  %v12914_v43 = vpack.i.bf16 %v1119_v32, %v12857_v2 }
 0x138   :  { %10450 = vrot.lane.b32.xlu1 %v12834_v38, %s12294_s29  ;;  %vm931_vm4 = vcmp.ge.f32.partialorder %v720_v33, 0.0  ;;  %v722_v40 = vpop.f32.mrb[33].mxu0  ;;  %vm915_vm5 = vcmp.ge.f32.partialorder %v359_v17, 0.0  ;;  %v1015_v41 = vmul.f32 %v12624_v21, %v359_v17  ;;  %1220 = vst [vmem:[#allocation2 + $0x2b0] sm:$0xff] %v1120_v39  ;;  %v1031_v45 = vmul.f32 %v12624_v21, %v720_v33  ;;  %18795 = vst [vmem:[#allocation19_spill] sm:$0xff] %v12924_v15 }
 0x139   :  { %vm932_vm6 = vcmp.ge.f32.partialorder %v722_v40, 0.0  ;;  %v1113_v47 = vsel %vm914_vm3, %v357_v31, %v1014_v13  ;;  %v1032_v49 = vmul.f32 %v12624_v21, %v722_v40  ;;  %v12900_v38 = vpack.i.bf16 %v12883_v30, %v12873_v16  ;;  %10455 = vrot.lane.b32.xlu0 %v12877_v18, %s12292_s27  ;;  %18792 = vst [vmem:[#allocation16_spill] sm:$0xff] %v12914_v43  ;;  %v1325_v13 = vld [vmem:[#allocation2 + $0x2c8] sm:$0x1] }
 0x13a   :  { %1213 = vst [vmem:[#allocation2 + $0x278] sm:$0xff] %v1113_v47  ;;  %v12904_v44 = vsel %vm915_vm5, %v359_v17, %v1015_v41  ;;  %v363_v22 = vpop.f32.mrb[34].mxu1  ;;  %v1130_v54 = vsel %vm931_vm4, %v720_v33, %v1031_v45  ;;  %v12917_v10 = vpack.i.bf16 %v1113_v47, %v12880_v28  ;;  %v12927_v26 = vpack.i.bf16 %v1299_v58, %v12815_v27 }
 0x13b   :  { %1214 = vst [vmem:[#allocation2 + $0x280] sm:$0xff] %v12904_v44  ;;  %vm925_vm7 = vcmp.ge.f32.partialorder %v363_v22, 0.0  ;;  %v1025_v59 = vmul.f32 %v12624_v21, %v363_v22  ;;  %v365_v62 = vpop.f32.mrb[35].mxu1  ;;  %1230 = vst [vmem:[#allocation2 + $0x300] sm:$0x1] %v1130_v54  ;;  %v1131_v3 = vsel %vm932_vm6, %v722_v40, %v1032_v49  ;;  %v12931_v32 = vpack.i.bf16 %v12813_v25, %v12794_v0 }
 0x13c   :  { %2395 = vrot.lane.b32.xlu1 %v1324_v1, %s12293_s28  ;;  %vm926_vm8 = vcmp.ge.f32.partialorder %v365_v62, 0.0  ;;  %v1026_v8 = vmul.f32 %v12624_v21, %v365_v62  ;;  %1231 = vst [vmem:[#allocation2 + $0x308] sm:$0x1] %v1131_v3  ;;  %18793 = vst [vmem:[#allocation17_spill] sm:$0xff] %v12917_v10  ;;  %v12921_v1 = vpack.i.bf16 %v12873_v16, %v12713_v52 }
 0x13d   :  { %v1124_v11 = vsel %vm925_vm7, %v363_v22, %v1025_v59  ;;  %18796 = vst [vmem:[#allocation20_spill] sm:$0xff] %v12927_v26  ;;  %18797 = vst [vmem:[#allocation21_spill] sm:$0xff] %v12931_v32  ;;  %v12935_v17 = vpack.i.bf16 %v12855_v60, %v12837_v24  ;;  %2397 = vrot.lane.b32.xlu0 %v1325_v13, %s12293_s28  ;;  %v12942_v40 = vpack.i.bf16 %v12904_v44, %v12883_v30  ;;  %v1317_v26 = vld [vmem:[#allocation2 + $0x288] sm:$0xff] }
 0x13e   :  { %18794 = vst [vmem:[#allocation18_spill] sm:$0xff] %v12921_v1  ;;  %1224 = vst [vmem:[#allocation2 + $0x2d0] sm:$0x1] %v1124_v11  ;;  %v1125_v31 = vsel %vm926_vm8, %v365_v62, %v1026_v8  ;;  %v482_v33 = vpop.f32.mrb[36].mxu1 }
 0x13f   :  { %18798 = vst [vmem:[#allocation22_spill] sm:$0xff] %v12935_v17  ;;  %1225 = vst [vmem:[#allocation2 + $0x2d8] sm:$0x1] %v1125_v31  ;;  %vm927_vm9 = vcmp.ge.f32.partialorder %v482_v33, 0.0  ;;  %v1027_v52 = vmul.f32 %v12624_v21, %v482_v33  ;;  %v484_v39 = vpop.f32.mrb[37].mxu1 }
 0x140   :  { %1615 = vrot.lane.b32.xlu1 %v1325_v13, %s12292_s27  ;;  %18799 = vst [vmem:[#allocation23_spill] sm:$0xff] %v12942_v40  ;;  %vm928_vm10 = vcmp.ge.f32.partialorder %v484_v39, 0.0  ;;  %v1028_v0 = vmul.f32 %v12624_v21, %v484_v39 }
 0x141   :  { %v1126_v41 = vsel %vm927_vm9, %v482_v33, %v1027_v52  ;;  %10465 = vrot.lane.b32.xlu0 %v12877_v18, %s12294_s29 }
 0x142   :  { %1226 = vst [vmem:[#allocation2 + $0x2e0] sm:$0x1] %v1126_v41  ;;  %v1127_v24 = vsel %vm928_vm10, %v484_v39, %v1028_v0  ;;  %v553_v45 = vpop.f32.mrb[38].mxu1  ;;  %v1332_v17 = vld [vmem:[#allocation2 + $0x300] sm:$0x1] }
 0x143   :  { %1227 = vst [vmem:[#allocation2 + $0x2e8] sm:$0x1] %v1127_v24  ;;  %vm841_vm11 = vcmp.ge.f32.partialorder %v553_v45, 0.0  ;;  %v941_v47 = vmul.f32 %v12624_v21, %v553_v45  ;;  %v555_v49 = vpop.f32.mrb[39].mxu1 }
 0x144   :  { %10460 = vrot.lane.b32.xlu1 %v12877_v18, %s12293_s28  ;;  %vm842_vm12 = vcmp.ge.f32.partialorder %v555_v49, 0.0  ;;  %v942_v22 = vmul.f32 %v12624_v21, %v555_v49 }
 0x145   :  { %v1040_v54 = vsel %vm841_vm11, %v553_v45, %v941_v47  ;;  %10475 = vrot.lane.b32.xlu0 %v12769_v19, %s12292_s27 }
 0x146   :  { %1139 = vst [vmem:[#allocation2 + $0x30] sm:$0xff] %v1040_v54  ;;  %v1041_v57 = vsel %vm842_vm12, %v555_v49, %v942_v22  ;;  %v559_v58 = vpop.f32.mrb[40].mxu1  ;;  %v10499_v49 = vpack.i.bf16 %v12773_v42, %v12641_v46 }
 0x147   :  { %1140 = vst [vmem:[#allocation2 + $0x38] sm:$0xff] %v1041_v57  ;;  %vm852_vm13 = vcmp.ge.f32.partialorder %v559_v58, 0.0  ;;  %v952_v59 = vmul.f32 %v12624_v21, %v559_v58  ;;  %v561_v62 = vpop.f32.mrb[41].mxu1 }
 0x148   :  { %3180 = vrot.lane.b32.xlu1 %v1325_v13, %s12294_s29  ;;  %vm853_vm14 = vcmp.ge.f32.partialorder %v561_v62, 0.0  ;;  %v953_v3 = vmul.f32 %v12624_v21, %v561_v62 }
 0x149   :  { %v1051_v8 = vsel %vm852_vm13, %v559_v58, %v952_v59  ;;  %10480 = vrot.lane.b32.xlu0 %v12769_v19, %s12293_s28 }
 0x14a   :  { %1151 = vst [vmem:[#allocation2 + $0x88] sm:$0xff] %v1051_v8  ;;  %v1052_v11 = vsel %vm853_vm14, %v561_v62, %v953_v3  ;;  %v565_v31 = vpop.f32.mrb[42].mxu1  ;;  %v1252_v3 = vld [vmem:[#allocation2 + $0x80] sm:$0xff]  ;;  %vm1143_vm14 = vcmask 719872  }
 0x14b   :  { %1152 = vst [vmem:[#allocation2 + $0x90] sm:$0xff] %v1052_v11  ;;  %vm863_vm15 = vcmp.ge.f32.partialorder %v565_v31, 0.0  ;;  %v963_v33 = vmul.f32 %v12624_v21, %v565_v31  ;;  %v567_v52 = vpop.f32.mrb[43].mxu1 }
 0x14c   :  { %10470 = vrot.lane.b32.xlu1 %v12877_v18, %s12295_s30  ;;  %vm864_vm0 = vcmp.ge.f32.partialorder %v567_v52, 0.0  ;;  %v964_v13 = vmul.f32 %v12624_v21, %v567_v52 }
 0x14d   :  { %v1062_v39 = vsel %vm863_vm15, %v565_v31, %v963_v33  ;;  %10490 = vrot.lane.b32.xlu0 %v12769_v19, %s12295_s30 }
 0x14e   :  { %1162 = vst [vmem:[#allocation2 + $0xe0] sm:$0xff] %v1062_v39  ;;  %v1063_v0 = vsel %vm864_vm0, %v567_v52, %v964_v13  ;;  %v571_v41 = vpop.f32.mrb[44].mxu1 }
 0x14f   :  { %1163 = vst [vmem:[#allocation2 + $0xe8] sm:$0xff] %v1063_v0  ;;  %vm874_vm1 = vcmp.ge.f32.partialorder %v571_v41, 0.0  ;;  %v974_v24 = vmul.f32 %v12624_v21, %v571_v41  ;;  %v573_v45 = vpop.f32.mrb[45].mxu1 }
 0x150   :  { %10485 = vrot.lane.b32.xlu1 %v12769_v19, %s12294_s29  ;;  %vm875_vm2 = vcmp.ge.f32.partialorder %v573_v45, 0.0  ;;  %v975_v18 = vmul.f32 %v12624_v21, %v573_v45 }
 0x151   :  { %v1073_v47 = vsel %vm874_vm1, %v571_v41, %v974_v24  ;;  %10495 = vrot.lane.b32.xlu0 %v10499_v49, %s12292_s27  ;;  %v1253_v19 = vld [vmem:[#allocation2 + $0x88] sm:$0xff] }
 0x152   :  { %1173 = vst [vmem:[#allocation2 + $0x138] sm:$0xff] %v1073_v47  ;;  %v1074_v22 = vsel %vm875_vm2, %v573_v45, %v975_v18  ;;  %v577_v54 = vpop.f32.mrb[46].mxu1  ;;  %v12974_v8 = vpack.i.bf16 %v1253_v19, %v1252_v3  ;;  %v1274_v18 = vld [vmem:[#allocation2 + $0x130] sm:$0xff] }
 0x153   :  { %1174 = vst [vmem:[#allocation2 + $0x140] sm:$0xff] %v1074_v22  ;;  %vm885_vm3 = vcmp.ge.f32.partialorder %v577_v54, 0.0  ;;  %v985_v57 = vmul.f32 %v12624_v21, %v577_v54  ;;  %v579_v58 = vpop.f32.mrb[47].mxu1 }
 0x154   :  { %10500 = vrot.lane.b32.xlu1 %v10499_v49, %s12293_s28  ;;  %vm886_vm4 = vcmp.ge.f32.partialorder %v579_v58, 0.0  ;;  %v986_v59 = vmul.f32 %v12624_v21, %v579_v58  ;;  %18800 = vst [vmem:[#allocation24_spill] sm:$0xff] %v12974_v8 }
 0x155   :  { %v1084_v62 = vsel %vm885_vm3, %v577_v54, %v985_v57  ;;  %10505 = vrot.lane.b32.xlu0 %v10499_v49, %s12294_s29 }
 0x156   :  { %1184 = vst [vmem:[#allocation2 + $0x190] sm:$0xff] %v1084_v62  ;;  %v1085_v46 = vsel %vm886_vm4, %v579_v58, %v986_v59  ;;  %v583_v42 = vpop.f32.mrb[48].mxu1 }
 0x157   :  { %1185 = vst [vmem:[#allocation2 + $0x198] sm:$0xff] %v1085_v46  ;;  %vm896_vm5 = vcmp.ge.f32.partialorder %v583_v42, 0.0  ;;  %v996_v11 = vmul.f32 %v12624_v21, %v583_v42  ;;  %v585_v31 = vpop.f32.mrb[49].mxu1 }
 0x158   :  { %10510 = vrot.lane.b32.xlu1 %v10499_v49, %s12295_s30  ;;  %vm897_vm6 = vcmp.ge.f32.partialorder %v585_v31, 0.0  ;;  %v997_v33 = vmul.f32 %v12624_v21, %v585_v31  ;;  %v10519_v49 = vpack.i.bf16 %v12785_v55, %v12777_v48 }
 0x159   :  { %v1095_v52 = vsel %vm896_vm5, %v583_v42, %v996_v11  ;;  %v1275_v0 = vld [vmem:[#allocation2 + $0x138] sm:$0xff]  ;;  %10525 = vrot.lane.b32.xlu0 %v12792_v61, %s12293_s28  ;;  %v1296_v11 = vld [vmem:[#allocation2 + $0x1e0] sm:$0xff] }
 0x15a   :  { %1195 = vst [vmem:[#allocation2 + $0x1e8] sm:$0xff] %v1095_v52  ;;  %v1096_v13 = vsel %vm897_vm6, %v585_v31, %v997_v33  ;;  %v589_v39 = vpop.f32.mrb[50].mxu1  ;;  %v12988_v22 = vpack.i.bf16 %v1275_v0, %v1274_v18  ;;  %vm1635_vm6 = vcmask 449536  }
 0x15b   :  { %1196 = vst [vmem:[#allocation2 + $0x1f0] sm:$0xff] %v1096_v13  ;;  %vm907_vm7 = vcmp.ge.f32.partialorder %v589_v39, 0.0  ;;  %v1007_v41 = vmul.f32 %v12624_v21, %v589_v39  ;;  %v591_v24 = vpop.f32.mrb[51].mxu1 }
 0x15c   :  { %10515 = vrot.lane.b32.xlu1 %v12792_v61, %s12292_s27  ;;  %vm908_vm8 = vcmp.ge.f32.partialorder %v591_v24, 0.0  ;;  %v1008_v45 = vmul.f32 %v12624_v21, %v591_v24  ;;  %18801 = vst [vmem:[#allocation25_spill] sm:$0xff] %v12988_v22 }
 0x15d   :  { %v1106_v47 = vsel %vm907_vm7, %v589_v39, %v1007_v41  ;;  %10530 = vrot.lane.b32.xlu0 %v10519_v49, %s12293_s28  ;;  %vm2417_vm7 = vcmask 441344  }
 0x15e   :  { %1206 = vst [vmem:[#allocation2 + $0x240] sm:$0xff] %v1106_v47  ;;  %v1107_v54 = vsel %vm908_vm8, %v591_v24, %v1008_v45  ;;  %v595_v57 = vpop.f32.mrb[52].mxu1  ;;  %v1318_v24 = vld [vmem:[#allocation2 + $0x290] sm:$0xff]  ;;  %vm3200_vm8 = vcmask 457728  }
 0x15f   :  { %1207 = vst [vmem:[#allocation2 + $0x248] sm:$0xff] %v1107_v54  ;;  %vm918_vm9 = vcmp.ge.f32.partialorder %v595_v57, 0.0  ;;  %v1018_v58 = vmul.f32 %v12624_v21, %v595_v57  ;;  %v597_v19 = vpop.f32.mrb[53].mxu1 }
 0x160   :  { %10520 = vrot.lane.b32.xlu1 %v10519_v49, %s12292_s27  ;;  %vm919_vm10 = vcmp.ge.f32.partialorder %v597_v19, 0.0  ;;  %v1019_v59 = vmul.f32 %v12624_v21, %v597_v19 }
 0x161   :  { %v1117_v62 = vsel %vm918_vm9, %v595_v57, %v1018_v58  ;;  %v1297_v3 = vld [vmem:[#allocation2 + $0x1e8] sm:$0xff]  ;;  %10545 = vrot.lane.b32.xlu0 %v12792_v61, %s12295_s30  ;;  %vm4003_vm9 = vcmask 736256  }
 0x162   :  { %1217 = vst [vmem:[#allocation2 + $0x298] sm:$0xff] %v1117_v62  ;;  %v1118_v48 = vsel %vm919_vm10, %v597_v19, %v1019_v59  ;;  %v601_v55 = vpop.f32.mrb[54].mxu1  ;;  %v13000_v33 = vpack.i.bf16 %v1297_v3, %v1296_v11 }
 0x163   :  { %1218 = vst [vmem:[#allocation2 + $0x2a0] sm:$0xff] %v1118_v48  ;;  %vm929_vm11 = vcmp.ge.f32.partialorder %v601_v55, 0.0  ;;  %v1029_v46 = vmul.f32 %v12624_v21, %v601_v55  ;;  %v603_v42 = vpop.f32.mrb[55].mxu1 }
 0x164   :  { %10535 = vrot.lane.b32.xlu1 %v12792_v61, %s12294_s29  ;;  %vm930_vm12 = vcmp.ge.f32.partialorder %v603_v42, 0.0  ;;  %v1030_v31 = vmul.f32 %v12624_v21, %v603_v42  ;;  %18802 = vst [vmem:[#allocation26_spill] sm:$0xff] %v13000_v33 }
 0x165   :  { %v1128_v52 = vsel %vm929_vm11, %v601_v55, %v1029_v46  ;;  %10550 = vrot.lane.b32.xlu0 %v10519_v49, %s12295_s30  ;;  %vm1232_vm11 = vcmask 712704  }
 0x166   :  { %1228 = vst [vmem:[#allocation2 + $0x2f0] sm:$0x1] %v1128_v52  ;;  %v1129_v13 = vsel %vm930_vm12, %v603_v42, %v1030_v31  ;;  %v791_v39 = vpop.f32.mrb[56].mxu1  ;;  %vm1813_vm12 = vcmask 1040384  }
 0x167   :  { %1229 = vst [vmem:[#allocation2 + $0x2f8] sm:$0x1] %v1129_v13  ;;  %vm845_vm13 = vcmp.ge.f32.partialorder %v791_v39, 0.0  ;;  %v945_v0 = vmul.f32 %v12624_v21, %v791_v39  ;;  %v9362_v41 = vpop.f32.mrb[57].mxu1 }
 0x168   :  { %10540 = vrot.lane.b32.xlu1 %v10519_v49, %s12294_s29  ;;  %v1273_v41 = vld [vmem:[#allocation2 + $0x128] sm:$0xff] }
 0x169   :  { %v1044_v61 = vsel %vm845_vm13, %v791_v39, %v945_v0  ;;  %v1319_v45 = vld [vmem:[#allocation2 + $0x298] sm:$0xff]  ;;  %10555 = vrot.lane.b32.xlu0 %v12807_v12, %s12292_s27  ;;  %vm1806_vm13 = vcmask 531456  }
 0x16a   :  { %1144 = vst.msk [vmem:[#allocation2 + $0x50] sm:$0xff] %vm1143_vm14, %v1044_v61  ;;  %v796_v18 = vpop.f32.mrb[58].mxu1  ;;  %v13006_v47 = vpack.i.bf16 %v1319_v45, %v1318_v24  ;;  %v10604_v61 = vpack.i.bf16 %v1273_v41, %v12813_v25  ;;  %v1256_v24 = vld [vmem:[#allocation2 + $0xa0] sm:$0xff] }
 0x16b   :  { %vm856_vm15 = vcmp.ge.f32.partialorder %v796_v18, 0.0  ;;  %v956_v54 = vmul.f32 %v12624_v21, %v796_v18  ;;  %v9365_v57 = vpop.f32.mrb[59].mxu1 }
 0x16c   :  { %18803 = vst [vmem:[#allocation27_spill] sm:$0xff] %v13006_v47  ;;  %10560 = vrot.lane.b32.xlu1 %v12807_v12, %s12293_s28 }
 0x16d   :  { %v1055_v58 = vsel %vm856_vm15, %v796_v18, %v956_v54  ;;  %10565 = vrot.lane.b32.xlu0 %v12807_v12, %s12294_s29  ;;  %vm5609_vm15 = vcmask 752640  }
 0x16e   :  { %1155 = vst.msk [vmem:[#allocation2 + $0xa8] sm:$0xff] %vm1143_vm14, %v1055_v58  ;;  %v801_v49 = vpop.f32.mrb[60].mxu1 }
 0x16f   :  { %vm867_vm0 = vcmp.ge.f32.partialorder %v801_v49, 0.0  ;;  %v967_v19 = vmul.f32 %v12624_v21, %v801_v49  ;;  %v9368_v59 = vpop.f32.mrb[61].mxu1  ;;  %v13021_v48 = vpop.permute.xlu0 %10315 }
 0x170   :  { %10570 = vrot.lane.b32.xlu1 %v12807_v12, %s12295_s30  ;;  %18805 = vst [vmem:[#allocation29_spill] sm:$0xff] %v13021_v48 }
 0x171   :  { %v1066_v62 = vsel %vm867_vm0, %v801_v49, %v967_v19  ;;  %10580 = vrot.lane.b32.xlu0 %v12817_v29, %s12293_s28  ;;  %vm6412_vm0 = vcmask 1031168  }
 0x172   :  { %v13019_v3 = vpop.permute.xlu1 %10320  ;;  %1166 = vst.msk [vmem:[#allocation2 + $0x100] sm:$0xff] %vm1143_vm14, %v1066_v62  ;;  %v806_v55 = vpop.f32.mrb[62].mxu1 }
 0x173   :  { %18804 = vst [vmem:[#allocation28_spill] sm:$0xff] %v13019_v3  ;;  %vm878_vm1 = vcmp.ge.f32.partialorder %v806_v55, 0.0  ;;  %v978_v46 = vmul.f32 %v12624_v21, %v806_v55  ;;  %v9371_v42 = vpop.f32.mrb[63].mxu1  ;;  %v13031_v31 = vpop.permute.xlu0 %10335 }
 0x174   :  { %10575 = vrot.lane.b32.xlu1 %v12817_v29, %s12292_s27  ;;  %18807 = vst [vmem:[#allocation31_spill] sm:$0xff] %v13031_v31 }
 0x175   :  { %v1077_v11 = vsel %vm878_vm1, %v806_v55, %v978_v46  ;;  %v1257_v13 = vld [vmem:[#allocation2 + $0xa8] sm:$0xff]  ;;  %10590 = vrot.lane.b32.xlu0 %v12817_v29, %s12295_s30  ;;  %v10609_v55 = vpack.i.bf16 %v12827_v20, %v12815_v27  ;;  %v1287_v20 = vld [vmem:[#allocation2 + $0x198] sm:$0xff]  ;;  %vm7215_vm1 = vcmask 1039360  }
 0x176   :  { %v13029_v12 = vpop.permute.xlu1 %10325  ;;  %1177 = vst.msk [vmem:[#allocation2 + $0x158] sm:$0xff] %vm1143_vm14, %v1077_v11  ;;  %v811_v52 = vpop.f32.mrb[64].mxu1  ;;  %v13044_v57 = vpack.i.bf16 %v1257_v13, %v1256_v24  ;;  %v1278_v13 = vld [vmem:[#allocation2 + $0x150] sm:$0xff] }
 0x177   :  { %18806 = vst [vmem:[#allocation30_spill] sm:$0xff] %v13029_v12  ;;  %vm889_vm2 = vcmp.ge.f32.partialorder %v811_v52, 0.0  ;;  %v989_v39 = vmul.f32 %v12624_v21, %v811_v52  ;;  %v9374_v0 = vpop.f32.mrb[65].mxu1  ;;  %v13042_v54 = vpop.permute.xlu0 %10340 }
 0x178   :  { %10585 = vrot.lane.b32.xlu1 %v12817_v29, %s12294_s29  ;;  %18809 = vst [vmem:[#allocation33_spill] sm:$0xff] %v13042_v54  ;;  %18810 = vst [vmem:[#allocation34_spill] sm:$0xff] %v13044_v57 }
 0x179   :  { %v1088_v45 = vsel %vm889_vm2, %v811_v52, %v989_v39  ;;  %10595 = vrot.lane.b32.xlu0 %v10604_v61, %s12292_s27 }
 0x17a   :  { %v13040_v18 = vpop.permute.xlu1 %10330  ;;  %1188 = vst.msk [vmem:[#allocation2 + $0x1b0] sm:$0xff] %vm1143_vm14, %v1088_v45  ;;  %v816_v58 = vpop.f32.mrb[66].mxu1 }
 0x17b   :  { %18808 = vst [vmem:[#allocation32_spill] sm:$0xff] %v13040_v18  ;;  %vm900_vm3 = vcmp.ge.f32.partialorder %v816_v58, 0.0  ;;  %v1000_v49 = vmul.f32 %v12624_v21, %v816_v58  ;;  %v9377_v19 = vpop.f32.mrb[67].mxu1  ;;  %v13052_v62 = vpop.permute.xlu0 %10365 }
 0x17c   :  { %10605 = vrot.lane.b32.xlu1 %v10604_v61, %s12293_s28  ;;  %18812 = vst [vmem:[#allocation36_spill] sm:$0xff] %v13052_v62 }
 0x17d   :  { %v1099_v25 = vsel %vm900_vm3, %v816_v58, %v1000_v49  ;;  %v1279_v42 = vld [vmem:[#allocation2 + $0x158] sm:$0xff]  ;;  %10600 = vrot.lane.b32.xlu0 %v10609_v55, %s12292_s27  ;;  %v1286_v49 = vld [vmem:[#allocation2 + $0x190] sm:$0xff] }
 0x17e   :  { %v13050_v59 = vpop.permute.xlu1 %10345  ;;  %1199 = vst.msk [vmem:[#allocation2 + $0x208] sm:$0xff] %vm1143_vm14, %v1099_v25  ;;  %v821_v46 = vpop.f32.mrb[68].mxu1  ;;  %v13064_v24 = vpack.i.bf16 %v1279_v42, %v1278_v13  ;;  %v13074_v42 = vpack.i.bf16 %v1287_v20, %v1286_v49 }
 0x17f   :  { %18811 = vst [vmem:[#allocation35_spill] sm:$0xff] %v13050_v59  ;;  %vm911_vm4 = vcmp.ge.f32.partialorder %v821_v46, 0.0  ;;  %v1011_v11 = vmul.f32 %v12624_v21, %v821_v46  ;;  %v9380_v52 = vpop.f32.mrb[69].mxu1  ;;  %v13062_v41 = vpop.permute.xlu0 %10370 }
 0x180   :  { %10610 = vrot.lane.b32.xlu1 %v10609_v55, %s12293_s28  ;;  %18814 = vst [vmem:[#allocation38_spill] sm:$0xff] %v13062_v41  ;;  %18815 = vst [vmem:[#allocation39_spill] sm:$0xff] %v13064_v24 }
 0x181   :  { %v1110_v39 = vsel %vm911_vm4, %v821_v46, %v1011_v11  ;;  %10615 = vrot.lane.b32.xlu0 %v10604_v61, %s12294_s29  ;;  %v1300_v11 = vld [vmem:[#allocation2 + $0x200] sm:$0xff] }
 0x182   :  { %v13060_v0 = vpop.permute.xlu1 %10350  ;;  %1210 = vst.msk [vmem:[#allocation2 + $0x260] sm:$0xff] %vm1143_vm14, %v1110_v39  ;;  %v826_v27 = vpop.f32.mrb[70].mxu1 }
 0x183   :  { %18813 = vst [vmem:[#allocation37_spill] sm:$0xff] %v13060_v0  ;;  %vm922_vm5 = vcmp.ge.f32.partialorder %v826_v27, 0.0  ;;  %v1022_v45 = vmul.f32 %v12624_v21, %v826_v27  ;;  %v9383_v58 = vpop.f32.mrb[71].mxu1  ;;  %v13072_v25 = vpop.permute.xlu0 %10385 }
 0x184   :  { %10625 = vrot.lane.b32.xlu1 %v10604_v61, %s12295_s30  ;;  %18817 = vst [vmem:[#allocation41_spill] sm:$0xff] %v13072_v25 }
 0x185   :  { %v1121_v46 = vsel %vm922_vm5, %v826_v27, %v1022_v45  ;;  %v1301_v52 = vld [vmem:[#allocation2 + $0x208] sm:$0xff]  ;;  %10620 = vrot.lane.b32.xlu0 %v10609_v55, %s12294_s29  ;;  %v1322_v45 = vld [vmem:[#allocation2 + $0x2b0] sm:$0xff] }
 0x186   :  { %v13070_v19 = vpop.permute.xlu1 %10355  ;;  %1221 = vst.msk [vmem:[#allocation2 + $0x2b8] sm:$0xff] %vm1143_vm14, %v1121_v46  ;;  %v13084_v39 = vpack.i.bf16 %v1301_v52, %v1300_v11  ;;  %v12074_v11 = vld [vmem:[#allocation2 + $0x1d8] sm:$0xff]  ;;  %vm4806_vm14 = vcmask 744448  }
 0x187   :  { %18816 = vst [vmem:[#allocation40_spill] sm:$0xff] %v13070_v19  ;;  %v13082_v13 = vpop.permute.xlu0 %10390  ;;  %v10659_v52 = vpack.i.bf16 %v12074_v11, %v12855_v60 }
 0x188   :  { %10630 = vrot.lane.b32.xlu1 %v12852_v56, %s12292_s27  ;;  %18819 = vst [vmem:[#allocation43_spill] sm:$0xff] %v13082_v13  ;;  %18820 = vst [vmem:[#allocation44_spill] sm:$0xff] %v13084_v39  ;;  %v1333_v13 = vld [vmem:[#allocation2 + $0x308] sm:$0x1] }
 0x189   :  { %10635 = vrot.lane.b32.xlu0 %v12852_v56, %s12293_s28 }
 0x18a   :  { %v13080_v61 = vpop.permute.xlu1 %10360 }
 0x18b   :  { %18818 = vst [vmem:[#allocation42_spill] sm:$0xff] %v13080_v61  ;;  %v13092_v20 = vpop.permute.xlu0 %10395 }
 0x18c   :  { %10640 = vrot.lane.b32.xlu1 %v12852_v56, %s12294_s29  ;;  %18822 = vst [vmem:[#allocation46_spill] sm:$0xff] %v13092_v20 }
 0x18d   :  { %v1323_v58 = vld [vmem:[#allocation2 + $0x2b8] sm:$0xff]  ;;  %10645 = vrot.lane.b32.xlu0 %v12859_v7, %s12292_s27 }
 0x18e   :  { %v13090_v27 = vpop.permute.xlu1 %10375  ;;  %v13098_v55 = vpack.i.bf16 %v1323_v58, %v1322_v45 }
 0x18f   :  { %18821 = vst [vmem:[#allocation45_spill] sm:$0xff] %v13090_v27  ;;  %v13102_v46 = vpop.permute.xlu0 %10400 }
 0x190   :  { %10650 = vrot.lane.b32.xlu1 %v12859_v7, %s12293_s28  ;;  %18823 = vst [vmem:[#allocation47_spill] sm:$0xff] %v13098_v55 }
 0x191   :  { %10655 = vrot.lane.b32.xlu0 %v12859_v7, %s12294_s29 }
 0x192   :  { %v13100_v49 = vpop.permute.xlu1 %10380 }
 0x193   :  { %18824 = vst [vmem:[#allocation48_spill] sm:$0xff] %v13100_v49  ;;  %v13112_v36 = vpop.permute.xlu0 %10415 }
 0x194   :  { %10660 = vrot.lane.b32.xlu1 %v10659_v52, %s12292_s27  ;;  %18826 = vst [vmem:[#allocation50_spill] sm:$0xff] %v13112_v36 }
 0x195   :  { %10670 = vrot.lane.b32.xlu0 %v10659_v52, %s12293_s28 }
 0x196   :  { %v13110_v37 = vpop.permute.xlu1 %10405 }
 0x197   :  { %18825 = vst [vmem:[#allocation49_spill] sm:$0xff] %v13110_v37  ;;  %v13118_v58 = vpop.permute.xlu0 %10420 }
 0x198   :  { %10665 = vrot.lane.b32.xlu1 %v10664_v53, %s12292_s27  ;;  %18828 = vst [vmem:[#allocation52_spill] sm:$0xff] %v13118_v58 }
 0x199   :  { %10675 = vrot.lane.b32.xlu0 %v10664_v53, %s12293_s28 }
 0x19a   :  { %v13116_v45 = vpop.permute.xlu1 %10410 }
 0x19b   :  { %18827 = vst [vmem:[#allocation51_spill] sm:$0xff] %v13116_v45  ;;  %v13124_v5 = vpop.permute.xlu0 %10435 }
 0x19c   :  { %10680 = vrot.lane.b32.xlu1 %v10659_v52, %s12294_s29  ;;  %18830 = vst [vmem:[#allocation54_spill] sm:$0xff] %v13124_v5 }
 0x19d   :  { %10690 = vrot.lane.b32.xlu0 %v12900_v38, %s12292_s27 }
 0x19e   :  { %v13122_v11 = vpop.permute.xlu1 %10425 }
 0x19f   :  { %18829 = vst [vmem:[#allocation53_spill] sm:$0xff] %v13122_v11  ;;  %v13131_v9 = vpop.permute.xlu0 %10440 }
 0x1a0   :  { %10685 = vrot.lane.b32.xlu1 %v10664_v53, %s12294_s29  ;;  %18832 = vst [vmem:[#allocation56_spill] sm:$0xff] %v13131_v9 }
 0x1a1   :  { %10700 = vrot.lane.b32.xlu0 %v12900_v38, %s12294_s29 }
 0x1a2   :  { %v13129_v2 = vpop.permute.xlu1 %10430 }
 0x1a3   :  { %18831 = vst [vmem:[#allocation55_spill] sm:$0xff] %v13129_v2  ;;  %v13139_v40 = vpop.permute.xlu0 %1613 }
 0x1a4   :  { %10695 = vrot.lane.b32.xlu1 %v12900_v38, %s12293_s28  ;;  %18834 = vst [vmem:[#allocation58_spill] sm:$0xff] %v13139_v40 }
 0x1a5   :  { %1629 = vrot.lane.b32.xlu0 %v1332_v17, %s12292_s27 }
 0x1a6   :  { %v13137_v52 = vpop.permute.xlu1 %10445 }
 0x1a7   :  { %18833 = vst [vmem:[#allocation57_spill] sm:$0xff] %v13137_v52  ;;  %v13146_v32 = vpop.permute.xlu0 %3178 }
 0x1a8   :  { %10705 = vrot.lane.b32.xlu1 %v12917_v10, %s12292_s27  ;;  %18836 = vst [vmem:[#allocation60_spill] sm:$0xff] %v13146_v32  ;;  %v10719_v32 = vpack.i.bf16 %v1317_v26, %v12904_v44 }
 0x1a9   :  { %10710 = vrot.lane.b32.xlu0 %v12917_v10, %s12293_s28 }
 0x1aa   :  { %v13144_v53 = vpop.permute.xlu1 %10450 }
 0x1ab   :  { %18835 = vst [vmem:[#allocation59_spill] sm:$0xff] %v13144_v53  ;;  %v13153_v23 = vpop.permute.xlu0 %10455 }
 0x1ac   :  { %2411 = vrot.lane.b32.xlu1 %v1332_v17, %s12293_s28  ;;  %18838 = vst [vmem:[#allocation62_spill] sm:$0xff] %v13153_v23 }
 0x1ad   :  { %3194 = vrot.lane.b32.xlu0 %v1332_v17, %s12294_s29 }
 0x1ae   :  { %v13151_v38 = vpop.permute.xlu1 %2395 }
 0x1af   :  { %18837 = vst [vmem:[#allocation61_spill] sm:$0xff] %v13151_v38  ;;  %v13160_v6 = vpop.permute.xlu0 %2397 }
 0x1b0   :  { %10715 = vrot.lane.b32.xlu1 %v12917_v10, %s12294_s29  ;;  %18840 = vst [vmem:[#allocation64_spill] sm:$0xff] %v13160_v6  ;;  %v1326_v6 = vld [vmem:[#allocation2 + $0x2d0] sm:$0x1] }
 0x1b1   :  { %10720 = vrot.lane.b32.xlu0 %v10719_v32, %s12292_s27 }
 0x1b2   :  { %v13158_v15 = vpop.permute.xlu1 %1615 }
 0x1b3   :  { %18839 = vst [vmem:[#allocation63_spill] sm:$0xff] %v13158_v15  ;;  %v13167_v14 = vpop.permute.xlu0 %10465 }
 0x1b4   :  { %1631 = vrot.lane.b32.xlu1 %v1333_v13, %s12292_s27  ;;  %18842 = vst [vmem:[#allocation66_spill] sm:$0xff] %v13167_v14 }
 0x1b5   :  { %2413 = vrot.lane.b32.xlu0 %v1333_v13, %s12293_s28 }
 0x1b6   :  { %v13165_v38 = vpop.permute.xlu1 %10460 }
 0x1b7   :  { %18841 = vst [vmem:[#allocation65_spill] sm:$0xff] %v13165_v38  ;;  %v13173_v0 = vpop.permute.xlu0 %10475  ;;  %v18851_v38 = vunpack.i.h.bf16 %v13029_v12  ;;  %v18276_v12 = vunpack.i.h.bf16 %v13031_v31 }
 0x1b8   :  { %10725 = vrot.lane.b32.xlu1 %v10719_v32, %s12293_s28  ;;  %v10477_v14 = vunpack.i.l.bf16 %v13173_v0 }
 0x1b9   :  { %10730 = vrot.lane.b32.xlu0 %v10719_v32, %s12294_s29  ;;  %v18265_v32 = vunpack.i.h.bf16 %v13021_v48 }
 0x1ba   :  { %v13171_v17 = vpop.permute.xlu1 %3180 }
 0x1bb   :  { %18843 = vst [vmem:[#allocation67_spill] sm:$0xff] %v13171_v17  ;;  %v13179_v26 = vpop.permute.xlu0 %10480  ;;  %v1327_v17 = vld [vmem:[#allocation2 + $0x2d8] sm:$0x1] }
 0x1bc   :  { %3196 = vrot.lane.b32.xlu1 %v1333_v13, %s12294_s29  ;;  %18845 = vst [vmem:[#allocation69_spill] sm:$0xff] %v13179_v26 }
 0x1bd   :  { %1617 = vrot.lane.b32.xlu0 %v1326_v6, %s12292_s27 }
 0x1be   :  { %v13177_v44 = vpop.permute.xlu1 %10470 }
 0x1bf   :  { %18844 = vst [vmem:[#allocation68_spill] sm:$0xff] %v13177_v44  ;;  %v13185_v15 = vpop.permute.xlu0 %10490  ;;  %v18850_v44 = vunpack.i.l.bf16 %v13179_v26  ;;  %v18862_v26 = vunpack.i.h.bf16 %v13050_v59 }
 0x1c0   :  { %2399 = vrot.lane.b32.xlu1 %v1326_v6, %s12293_s28  ;;  %18847 = vst [vmem:[#allocation71_spill] sm:$0xff] %v13185_v15 }
 0x1c1   :  { %3182 = vrot.lane.b32.xlu0 %v1326_v6, %s12294_s29  ;;  %v1637_v6 = vsel %vm1635_vm6, %v18265_v32, %v10477_v14  ;;  %v13211_v10 = vsel %vm2417_vm7, %v18851_v38, %v18850_v44  ;;  %v10478_v38 = vunpack.i.h.bf16 %v13173_v0  ;;  %v18861_v0 = vunpack.i.l.bf16 %v13185_v15 }
 0x1c2   :  { %v13183_v40 = vpop.permute.xlu1 %10485  ;;  %18852 = vst [vmem:[#allocation74_spill] sm:$0xff] %v13211_v10 }
 0x1c3   :  { %18846 = vst [vmem:[#allocation70_spill] sm:$0xff] %v13183_v40  ;;  %v13195_v1 = vpop.permute.xlu0 %10495 }
 0x1c4   :  { %1619 = vrot.lane.b32.xlu1 %v1327_v17, %s12292_s27  ;;  %18849 = vst [vmem:[#allocation73_spill] sm:$0xff] %v13195_v1  ;;  %v10498_v13 = vunpack.i.h.bf16 %v13195_v1  ;;  %v18269_v29 = vunpack.i.l.bf16 %v13195_v1 }
 0x1c5   :  { %2401 = vrot.lane.b32.xlu0 %v1327_v17, %s12293_s28 }
 0x1c6   :  { %v13193_v50 = vpop.permute.xlu1 %10500  ;;  %v1647_v43 = vsel %vm1635_vm6, %v18269_v29, %v10498_v13 }
 0x1c7   :  { %18848 = vst [vmem:[#allocation72_spill] sm:$0xff] %v13193_v50  ;;  %v18854_v48 = vunpack.i.l.bf16 %v13193_v50  ;;  %v13229_v34 = vpop.permute.xlu0 %10505  ;;  %v9387_v55 = vpack.c.bf16 %v1647_v43, %v1637_v6  ;;  %v18858_v43 = vunpack.i.l.bf16 %v13183_v40 }
 0x1c8   :  { %3184 = vrot.lane.b32.xlu1 %v1327_v17, %s12294_s29  ;;  %v18853_v17 = vunpack.i.h.bf16 %v13193_v50  ;;  %18857 = vst [vmem:[#allocation77_spill] sm:$0xff] %v13229_v34  ;;  %v18279_v50 = vunpack.i.h.bf16 %v13229_v34 }
 0x1c9   :  { %9388 = vmatprep.subr.bf16.mxu0 %v9387_v55  ;;  %v13245_v6 = vsel %vm3200_vm8, %v18276_v12, %v18858_v43  ;;  %v13259_v55 = vsel %vm4003_vm9, %v18862_v26, %v18861_v0  ;;  %v18291_v26 = vunpack.i.l.bf16 %v13019_v3 }
 0x1ca   :  { %v13223_v32 = vsel %vm2417_vm7, %v18854_v48, %v18853_v17  ;;  %v13227_v44 = vpop.permute.xlu1 %10510  ;;  %v18278_v48 = vunpack.i.l.bf16 %v13229_v34  ;;  %v1328_v17 = vld [vmem:[#allocation2 + $0x2e0] sm:$0x1]  ;;  %18859 = vst [vmem:[#allocation78_spill] sm:$0xff] %v13245_v6  ;;  %18863 = vst [vmem:[#allocation80_spill] sm:$0xff] %v13259_v55 }
 0x1cb   :  { %18855 = vst [vmem:[#allocation75_spill] sm:$0xff] %v13223_v32  ;;  %18856 = vst [vmem:[#allocation76_spill] sm:$0xff] %v13227_v44  ;;  %v18283_v29 = vunpack.i.h.bf16 %v13227_v44  ;;  %1621 = vrot.lane.b32.xlu0 %v1328_v17, %s12292_s27  ;;  %v18864_v31 = vunpack.i.l.bf16 %v13227_v44  ;;  %v13270_v10 = vpop.permute.xlu0 %10525  ;;  %v1329_v32 = vld [vmem:[#allocation2 + $0x2e8] sm:$0x1]  ;;  %v1243_v44 = vld [vmem:[#allocation2 + $0x38] sm:$0xff] }
 0x1cc   :  { %2403 = vrot.lane.b32.xlu1 %v1328_v17, %s12293_s28  ;;  %v13252_v1 = vsel %vm3200_vm8, %v18278_v48, %v18279_v50  ;;  %18867 = vst [vmem:[#allocation83_spill] sm:$0xff] %v13270_v10  ;;  %v1639_v48 = vsel %vm1635_vm6, %v10478_v38, %v18291_v26 }
 0x1cd   :  { %18860 = vst [vmem:[#allocation79_spill] sm:$0xff] %v13252_v1  ;;  %v13266_v43 = vsel %vm4003_vm9, %v18864_v31, %v18283_v29  ;;  %v1638_v31 = vsel %vm1635_vm6, %v10477_v14, %v10478_v38  ;;  %v1242_v14 = vld [vmem:[#allocation2 + $0x30] sm:$0xff] }
 0x1ce   :  { %18865 = vst [vmem:[#allocation81_spill] sm:$0xff] %v13266_v43  ;;  %v13268_v12 = vpop.permute.xlu1 %10515 }
 0x1cf   :  { %18866 = vst [vmem:[#allocation82_spill] sm:$0xff] %v13268_v12  ;;  %v18290_v0 = vunpack.i.h.bf16 %v13268_v12  ;;  %v10517_v59 = vunpack.i.l.bf16 %v13268_v12  ;;  %3186 = vrot.lane.b32.xlu0 %v1328_v17, %s12294_s29  ;;  %v13291_v43 = vpop.permute.xlu0 %10530  ;;  %v10734_v17 = vpack.i.bf16 %v1243_v44, %v1242_v14 }
 0x1d0   :  { %1623 = vrot.lane.b32.xlu1 %v1329_v32, %s12292_s27  ;;  %18869 = vst [vmem:[#allocation85_spill] sm:$0xff] %v13291_v43  ;;  %v12078_v43 = vld [vmem:[#allocation2 + $0x2a8] sm:$0xff] }
 0x1d1   :  { %v1648_v29 = vsel %vm1635_vm6, %v10498_v13, %v10517_v59  ;;  %v1649_v50 = vsel %vm1635_vm6, %v10517_v59, %v18290_v0 }
 0x1d2   :  { %v13289_v55 = vpop.permute.xlu1 %10520  ;;  %v9403_v6 = vpack.c.bf16 %v1649_v50, %v1639_v48  ;;  %v9405_v1 = vpack.c.bf16 %v1648_v29, %v1638_v31  ;;  %v831_v29 = vpop.f32.mrb[72].mxu1 }
 0x1d3   :  { %18868 = vst [vmem:[#allocation84_spill] sm:$0xff] %v13289_v55  ;;  %2405 = vrot.lane.b32.xlu0 %v1329_v32, %s12293_s28  ;;  %v13297_v38 = vpop.permute.xlu0 %10545  ;;  %vm933_vm10 = vcmp.ge.f32.partialorder %v831_v29, 0.0  ;;  %v1033_v44 = vmul.f32 %v12624_v21, %v831_v29  ;;  %v9386_v48 = vpop.f32.mrb[73].mxu1  ;;  %v12075_v21 = vld [vmem:[#allocation2 + $0x98] sm:$0xff] }
 0x1d4   :  { %3188 = vrot.lane.b32.xlu1 %v1329_v32, %s12294_s29  ;;  %9404 = vmatprep.subr.bf16.mxu1 %v9403_v6  ;;  %18871 = vst [vmem:[#allocation87_spill] sm:$0xff] %v13297_v38 }
 0x1d5   :  { %9406 = vmatpush1.bf16.msra.mxu1 %v9405_v1  ;;  %v1132_v6 = vsel %vm933_vm10, %v831_v29, %v1033_v44  ;;  %v18307_v29 = vunpack.i.h.bf16 %v13052_v62  ;;  %v18302_v44 = vunpack.i.h.bf16 %v13070_v19  ;;  %v1265_v62 = vld [vmem:[#allocation2 + $0xe8] sm:$0xff]  ;;  %v1264_v19 = vld [vmem:[#allocation2 + $0xe0] sm:$0xff] }
 0x1d6   :  { %v13295_v13 = vpop.permute.xlu1 %10535  ;;  %1233 = vst.msk [vmem:[#allocation2 + $0x310] sm:$0x1] %vm1232_vm11, %v1132_v6 }
 0x1d7   :  { %18870 = vst [vmem:[#allocation86_spill] sm:$0xff] %v13295_v13  ;;  %10740 = vrot.lane.b32.xlu0 %v10734_v17, %s12293_s28  ;;  %v13303_v50 = vpop.permute.xlu0 %10550 }
 0x1d8   :  { %10735 = vrot.lane.b32.xlu1 %v10734_v17, %s12292_s27  ;;  %18873 = vst [vmem:[#allocation89_spill] sm:$0xff] %v13303_v50 }
 0x1da   :  { %v13301_v59 = vpop.permute.xlu1 %10540 }
 0x1db   :  { %18872 = vst [vmem:[#allocation88_spill] sm:$0xff] %v13301_v59  ;;  %10750 = vrot.lane.b32.xlu0 %v10734_v17, %s12295_s30  ;;  %v13309_v1 = vpop.permute.xlu0 %10555 }
 0x1dc   :  { %10745 = vrot.lane.b32.xlu1 %v10734_v17, %s12294_s29  ;;  %v1254_v17 = vld [vmem:[#allocation2 + $0x90] sm:$0xff]  ;;  %v10557_v26 = vunpack.i.l.bf16 %v13309_v1 }
 0x1dd   :  { %v10774_v48 = vpack.i.bf16 %v12075_v21, %v1254_v17 }
 0x1de   :  { %v13307_v32 = vpop.permute.xlu1 %10560  ;;  %v13341_v17 = vsel %vm1635_vm6, %v18302_v44, %v10557_v26 }
 0x1df   :  { %10755 = vrot.lane.b32.xlu0 %v12974_v8, %s12292_s27  ;;  %v13318_v14 = vpop.permute.xlu0 %10565  ;;  %18877 = vst [vmem:[#allocation93_spill] sm:$0xff] %v13341_v17  ;;  %v18878_v21 = vunpack.i.l.bf16 %v13307_v32 }
 0x1e0   :  { %10760 = vrot.lane.b32.xlu1 %v12974_v8, %s12293_s28  ;;  %18875 = vst [vmem:[#allocation91_spill] sm:$0xff] %v13318_v14  ;;  %v18886_v12 = vunpack.i.l.bf16 %v13318_v14 }
 0x1e1   :  { %v13348_v59 = vsel %vm2417_vm7, %v18307_v29, %v18878_v21  ;;  %v10558_v21 = vunpack.i.h.bf16 %v13309_v1 }
 0x1e2   :  { %v13316_v31 = vpop.permute.xlu1 %10570  ;;  %18879 = vst [vmem:[#allocation94_spill] sm:$0xff] %v13348_v59  ;;  %v18893_v59 = vunpack.i.h.bf16 %v13072_v25 }
 0x1e3   :  { %18874 = vst [vmem:[#allocation90_spill] sm:$0xff] %v13316_v31  ;;  %10765 = vrot.lane.b32.xlu0 %v12974_v8, %s12294_s29  ;;  %v13330_v50 = vpop.permute.xlu0 %10580  ;;  %v18892_v1 = vunpack.i.l.bf16 %v13316_v31 }
 0x1e4   :  { %10770 = vrot.lane.b32.xlu1 %v12974_v8, %s12295_s30  ;;  %v18881_v34 = vunpack.i.h.bf16 %v13330_v50  ;;  %v18882_v44 = vunpack.i.l.bf16 %v13330_v50 }
 0x1e6   :  { %v13328_v6 = vpop.permute.xlu1 %10575  ;;  %v13362_v40 = vsel %vm2417_vm7, %v18882_v44, %v18881_v34 }
 0x1e7   :  { %18876 = vst [vmem:[#allocation92_spill] sm:$0xff] %v13328_v6  ;;  %v10578_v0 = vunpack.i.h.bf16 %v13328_v6  ;;  %v18308_v15 = vunpack.i.l.bf16 %v13328_v6  ;;  %10780 = vrot.lane.b32.xlu0 %v10774_v48, %s12293_s28  ;;  %18883 = vst [vmem:[#allocation96_spill] sm:$0xff] %v13362_v40  ;;  %v13368_v38 = vpop.permute.xlu0 %10590 }
 0x1e8   :  { %10775 = vrot.lane.b32.xlu1 %v10774_v48, %s12292_s27  ;;  %18885 = vst [vmem:[#allocation98_spill] sm:$0xff] %v13368_v38  ;;  %v18895_v40 = vunpack.i.h.bf16 %v13368_v38 }
 0x1e9   :  { %v13355_v8 = vsel %vm1635_vm6, %v18308_v15, %v10578_v0  ;;  %v18887_v15 = vunpack.i.h.bf16 %v13090_v27  ;;  %v18896_v27 = vunpack.i.l.bf16 %v13368_v38 }
 0x1ea   :  { %18880 = vst [vmem:[#allocation95_spill] sm:$0xff] %v13355_v8  ;;  %v13366_v29 = vpop.permute.xlu1 %10585 }
 0x1eb   :  { %18884 = vst [vmem:[#allocation97_spill] sm:$0xff] %v13366_v29  ;;  %10790 = vrot.lane.b32.xlu0 %v10774_v48, %s12295_s30  ;;  %v13386_v13 = vsel %vm3200_vm8, %v18887_v15, %v18886_v12  ;;  %v18889_v6 = vunpack.i.h.bf16 %v13366_v29  ;;  %v18890_v34 = vunpack.i.l.bf16 %v13366_v29  ;;  %v13407_v15 = vsel %vm4003_vm9, %v18896_v27, %v18895_v40  ;;  %v13411_v29 = vpop.permute.xlu0 %10595 }
 0x1ec   :  { %10785 = vrot.lane.b32.xlu1 %v10774_v48, %s12294_s29  ;;  %18888 = vst [vmem:[#allocation99_spill] sm:$0xff] %v13386_v13  ;;  %v13400_v48 = vsel %vm4003_vm9, %v18893_v59, %v18892_v1  ;;  %18897 = vst [vmem:[#allocation102_spill] sm:$0xff] %v13407_v15  ;;  %v18326_v59 = vunpack.i.l.bf16 %v13080_v61  ;;  %v18325_v1 = vunpack.i.h.bf16 %v13411_v29  ;;  %v10597_v38 = vunpack.i.l.bf16 %v13411_v29 }
 0x1ed   :  { %v13393_v44 = vsel %vm3200_vm8, %v18890_v34, %v18889_v6  ;;  %18894 = vst [vmem:[#allocation101_spill] sm:$0xff] %v13400_v48  ;;  %18899 = vst [vmem:[#allocation104_spill] sm:$0xff] %v13411_v29  ;;  %v10799_v6 = vpack.i.bf16 %v1265_v62, %v1264_v19  ;;  %v1658_v40 = vsel %vm1635_vm6, %v10557_v26, %v10558_v21 }
 0x1ee   :  { %18891 = vst [vmem:[#allocation100_spill] sm:$0xff] %v13393_v44  ;;  %v13409_v12 = vpop.permute.xlu1 %10605  ;;  %v1668_v62 = vsel %vm1635_vm6, %v10578_v0, %v10597_v38  ;;  %v1659_v19 = vsel %vm1635_vm6, %v10558_v21, %v18326_v59  ;;  %v1669_v27 = vsel %vm1635_vm6, %v10597_v38, %v18325_v1  ;;  %v18336_v1 = vunpack.i.h.bf16 %v13092_v20 }
 0x1ef   :  { %18898 = vst [vmem:[#allocation103_spill] sm:$0xff] %v13409_v12  ;;  %10795 = vrot.lane.b32.xlu0 %v10799_v6, %s12292_s27  ;;  %v13432_v34 = vpop.permute.xlu0 %10600  ;;  %v9407_v48 = vpack.c.bf16 %v1669_v27, %v1659_v19  ;;  %v9409_v15 = vpack.c.bf16 %v1668_v62, %v1658_v40  ;;  %v1276_v40 = vld [vmem:[#allocation2 + $0x140] sm:$0xff]  ;;  %v18349_v27 = vunpack.i.l.bf16 %v13102_v46 }
 0x1f0   :  { %10800 = vrot.lane.b32.xlu1 %v10799_v6, %s12293_s28  ;;  %18901 = vst [vmem:[#allocation106_spill] sm:$0xff] %v13432_v34 }
 0x1f1   :  { %9408 = vmatprep.subr.bf16.mxu1 %v9407_v48 }
 0x1f2   :  { %v13430_v25 = vpop.permute.xlu1 %10610  ;;  %9410 = vmatpush1.bf16.msra.mxu1 %v9409_v15 }
 0x1f3   :  { %18900 = vst [vmem:[#allocation105_spill] sm:$0xff] %v13430_v25  ;;  %10805 = vrot.lane.b32.xlu0 %v10799_v6, %s12294_s29  ;;  %v13438_v0 = vpop.permute.xlu0 %10615 }
 0x1f4   :  { %10810 = vrot.lane.b32.xlu1 %v10799_v6, %s12295_s30  ;;  %18903 = vst [vmem:[#allocation108_spill] sm:$0xff] %v13438_v0  ;;  %v12076_v6 = vld [vmem:[#allocation2 + $0x148] sm:$0xff] }
 0x1f5   :  { %v10839_v62 = vpack.i.bf16 %v12076_v6, %v1276_v40 }
 0x1f6   :  { %v13436_v26 = vpop.permute.xlu1 %10625 }
 0x1f7   :  { %18902 = vst [vmem:[#allocation107_spill] sm:$0xff] %v13436_v26  ;;  %10820 = vrot.lane.b32.xlu0 %v12988_v22, %s12293_s28  ;;  %v13444_v21 = vpop.permute.xlu0 %10620 }
 0x1f8   :  { %10815 = vrot.lane.b32.xlu1 %v12988_v22, %s12292_s27  ;;  %18904 = vst [vmem:[#allocation109_spill] sm:$0xff] %v13444_v21 }
 0x1fa   :  { %v10631_v38 = vpop.permute.xlu1 %10630 }
 0x1fb   :  { %10830 = vrot.lane.b32.xlu0 %v12988_v22, %s12295_s30  ;;  %v13452_v15 = vpop.permute.xlu0 %10635  ;;  %v10632_v19 = vunpack.i.l.bf16 %v10631_v38  ;;  %v10633_v29 = vunpack.i.h.bf16 %v10631_v38  ;;  %v18911_v38 = vunpack.i.h.bf16 %v13110_v37 }
 0x1fc   :  { %10825 = vrot.lane.b32.xlu1 %v12988_v22, %s12294_s29  ;;  %v18910_v26 = vunpack.i.l.bf16 %v13452_v15 }
 0x1fd   :  { %v13472_v59 = vsel %vm1635_vm6, %v18336_v1, %v10632_v19 }
 0x1fe   :  { %v13450_v48 = vpop.permute.xlu1 %10640  ;;  %18908 = vst [vmem:[#allocation113_spill] sm:$0xff] %v13472_v59  ;;  %v13485_v21 = vsel %vm2417_vm7, %v18911_v38, %v18910_v26  ;;  %v1679_v26 = vsel %vm1635_vm6, %v10633_v29, %v18349_v27 }
 0x1ff   :  { %18905 = vst [vmem:[#allocation110_spill] sm:$0xff] %v13450_v48  ;;  %10835 = vrot.lane.b32.xlu0 %v10839_v62, %s12292_s27  ;;  %v13461_v44 = vpop.permute.xlu0 %10645  ;;  %18912 = vst [vmem:[#allocation115_spill] sm:$0xff] %v13485_v21 }
 0x200   :  { %10840 = vrot.lane.b32.xlu1 %v10839_v62, %s12293_s28  ;;  %18907 = vst [vmem:[#allocation112_spill] sm:$0xff] %v13461_v44  ;;  %v10648_v40 = vunpack.i.h.bf16 %v13461_v44  ;;  %v18338_v6 = vunpack.i.l.bf16 %v13461_v44  ;;  %v1678_v44 = vsel %vm1635_vm6, %v10632_v19, %v10633_v29  ;;  %v18919_v19 = vunpack.i.h.bf16 %v13112_v36 }
 0x201   :  { %v18367_v36 = vunpack.i.h.bf16 %v13122_v11 }
 0x202   :  { %v13459_v13 = vpop.permute.xlu1 %10650  ;;  %v13478_v31 = vsel %vm1635_vm6, %v18338_v6, %v10648_v40 }
 0x203   :  { %18906 = vst [vmem:[#allocation111_spill] sm:$0xff] %v13459_v13  ;;  %10845 = vrot.lane.b32.xlu0 %v10839_v62, %s12294_s29  ;;  %18909 = vst [vmem:[#allocation114_spill] sm:$0xff] %v13478_v31  ;;  %v18914_v22 = vunpack.i.l.bf16 %v13459_v13  ;;  %v13498_v20 = vpop.permute.xlu0 %10655 }
 0x204   :  { %10850 = vrot.lane.b32.xlu1 %v10839_v62, %s12295_s30  ;;  %v18913_v62 = vunpack.i.h.bf16 %v13459_v13  ;;  %18917 = vst [vmem:[#allocation118_spill] sm:$0xff] %v13498_v20  ;;  %v18922_v0 = vunpack.i.l.bf16 %v13498_v20 }
 0x206   :  { %v13492_v1 = vsel %vm2417_vm7, %v18914_v22, %v18913_v62  ;;  %v13496_v6 = vpop.permute.xlu1 %10660  ;;  %v18918_v62 = vunpack.i.l.bf16 %v13450_v48 }
 0x207   :  { %18915 = vst [vmem:[#allocation116_spill] sm:$0xff] %v13492_v1  ;;  %18916 = vst [vmem:[#allocation117_spill] sm:$0xff] %v13496_v6  ;;  %v18350_v38 = vunpack.i.h.bf16 %v13496_v6  ;;  %v10662_v14 = vunpack.i.l.bf16 %v13496_v6  ;;  %10860 = vrot.lane.b32.xlu0 %v13074_v42, %s12293_s28  ;;  %v18921_v1 = vunpack.i.h.bf16 %v13498_v20 }
 0x208   :  { %10855 = vrot.lane.b32.xlu1 %v13074_v42, %s12292_s27  ;;  %v13525_v21 = vsel %vm3200_vm8, %v18919_v19, %v18918_v62  ;;  %v13562_v19 = vld [vmem:[#allocation2 + $0x248] sm:$0xff] }
 0x209   :  { %v1688_v37 = vsel %vm1635_vm6, %v10648_v40, %v10662_v14  ;;  %v1689_v22 = vsel %vm1635_vm6, %v10662_v14, %v18350_v38  ;;  %18920 = vst [vmem:[#allocation119_spill] sm:$0xff] %v13525_v21  ;;  %v13532_v59 = vsel %vm3200_vm8, %v18922_v0, %v18921_v1  ;;  %v13536_v40 = vpop.permute.xlu0 %10670  ;;  %v1298_v0 = vld [vmem:[#allocation2 + $0x1f0] sm:$0xff] }
 0x20a   :  { %18923 = vst [vmem:[#allocation120_spill] sm:$0xff] %v13532_v59  ;;  %v13534_v29 = vpop.permute.xlu1 %10665  ;;  %18925 = vst [vmem:[#allocation122_spill] sm:$0xff] %v13536_v40  ;;  %v9411_v27 = vpack.c.bf16 %v1689_v22, %v1679_v26  ;;  %v9413_v14 = vpack.c.bf16 %v1688_v37, %v1678_v44  ;;  %v12077_v26 = vld [vmem:[#allocation2 + $0x1f8] sm:$0xff] }
 0x20b   :  { %18924 = vst [vmem:[#allocation121_spill] sm:$0xff] %v13534_v29  ;;  %10870 = vrot.lane.b32.xlu0 %v13000_v33, %s12292_s27  ;;  %v13554_v22 = vpack.i.bf16 %v12077_v26, %v1298_v0 }
 0x20c   :  { %10865 = vrot.lane.b32.xlu1 %v13074_v42, %s12294_s29  ;;  %9412 = vmatprep.subr.bf16.mxu1 %v9411_v27  ;;  %v13560_v27 = vld [vmem:[#allocation2 + $0x240] sm:$0xff] }
 0x20d   :  { %9414 = vmatpush1.bf16.msra.mxu1 %v9413_v14  ;;  %v13546_v1 = vpop.permute.xlu0 %10675  ;;  %v10899_v21 = vpack.i.bf16 %v13562_v19, %v13560_v27 }
 0x20e   :  { %v13544_v62 = vpop.permute.xlu1 %10680  ;;  %18927 = vst [vmem:[#allocation124_spill] sm:$0xff] %v13546_v1 }
 0x20f   :  { %18926 = vst [vmem:[#allocation123_spill] sm:$0xff] %v13544_v62  ;;  %10880 = vrot.lane.b32.xlu0 %v13000_v33, %s12294_s29 }
 0x210   :  { %10875 = vrot.lane.b32.xlu1 %v13000_v33, %s12293_s28 }
 0x211   :  { %v10691_v44 = vpop.permute.xlu0 %10690 }
 0x212   :  { %v13552_v37 = vpop.permute.xlu1 %10685  ;;  %v10692_v0 = vunpack.i.l.bf16 %v10691_v44 }
 0x213   :  { %18928 = vst [vmem:[#allocation125_spill] sm:$0xff] %v13552_v37  ;;  %10890 = vrot.lane.b32.xlu0 %v13554_v22, %s12293_s28 }
 0x214   :  { %10885 = vrot.lane.b32.xlu1 %v13554_v22, %s12292_s27  ;;  %v13586_v48 = vsel %vm1635_vm6, %v18367_v36, %v10692_v0  ;;  %v1320_v36 = vld [vmem:[#allocation2 + $0x2a0] sm:$0xff] }
 0x215   :  { %v13566_v38 = vpop.permute.xlu0 %10700  ;;  %18932 = vst [vmem:[#allocation129_spill] sm:$0xff] %v13586_v48 }
 0x216   :  { %v13564_v14 = vpop.permute.xlu1 %10695  ;;  %18929 = vst [vmem:[#allocation126_spill] sm:$0xff] %v13566_v38 }
 0x217   :  { %10900 = vrot.lane.b32.xlu0 %v10899_v21, %s12292_s27 }
 0x218   :  { %10895 = vrot.lane.b32.xlu1 %v13554_v22, %s12294_s29 }
 0x219   :  { %v13575_v59 = vpop.permute.xlu0 %1629 }
 0x21a   :  { %v13573_v26 = vpop.permute.xlu1 %10705  ;;  %18931 = vst [vmem:[#allocation128_spill] sm:$0xff] %v13575_v59 }
 0x21b   :  { %18930 = vst [vmem:[#allocation127_spill] sm:$0xff] %v13573_v26  ;;  %v10708_v6 = vunpack.i.h.bf16 %v13573_v26  ;;  %v18368_v37 = vunpack.i.l.bf16 %v13573_v26  ;;  %10910 = vrot.lane.b32.xlu0 %v10899_v21, %s12294_s29  ;;  %v18936_v26 = vunpack.i.l.bf16 %v13564_v14 }
 0x21c   :  { %10905 = vrot.lane.b32.xlu1 %v10899_v21, %s12293_s28  ;;  %v18377_v21 = vunpack.i.h.bf16 %v13124_v5  ;;  %v18384_v5 = vunpack.i.h.bf16 %v13137_v52 }
 0x21d   :  { %v13591_v62 = vsel %vm1635_vm6, %v18368_v37, %v10708_v6  ;;  %v13595_v1 = vpop.permute.xlu0 %10710  ;;  %v10929_v37 = vpack.i.bf16 %v12078_v43, %v1320_v36 }
 0x21e   :  { %18933 = vst [vmem:[#allocation130_spill] sm:$0xff] %v13591_v62  ;;  %v13593_v31 = vpop.permute.xlu1 %2411  ;;  %18935 = vst [vmem:[#allocation132_spill] sm:$0xff] %v13595_v1  ;;  %v18379_v20 = vunpack.i.h.bf16 %v13595_v1  ;;  %v18378_v11 = vunpack.i.l.bf16 %v13595_v1  ;;  %v13612_v25 = vsel %vm2417_vm7, %v18377_v21, %v18936_v26 }
 0x21f   :  { %18934 = vst [vmem:[#allocation131_spill] sm:$0xff] %v13593_v31  ;;  %10920 = vrot.lane.b32.xlu0 %v13006_v47, %s12293_s28  ;;  %18937 = vst [vmem:[#allocation133_spill] sm:$0xff] %v13612_v25 }
 0x220   :  { %10915 = vrot.lane.b32.xlu1 %v13006_v47, %s12292_s27  ;;  %v13619_v48 = vsel %vm2417_vm7, %v18378_v11, %v18379_v20  ;;  %v10693_v11 = vunpack.i.h.bf16 %v10691_v44  ;;  %v18941_v20 = vunpack.i.l.bf16 %v13566_v38 }
 0x221   :  { %18938 = vst [vmem:[#allocation134_spill] sm:$0xff] %v13619_v48  ;;  %v13623_v31 = vpop.permute.xlu0 %3194  ;;  %v18394_v48 = vunpack.i.l.bf16 %v13129_v2 }
 0x222   :  { %v13621_v62 = vpop.permute.xlu1 %10715  ;;  %18940 = vst [vmem:[#allocation136_spill] sm:$0xff] %v13623_v31  ;;  %v13638_v36 = vsel %vm3200_vm8, %v18384_v5, %v18941_v20  ;;  %v1698_v5 = vsel %vm1635_vm6, %v10692_v0, %v10693_v11 }
 0x223   :  { %18939 = vst [vmem:[#allocation135_spill] sm:$0xff] %v13621_v62  ;;  %v18386_v26 = vunpack.i.h.bf16 %v13621_v62  ;;  %v18385_v21 = vunpack.i.l.bf16 %v13621_v62  ;;  %10930 = vrot.lane.b32.xlu0 %v10929_v37, %s12292_s27  ;;  %18942 = vst [vmem:[#allocation137_spill] sm:$0xff] %v13638_v36  ;;  %v13670_v62 = vld [vmem:[#allocation2 + $0x2f0] sm:$0x1] }
 0x224   :  { %10925 = vrot.lane.b32.xlu1 %v13006_v47, %s12294_s29 }
 0x225   :  { %v13645_v43 = vsel %vm3200_vm8, %v18385_v21, %v18386_v26  ;;  %v13649_v25 = vpop.permute.xlu0 %10720  ;;  %v1699_v26 = vsel %vm1635_vm6, %v10693_v11, %v18394_v48 }
 0x226   :  { %18943 = vst [vmem:[#allocation138_spill] sm:$0xff] %v13645_v43  ;;  %v13647_v17 = vpop.permute.xlu1 %1631  ;;  %18945 = vst [vmem:[#allocation140_spill] sm:$0xff] %v13649_v25  ;;  %v18393_v52 = vunpack.i.h.bf16 %v13649_v25  ;;  %v10722_v20 = vunpack.i.l.bf16 %v13649_v25 }
 0x227   :  { %18944 = vst [vmem:[#allocation139_spill] sm:$0xff] %v13647_v17  ;;  %10940 = vrot.lane.b32.xlu0 %v10929_v37, %s12294_s29 }
 0x228   :  { %10935 = vrot.lane.b32.xlu1 %v10929_v37, %s12293_s28  ;;  %v1708_v21 = vsel %vm1635_vm6, %v10708_v6, %v10722_v20  ;;  %v1709_v44 = vsel %vm1635_vm6, %v10722_v20, %v18393_v52  ;;  %v1331_v37 = vld [vmem:[#allocation2 + $0x2f8] sm:$0x1] }
 0x229   :  { %v13668_v43 = vpop.permute.xlu0 %2413  ;;  %v9415_v17 = vpack.c.bf16 %v1709_v44, %v1699_v26  ;;  %v9417_v31 = vpack.c.bf16 %v1708_v21, %v1698_v5  ;;  %v1246_v21 = vld [vmem:[#allocation2 + $0x50] sm:$0xff] }
 0x22a   :  { %v13666_v36 = vpop.permute.xlu1 %10725  ;;  %18947 = vst [vmem:[#allocation142_spill] sm:$0xff] %v13668_v43 }
 0x22b   :  { %18946 = vst [vmem:[#allocation141_spill] sm:$0xff] %v13666_v36  ;;  %1625 = vrot.lane.b32.xlu0 %v13670_v62, %s12292_s27  ;;  %9416 = vmatprep.subr.bf16.mxu1 %v9415_v17 }
 0x22c   :  { %2407 = vrot.lane.b32.xlu1 %v13670_v62, %s12293_s28  ;;  %9418 = vmatpush1.bf16.msra.mxu1 %v9417_v31  ;;  %v13689_v31 = vld [vmem:[#allocation2 + $0x58] sm:$0xff] }
 0x22d   :  { %v13678_v6 = vpop.permute.xlu0 %10730  ;;  %18952 = vst [vmem:[#allocation147_spill] sm:$0xff] %v13689_v31  ;;  %v10944_v44 = vpack.i.bf16 %v13689_v31, %v1246_v21 }
 0x22e   :  { %v13676_v11 = vpop.permute.xlu1 %3196  ;;  %18949 = vst [vmem:[#allocation144_spill] sm:$0xff] %v13678_v6  ;;  %v13756_v6 = vld [vmem:[#allocation2 + $0x1b8] sm:$0xff] }
 0x22f   :  { %18948 = vst [vmem:[#allocation143_spill] sm:$0xff] %v13676_v11  ;;  %3190 = vrot.lane.b32.xlu0 %v13670_v62, %s12294_s29  ;;  %v13712_v11 = vld [vmem:[#allocation3 + $0x10] sm:$0xff]  ;;  %18968 = vst [vmem:[#allocation162_spill] sm:$0xff] %v13756_v6 }
 0x230   :  { %1627 = vrot.lane.b32.xlu1 %v1331_v37, %s12292_s27 }
 0x231   :  { %v13685_v0 = vpop.permute.xlu0 %1617 }
 0x232   :  { %v13683_v5 = vpop.permute.xlu1 %2399  ;;  %18951 = vst [vmem:[#allocation146_spill] sm:$0xff] %v13685_v0 }
 0x233   :  { %18950 = vst [vmem:[#allocation145_spill] sm:$0xff] %v13683_v5  ;;  %2409 = vrot.lane.b32.xlu0 %v1331_v37, %s12293_s28 }
 0x234   :  { %3192 = vrot.lane.b32.xlu1 %v1331_v37, %s12294_s29 }
 0x235   :  { %v13691_v26 = vpop.permute.xlu0 %3182 }
 0x236   :  { %v1620_v17 = vpop.permute.xlu1 %1619  ;;  %18953 = vst [vmem:[#allocation148_spill] sm:$0xff] %v13691_v26  ;;  %v13728_v26 = vld [vmem:[#allocation3 + $0x18] sm:$0x1] }
 0x237   :  { %10950 = vrot.lane.b32.xlu0 %v10944_v44, %s12293_s28  ;;  %18960 = vst [vmem:[#allocation155_spill] sm:$0xff] %v13728_v26 }
 0x238   :  { %10945 = vrot.lane.b32.xlu1 %v10944_v44, %s12292_s27 }
 0x239   :  { %v13698_v52 = vpop.permute.xlu0 %2401 }
 0x23a   :  { %v13696_v20 = vpop.permute.xlu1 %3184  ;;  %18955 = vst [vmem:[#allocation150_spill] sm:$0xff] %v13698_v52 }
 0x23b   :  { %18954 = vst [vmem:[#allocation149_spill] sm:$0xff] %v13696_v20  ;;  %10960 = vrot.lane.b32.xlu0 %v10944_v44, %s12295_s30 }
 0x23c   :  { %10955 = vrot.lane.b32.xlu1 %v10944_v44, %s12294_s29  ;;  %v1718_v44 = vsel %vm1635_vm6, %v13685_v0, %v1620_v17 }
 0x23d   :  { %v13704_v48 = vpop.permute.xlu0 %1621 }
 0x23e   :  { %v13702_v37 = vpop.permute.xlu1 %2403  ;;  %18957 = vst [vmem:[#allocation152_spill] sm:$0xff] %v13704_v48  ;;  %v1719_v21 = vsel %vm1635_vm6, %v1620_v17, %v13704_v48  ;;  %v1268_v48 = vld [vmem:[#allocation2 + $0x100] sm:$0xff]  ;;  %v13730_v17 = vld [vmem:[#allocation2 + $0x108] sm:$0xff] }
 0x23f   :  { %18956 = vst [vmem:[#allocation151_spill] sm:$0xff] %v13702_v37  ;;  %10965 = vrot.lane.b32.xlu0 %v13044_v57, %s12292_s27  ;;  %9142 = vmatprep.subr.msk.mxu1 %vm1813_vm12, %v1719_v21  ;;  %18961 = vst [vmem:[#allocation156_spill] sm:$0xff] %v13730_v17  ;;  %v18962_v21 = vmov 0.0   ;;  %v10989_v0 = vpack.i.bf16 %v13730_v17, %v1268_v48  ;;  %v1290_v48 = vld [vmem:[#allocation2 + $0x1b0] sm:$0xff]  ;;  %v18425_v17 = vunpack.i.h.bf16 %v13019_v3 }
 0x240   :  { %10970 = vrot.lane.b32.xlu1 %v13044_v57, %s12293_s28  ;;  %9143 = vmatpush1.msk.msra.mxu1 %vm1813_vm12, %v1718_v44 }
 0x241   :  { %v13720_v25 = vpop.permute.xlu0 %3186  ;;  %9144 = vmatmul.mubr.msk.f32.vlgmr.msra.gmra.mrb[74].mxu1 %vm1806_vm13, %v13712_v11 }
 0x242   :  { %v13718_v43 = vpop.permute.xlu1 %1623  ;;  %18959 = vst [vmem:[#allocation154_spill] sm:$0xff] %v13720_v25  ;;  %1981 = vmatprep.mubr.f32.mxu1 %v18962_v21 }
 0x243   :  { %18958 = vst [vmem:[#allocation153_spill] sm:$0xff] %v13718_v43  ;;  %10975 = vrot.lane.b32.xlu0 %v13044_v57, %s12294_s29 }
 0x244   :  { %10980 = vrot.lane.b32.xlu1 %v13044_v57, %s12295_s30 }
 0x245   :  { %v13735_v43 = vpop.permute.xlu0 %2405  ;;  %9145 = vmatmul.mubr.msk.f32.gmra.mrb[76].mxu1 %vm1806_vm13, %v13728_v26 }
 0x246   :  { %v13733_v44 = vpop.permute.xlu1 %3188  ;;  %18964 = vst [vmem:[#allocation158_spill] sm:$0xff] %v13735_v43  ;;  %2129 = vmatprep.mubr.f32.mxu1 %v18962_v21 }
 0x247   :  { %18963 = vst [vmem:[#allocation157_spill] sm:$0xff] %v13733_v44  ;;  %10985 = vrot.lane.b32.xlu0 %v10989_v0, %s12292_s27 }
 0x248   :  { %10990 = vrot.lane.b32.xlu1 %v10989_v0, %s12293_s28 }
 0x249   :  { %v13743_v20 = vpop.permute.xlu0 %10740 }
 0x24a   :  { %v10736_v57 = vpop.permute.xlu1 %10735  ;;  %18965 = vst [vmem:[#allocation159_spill] sm:$0xff] %v13743_v20  ;;  %v18973_v37 = vunpack.i.l.bf16 %v13743_v20 }
 0x24b   :  { %10995 = vrot.lane.b32.xlu0 %v10989_v0, %s12294_s29  ;;  %v10737_v25 = vunpack.i.l.bf16 %v10736_v57 }
 0x24c   :  { %11000 = vrot.lane.b32.xlu1 %v10989_v0, %s12295_s30 }
 0x24d   :  { %v13749_v43 = vpop.permute.xlu0 %10750  ;;  %v13778_v0 = vsel %vm1635_vm6, %v18425_v17, %v10737_v25 }
 0x24e   :  { %v13747_v44 = vpop.permute.xlu1 %10745  ;;  %18967 = vst [vmem:[#allocation161_spill] sm:$0xff] %v13749_v43  ;;  %v13765_v43 = vpack.i.bf16 %v13756_v6, %v1290_v48  ;;  %18971 = vst [vmem:[#allocation165_spill] sm:$0xff] %v13778_v0  ;;  %v18974_v6 = vunpack.i.h.bf16 %v13040_v18 }
 0x24f   :  { %18966 = vst [vmem:[#allocation160_spill] sm:$0xff] %v13747_v44  ;;  %11010 = vrot.lane.b32.xlu0 %v13064_v24, %s12293_s28 }
 0x250   :  { %11005 = vrot.lane.b32.xlu1 %v13064_v24, %s12292_s27 }
 0x251   :  { %v13762_v52 = vpop.permute.xlu0 %10755 }
 0x252   :  { %v13760_v5 = vpop.permute.xlu1 %10760  ;;  %18970 = vst [vmem:[#allocation164_spill] sm:$0xff] %v13762_v52  ;;  %v10758_v8 = vunpack.i.h.bf16 %v13762_v52  ;;  %v18427_v38 = vunpack.i.l.bf16 %v13762_v52 }
 0x253   :  { %18969 = vst [vmem:[#allocation163_spill] sm:$0xff] %v13760_v5  ;;  %11025 = vrot.lane.b32.xlu0 %v13765_v43, %s12293_s28  ;;  %v18976_v1 = vunpack.i.h.bf16 %v13760_v5  ;;  %v18977_v3 = vunpack.i.l.bf16 %v13760_v5 }
 0x254   :  { %11015 = vrot.lane.b32.xlu1 %v13064_v24, %s12294_s29  ;;  %v13784_v31 = vsel %vm1635_vm6, %v18427_v38, %v10758_v8  ;;  %v13791_v24 = vsel %vm2417_vm7, %v18974_v6, %v18973_v37  ;;  %v18435_v6 = vunpack.i.h.bf16 %v13042_v54 }
 0x255   :  { %18972 = vst [vmem:[#allocation166_spill] sm:$0xff] %v13784_v31  ;;  %18975 = vst [vmem:[#allocation167_spill] sm:$0xff] %v13791_v24  ;;  %v13798_v17 = vsel %vm2417_vm7, %v18977_v3, %v18976_v1  ;;  %v13802_v52 = vpop.permute.xlu0 %10765  ;;  %v10738_v3 = vunpack.i.h.bf16 %v10736_v57  ;;  %v18981_v1 = vunpack.i.l.bf16 %v13747_v44  ;;  %v13846_v31 = vld [vmem:[#allocation2 + $0x268] sm:$0xff]  ;;  %v12079_v44 = vld [vmem:[#allocation2 + $0x200] sm:$0xff] }
 0x256   :  { %18978 = vst [vmem:[#allocation168_spill] sm:$0xff] %v13798_v17  ;;  %v13800_v48 = vpop.permute.xlu1 %10770  ;;  %18980 = vst [vmem:[#allocation170_spill] sm:$0xff] %v13802_v52  ;;  %v18437_v37 = vunpack.i.h.bf16 %v13802_v52  ;;  %v18436_v26 = vunpack.i.l.bf16 %v13802_v52  ;;  %v18452_v17 = vunpack.i.l.bf16 %v13153_v23  ;;  %v18996_v23 = vunpack.i.h.bf16 %v13062_v41 }
 0x257   :  { %18979 = vst [vmem:[#allocation169_spill] sm:$0xff] %v13800_v48  ;;  %11035 = vrot.lane.b32.xlu0 %v13084_v39, %s12292_s27  ;;  %v13820_v38 = vsel %vm3200_vm8, %v18435_v6, %v18981_v1  ;;  %v13838_v6 = vld [vmem:[#allocation2 + $0x260] sm:$0xff] }
 0x258   :  { %11020 = vrot.lane.b32.xlu1 %v13765_v43, %s12292_s27  ;;  %18982 = vst [vmem:[#allocation171_spill] sm:$0xff] %v13820_v38  ;;  %v13827_v20 = vsel %vm3200_vm8, %v18436_v26, %v18437_v37  ;;  %v1642_v26 = vsel %vm1635_vm6, %v10737_v25, %v10738_v3  ;;  %v1643_v57 = vsel %vm1635_vm6, %v10738_v3, %v18452_v17 }
 0x259   :  { %18983 = vst [vmem:[#allocation172_spill] sm:$0xff] %v13827_v20  ;;  %v13831_v24 = vpop.permute.xlu0 %10780 }
 0x25a   :  { %v13829_v48 = vpop.permute.xlu1 %10775  ;;  %18985 = vst [vmem:[#allocation174_spill] sm:$0xff] %v13831_v24 }
 0x25b   :  { %18984 = vst [vmem:[#allocation173_spill] sm:$0xff] %v13829_v48  ;;  %v18451_v0 = vunpack.i.h.bf16 %v13829_v48  ;;  %v10777_v1 = vunpack.i.l.bf16 %v13829_v48  ;;  %11045 = vrot.lane.b32.xlu0 %v13084_v39, %s12294_s29  ;;  %v12080_v39 = vld [vmem:[#allocation2 + $0x208] sm:$0xff]  ;;  %v13886_v48 = vld [vmem:[#allocation2 + $0x310] sm:$0x1] }
 0x25c   :  { %11030 = vrot.lane.b32.xlu1 %v13765_v43, %s12294_s29  ;;  %v13858_v54 = vpack.i.bf16 %v12080_v39, %v12079_v44 }
 0x25d   :  { %v1652_v37 = vsel %vm1635_vm6, %v10758_v8, %v10777_v1  ;;  %v1653_v38 = vsel %vm1635_vm6, %v10777_v1, %v18451_v0  ;;  %v13856_v52 = vpop.permute.xlu0 %10790  ;;  %v11049_v8 = vpack.i.bf16 %v13846_v31, %v13838_v6  ;;  %v18461_v0 = vunpack.i.h.bf16 %v13080_v61 }
 0x25e   :  { %v13854_v20 = vpop.permute.xlu1 %10785  ;;  %18987 = vst [vmem:[#allocation176_spill] sm:$0xff] %v13856_v52  ;;  %v9435_v25 = vpack.c.bf16 %v1653_v38, %v1643_v57  ;;  %v9437_v5 = vpack.c.bf16 %v1652_v37, %v1642_v26  ;;  %v12081_v38 = vld [vmem:[#allocation2 + $0x2b0] sm:$0xff]  ;;  %v12082_v26 = vld [vmem:[#allocation2 + $0x2b8] sm:$0xff] }
 0x25f   :  { %18986 = vst [vmem:[#allocation175_spill] sm:$0xff] %v13854_v20  ;;  %11050 = vrot.lane.b32.xlu0 %v11049_v8, %s12292_s27  ;;  %v11064_v37 = vpack.i.bf16 %v12082_v26, %v12081_v38 }
 0x260   :  { %11040 = vrot.lane.b32.xlu1 %v13858_v54, %s12293_s28  ;;  %9436 = vmatprep.subr.bf16.mxu1 %v9435_v25 }
 0x261   :  { %9438 = vmatpush1.bf16.msra.mxu1 %v9437_v5  ;;  %v10796_v1 = vpop.permute.xlu0 %10795 }
 0x262   :  { %v13865_v3 = vpop.permute.xlu1 %10800  ;;  %v10797_v57 = vunpack.i.l.bf16 %v10796_v1 }
 0x263   :  { %18988 = vst [vmem:[#allocation177_spill] sm:$0xff] %v13865_v3  ;;  %11060 = vrot.lane.b32.xlu0 %v11049_v8, %s12294_s29  ;;  %v18995_v26 = vunpack.i.l.bf16 %v13865_v3 }
 0x264   :  { %11055 = vrot.lane.b32.xlu1 %v11049_v8, %s12293_s28  ;;  %v13894_v25 = vsel %vm1635_vm6, %v18461_v0, %v10797_v57 }
 0x265   :  { %v13871_v44 = vpop.permute.xlu0 %10805  ;;  %18993 = vst [vmem:[#allocation182_spill] sm:$0xff] %v13894_v25 }
 0x266   :  { %v13869_v39 = vpop.permute.xlu1 %10810  ;;  %18990 = vst [vmem:[#allocation179_spill] sm:$0xff] %v13871_v44 }
 0x267   :  { %18989 = vst [vmem:[#allocation178_spill] sm:$0xff] %v13869_v39  ;;  %11070 = vrot.lane.b32.xlu0 %v11064_v37, %s12293_s28 }
 0x268   :  { %11065 = vrot.lane.b32.xlu1 %v11064_v37, %s12292_s27 }
 0x269   :  { %v13880_v8 = vpop.permute.xlu0 %10820 }
 0x26a   :  { %v13878_v17 = vpop.permute.xlu1 %10815  ;;  %18992 = vst [vmem:[#allocation181_spill] sm:$0xff] %v13880_v8  ;;  %v18998_v20 = vunpack.i.h.bf16 %v13880_v8  ;;  %v18999_v61 = vunpack.i.l.bf16 %v13880_v8 }
 0x26b   :  { %18991 = vst [vmem:[#allocation180_spill] sm:$0xff] %v13878_v17  ;;  %v10818_v52 = vunpack.i.h.bf16 %v13878_v17  ;;  %v18463_v39 = vunpack.i.l.bf16 %v13878_v17  ;;  %1633 = vrot.lane.b32.xlu0 %v13886_v48, %s12292_s27 }
 0x26c   :  { %11075 = vrot.lane.b32.xlu1 %v11064_v37, %s12294_s29  ;;  %v13907_v37 = vsel %vm2417_vm7, %v18996_v23, %v18995_v26  ;;  %v13914_v0 = vsel %vm2417_vm7, %v18999_v61, %v18998_v20  ;;  %v18472_v23 = vunpack.i.h.bf16 %v13100_v49  ;;  %v10798_v61 = vunpack.i.h.bf16 %v10796_v1  ;;  %v12084_v1 = vld [vmem:[#allocation2 + $0x150] sm:$0xff] }
 0x26d   :  { %v13900_v38 = vsel %vm1635_vm6, %v18463_v39, %v10818_v52  ;;  %18997 = vst [vmem:[#allocation184_spill] sm:$0xff] %v13907_v37  ;;  %19000 = vst [vmem:[#allocation185_spill] sm:$0xff] %v13914_v0  ;;  %v13918_v17 = vpop.permute.xlu0 %10830  ;;  %v19003_v20 = vunpack.i.l.bf16 %v13871_v44  ;;  %v12083_v0 = vld [vmem:[#allocation2 + $0x158] sm:$0xff] }
 0x26e   :  { %18994 = vst [vmem:[#allocation183_spill] sm:$0xff] %v13900_v38  ;;  %v13916_v5 = vpop.permute.xlu1 %10825  ;;  %19002 = vst [vmem:[#allocation187_spill] sm:$0xff] %v13918_v17  ;;  %v11079_v25 = vpack.i.bf16 %v12083_v0, %v12084_v1 }
 0x26f   :  { %19001 = vst [vmem:[#allocation186_spill] sm:$0xff] %v13916_v5  ;;  %v18476_v26 = vunpack.i.h.bf16 %v13916_v5  ;;  %v18475_v24 = vunpack.i.l.bf16 %v13916_v5  ;;  %3198 = vrot.lane.b32.xlu0 %v13886_v48, %s12294_s29  ;;  %v13936_v39 = vsel %vm3200_vm8, %v18472_v23, %v19003_v20  ;;  %v18482_v20 = vunpack.i.l.bf16 %v13289_v55 }
 0x270   :  { %2415 = vrot.lane.b32.xlu1 %v13886_v48, %s12293_s28  ;;  %19004 = vst [vmem:[#allocation188_spill] sm:$0xff] %v13936_v39 }
 0x271   :  { %v13943_v3 = vsel %vm3200_vm8, %v18475_v24, %v18476_v26  ;;  %v13947_v37 = vpop.permute.xlu0 %10835  ;;  %v1662_v24 = vsel %vm1635_vm6, %v10797_v57, %v10798_v61  ;;  %v1663_v0 = vsel %vm1635_vm6, %v10798_v61, %v18482_v20  ;;  %v12087_v61 = vld [vmem:[#allocation2 + $0x1a0] sm:$0xff] }
 0x272   :  { %19005 = vst [vmem:[#allocation189_spill] sm:$0xff] %v13943_v3  ;;  %v13945_v17 = vpop.permute.xlu1 %10840  ;;  %19007 = vst [vmem:[#allocation191_spill] sm:$0xff] %v13947_v37  ;;  %v18481_v23 = vunpack.i.h.bf16 %v13947_v37  ;;  %v10837_v44 = vunpack.i.l.bf16 %v13947_v37  ;;  %v12085_v3 = vld [vmem:[#allocation2 + $0x180] sm:$0xff] }
 0x273   :  { %19006 = vst [vmem:[#allocation190_spill] sm:$0xff] %v13945_v17  ;;  %11080 = vrot.lane.b32.xlu0 %v11079_v25, %s12295_s30 }
 0x274   :  { %11085 = vrot.lane.b32.xlu1 %v12701_v35, %s12295_s30  ;;  %v1672_v26 = vsel %vm1635_vm6, %v10818_v52, %v10837_v44  ;;  %v1673_v1 = vsel %vm1635_vm6, %v10837_v44, %v18481_v23  ;;  %v13969_v35 = vld [vmem:[#allocation2 + $0x188] sm:$0xff] }
 0x275   :  { %v13967_v39 = vpop.permute.xlu0 %10845  ;;  %v11094_v25 = vpack.i.bf16 %v13969_v35, %v12085_v3  ;;  %v9439_v57 = vpack.c.bf16 %v1673_v1, %v1663_v0  ;;  %v9441_v5 = vpack.c.bf16 %v1672_v26, %v1662_v24  ;;  %v13977_v23 = vld [vmem:[#allocation2 + $0x1a8] sm:$0xff] }
 0x276   :  { %v13965_v38 = vpop.permute.xlu1 %10850  ;;  %19009 = vst [vmem:[#allocation193_spill] sm:$0xff] %v13967_v39  ;;  %v11104_v20 = vpack.i.bf16 %v13977_v23, %v12087_v61  ;;  %v19016_v61 = vpack.i.bf16 %v12731_v4, %v12855_v60 }
 0x277   :  { %19008 = vst [vmem:[#allocation192_spill] sm:$0xff] %v13965_v38  ;;  %11090 = vrot.lane.b32.xlu0 %v12852_v56, %s12295_s30  ;;  %9440 = vmatprep.subr.bf16.mxu1 %v9439_v57  ;;  %v18484_v56 = vunpack.i.h.bf16 %v13102_v46 }
 0x278   :  { %11095 = vrot.lane.b32.xlu1 %v11094_v25, %s12295_s30  ;;  %9442 = vmatpush1.bf16.msra.mxu1 %v9441_v5 }
 0x279   :  { %v13975_v44 = vpop.permute.xlu0 %10860 }
 0x27a   :  { %v10856_v52 = vpop.permute.xlu1 %10855  ;;  %v19017_v57 = vunpack.i.l.bf16 %v13975_v44 }
 0x27b   :  { %11100 = vrot.lane.b32.xlu0 %v13074_v42, %s12295_s30  ;;  %v10857_v24 = vunpack.i.l.bf16 %v10856_v52  ;;  %v10858_v55 = vunpack.i.h.bf16 %v10856_v52  ;;  %v19018_v42 = vunpack.i.h.bf16 %v13116_v45 }
 0x27c   :  { %11105 = vrot.lane.b32.xlu1 %v11104_v20, %s12295_s30 }
 0x27d   :  { %v13985_v26 = vpop.permute.xlu0 %10870  ;;  %v13999_v1 = vsel %vm1635_vm6, %v18484_v56, %v10857_v24  ;;  %v14029_v20 = vsel %vm2417_vm7, %v19018_v42, %v19017_v57 }
 0x27e   :  { %v13983_v3 = vpop.permute.xlu1 %10865  ;;  %19011 = vst [vmem:[#allocation195_spill] sm:$0xff] %v13985_v26  ;;  %v10873_v5 = vunpack.i.h.bf16 %v13985_v26  ;;  %v18486_v0 = vunpack.i.l.bf16 %v13985_v26  ;;  %19012 = vst [vmem:[#allocation196_spill] sm:$0xff] %v13999_v1  ;;  %v19023_v1 = vunpack.i.h.bf16 %v13118_v58 }
 0x27f   :  { %19010 = vst [vmem:[#allocation194_spill] sm:$0xff] %v13983_v3  ;;  %11110 = vrot.lane.b32.xlu0 %v13765_v43, %s12295_s30  ;;  %19019 = vst [vmem:[#allocation200_spill] sm:$0xff] %v14029_v20 }
 0x280   :  { %11115 = vrot.lane.b32.xlu1 %v12859_v7, %s12295_s30  ;;  %v14004_v25 = vsel %vm1635_vm6, %v18486_v0, %v10873_v5  ;;  %v19022_v0 = vunpack.i.l.bf16 %v13983_v3 }
 0x281   :  { %19013 = vst [vmem:[#allocation197_spill] sm:$0xff] %v14004_v25  ;;  %v14010_v43 = vpop.permute.xlu0 %10880 }
 0x282   :  { %v14008_v38 = vpop.permute.xlu1 %10875  ;;  %19015 = vst [vmem:[#allocation199_spill] sm:$0xff] %v14010_v43  ;;  %v14043_v4 = vsel %vm3200_vm8, %v19023_v1, %v19022_v0  ;;  %v19025_v60 = vunpack.i.h.bf16 %v14010_v43  ;;  %v18496_v0 = vunpack.i.l.bf16 %v13432_v34 }
 0x283   :  { %19014 = vst [vmem:[#allocation198_spill] sm:$0xff] %v14008_v38  ;;  %v18491_v56 = vunpack.i.l.bf16 %v14008_v38  ;;  %11120 = vrot.lane.b32.xlu0 %v19016_v61, %s12295_s30  ;;  %v19020_v37 = vunpack.i.h.bf16 %v14008_v38  ;;  %19024 = vst [vmem:[#allocation202_spill] sm:$0xff] %v14043_v4  ;;  %v19026_v61 = vunpack.i.l.bf16 %v14010_v43 }
 0x284   :  { %11125 = vrot.lane.b32.xlu1 %v13000_v33, %s12295_s30 }
 0x285   :  { %v14036_v52 = vsel %vm2417_vm7, %v18491_v56, %v19020_v37  ;;  %v14050_v42 = vsel %vm3200_vm8, %v19026_v61, %v19025_v60  ;;  %v14054_v25 = vpop.permute.xlu0 %10890  ;;  %v1682_v60 = vsel %vm1635_vm6, %v10857_v24, %v10858_v55  ;;  %v1683_v56 = vsel %vm1635_vm6, %v10858_v55, %v18496_v0 }
 0x286   :  { %19021 = vst [vmem:[#allocation201_spill] sm:$0xff] %v14036_v52  ;;  %19027 = vst [vmem:[#allocation203_spill] sm:$0xff] %v14050_v42  ;;  %v14052_v57 = vpop.permute.xlu1 %10885 }
 0x287   :  { %19028 = vst [vmem:[#allocation204_spill] sm:$0xff] %v14052_v57  ;;  %19029 = vst [vmem:[#allocation205_spill] sm:$0xff] %v14054_v25  ;;  %v18497_v1 = vunpack.i.h.bf16 %v14052_v57  ;;  %v10887_v26 = vunpack.i.l.bf16 %v14052_v57  ;;  %11130 = vrot.lane.b32.xlu0 %v13554_v22, %s12295_s30  ;;  %v19031_v22 = vpack.i.bf16 %v12880_v28, %v12873_v16  ;;  %v12093_v28 = vld [vmem:[#allocation2 + $0x238] sm:$0xff]  ;;  %v19037_v57 = vunpack.i.h.bf16 %v13131_v9 }
 0x288   :  { %11135 = vrot.lane.b32.xlu1 %v13858_v54, %s12295_s30  ;;  %v14113_v16 = vpack.i.bf16 %v13560_v27, %v12093_v28 }
 0x289   :  { %v1692_v61 = vsel %vm1635_vm6, %v10873_v5, %v10887_v26  ;;  %v1693_v37 = vsel %vm1635_vm6, %v10887_v26, %v18497_v1  ;;  %v10901_v42 = vpop.permute.xlu0 %10900  ;;  %v12089_v26 = vld [vmem:[#allocation2 + $0x278] sm:$0xff]  ;;  %v14108_v1 = vld [vmem:[#allocation2 + $0x2d0] sm:$0x1] }
 0x28a   :  { %v14075_v4 = vpop.permute.xlu1 %10895  ;;  %v9443_v20 = vpack.c.bf16 %v1693_v37, %v1683_v56  ;;  %v9445_v54 = vpack.c.bf16 %v1692_v61, %v1682_v60  ;;  %v11149_v5 = vpack.i.bf16 %v13846_v31, %v12089_v26  ;;  %v10902_v0 = vunpack.i.l.bf16 %v10901_v42  ;;  %v14088_v56 = vld [vmem:[#allocation2 + $0x2c8] sm:$0x1] }
 0x28b   :  { %19030 = vst [vmem:[#allocation206_spill] sm:$0xff] %v14075_v4  ;;  %11140 = vrot.lane.b32.xlu0 %v12729_v63, %s12295_s30  ;;  %v18502_v63 = vunpack.i.h.bf16 %v13129_v2  ;;  %v10903_v26 = vunpack.i.h.bf16 %v10901_v42  ;;  %v19043_v2 = vpack.i.bf16 %v12711_v51, %v12883_v30 }
 0x28c   :  { %11145 = vrot.lane.b32.xlu1 %v19031_v22, %s12295_s30  ;;  %9444 = vmatprep.subr.bf16.mxu1 %v9443_v20 }
 0x28d   :  { %9446 = vmatpush1.bf16.msra.mxu1 %v9445_v54  ;;  %v14085_v24 = vpop.permute.xlu0 %10910  ;;  %v14118_v54 = vsel %vm1635_vm6, %v18502_v63, %v10902_v0  ;;  %v1702_v42 = vsel %vm1635_vm6, %v10902_v0, %v10903_v26 }
 0x28e   :  { %v14083_v55 = vpop.permute.xlu1 %10905  ;;  %19034 = vst [vmem:[#allocation209_spill] sm:$0xff] %v14118_v54  ;;  %v19044_v0 = vunpack.i.l.bf16 %v14085_v24  ;;  %v19058_v54 = vld [vmem:[#allocation72_spill] sm:$0xff] }
 0x28f   :  { %11150 = vrot.lane.b32.xlu0 %v11149_v5, %s12295_s30  ;;  %v14104_v5 = vld [vmem:[#allocation2 + $0x2c0] sm:$0x1]  ;;  %v19036_v52 = vunpack.i.l.bf16 %v14083_v55 }
 0x290   :  { %3983 = vrot.lane.b32.xlu1 %v14088_v56, %s12295_s30 }
 0x291   :  { %v14098_v37 = vpop.permute.xlu0 %10920  ;;  %v14131_v34 = vsel %vm2417_vm7, %v19037_v57, %v19036_v52 }
 0x292   :  { %v14096_v20 = vpop.permute.xlu1 %10915  ;;  %19033 = vst [vmem:[#allocation208_spill] sm:$0xff] %v14098_v37  ;;  %19038 = vst [vmem:[#allocation211_spill] sm:$0xff] %v14131_v34  ;;  %v19039_v27 = vunpack.i.h.bf16 %v14098_v37  ;;  %v19040_v28 = vunpack.i.l.bf16 %v14098_v37  ;;  %v19045_v34 = vunpack.i.h.bf16 %v13144_v53 }
 0x293   :  { %19032 = vst [vmem:[#allocation207_spill] sm:$0xff] %v14096_v20  ;;  %v10918_v60 = vunpack.i.h.bf16 %v14096_v20  ;;  %v18504_v61 = vunpack.i.l.bf16 %v14096_v20  ;;  %3985 = vrot.lane.b32.xlu0 %v14108_v1, %s12295_s30  ;;  %v18513_v20 = vunpack.i.l.bf16 %v13534_v29 }
 0x294   :  { %3981 = vrot.lane.b32.xlu1 %v14104_v5, %s12295_s30  ;;  %v14138_v63 = vsel %vm2417_vm7, %v19040_v28, %v19039_v27 }
 0x295   :  { %v14124_v22 = vsel %vm1635_vm6, %v18504_v61, %v10918_v60  ;;  %19041 = vst [vmem:[#allocation212_spill] sm:$0xff] %v14138_v63  ;;  %v14144_v43 = vpop.permute.xlu0 %10930  ;;  %v1703_v52 = vsel %vm1635_vm6, %v10903_v26, %v18513_v20  ;;  %v14173_v63 = vsel %vm3200_vm8, %v19045_v34, %v19044_v0  ;;  %v14186_v20 = vld [vmem:[#allocation2 + $0x288] sm:$0xff]  ;;  %v12096_v0 = vld [vmem:[#allocation2 + $0x258] sm:$0xff] }
 0x296   :  { %19035 = vst [vmem:[#allocation210_spill] sm:$0xff] %v14124_v22  ;;  %v14142_v61 = vpop.permute.xlu1 %10925  ;;  %19042 = vst [vmem:[#allocation213_spill] sm:$0xff] %v14144_v43  ;;  %v18514_v27 = vunpack.i.h.bf16 %v14144_v43  ;;  %v10932_v28 = vunpack.i.l.bf16 %v14144_v43  ;;  %v19059_v22 = vunpack.i.h.bf16 %v19058_v54 }
 0x297   :  { %11155 = vrot.lane.b32.xlu0 %v19043_v2, %s12295_s30  ;;  %19046 = vst [vmem:[#allocation214_spill] sm:$0xff] %v14173_v63  ;;  %v19047_v51 = vunpack.i.h.bf16 %v14142_v61  ;;  %v19048_v30 = vunpack.i.l.bf16 %v14142_v61  ;;  %v19057_v63 = vunpack.i.h.bf16 %v13270_v10 }
 0x298   :  { %11160 = vrot.lane.b32.xlu1 %v14113_v16, %s12295_s30  ;;  %v1712_v3 = vsel %vm1635_vm6, %v10918_v60, %v10932_v28  ;;  %v1713_v57 = vsel %vm1635_vm6, %v10932_v28, %v18514_v27  ;;  %v11169_v28 = vpack.i.bf16 %v13562_v19, %v14186_v20  ;;  %v19053_v19 = vld [vmem:[#allocation69_spill] sm:$0xff] }
 0x299   :  { %v14180_v2 = vsel %vm3200_vm8, %v19048_v30, %v19047_v51  ;;  %v14184_v60 = vpop.permute.xlu0 %10940  ;;  %v9447_v27 = vpack.c.bf16 %v1713_v57, %v1703_v52  ;;  %v9449_v43 = vpack.c.bf16 %v1712_v3, %v1702_v42  ;;  %v10527_v51 = vunpack.i.l.bf16 %v13270_v10  ;;  %v14206_v57 = vld [vmem:[#allocation2 + $0x2e8] sm:$0x1] }
 0x29a   :  { %19049 = vst [vmem:[#allocation215_spill] sm:$0xff] %v14180_v2  ;;  %v14182_v26 = vpop.permute.xlu1 %10935  ;;  %19051 = vst [vmem:[#allocation217_spill] sm:$0xff] %v14184_v60  ;;  %v10483_v3 = vunpack.i.h.bf16 %v19053_v19  ;;  %v10607_v52 = vunpack.i.l.bf16 %v13409_v12  ;;  %v14215_v42 = vpack.i.bf16 %v13838_v6, %v12096_v0  ;;  %v10672_v6 = vunpack.i.l.bf16 %v13536_v40 }
 0x29b   :  { %19050 = vst [vmem:[#allocation216_spill] sm:$0xff] %v14182_v26  ;;  %11165 = vrot.lane.b32.xlu0 %v13006_v47, %s12295_s30  ;;  %9448 = vmatprep.subr.bf16.mxu1 %v9447_v27  ;;  %19054 = vst [vmem:[#allocation69_spill] sm:$0xff] %v14206_v57  ;;  %v10563_v27 = vunpack.i.h.bf16 %v13307_v32  ;;  %v19062_v47 = vunpack.i.l.bf16 %v19053_v19  ;;  %v19064_v19 = vunpack.i.h.bf16 %v13330_v50 }
 0x29c   :  { %11170 = vrot.lane.b32.xlu1 %v11169_v28, %s12295_s30  ;;  %9450 = vmatpush1.bf16.msra.mxu1 %v9449_v43  ;;  %19056 = vst [vmem:[#allocation220_spill] sm:$0xff] %v14215_v42 }
 0x29d   :  { %v14199_v29 = vpop.permute.xlu0 %1625  ;;  %v2420_v2 = vsel %vm2417_vm7, %v19062_v47, %v10483_v3  ;;  %v2450_v47 = vsel %vm2417_vm7, %v19064_v19, %v10607_v52 }
 0x29e   :  { %v14197_v30 = vpop.permute.xlu1 %2407 }
 0x29f   :  { %19052 = vst [vmem:[#allocation218_spill] sm:$0xff] %v14197_v30  ;;  %3991 = vrot.lane.b32.xlu0 %v14206_v57, %s12295_s30  ;;  %v2430_v57 = vsel %vm2417_vm7, %v19059_v22, %v10527_v51  ;;  %v19060_v22 = vunpack.i.l.bf16 %v13040_v18 }
 0x2a0   :  { %3993 = vrot.lane.b32.xlu1 %v13670_v62, %s12295_s30  ;;  %v2431_v62 = vsel %vm2417_vm7, %v10527_v51, %v19057_v63  ;;  %v14232_v63 = vld [vmem:[#allocation2 + $0x2e0] sm:$0x1]  ;;  %v19061_v51 = vunpack.i.h.bf16 %v13409_v12  ;;  %v19063_v12 = vunpack.i.l.bf16 %v13062_v41 }
 0x2a1   :  { %v14212_v34 = vpop.permute.xlu0 %3190  ;;  %v2421_v0 = vsel %vm2417_vm7, %v10483_v3, %v19060_v22  ;;  %v9485_v22 = vpack.c.bf16 %v2430_v57, %v2420_v2  ;;  %v19065_v3 = vld [vmem:[#allocation29_spill] sm:$0xff]  ;;  %v19066_v2 = vld [vmem:[#allocation16_spill] sm:$0xff]  ;;  %v19067_v57 = vunpack.i.h.bf16 %v13536_v40  ;;  %v19071_v40 = vld [vmem:[#allocation155_spill] sm:$0xff] }
 0x2a2   :  { %v1628_v28 = vpop.permute.xlu1 %1627  ;;  %19055 = vst [vmem:[#allocation219_spill] sm:$0xff] %v14212_v34  ;;  %v9483_v10 = vpack.c.bf16 %v2431_v62, %v2421_v0  ;;  %v18533_v62 = vunpack.i.l.bf16 %v13116_v45  ;;  %v19068_v0 = vunpack.i.l.bf16 %v13307_v32  ;;  %v19070_v32 = vunpack.i.h.bf16 %v13459_v13  ;;  %v19074_v45 = vld [vmem:[#allocation73_spill] sm:$0xff] }
 0x2a3   :  { %v1722_v43 = vsel %vm1635_vm6, %v14199_v29, %v1628_v28  ;;  %v1723_v34 = vsel %vm1635_vm6, %v1628_v28, %v13575_v59  ;;  %3989 = vrot.lane.b32.xlu0 %v14232_v63, %s12295_s30  ;;  %v2451_v28 = vsel %vm2417_vm7, %v10607_v52, %v19061_v51  ;;  %v2441_v51 = vsel %vm2417_vm7, %v10563_v27, %v19063_v12 }
 0x2a4   :  { %11175 = vrot.lane.b32.xlu1 %v14215_v42, %s12295_s30  ;;  %9150 = vmatprep.subr.msk.mxu1 %vm1813_vm12, %v1723_v34  ;;  %v10638_v42 = vunpack.i.h.bf16 %v13452_v15  ;;  %v9487_v34 = vpack.c.bf16 %v2451_v28, %v2441_v51  ;;  %v2471_v12 = vsel %vm2417_vm7, %v10672_v6, %v19067_v57  ;;  %v19069_v28 = vld [vmem:[#allocation47_spill] sm:$0xff]  ;;  %v19075_v41 = vunpack.i.l.bf16 %v19074_v45 }
 0x2a5   :  { %9151 = vmatpush1.msk.msra.mxu1 %vm1813_vm12, %v1722_v43  ;;  %v14250_v18 = vpop.permute.xlu0 %2409  ;;  %v10317_v43 = vunpack.i.l.bf16 %v19065_v3 }
 0x2a6   :  { %v14248_v59 = vpop.permute.xlu1 %3192  ;;  %9484 = vmatprep.subr.bf16.mxu1 %v9483_v10  ;;  %9152 = vmatmul.mubr.msk.f32.vlgmr.msra.gmra.mrb[78].mxu1 %vm1806_vm13, %v13712_v11  ;;  %v2440_v10 = vsel %vm2417_vm7, %v19068_v0, %v10563_v27  ;;  %v10727_v11 = vunpack.i.l.bf16 %v13666_v36  ;;  %v2461_v57 = vsel %vm2417_vm7, %v10638_v42, %v18533_v62  ;;  %v2470_v27 = vsel %vm2417_vm7, %v19070_v32, %v10672_v6  ;;  %v12102_v62 = vld [vmem:[#allocation2 + $0x10] sm:$0xff] }
 0x2a7   :  { %9486 = vmatpush1.bf16.msra.mxu1 %v9485_v22  ;;  %11180 = vrot.lane.b32.xlu0 %v19069_v28, %s12295_s30  ;;  %v9489_v19 = vpack.c.bf16 %v2450_v47, %v2440_v10  ;;  %v10698_v0 = vunpack.i.h.bf16 %v13564_v14  ;;  %v19072_v47 = vunpack.i.h.bf16 %v19065_v3  ;;  %v19073_v6 = vunpack.i.l.bf16 %v13452_v15 }
 0x2a8   :  { %11185 = vrot.lane.b32.xlu1 %v19066_v2, %s12295_s30  ;;  %9488 = vmatprep.subr.bf16.mxu1 %v9487_v34  ;;  %v9491_v34 = vpack.c.bf16 %v2471_v12, %v2461_v57  ;;  %v14301_v57 = vld [vmem:[#allocation2 + $0x308] sm:$0x1]  ;;  %v14378_v2 = vld [vmem:[#allocation3] sm:$0xff] }
 0x2a9   :  { %v14276_v51 = vpop.permute.xlu0 %10950  ;;  %2135 = vmatprep.mubr.f32.mxu1 %v18962_v21  ;;  %v1636_v10 = vsel %vm1635_vm6, %v10317_v43, %v19072_v47  ;;  %v2460_v32 = vsel %vm2417_vm7, %v19073_v6, %v10638_v42  ;;  %v12099_v42 = vld [vmem:[#allocation2 + $0x60] sm:$0xff]  ;;  %v12101_v6 = vld [vmem:[#allocation2 + $0x8] sm:$0xff]  ;;  %19107 = vst [vmem:[#allocation221_spill] sm:$0xff] %v14378_v2 }
 0x2aa   :  { %v14274_v22 = vpop.permute.xlu1 %10945  ;;  %9153 = vmatmul.mubr.msk.f32.gmra.mrb[80].mxu1 %vm1806_vm13, %v19071_v40  ;;  %v19076_v40 = vunpack.i.h.bf16 %v13666_v36  ;;  %v9493_v15 = vpack.c.bf16 %v2470_v27, %v2460_v32  ;;  %v14318_v36 = vpack.i.bf16 %v12102_v62, %v12101_v6  ;;  %v19084_v27 = vld [vmem:[#allocation174_spill] sm:$0xff]  ;;  %v19086_v62 = vld [vmem:[#allocation159_spill] sm:$0xff]  ;;  %v19088_v6 = vld [vmem:[#allocation93_spill] sm:$0xff] }
 0x2ab   :  { %v10948_v52 = vunpack.i.h.bf16 %v14274_v22  ;;  %9490 = vmatpush1.bf16.msra.mxu1 %v9489_v19  ;;  %3999 = vrot.lane.b32.xlu0 %v14301_v57, %s12295_s30  ;;  %v12100_v19 = vld [vmem:[#allocation2 + $0x68] sm:$0xff] }
 0x2ac   :  { %4001 = vrot.lane.b32.xlu1 %v13886_v48, %s12295_s30  ;;  %9492 = vmatprep.subr.bf16.mxu1 %v9491_v34  ;;  %v2491_v48 = vsel %vm2417_vm7, %v10727_v11, %v19076_v40  ;;  %v14312_v45 = vpack.i.bf16 %v12100_v19, %v12099_v42  ;;  %19082 = vst [vmem:[#allocation73_spill] sm:$0xff] %v14318_v36  ;;  %v19083_v40 = vunpack.i.l.bf16 %v13131_v9  ;;  %v10782_v42 = vunpack.i.l.bf16 %v19084_v27 }
 0x2ad   :  { %v1646_v12 = vsel %vm1635_vm6, %v10948_v52, %v19075_v41  ;;  %v14310_v43 = vpop.permute.xlu0 %10960  ;;  %2755 = vmatprep.mubr.f32.mxu1 %v18962_v21  ;;  %v19080_v52 = vld [vmem:[#allocation132_spill] sm:$0xff]  ;;  %v10743_v19 = vunpack.i.h.bf16 %v19086_v62 }
 0x2ae   :  { %v14308_v3 = vpop.permute.xlu1 %10955  ;;  %19078 = vst [vmem:[#allocation29_spill] sm:$0xff] %v14310_v43  ;;  %19079 = vst [vmem:[#allocation155_spill] sm:$0xff] %v14312_v45  ;;  %v9389_v41 = vpack.c.bf16 %v1646_v12, %v1636_v10  ;;  %v19081_v47 = vunpack.i.h.bf16 %v19080_v52  ;;  %v2481_v43 = vsel %vm2417_vm7, %v10698_v0, %v19083_v40 }
 0x2af   :  { %19077 = vst [vmem:[#allocation72_spill] sm:$0xff] %v14308_v3  ;;  %9494 = vmatpush1.bf16.msra.mxu1 %v9493_v15  ;;  %v9495_v10 = vpack.c.bf16 %v2491_v48, %v2481_v43  ;;  %11190 = vrot.lane.b32.xlu0 %v14318_v36, %s12296_s6  ;;  %v12103_v43 = vld [vmem:[#allocation2] sm:$0xff] }
 0x2b0   :  { %v2490_v34 = vsel %vm2417_vm7, %v19081_v47, %v10727_v11  ;;  %11195 = vrot.lane.b32.xlu1 %v14312_v45, %s12296_s6  ;;  %v19085_v11 = vunpack.i.l.bf16 %v13564_v14  ;;  %9390 = vmatpush1.bf16.msra.mxu0 %v9389_v41  ;;  %v19087_v47 = vld [vmem:[#allocation95_spill] sm:$0xff]  ;;  %v10842_v41 = vunpack.i.l.bf16 %v13945_v17 }
 0x2b1   :  { %9496 = vmatprep.subr.bf16.mxu1 %v9495_v10  ;;  %v19089_v40 = vpack.c.bf16 %v19087_v47, %v19088_v6  ;;  %v14338_v32 = vpop.permute.xlu0 %10965  ;;  %v19091_v14 = vld [vmem:[#allocation147_spill] sm:$0xff]  ;;  %v19095_v47 = vld [vmem:[#allocation150_spill] sm:$0xff] }
 0x2b2   :  { %v2480_v12 = vsel %vm2417_vm7, %v19085_v11, %v10698_v0  ;;  %v14336_v15 = vpop.permute.xlu1 %10970  ;;  %v14341_v3 = vpack.i.bf16 %v19091_v14, %v12103_v43  ;;  %v19093_v11 = vld [vmem:[#allocation65_spill] sm:$0xff]  ;;  %v19094_v10 = vld [vmem:[#allocation151_spill] sm:$0xff]  ;;  %v14355_v14 = vld [vmem:[#allocation2 + $0x300] sm:$0x1] }
 0x2b3   :  { %9392 = vmatprep.subr.bf16.mxu0 %v19089_v40  ;;  %19090 = vst [vmem:[#allocation159_spill] sm:$0xff] %v14336_v15  ;;  %v9497_v48 = vpack.c.bf16 %v2490_v34, %v2480_v12  ;;  %v2501_v6 = vsel %vm2417_vm7, %v19095_v47, %v19094_v10  ;;  %v19096_v34 = vunpack.i.h.bf16 %v19084_v27  ;;  %v19097_v40 = vld [vmem:[#allocation177_spill] sm:$0xff]  ;;  %19098 = vst [vmem:[#allocation93_spill] sm:$0xff] %v14355_v14  ;;  %3997 = vrot.lane.b32.xlu0 %v14355_v14, %s12295_s30  ;;  %v12106_v0 = vld [vmem:[#allocation2 + $0xc0] sm:$0xff] }
 0x2b4   :  { %19092 = vst [vmem:[#allocation95_spill] sm:$0xff] %v14341_v3  ;;  %11200 = vrot.lane.b32.xlu1 %v14341_v3, %s12296_s6  ;;  %v10803_v43 = vunpack.i.h.bf16 %v19097_v40  ;;  %v19100_v15 = vld [vmem:[#allocation85_spill] sm:$0xff] }
 0x2b5   :  { %9498 = vmatpush1.bf16.msra.mxu1 %v9497_v48  ;;  %v2435_v12 = vsel %vm2417_vm7, %v10782_v42, %v19096_v34  ;;  %v12105_v48 = vld [vmem:[#allocation2 + $0xb8] sm:$0xff]  ;;  %v19101_v10 = vld [vmem:[#allocation145_spill] sm:$0xff]  ;;  %v14371_v13 = vpop.permute.xlu0 %10975 }
 0x2b6   :  { %9162 = vmatprep.subr.msk.mxu1 %vm1813_vm12, %v2501_v6  ;;  %v14360_v9 = vpack.i.bf16 %v12106_v0, %v12105_v48  ;;  %v2500_v27 = vsel %vm2417_vm7, %v19101_v10, %v19095_v47  ;;  %v19102_v34 = vld [vmem:[#allocation163_spill] sm:$0xff]  ;;  %v14369_v36 = vpop.permute.xlu1 %10980  ;;  %19105 = vst [vmem:[#allocation177_spill] sm:$0xff] %v14371_v13  ;;  %v19106_v6 = vunpack.i.l.bf16 %v19093_v11  ;;  %v10892_v48 = vunpack.i.l.bf16 %v14054_v25  ;;  %v19127_v10 = vld [vmem:[#allocation162_spill] sm:$0xff] }
 0x2b7   :  { %v19103_v45 = vunpack.i.h.bf16 %v19102_v34  ;;  %19104 = vst [vmem:[#allocation150_spill] sm:$0xff] %v14369_v36  ;;  %v19108_v47 = vunpack.i.h.bf16 %v13945_v17  ;;  %v19110_v36 = vunpack.i.l.bf16 %v19086_v62  ;;  %v10863_v0 = vunpack.i.h.bf16 %v13975_v44  ;;  %v19113_v17 = vld [vmem:[#allocation105_spill] sm:$0xff] }
 0x2b8   :  { %19099 = vst [vmem:[#allocation147_spill] sm:$0xff] %v14360_v9  ;;  %v2425_v14 = vsel %vm2417_vm7, %v10743_v19, %v19106_v6  ;;  %v19111_v6 = vld [vmem:[#allocation13_spill] sm:$0xff]  ;;  %11205 = vrot.lane.b32.xlu0 %v14360_v9, %s12296_s6  ;;  %v10937_v62 = vunpack.i.l.bf16 %v14182_v26 }
 0x2b9   :  { %v2434_v52 = vsel %vm2417_vm7, %v19103_v45, %v10782_v42  ;;  %v9515_v3 = vpack.c.bf16 %v2435_v12, %v2425_v14  ;;  %v2455_v34 = vsel %vm2417_vm7, %v10842_v41, %v19108_v47  ;;  %v19109_v45 = vld [vmem:[#allocation40_spill] sm:$0xff]  ;;  %v2424_v13 = vsel %vm2417_vm7, %v19110_v36, %v10743_v19  ;;  %9163 = vmatpush1.msk.msra.mxu1 %vm1813_vm12, %v2500_v27  ;;  %v14404_v11 = vpop.permute.xlu0 %10985 }
 0x2ba   :  { %v10357_v42 = vunpack.i.l.bf16 %v19109_v45  ;;  %11210 = vrot.lane.b32.xlu1 %v19111_v6, %s12296_s6  ;;  %v9517_v12 = vpack.c.bf16 %v2434_v52, %v2424_v13  ;;  %v19112_v14 = vunpack.i.l.bf16 %v19100_v15  ;;  %v19114_v36 = vunpack.i.h.bf16 %v13880_v8  ;;  %9164 = vmatmul.mubr.msk.f32.vlgmr.msra.gmra.mrb[74].mxu1 %vm1806_vm13, %v14378_v2  ;;  %v14402_v19 = vpop.permute.xlu1 %10990  ;;  %v19115_v13 = vld [vmem:[#allocation156_spill] sm:$0xff] }
 0x2bb   :  { %9516 = vmatprep.subr.bf16.mxu1 %v9515_v3  ;;  %v12107_v3 = vld [vmem:[#allocation2 + $0xb0] sm:$0xff]  ;;  %v10988_v15 = vunpack.i.h.bf16 %v14404_v11  ;;  %2761 = vmatprep.mubr.f32.mxu1 %v18962_v21  ;;  %v14416_v8 = vld [vmem:[#allocation3 + $0x8] sm:$0x1] }
 0x2bc   :  { %v2445_v47 = vsel %vm2417_vm7, %v10803_v43, %v19112_v14  ;;  %v2454_v27 = vsel %vm2417_vm7, %v19114_v36, %v10842_v41  ;;  %v14407_v52 = vpack.i.bf16 %v19115_v13, %v12107_v3  ;;  %9518 = vmatpush1.bf16.msra.mxu1 %v9517_v12  ;;  %v19116_v41 = vunpack.i.h.bf16 %v14054_v25  ;;  %19117 = vst [vmem:[#allocation40_spill] sm:$0xff] %v14416_v8  ;;  %v19120_v12 = vld [vmem:[#allocation14_spill] sm:$0xff]  ;;  %v19121_v25 = vld [vmem:[#allocation92_spill] sm:$0xff] }
 0x2bd   :  { %v9519_v6 = vpack.c.bf16 %v2455_v34, %v2445_v47  ;;  %v19118_v34 = vunpack.i.h.bf16 %v19109_v45  ;;  %v19119_v3 = vunpack.i.l.bf16 %v19097_v40  ;;  %v10908_v14 = vunpack.i.h.bf16 %v14083_v55 }
 0x2be   :  { %v2475_v36 = vsel %vm2417_vm7, %v10892_v48, %v19116_v41  ;;  %11220 = vrot.lane.b32.xlu1 %v19120_v12, %s12296_s6  ;;  %v19122_v41 = vunpack.i.l.bf16 %v19121_v25  ;;  %11215 = vrot.lane.b32.xlu0 %v14407_v52, %s12296_s6  ;;  %v12108_v25 = vld [vmem:[#allocation2 + $0x160] sm:$0xff] }
 0x2bf   :  { %v1656_v47 = vsel %vm1635_vm6, %v10357_v42, %v19118_v34  ;;  %v2444_v13 = vsel %vm2417_vm7, %v19119_v3, %v10803_v43  ;;  %9520 = vmatprep.subr.bf16.mxu1 %v9519_v6  ;;  %v19123_v42 = vunpack.i.l.bf16 %v19113_v17  ;;  %v19124_v43 = vunpack.i.h.bf16 %v14008_v38  ;;  %v14438_v34 = vpop.permute.xlu1 %11000  ;;  %v14440_v3 = vpop.permute.xlu0 %10995  ;;  %9165 = vmatmul.mubr.msk.f32.gmra.mrb[76].mxu1 %vm1806_vm13, %v14416_v8 }
 0x2c0   :  { %v1666_v9 = vsel %vm1635_vm6, %v10988_v15, %v19122_v41  ;;  %v9521_v45 = vpack.c.bf16 %v2454_v27, %v2444_v13  ;;  %19125 = vst [vmem:[#allocation156_spill] sm:$0xff] %v14438_v34  ;;  %19126 = vst [vmem:[#allocation92_spill] sm:$0xff] %v14440_v3  ;;  %v14443_v15 = vpack.i.bf16 %v19127_v10, %v12108_v25  ;;  %v19129_v27 = vld [vmem:[#allocation124_spill] sm:$0xff]  ;;  %2909 = vmatprep.mubr.f32.mxu1 %v18962_v21 }
 0x2c1   :  { %v2465_v40 = vsel %vm2417_vm7, %v10863_v0, %v19123_v42  ;;  %v2474_v6 = vsel %vm2417_vm7, %v19124_v43, %v10892_v48  ;;  %v9393_v41 = vpack.c.bf16 %v1666_v9, %v1656_v47  ;;  %v18558_v13 = vunpack.i.l.bf16 %v19129_v27  ;;  %v19147_v27 = vld [vmem:[#allocation91_spill] sm:$0xff] }
 0x2c2   :  { %v9523_v12 = vpack.c.bf16 %v2475_v36, %v2465_v40  ;;  %19128 = vst [vmem:[#allocation162_spill] sm:$0xff] %v14443_v15  ;;  %9522 = vmatpush1.bf16.msra.mxu1 %v9521_v45  ;;  %v19130_v42 = vunpack.i.h.bf16 %v14182_v26  ;;  %v19131_v43 = vunpack.i.l.bf16 %v13975_v44  ;;  %11230 = vrot.lane.b32.xlu1 %v14443_v15, %s12296_s6  ;;  %v19132_v47 = vunpack.i.h.bf16 %v14098_v37  ;;  %v19133_v44 = vld [vmem:[#allocation114_spill] sm:$0xff]  ;;  %v19134_v40 = vld [vmem:[#allocation113_spill] sm:$0xff] }
 0x2c3   :  { %11225 = vrot.lane.b32.xlu0 %v12859_v7, %s12296_s6  ;;  %9394 = vmatpush1.bf16.msra.mxu0 %v9393_v41  ;;  %v2485_v10 = vsel %vm2417_vm7, %v10908_v14, %v18558_v13  ;;  %v14470_v25 = vpop.permute.xlu0 %11010  ;;  %v19146_v26 = vld [vmem:[#allocation33_spill] sm:$0xff]  ;;  %v10568_v17 = vunpack.i.h.bf16 %v19147_v27  ;;  %v19267_v7 = vld [vmem:[#allocation196_spill] sm:$0xff] }
 0x2c4   :  { %v2495_v48 = vsel %vm2417_vm7, %v10937_v62, %v19130_v42  ;;  %v2464_v36 = vsel %vm2417_vm7, %v19131_v43, %v10863_v0  ;;  %9524 = vmatprep.subr.bf16.mxu1 %v9523_v12  ;;  %v2494_v45 = vsel %vm2417_vm7, %v19132_v47, %v10937_v62  ;;  %v19135_v0 = vpack.c.bf16 %v19133_v44, %v19134_v40  ;;  %v14468_v12 = vpop.permute.xlu1 %11005  ;;  %v19137_v43 = vld [vmem:[#allocation86_spill] sm:$0xff]  ;;  %v19139_v62 = vld [vmem:[#allocation17_spill] sm:$0xff]  ;;  %v19141_v40 = vld [vmem:[#allocation108_spill] sm:$0xff] }
 0x2c5   :  { %v9525_v9 = vpack.c.bf16 %v2474_v6, %v2464_v36  ;;  %19136 = vst [vmem:[#allocation114_spill] sm:$0xff] %v14470_v25  ;;  %v9527_v42 = vpack.c.bf16 %v2495_v48, %v2485_v10  ;;  %v10537_v6 = vunpack.i.l.bf16 %v19137_v43  ;;  %v19138_v36 = vunpack.i.l.bf16 %v14083_v55  ;;  %v19140_v47 = vld [vmem:[#allocation70_spill] sm:$0xff]  ;;  %v12109_v55 = vld [vmem:[#allocation2 + $0x28] sm:$0xff]  ;;  %v19148_v25 = vld [vmem:[#allocation131_spill] sm:$0xff] }
 0x2c6   :  { %9396 = vmatprep.subr.bf16.mxu0 %v19135_v0  ;;  %11240 = vrot.lane.b32.xlu1 %v19139_v62, %s12296_s6  ;;  %v10488_v44 = vunpack.i.h.bf16 %v19140_v47  ;;  %v10617_v34 = vunpack.i.l.bf16 %v19141_v40  ;;  %v19142_v48 = vld [vmem:[#allocation18_spill] sm:$0xff]  ;;  %v19151_v62 = vld [vmem:[#allocation77_spill] sm:$0xff]  ;;  %v2504_v0 = vsel %vm2417_vm7, %v14197_v30, %v14250_v18 }
 0x2c7   :  { %9526 = vmatpush1.bf16.msra.mxu1 %v9525_v9  ;;  %v2484_v13 = vsel %vm2417_vm7, %v19138_v36, %v10908_v14  ;;  %11235 = vrot.lane.b32.xlu0 %v19142_v48, %s12296_s6  ;;  %v14486_v9 = vpop.permute.xlu0 %11025  ;;  %v12110_v14 = vld [vmem:[#allocation2 + $0x30] sm:$0xff]  ;;  %v19160_v30 = vld [vmem:[#allocation97_spill] sm:$0xff] }
 0x2c8   :  { %9528 = vmatprep.subr.bf16.mxu1 %v9527_v42  ;;  %v9529_v10 = vpack.c.bf16 %v2494_v45, %v2484_v13  ;;  %v14484_v41 = vpop.permute.xlu1 %11015  ;;  %v14488_v42 = vpack.i.bf16 %v12110_v14, %v12109_v55  ;;  %v12111_v36 = vld [vmem:[#allocation2 + $0x210] sm:$0xff]  ;;  %v2505_v13 = vsel %vm2417_vm7, %v14250_v18, %v19148_v25  ;;  %v19149_v45 = vunpack.i.h.bf16 %v19137_v43 }
 0x2c9   :  { %19143 = vst [vmem:[#allocation113_spill] sm:$0xff] %v14484_v41  ;;  %v14491_v3 = vpack.i.bf16 %v13846_v31, %v12111_v36  ;;  %v19150_v48 = vld [vmem:[#allocation46_spill] sm:$0xff]  ;;  %v19152_v31 = vunpack.i.h.bf16 %v19151_v62  ;;  %v19155_v43 = vunpack.i.h.bf16 %v19141_v40  ;;  %v18576_v40 = vunpack.i.l.bf16 %v13118_v58 }
 0x2ca   :  { %19144 = vst [vmem:[#allocation70_spill] sm:$0xff] %v14488_v42  ;;  %v3214_v41 = vsel %vm3200_vm8, %v10537_v6, %v19149_v45  ;;  %v10397_v55 = vunpack.i.l.bf16 %v19150_v48  ;;  %11250 = vrot.lane.b32.xlu1 %v14488_v42, %s12296_s6  ;;  %v19154_v45 = vunpack.i.l.bf16 %v19146_v26  ;;  %v19157_v26 = vld [vmem:[#allocation110_spill] sm:$0xff]  ;;  %v19161_v15 = vunpack.i.h.bf16 %v19160_v30  ;;  %v19204_v30 = vld [vmem:[#allocation25_spill] sm:$0xff] }
 0x2cb   :  { %19145 = vst [vmem:[#allocation222_spill] sm:$0xff] %v14491_v3  ;;  %9530 = vmatpush1.bf16.msra.mxu1 %v9529_v10  ;;  %v3213_v36 = vsel %vm3200_vm8, %v19152_v31, %v10537_v6  ;;  %v19153_v10 = vld [vmem:[#allocation123_spill] sm:$0xff]  ;;  %11245 = vrot.lane.b32.xlu0 %v14491_v3, %s12296_s6  ;;  %v3234_v6 = vsel %vm3200_vm8, %v10617_v34, %v19155_v43  ;;  %v14527_v42 = vpop.permute.xlu0 %11035  ;;  %v10643_v37 = vunpack.i.h.bf16 %v19157_v26 }
 0x2cc   :  { %9170 = vmatprep.subr.msk.mxu1 %vm1813_vm12, %v2505_v13  ;;  %v10682_v25 = vunpack.i.l.bf16 %v19153_v10  ;;  %v3204_v14 = vsel %vm3200_vm8, %v10488_v44, %v19154_v45  ;;  %v19156_v13 = vunpack.i.l.bf16 %v19140_v47  ;;  %v14525_v62 = vpop.permute.xlu1 %11020  ;;  %v19158_v47 = vunpack.i.l.bf16 %v13100_v49 }
 0x2cd   :  { %v9563_v3 = vpack.c.bf16 %v3214_v41, %v3204_v14  ;;  %v11023_v45 = vunpack.i.h.bf16 %v14525_v62  ;;  %v3233_v41 = vsel %vm3200_vm8, %v19161_v15, %v10617_v34  ;;  %v19162_v14 = vld [vmem:[#allocation144_spill] sm:$0xff] }
 0x2ce   :  { %v3203_v31 = vsel %vm3200_vm8, %v19156_v13, %v10488_v44  ;;  %v3224_v44 = vsel %vm3200_vm8, %v10568_v17, %v19158_v47  ;;  %v19159_v13 = vunpack.i.h.bf16 %v19150_v48  ;;  %v19163_v47 = vld [vmem:[#allocation112_spill] sm:$0xff]  ;;  %4786 = vrot.lane.b32.xlu1 %v14088_v56, %s12296_s6 }
 0x2cf   :  { %9171 = vmatpush1.msk.msra.mxu1 %vm1813_vm12, %v2504_v0  ;;  %v9565_v43 = vpack.c.bf16 %v3213_v36, %v3203_v31  ;;  %v9567_v0 = vpack.c.bf16 %v3234_v6, %v3224_v44  ;;  %v18578_v36 = vunpack.i.h.bf16 %v19162_v14  ;;  %v10732_v31 = vunpack.i.l.bf16 %v19162_v14  ;;  %v19167_v6 = vld [vmem:[#allocation24_spill] sm:$0xff] }
 0x2d0   :  { %v1676_v18 = vsel %vm1635_vm6, %v10397_v55, %v19159_v13  ;;  %9564 = vmatprep.subr.bf16.mxu1 %v9563_v3  ;;  %9172 = vmatmul.mubr.msk.f32.vlgmr.msra.gmra.mrb[78].mxu1 %vm1806_vm13, %v14378_v2  ;;  %v19164_v49 = vunpack.i.l.bf16 %v19163_v47  ;;  %v19165_v55 = vunpack.i.h.bf16 %v19153_v10  ;;  %v19166_v3 = vunpack.i.l.bf16 %v19147_v27  ;;  %v14559_v44 = vpop.permute.xlu1 %11030  ;;  %v14561_v13 = vpop.permute.xlu0 %11045  ;;  %v19171_v27 = vld [vmem:[#allocation118_spill] sm:$0xff]  ;;  %v12113_v14 = vld [vmem:[#allocation2 + $0xe0] sm:$0xff] }
 0x2d1   :  { %9566 = vmatpush1.bf16.msra.mxu1 %v9565_v43  ;;  %11255 = vrot.lane.b32.xlu0 %v19167_v6, %s12296_s6  ;;  %19168 = vst [vmem:[#allocation91_spill] sm:$0xff] %v14559_v44  ;;  %19169 = vst [vmem:[#allocation46_spill] sm:$0xff] %v14561_v13  ;;  %v3244_v47 = vsel %vm3200_vm8, %v10643_v37, %v18576_v40  ;;  %v19175_v40 = vunpack.i.l.bf16 %v19157_v26  ;;  %v19212_v6 = vld [vmem:[#allocation170_spill] sm:$0xff] }
 0x2d2   :  { %v1686_v48 = vsel %vm1635_vm6, %v11023_v45, %v19164_v49  ;;  %v3254_v34 = vsel %vm3200_vm8, %v10682_v25, %v19165_v55  ;;  %v3223_v15 = vsel %vm3200_vm8, %v19166_v3, %v10568_v17  ;;  %9568 = vmatprep.subr.bf16.mxu1 %v9567_v0  ;;  %v19170_v45 = vld [vmem:[#allocation126_spill] sm:$0xff]  ;;  %2915 = vmatprep.mubr.f32.mxu1 %v18962_v21  ;;  %v19172_v17 = vunpack.i.h.bf16 %v19171_v27  ;;  %v19173_v3 = vld [vmem:[#allocation53_spill] sm:$0xff]  ;;  %v19203_v27 = vld [vmem:[#allocation179_spill] sm:$0xff] }
 0x2d3   :  { %v9397_v49 = vpack.c.bf16 %v1686_v48, %v1676_v18  ;;  %v10703_v43 = vunpack.i.h.bf16 %v19170_v45  ;;  %v9569_v56 = vpack.c.bf16 %v3233_v41, %v3223_v15  ;;  %v9571_v0 = vpack.c.bf16 %v3254_v34, %v3244_v47  ;;  %v19174_v41 = vld [vmem:[#allocation9_spill] sm:$0xff] }
 0x2d4   :  { %v3253_v55 = vsel %vm3200_vm8, %v19172_v17, %v10682_v25  ;;  %9173 = vmatmul.mubr.msk.f32.gmra.mrb[80].mxu1 %vm1806_vm13, %v14416_v8  ;;  %v10427_v18 = vunpack.i.l.bf16 %v19173_v3  ;;  %11260 = vrot.lane.b32.xlu1 %v19174_v41, %s12296_s6  ;;  %v3274_v15 = vsel %vm3200_vm8, %v10732_v31, %v18578_v36  ;;  %v3243_v25 = vsel %vm3200_vm8, %v19175_v40, %v10643_v37  ;;  %v14585_v34 = vpop.permute.xlu1 %11040  ;;  %v19178_v47 = vld [vmem:[#allocation129_spill] sm:$0xff]  ;;  %v12112_v36 = vld [vmem:[#allocation2 + $0xd8] sm:$0xff] }
 0x2d5   :  { %9398 = vmatpush1.bf16.msra.mxu0 %v9397_v49  ;;  %9570 = vmatpush1.bf16.msra.mxu1 %v9569_v56  ;;  %19176 = vst [vmem:[#allocation110_spill] sm:$0xff] %v14585_v34  ;;  %v14587_v49 = vpop.permute.xlu0 %11050  ;;  %v19177_v56 = vld [vmem:[#allocation130_spill] sm:$0xff]  ;;  %v9573_v13 = vpack.c.bf16 %v3253_v55, %v3243_v25  ;;  %v14593_v26 = vpack.i.bf16 %v12113_v14, %v12112_v36  ;;  %v19181_v37 = vunpack.i.l.bf16 %v13144_v53  ;;  %v19182_v40 = vld [vmem:[#allocation135_spill] sm:$0xff]  ;;  %v10808_v44 = vunpack.i.h.bf16 %v19203_v27 }
 0x2d6   :  { %4788 = vrot.lane.b32.xlu0 %v14108_v1, %s12296_s6  ;;  %9572 = vmatprep.subr.bf16.mxu1 %v9571_v0  ;;  %v19179_v17 = vpack.c.bf16 %v19177_v56, %v19178_v47  ;;  %v11053_v48 = vunpack.i.h.bf16 %v14587_v49  ;;  %v19183_v0 = vunpack.i.h.bf16 %v19182_v40  ;;  %v19184_v56 = vunpack.i.h.bf16 %v19173_v3  ;;  %v19185_v55 = vld [vmem:[#allocation175_spill] sm:$0xff] }
 0x2d7   :  { %19180 = vst [vmem:[#allocation112_spill] sm:$0xff] %v14593_v26  ;;  %v3264_v1 = vsel %vm3200_vm8, %v10703_v43, %v19181_v37  ;;  %3538 = vmatprep.mubr.f32.mxu1 %v18962_v21  ;;  %v10787_v14 = vunpack.i.l.bf16 %v19185_v55  ;;  %v19186_v36 = vld [vmem:[#allocation127_spill] sm:$0xff]  ;;  %v19188_v37 = vunpack.i.l.bf16 %v19170_v45 }
 0x2d8   :  { %9400 = vmatprep.subr.bf16.mxu0 %v19179_v17  ;;  %v3273_v58 = vsel %vm3200_vm8, %v19183_v0, %v10732_v31  ;;  %v9575_v10 = vpack.c.bf16 %v3274_v15, %v3264_v1  ;;  %v1696_v47 = vsel %vm1635_vm6, %v10427_v18, %v19184_v56  ;;  %v19187_v17 = vunpack.i.l.bf16 %v19186_v36  ;;  %11265 = vrot.lane.b32.xlu1 %v14593_v26, %s12296_s6  ;;  %v14617_v3 = vpop.permute.xlu1 %11055  ;;  %v12114_v15 = vld [vmem:[#allocation2 + $0xd0] sm:$0xff]  ;;  %v12115_v1 = vld [vmem:[#allocation2 + $0x128] sm:$0xff] }
 0x2d9   :  { %9574 = vmatpush1.bf16.msra.mxu1 %v9573_v13  ;;  %v3263_v31 = vsel %vm3200_vm8, %v19188_v37, %v10703_v43  ;;  %v14619_v18 = vpop.permute.xlu0 %11060  ;;  %v14621_v0 = vpack.i.bf16 %v12115_v1, %v12114_v15  ;;  %v12117_v43 = vld [vmem:[#allocation2 + $0x230] sm:$0xff] }
 0x2da   :  { %v1706_v53 = vsel %vm1635_vm6, %v11053_v48, %v19187_v17  ;;  %4784 = vrot.lane.b32.xlu0 %v14104_v5, %s12296_s6  ;;  %9576 = vmatprep.subr.bf16.mxu1 %v9575_v10  ;;  %19189 = vst [vmem:[#allocation126_spill] sm:$0xff] %v14619_v18  ;;  %v19191_v48 = vld [vmem:[#allocation160_spill] sm:$0xff]  ;;  %v9577_v36 = vpack.c.bf16 %v3273_v58, %v3263_v31  ;;  %v12116_v17 = vld [vmem:[#allocation2 + $0x190] sm:$0xff]  ;;  %v12118_v58 = vld [vmem:[#allocation2 + $0x48] sm:$0xff] }
 0x2db   :  { %19190 = vst [vmem:[#allocation53_spill] sm:$0xff] %v14621_v0  ;;  %v9401_v13 = vpack.c.bf16 %v1706_v53, %v1696_v47  ;;  %v10748_v56 = vunpack.i.h.bf16 %v19191_v48  ;;  %v14625_v45 = vpack.i.bf16 %v12116_v17, %v13969_v35  ;;  %v14628_v5 = vpack.i.bf16 %v14186_v20, %v12117_v43  ;;  %v19193_v10 = vld [vmem:[#allocation28_spill] sm:$0xff]  ;;  %v12119_v31 = vld [vmem:[#allocation2 + $0x50] sm:$0xff]  ;;  %v19198_v17 = vld [vmem:[#allocation149_spill] sm:$0xff] }
 0x2dc   :  { %v19194_v37 = vunpack.i.h.bf16 %v19193_v10  ;;  %v19195_v25 = vunpack.i.l.bf16 %v19193_v10  ;;  %v10847_v47 = vunpack.i.l.bf16 %v13967_v39  ;;  %v14639_v35 = vpack.i.bf16 %v12119_v31, %v12118_v58  ;;  %v19196_v15 = vld [vmem:[#allocation66_spill] sm:$0xff]  ;;  %11275 = vrot.lane.b32.xlu1 %v14621_v0, %s12296_s6  ;;  %v19200_v58 = vld [vmem:[#allocation63_spill] sm:$0xff]  ;;  %v19208_v18 = vld [vmem:[#allocation164_spill] sm:$0xff] }
 0x2dd   :  { %19192 = vst [vmem:[#allocation130_spill] sm:$0xff] %v14625_v45  ;;  %9402 = vmatpush1.bf16.msra.mxu0 %v9401_v13  ;;  %9578 = vmatpush1.bf16.msra.mxu1 %v9577_v36  ;;  %v19197_v20 = vld [vmem:[#allocation154_spill] sm:$0xff]  ;;  %v19199_v43 = vunpack.i.h.bf16 %v19185_v55  ;;  %v12121_v13 = vld [vmem:[#allocation2 + $0x100] sm:$0xff]  ;;  %v19209_v0 = vunpack.i.l.bf16 %v19208_v18 }
 0x2de   :  { %v14635_v40 = vsel %vm1635_vm6, %v19195_v25, %v19194_v37  ;;  %v3284_v25 = vsel %vm3200_vm8, %v19198_v17, %v19197_v20  ;;  %v12120_v37 = vld [vmem:[#allocation2 + $0xf8] sm:$0xff]  ;;  %v19201_v31 = vld [vmem:[#allocation58_spill] sm:$0xff]  ;;  %v19202_v36 = vld [vmem:[#allocation88_spill] sm:$0xff]  ;;  %11270 = vrot.lane.b32.xlu0 %v19204_v30, %s12296_s6  ;;  %v14663_v20 = vpop.permute.xlu1 %11065 }
 0x2df   :  { %v3218_v10 = vsel %vm3200_vm8, %v10787_v14, %v19199_v43  ;;  %v14650_v53 = vpack.i.bf16 %v12121_v13, %v12120_v37  ;;  %v1716_v1 = vsel %vm1635_vm6, %v19201_v31, %v19200_v58  ;;  %9182 = vmatprep.subr.msk.mxu1 %vm1813_vm12, %v3284_v25  ;;  %v19205_v55 = vld [vmem:[#allocation146_spill] sm:$0xff]  ;;  %v14665_v37 = vpop.permute.xlu0 %11070  ;;  %v19207_v13 = vld [vmem:[#allocation148_spill] sm:$0xff]  ;;  %v19213_v25 = vunpack.i.h.bf16 %v19212_v6 }
 0x2e0   :  { %v1717_v43 = vsel %vm1635_vm6, %v19200_v58, %v19205_v55  ;;  %19206 = vst [vmem:[#allocation129_spill] sm:$0xff] %v14665_v37  ;;  %v3283_v31 = vsel %vm3200_vm8, %v19207_v13, %v19198_v17  ;;  %v19210_v26 = vld [vmem:[#allocation82_spill] sm:$0xff]  ;;  %v19214_v55 = vunpack.i.l.bf16 %v19196_v15  ;;  %v10897_v17 = vunpack.i.l.bf16 %v14075_v4  ;;  %11285 = vrot.lane.b32.xlu1 %v13000_v33, %s12296_s6  ;;  %v19229_v13 = vld [vmem:[#allocation165_spill] sm:$0xff] }
 0x2e1   :  { %v19211_v41 = vunpack.i.h.bf16 %v19210_v26  ;;  %v3217_v34 = vsel %vm3200_vm8, %v19213_v25, %v10787_v14  ;;  %9138 = vmatprep.subr.msk.mxu0 %vm1813_vm12, %v1717_v43  ;;  %v14685_v26 = vld [vmem:[#allocation3 + $0x20] sm:$0xff]  ;;  %v19216_v14 = vld [vmem:[#allocation42_spill] sm:$0xff]  ;;  %9183 = vmatpush1.msk.msra.mxu1 %vm1813_vm12, %v3283_v31 }
 0x2e2   :  { %v3208_v58 = vsel %vm3200_vm8, %v10748_v56, %v19214_v55  ;;  %9139 = vmatpush1.msk.msra.mxu0 %vm1813_vm12, %v1716_v1  ;;  %v19217_v25 = vunpack.i.h.bf16 %v19216_v14  ;;  %v19218_v43 = vunpack.i.l.bf16 %v19216_v14  ;;  %v19219_v55 = vunpack.i.l.bf16 %v19191_v48  ;;  %v12122_v1 = vld [vmem:[#allocation2 + $0x1b0] sm:$0xff]  ;;  %11280 = vrot.lane.b32.xlu0 %v14625_v45, %s12296_s6  ;;  %v14714_v31 = vpop.permute.xlu1 %11075 }
 0x2e3   :  { %v1650_v30 = vsel %vm1635_vm6, %v19211_v41, %v19209_v0  ;;  %v9595_v18 = vpack.c.bf16 %v3218_v10, %v3208_v58  ;;  %v19215_v41 = vunpack.i.h.bf16 %v13967_v39  ;;  %v14702_v10 = vpack.i.bf16 %v12122_v1, %v13977_v23  ;;  %19223 = vst [vmem:[#allocation127_spill] sm:$0xff] %v14714_v31  ;;  %v19225_v1 = vld [vmem:[#allocation109_spill] sm:$0xff]  ;;  %v19226_v39 = vld [vmem:[#allocation186_spill] sm:$0xff]  ;;  %9184 = vmatmul.mubr.msk.f32.vlgmr.msra.gmra.mrb[74].mxu1 %vm1806_vm13, %v14685_v26 }
 0x2e4   :  { %v1660_v15 = vsel %vm1635_vm6, %v19218_v43, %v19217_v25  ;;  %v3207_v37 = vsel %vm3200_vm8, %v19219_v55, %v10748_v56  ;;  %v19220_v58 = vunpack.i.h.bf16 %v13102_v46  ;;  %v19222_v25 = vld [vmem:[#allocation194_spill] sm:$0xff]  ;;  %v14716_v43 = vpop.permute.xlu0 %1633  ;;  %v19224_v23 = vunpack.i.l.bf16 %v19202_v36  ;;  %v19233_v36 = vld [vmem:[#allocation104_spill] sm:$0xff]  ;;  %11295 = vrot.lane.b32.xlu1 %v14113_v16, %s12296_s6  ;;  %3544 = vmatprep.mubr.f32.mxu1 %v18962_v21 }
 0x2e5   :  { %v3238_v0 = vsel %vm3200_vm8, %v10847_v47, %v19215_v41  ;;  %v19221_v41 = vunpack.i.l.bf16 %v13102_v46  ;;  %v10868_v48 = vunpack.i.h.bf16 %v19222_v25  ;;  %9596 = vmatprep.subr.bf16.mxu1 %v9595_v18  ;;  %v9597_v56 = vpack.c.bf16 %v3217_v34, %v3207_v37  ;;  %v19228_v6 = vld [vmem:[#allocation166_spill] sm:$0xff]  ;;  %v19231_v18 = vld [vmem:[#allocation180_spill] sm:$0xff] }
 0x2e6   :  { %v3228_v55 = vsel %vm3200_vm8, %v10808_v44, %v19224_v23  ;;  %v19230_v33 = vpack.c.bf16 %v19228_v6, %v19229_v13  ;;  %v9421_v34 = vpack.c.bf16 %v1650_v30, %v14635_v40  ;;  %v19232_v31 = vunpack.i.l.bf16 %v19231_v18  ;;  %v19236_v6 = vld [vmem:[#allocation55_spill] sm:$0xff]  ;;  %v19243_v45 = vld [vmem:[#allocation182_spill] sm:$0xff] }
 0x2e7   :  { %v14709_v14 = vsel %vm1635_vm6, %v19221_v41, %v19220_v58  ;;  %v19227_v58 = vunpack.i.h.bf16 %v19226_v39  ;;  %v9599_v37 = vpack.c.bf16 %v3238_v0, %v3228_v55  ;;  %v19234_v23 = vunpack.i.h.bf16 %v19233_v36  ;;  %9598 = vmatpush1.bf16.msra.mxu1 %v9597_v56  ;;  %v19239_v0 = vld [vmem:[#allocation62_spill] sm:$0xff]  ;;  %v19240_v55 = vld [vmem:[#allocation87_spill] sm:$0xff] }
 0x2e8   :  { %9420 = vmatprep.subr.bf16.mxu0 %v19230_v33  ;;  %v19235_v33 = vunpack.i.h.bf16 %v14075_v4  ;;  %v19237_v40 = vunpack.i.h.bf16 %v19236_v6  ;;  %v19238_v36 = vunpack.i.l.bf16 %v19236_v6  ;;  %v10547_v56 = vunpack.i.l.bf16 %v19240_v55  ;;  %v19242_v4 = vld [vmem:[#allocation183_spill] sm:$0xff]  ;;  %11305 = vrot.lane.b32.xlu1 %v14628_v5, %s12296_s6 }
 0x2e9   :  { %v3237_v41 = vsel %vm3200_vm8, %v19227_v58, %v10847_v47  ;;  %v1670_v46 = vsel %vm1635_vm6, %v19234_v23, %v19232_v31  ;;  %v10942_v47 = vunpack.i.l.bf16 %v14184_v60  ;;  %v14738_v58 = vld [vmem:[#allocation3 + $0x10] sm:$0xff]  ;;  %v19241_v18 = vunpack.i.l.bf16 %v19203_v27  ;;  %9600 = vmatprep.subr.bf16.mxu1 %v9599_v37  ;;  %v14766_v31 = vpop.permute.xlu0 %3198 }
 0x2ea   :  { %9140 = vmatmul.mubr.msk.f32.vlgmr.msra.gmra.mrb[34].mxu0 %vm1806_vm13, %v14738_v58  ;;  %v3258_v30 = vsel %vm3200_vm8, %v10897_v17, %v19235_v33  ;;  %v14750_v13 = vsel %vm1635_vm6, %v19238_v36, %v19237_v40  ;;  %v10913_v33 = vunpack.i.h.bf16 %v14085_v24  ;;  %v19244_v6 = vpack.c.bf16 %v19242_v4, %v19243_v45  ;;  %v14764_v36 = vpop.permute.xlu1 %2415  ;;  %19246 = vst [vmem:[#allocation28_spill] sm:$0xff] %v14766_v31  ;;  %v19251_v4 = vld [vmem:[#allocation10_spill] sm:$0xff]  ;;  %v19262_v31 = vld [vmem:[#allocation76_spill] sm:$0xff] }
 0x2eb   :  { %v3227_v23 = vsel %vm3200_vm8, %v19241_v18, %v10808_v44  ;;  %9422 = vmatpush1.bf16.msra.mxu0 %v9421_v34  ;;  %19245 = vst [vmem:[#allocation160_spill] sm:$0xff] %v14764_v36  ;;  %v19247_v44 = vunpack.i.l.bf16 %v19225_v1  ;;  %v19248_v34 = vld [vmem:[#allocation37_spill] sm:$0xff]  ;;  %v19249_v18 = vld [vmem:[#allocation199_spill] sm:$0xff]  ;;  %11290 = vrot.lane.b32.xlu0 %v19251_v4, %s12296_s6  ;;  %v9425_v45 = vpack.c.bf16 %v1670_v46, %v1660_v15  ;;  %v14789_v15 = vld [vmem:[#allocation3 + $0x28] sm:$0x1]  ;;  %v19259_v46 = vunpack.i.h.bf16 %v19239_v0 }
 0x2ec   :  { %9424 = vmatprep.subr.bf16.mxu0 %v19244_v6  ;;  %v9601_v40 = vpack.c.bf16 %v3237_v41, %v3227_v23  ;;  %v19250_v39 = vunpack.i.h.bf16 %v19249_v18  ;;  %v19252_v41 = vld [vmem:[#allocation71_spill] sm:$0xff]  ;;  %v19253_v6 = vld [vmem:[#allocation125_spill] sm:$0xff]  ;;  %1904 = vmatprep.mubr.f32.mxu0 %v18962_v21 }
 0x2ed   :  { %v3248_v27 = vsel %vm3200_vm8, %v10868_v48, %v19247_v44  ;;  %v10493_v23 = vunpack.i.h.bf16 %v19252_v41  ;;  %v19254_v1 = vld [vmem:[#allocation195_spill] sm:$0xff]  ;;  %v19256_v44 = vld [vmem:[#allocation117_spill] sm:$0xff]  ;;  %9185 = vmatmul.mubr.msk.f32.gmra.mrb[76].mxu1 %vm1806_vm13, %v14789_v15 }
 0x2ee   :  { %v3257_v8 = vsel %vm3200_vm8, %v19250_v39, %v10897_v17  ;;  %v9603_v16 = vpack.c.bf16 %v3258_v30, %v3248_v27  ;;  %v19255_v36 = vunpack.i.l.bf16 %v19254_v1  ;;  %v19257_v38 = vunpack.i.h.bf16 %v19256_v44  ;;  %9602 = vmatpush1.bf16.msra.mxu1 %v9601_v40  ;;  %v19261_v1 = vld [vmem:[#allocation84_spill] sm:$0xff]  ;;  %v19266_v4 = vld [vmem:[#allocation197_spill] sm:$0xff]  ;;  %v19276_v44 = vld [vmem:[#allocation207_spill] sm:$0xff]  ;;  %3692 = vmatprep.mubr.f32.mxu1 %v18962_v21 }
 0x2ef   :  { %v19258_v39 = vunpack.i.h.bf16 %v14184_v60  ;;  %v19260_v30 = vunpack.i.l.bf16 %v19239_v0  ;;  %9426 = vmatpush1.bf16.msra.mxu0 %v9425_v45  ;;  %v19265_v60 = vld [vmem:[#allocation90_spill] sm:$0xff]  ;;  %v19268_v2 = vpack.c.bf16 %v19266_v4, %v19267_v7  ;;  %v19271_v45 = vunpack.i.h.bf16 %v19240_v55  ;;  %v19278_v55 = vld [vmem:[#allocation140_spill] sm:$0xff] }
 0x2f0   :  { %v1690_v37 = vsel %vm1635_vm6, %v19257_v38, %v19255_v36  ;;  %v19263_v38 = vunpack.i.h.bf16 %v19262_v31  ;;  %v19264_v36 = vunpack.i.l.bf16 %v19222_v25  ;;  %9604 = vmatprep.subr.bf16.mxu1 %v9603_v16  ;;  %v19270_v25 = vunpack.i.l.bf16 %v19253_v6  ;;  %v14845_v31 = vld [vmem:[#allocation3 + $0x18] sm:$0x1] }
 0x2f1   :  { %v3278_v17 = vsel %vm3200_vm8, %v10942_v47, %v19258_v39  ;;  %v14796_v27 = vsel %vm1635_vm6, %v19260_v30, %v19259_v46  ;;  %9428 = vmatprep.subr.bf16.mxu0 %v19268_v2  ;;  %v14813_v30 = vpop.permute.xlu1 %11085  ;;  %v14823_v16 = vsel %vm4003_vm9, %v10547_v56, %v19271_v45  ;;  %v19273_v2 = vunpack.i.h.bf16 %v14142_v61  ;;  %9141 = vmatmul.mubr.msk.f32.gmra.mrb[36].mxu0 %vm1806_vm13, %v14845_v31 }
 0x2f2   :  { %v14802_v40 = vsel %vm4003_vm9, %v19263_v38, %v10547_v56  ;;  %v3247_v39 = vsel %vm3200_vm8, %v19264_v36, %v10868_v48  ;;  %v14815_v38 = vpop.permute.xlu0 %11080  ;;  %v3268_v48 = vsel %vm3200_vm8, %v10913_v33, %v19270_v25  ;;  %v19272_v36 = vld [vmem:[#allocation107_spill] sm:$0xff]  ;;  %v19275_v25 = vunpack.i.l.bf16 %v19252_v41  ;;  %2052 = vmatprep.mubr.f32.mxu0 %v18962_v21 }
 0x2f3   :  { %v9605_v46 = vpack.c.bf16 %v3257_v8, %v3247_v39  ;;  %19269 = vst [vmem:[#allocation149_spill] sm:$0xff] %v14815_v38  ;;  %v10627_v7 = vunpack.i.l.bf16 %v19272_v36  ;;  %v3277_v4 = vsel %vm3200_vm8, %v19273_v2, %v10942_v47  ;;  %v19274_v8 = vld [vmem:[#allocation27_spill] sm:$0xff]  ;;  %v9429_v39 = vpack.c.bf16 %v1690_v37, %v14709_v14 }
 0x2f4   :  { %11300 = vrot.lane.b32.xlu0 %v19274_v8, %s12296_s6  ;;  %v9607_v18 = vpack.c.bf16 %v3278_v17, %v3268_v48  ;;  %v14837_v56 = vsel %vm4003_vm9, %v19275_v25, %v10493_v23  ;;  %v19277_v38 = vunpack.i.l.bf16 %v19276_v44  ;;  %v19279_v47 = vunpack.i.h.bf16 %v19278_v55  ;;  %v19284_v25 = vld [vmem:[#allocation210_spill] sm:$0xff] }
 0x2f5   :  { %9606 = vmatpush1.bf16.msra.mxu1 %v9605_v46  ;;  %v19280_v14 = vunpack.i.l.bf16 %v19248_v34  ;;  %v19281_v41 = vunpack.i.h.bf16 %v19261_v1  ;;  %v19282_v17 = vunpack.i.l.bf16 %v19261_v1  ;;  %v19283_v55 = vunpack.i.l.bf16 %v14085_v24  ;;  %9430 = vmatpush1.bf16.msra.mxu0 %v9429_v39 }
 0x2f6   :  { %v1710_v2 = vsel %vm1635_vm6, %v19279_v47, %v19277_v38  ;;  %v10968_v38 = vunpack.i.h.bf16 %v14338_v32  ;;  %v10967_v48 = vunpack.i.l.bf16 %v14338_v32  ;;  %9608 = vmatprep.subr.bf16.mxu1 %v9607_v18  ;;  %v19285_v47 = vld [vmem:[#allocation209_spill] sm:$0xff]  ;;  %v19289_v32 = vunpack.i.h.bf16 %v19265_v60 }
 0x2f7   :  { %v4007_v37 = vsel %vm4003_vm9, %v10493_v23, %v19280_v14  ;;  %v14857_v44 = vsel %vm1635_vm6, %v19282_v17, %v19281_v41  ;;  %v3267_v46 = vsel %vm3200_vm8, %v19283_v55, %v10913_v33  ;;  %v19286_v23 = vpack.c.bf16 %v19284_v25, %v19285_v47  ;;  %v19287_v14 = vld [vmem:[#allocation34_spill] sm:$0xff]  ;;  %v14869_v41 = vpop.permute.xlu1 %11095  ;;  %v14871_v17 = vpop.permute.xlu0 %11090 }
 0x2f8   :  { %11315 = vrot.lane.b32.xlu1 %v19287_v14, %s12296_s6  ;;  %v9609_v45 = vpack.c.bf16 %v3277_v4, %v3267_v46  ;;  %19288 = vst [vmem:[#allocation63_spill] sm:$0xff] %v14869_v41  ;;  %v9643_v24 = vpack.c.bf16 %v14823_v16, %v4007_v37  ;;  %v9645_v33 = vpack.c.bf16 %v14802_v40, %v14837_v56  ;;  %v19290_v18 = vunpack.i.l.bf16 %v19265_v60  ;;  %v19291_v55 = vld [vmem:[#allocation98_spill] sm:$0xff]  ;;  %v19293_v40 = vld [vmem:[#allocation43_spill] sm:$0xff]  ;;  %v19294_v37 = vld [vmem:[#allocation136_spill] sm:$0xff] }
 0x2f9   :  { %9432 = vmatprep.subr.bf16.mxu0 %v19286_v23  ;;  %v19292_v25 = vunpack.i.h.bf16 %v19291_v55  ;;  %v10947_v46 = vunpack.i.l.bf16 %v14274_v22  ;;  %11310 = vrot.lane.b32.xlu0 %v14639_v35, %s12296_s6  ;;  %v9433_v16 = vpack.c.bf16 %v1710_v2, %v14750_v13  ;;  %v3288_v47 = vsel %vm3200_vm8, %v14248_v59, %v19294_v37  ;;  %v19295_v23 = vld [vmem:[#allocation153_spill] sm:$0xff] }
 0x2fa   :  { %v14881_v39 = vsel %vm4003_vm9, %v19290_v18, %v19289_v32  ;;  %9610 = vmatpush1.bf16.msra.mxu1 %v9609_v45  ;;  %v1721_v32 = vsel %vm1635_vm6, %v19295_v23, %v14199_v29  ;;  %v19296_v22 = vunpack.i.h.bf16 %v19272_v36  ;;  %v10987_v13 = vunpack.i.l.bf16 %v14404_v11  ;;  %v19297_v56 = vld [vmem:[#allocation173_spill] sm:$0xff]  ;;  %v14916_v11 = vld [vmem:[#allocation2 + $0x2f0] sm:$0x1] }
 0x2fb   :  { %v14886_v4 = vsel %vm4003_vm9, %v19292_v25, %v10627_v7  ;;  %v11008_v2 = vunpack.i.h.bf16 %v14468_v12  ;;  %v11007_v45 = vunpack.i.l.bf16 %v14468_v12  ;;  %9434 = vmatpush1.bf16.msra.mxu0 %v9433_v16  ;;  %9190 = vmatprep.subr.msk.mxu1 %vm1813_vm12, %v3288_v47  ;;  %v1655_v25 = vsel %vm1635_vm6, %v10967_v48, %v10968_v38  ;;  %v14920_v12 = vpop.permute.xlu1 %11105  ;;  %v14922_v38 = vpop.permute.xlu0 %11100  ;;  %v19301_v16 = vld [vmem:[#allocation106_spill] sm:$0xff] }
 0x2fc   :  { %v4037_v18 = vsel %vm4003_vm9, %v10627_v7, %v19296_v22  ;;  %v19298_v34 = vunpack.i.h.bf16 %v19297_v56  ;;  %v11022_v55 = vunpack.i.l.bf16 %v14525_v62  ;;  %v11038_v36 = vunpack.i.h.bf16 %v14527_v42  ;;  %9146 = vmatprep.subr.msk.mxu0 %vm1813_vm12, %v1721_v32  ;;  %4796 = vrot.lane.b32.xlu1 %v14916_v11, %s12296_s6  ;;  %19299 = vst [vmem:[#allocation58_spill] sm:$0xff] %v14920_v12  ;;  %19300 = vst [vmem:[#allocation179_spill] sm:$0xff] %v14922_v38  ;;  %v19307_v38 = vld [vmem:[#allocation152_spill] sm:$0xff] }
 0x2fd   :  { %v11037_v7 = vunpack.i.l.bf16 %v14527_v42  ;;  %v19304_v42 = vunpack.i.h.bf16 %v19239_v0  ;;  %v19305_v32 = vunpack.i.l.bf16 %v19293_v40  ;;  %v19306_v22 = vunpack.i.h.bf16 %v19265_v60 }
 0x2fe   :  { %v1654_v29 = vsel %vm1635_vm6, %v19298_v34, %v10967_v48  ;;  %v19302_v34 = vld [vmem:[#allocation219_spill] sm:$0xff]  ;;  %v19303_v48 = vld [vmem:[#allocation69_spill] sm:$0xff]  ;;  %v1720_v56 = vsel %vm1635_vm6, %v19307_v38, %v19295_v23  ;;  %v11092_v0 = vunpack.i.l.bf16 %v14871_v17  ;;  %v1675_v23 = vsel %vm1635_vm6, %v11007_v45, %v11008_v2 }
 0x2ff   :  { %v3287_v62 = vsel %vm3200_vm8, %v19302_v34, %v14248_v59  ;;  %4794 = vrot.lane.b32.xlu0 %v19303_v48, %s12296_s6  ;;  %v1645_v47 = vsel %vm1635_vm6, %v19304_v42, %v10947_v46  ;;  %v4027_v12 = vsel %vm4003_vm9, %v19306_v22, %v19305_v32  ;;  %v9649_v48 = vpack.c.bf16 %v14886_v4, %v14881_v39  ;;  %v19309_v38 = vld [vmem:[#allocation191_spill] sm:$0xff]  ;;  %v14957_v39 = vpop.permute.xlu1 %11115 }
 0x300   :  { %9191 = vmatpush1.msk.msra.mxu1 %vm1813_vm12, %v3287_v62  ;;  %v9451_v59 = vpack.c.bf16 %v1655_v25, %v1645_v47  ;;  %v9647_v37 = vpack.c.bf16 %v4037_v18, %v4027_v12  ;;  %9147 = vmatpush1.msk.msra.mxu0 %vm1813_vm12, %v1720_v56  ;;  %v9453_v60 = vpack.c.bf16 %v1654_v29, %v14796_v27  ;;  %v19308_v46 = vunpack.i.h.bf16 %v19261_v1  ;;  %v19313_v47 = vld [vmem:[#allocation204_spill] sm:$0xff] }
 0x301   :  { %9644 = vmatprep.subr.bf16.mxu1 %v9643_v24  ;;  %v19310_v62 = vunpack.i.h.bf16 %v19309_v38  ;;  %v11068_v25 = vunpack.i.h.bf16 %v14663_v20  ;;  %9192 = vmatmul.mubr.msk.f32.vlgmr.msra.gmra.mrb[78].mxu1 %vm1806_vm13, %v14685_v26  ;;  %v14959_v24 = vpop.permute.xlu0 %11110  ;;  %v19311_v27 = vunpack.i.h.bf16 %v19301_v16  ;;  %v1695_v4 = vsel %vm1635_vm6, %v11037_v7, %v11038_v36  ;;  %v19312_v36 = vld [vmem:[#allocation11_spill] sm:$0xff] }
 0x302   :  { %v1665_v42 = vsel %vm1635_vm6, %v19308_v46, %v10987_v13  ;;  %9452 = vmatprep.subr.bf16.mxu0 %v9451_v59  ;;  %v11067_v13 = vunpack.i.l.bf16 %v14663_v20  ;;  %v18615_v2 = vunpack.i.h.bf16 %v14813_v30  ;;  %9646 = vmatpush1.bf16.msra.mxu1 %v9645_v33  ;;  %v18616_v29 = vunpack.i.l.bf16 %v14957_v39 }
 0x303   :  { %v1674_v18 = vsel %vm1635_vm6, %v19310_v62, %v11007_v45  ;;  %v1685_v1 = vsel %vm1635_vm6, %v19311_v27, %v11022_v55  ;;  %4792 = vrot.lane.b32.xlu1 %v14232_v63, %s12296_s6  ;;  %v11118_v45 = vunpack.i.h.bf16 %v14957_v39  ;;  %v18613_v12 = vunpack.i.h.bf16 %v14869_v41  ;;  %11320 = vrot.lane.b32.xlu0 %v19312_v36, %s12296_s6  ;;  %v19317_v27 = vld [vmem:[#allocation121_spill] sm:$0xff] }
 0x304   :  { %v11097_v56 = vunpack.i.l.bf16 %v14869_v41  ;;  %v11093_v55 = vunpack.i.h.bf16 %v14871_v17  ;;  %9148 = vmatmul.mubr.msk.f32.vlgmr.msra.gmra.mrb[38].mxu0 %vm1806_vm13, %v14738_v58  ;;  %v9455_v20 = vpack.c.bf16 %v1675_v23, %v1665_v42  ;;  %9648 = vmatprep.subr.bf16.mxu1 %v9647_v37  ;;  %v9457_v63 = vpack.c.bf16 %v1674_v18, %v14857_v44  ;;  %v19315_v42 = vld [vmem:[#allocation39_spill] sm:$0xff] }
 0x305   :  { %9454 = vmatpush1.bf16.msra.mxu0 %v9453_v60  ;;  %v14982_v33 = vsel %vm4003_vm9, %v18615_v2, %v11092_v0  ;;  %v14987_v17 = vsel %vm4003_vm9, %v18616_v29, %v11118_v45  ;;  %v19314_v32 = vunpack.i.h.bf16 %v19313_v47  ;;  %v11052_v59 = vunpack.i.l.bf16 %v14587_v49  ;;  %v14993_v60 = vpop.permute.xlu1 %11125  ;;  %v11121_v44 = vpop.permute.xlu0 %11120  ;;  %2058 = vmatprep.mubr.f32.mxu0 %v18962_v21  ;;  %v19367_v2 = vld [vmem:[#allocation64_spill] sm:$0xff] }
 0x306   :  { %9456 = vmatprep.subr.bf16.mxu0 %v9455_v20  ;;  %v9459_v37 = vpack.c.bf16 %v1695_v4, %v1685_v1  ;;  %9650 = vmatpush1.bf16.msra.mxu1 %v9649_v48  ;;  %v18614_v23 = vunpack.i.l.bf16 %v14993_v60  ;;  %v11123_v38 = vunpack.i.h.bf16 %v11121_v44  ;;  %v1715_v49 = vsel %vm1635_vm6, %v11067_v13, %v11068_v25 }
 0x307   :  { %v1694_v22 = vsel %vm1635_vm6, %v19314_v32, %v11037_v7  ;;  %11330 = vrot.lane.b32.xlu1 %v19315_v42, %s12296_s6  ;;  %v11122_v7 = vunpack.i.l.bf16 %v11121_v44  ;;  %v15005_v62 = vsel %vm4003_vm9, %v11097_v56, %v18613_v12  ;;  %v4046_v18 = vsel %vm4003_vm9, %v11092_v0, %v11093_v55  ;;  %11325 = vrot.lane.b32.xlu0 %v14650_v53, %s12296_s6  ;;  %v19337_v12 = vld [vmem:[#allocation75_spill] sm:$0xff] }
 0x308   :  { %19316 = vst [vmem:[#allocation146_spill] sm:$0xff] %v15005_v62  ;;  %v4047_v48 = vsel %vm4003_vm9, %v11093_v55, %v11097_v56  ;;  %9149 = vmatmul.mubr.msk.f32.gmra.mrb[40].mxu0 %vm1806_vm13, %v14845_v31  ;;  %v10668_v1 = vunpack.i.h.bf16 %v19317_v27  ;;  %v15017_v25 = vsel %vm4003_vm9, %v11123_v38, %v18614_v23  ;;  %v19319_v20 = vunpack.i.h.bf16 %v19301_v16  ;;  %3698 = vmatprep.mubr.f32.mxu1 %v18962_v21 }
 0x309   :  { %9458 = vmatpush1.bf16.msra.mxu0 %v9457_v63  ;;  %19318 = vst [vmem:[#allocation164_spill] sm:$0xff] %v15017_v25  ;;  %v4056_v4 = vsel %vm4003_vm9, %v11118_v45, %v11122_v7  ;;  %v4057_v0 = vsel %vm4003_vm9, %v11122_v7, %v11123_v38  ;;  %2206 = vmatprep.mubr.f32.mxu0 %v18962_v21  ;;  %v19320_v56 = vunpack.i.l.bf16 %v19301_v16  ;;  %v15027_v47 = vpop.permute.xlu1 %11135  ;;  %v15029_v63 = vpop.permute.xlu0 %11130  ;;  %v19323_v16 = vld [vmem:[#allocation213_spill] sm:$0xff]  ;;  %v19418_v25 = vld [vmem:[#allocation159_spill] sm:$0xff] }
 0x30a   :  { %9460 = vmatprep.subr.bf16.mxu0 %v9459_v37  ;;  %19321 = vst [vmem:[#allocation82_spill] sm:$0xff] %v15027_v47  ;;  %19322 = vst [vmem:[#allocation42_spill] sm:$0xff] %v15029_v63  ;;  %v9651_v32 = vpack.c.bf16 %v4057_v0, %v4047_v48  ;;  %v9653_v44 = vpack.c.bf16 %v4056_v4, %v4046_v18  ;;  %v1705_v7 = vsel %vm1635_vm6, %v10668_v1, %v11052_v59  ;;  %v19386_v63 = vld [vmem:[#allocation103_spill] sm:$0xff] }
 0x30b   :  { %v1684_v55 = vsel %vm1635_vm6, %v19320_v56, %v19319_v20  ;;  %11340 = vrot.lane.b32.xlu1 %v14702_v10, %s12296_s6  ;;  %v19324_v20 = vunpack.i.h.bf16 %v19323_v16  ;;  %v19325_v56 = vld [vmem:[#allocation19_spill] sm:$0xff]  ;;  %v9463_v48 = vpack.c.bf16 %v1715_v49, %v1705_v7  ;;  %v19326_v18 = vunpack.i.l.bf16 %v19317_v27  ;;  %9193 = vmatmul.mubr.msk.f32.gmra.mrb[80].mxu1 %vm1806_vm13, %v14789_v15 }
 0x30c   :  { %v9461_v38 = vpack.c.bf16 %v1694_v22, %v1684_v55  ;;  %11335 = vrot.lane.b32.xlu0 %v19325_v56, %s12296_s6  ;;  %9652 = vmatprep.subr.bf16.mxu1 %v9651_v32  ;;  %v10953_v22 = vunpack.i.h.bf16 %v14276_v51  ;;  %v19328_v55 = vld [vmem:[#allocation30_spill] sm:$0xff]  ;;  %v19330_v32 = vld [vmem:[#allocation139_spill] sm:$0xff]  ;;  %v10993_v16 = vunpack.i.h.bf16 %v14402_v19 }
 0x30d   :  { %v1714_v37 = vsel %vm1635_vm6, %v19324_v20, %v11067_v13  ;;  %9654 = vmatpush1.bf16.msra.mxu1 %v9653_v44  ;;  %v1704_v4 = vsel %vm1635_vm6, %v19326_v18, %v10668_v1  ;;  %v15046_v59 = vpop.permute.xlu1 %11145  ;;  %v15048_v0 = vpop.permute.xlu0 %11140  ;;  %v19327_v13 = vld [vmem:[#allocation20_spill] sm:$0xff]  ;;  %4341 = vmatprep.mubr.f32.mxu1 %v18962_v21  ;;  %v10327_v27 = vunpack.i.l.bf16 %v19328_v55  ;;  %v1725_v44 = vsel %vm1635_vm6, %v19330_v32, %v14716_v43 }
 0x30e   :  { %9462 = vmatpush1.bf16.msra.mxu0 %v9461_v38  ;;  %v9465_v49 = vpack.c.bf16 %v1714_v37, %v1704_v4  ;;  %v19329_v1 = vld [vmem:[#allocation44_spill] sm:$0xff]  ;;  %v19331_v38 = vunpack.i.l.bf16 %v19058_v54 }
 0x30f   :  { %9464 = vmatprep.subr.bf16.mxu0 %v9463_v48  ;;  %11350 = vrot.lane.b32.xlu1 %v19327_v13, %s12296_s6  ;;  %v19332_v48 = vunpack.i.h.bf16 %v19328_v55  ;;  %v19333_v18 = vld [vmem:[#allocation36_spill] sm:$0xff]  ;;  %v11028_v55 = vunpack.i.h.bf16 %v14486_v9 }
 0x310   :  { %11345 = vrot.lane.b32.xlu0 %v19329_v1, %s12296_s6  ;;  %v2428_v7 = vsel %vm2417_vm7, %v10953_v22, %v19331_v38  ;;  %v10367_v4 = vunpack.i.l.bf16 %v19333_v18  ;;  %v19334_v54 = vld [vmem:[#allocation128_spill] sm:$0xff]  ;;  %v19336_v38 = vunpack.i.l.bf16 %v13330_v50  ;;  %v19340_v50 = vunpack.i.h.bf16 %v19333_v18 }
 0x311   :  { %v15066_v20 = vpop.permute.xlu1 %3983  ;;  %v15068_v37 = vpop.permute.xlu0 %11150  ;;  %v2418_v43 = vsel %vm2417_vm7, %v10327_v27, %v19332_v48  ;;  %v1724_v22 = vsel %vm1635_vm6, %v19334_v54, %v19330_v32  ;;  %v19338_v27 = vld [vmem:[#allocation74_spill] sm:$0xff]  ;;  %v11058_v18 = vunpack.i.h.bf16 %v14617_v3  ;;  %vm12300_vm6 = vmmov 1  }
 0x312   :  { %9466 = vmatpush1.bf16.msra.mxu0 %v9465_v49  ;;  %v19335_v49 = vld [vmem:[#allocation220_spill] sm:$0xff]  ;;  %v2448_v45 = vsel %vm2417_vm7, %v10993_v16, %v19336_v38  ;;  %v19339_v48 = vpack.c.bf16 %v19337_v12, %v19338_v27  ;;  %v19341_v16 = vld [vmem:[#allocation49_spill] sm:$0xff]  ;;  %v19343_v12 = vld [vmem:[#allocation94_spill] sm:$0xff] }
 0x313   :  { %9154 = vmatprep.subr.msk.mxu0 %vm1813_vm12, %v1725_v44  ;;  %11360 = vrot.lane.b32.xlu1 %v19069_v28, %s12296_s6  ;;  %v9469_v44 = vpack.c.bf16 %v2428_v7, %v2418_v43  ;;  %v2438_v7 = vsel %vm2417_vm7, %v10367_v4, %v19340_v50  ;;  %v10407_v43 = vunpack.i.l.bf16 %v19341_v16  ;;  %v19349_v50 = vld [vmem:[#allocation73_spill] sm:$0xff] }
 0x314   :  { %11355 = vrot.lane.b32.xlu0 %v19335_v49, %s12296_s6  ;;  %v9473_v38 = vpack.c.bf16 %v2448_v45, %v2438_v7  ;;  %v19350_v45 = vunpack.i.h.bf16 %v19341_v16 }
 0x315   :  { %v15091_v32 = vpop.permute.xlu1 %3981  ;;  %v15093_v54 = vpop.permute.xlu0 %3985 }
 0x316   :  { %9155 = vmatpush1.msk.msra.mxu0 %vm1813_vm12, %v1724_v22  ;;  %v19342_v22 = vld [vmem:[#allocation96_spill] sm:$0xff]  ;;  %v2458_v7 = vsel %vm2417_vm7, %v10407_v43, %v19350_v45  ;;  %v19358_v45 = vld [vmem:[#allocation93_spill] sm:$0xff] }
 0x317   :  { %9468 = vmatprep.subr.bf16.mxu0 %v19339_v48  ;;  %9156 = vmatmul.mubr.msk.f32.vlgmr.msra.gmra.mrb[42].mxu0 %vm1806_vm13, %v14738_v58  ;;  %v19344_v49 = vpack.c.bf16 %v19342_v22, %v19343_v12  ;;  %v19345_v58 = vld [vmem:[#allocation16_spill] sm:$0xff]  ;;  %v19351_v22 = vld [vmem:[#allocation54_spill] sm:$0xff] }
 0x318   :  { %9470 = vmatpush1.bf16.msra.mxu0 %v9469_v44  ;;  %4802 = vrot.lane.b32.xlu1 %v14301_v57, %s12296_s6  ;;  %v19346_v44 = vld [vmem:[#allocation111_spill] sm:$0xff]  ;;  %v19352_v12 = vld [vmem:[#allocation116_spill] sm:$0xff] }
 0x319   :  { %9472 = vmatprep.subr.bf16.mxu0 %v19344_v49  ;;  %11365 = vrot.lane.b32.xlu0 %v19345_v58, %s12296_s6  ;;  %v19347_v27 = vunpack.i.l.bf16 %v19346_v44  ;;  %v15111_v48 = vpop.permute.xlu1 %11160  ;;  %v15113_v4 = vpop.permute.xlu0 %11155  ;;  %v19353_v49 = vld [vmem:[#allocation115_spill] sm:$0xff] }
 0x31a   :  { %2212 = vmatprep.mubr.f32.mxu0 %v18962_v21  ;;  %19348 = vst [vmem:[#allocation194_spill] sm:$0xff] %v15113_v4  ;;  %v19354_v44 = vpack.c.bf16 %v19352_v12, %v19353_v49  ;;  %v19359_v12 = vunpack.i.h.bf16 %v19351_v22 }
 0x31b   :  { %v2468_v57 = vsel %vm2417_vm7, %v11028_v55, %v19347_v27  ;;  %9157 = vmatmul.mubr.msk.f32.gmra.mrb[44].mxu0 %vm1806_vm13, %v14845_v31  ;;  %v10437_v55 = vunpack.i.l.bf16 %v19351_v22  ;;  %v15126_v27 = vld [vmem:[#allocation2 + $0x310] sm:$0x1]  ;;  %v19368_v22 = vld [vmem:[#allocation147_spill] sm:$0xff] }
 0x31c   :  { %9474 = vmatpush1.bf16.msra.mxu0 %v9473_v38  ;;  %11370 = vrot.lane.b32.xlu1 %v19349_v50, %s12297_s7  ;;  %v9477_v31 = vpack.c.bf16 %v2468_v57, %v2458_v7  ;;  %v19355_v38 = vld [vmem:[#allocation132_spill] sm:$0xff]  ;;  %v19361_v57 = vld [vmem:[#allocation133_spill] sm:$0xff] }
 0x31d   :  { %9476 = vmatprep.subr.bf16.mxu0 %v19354_v44  ;;  %4804 = vrot.lane.b32.xlu0 %v15126_v27, %s12296_s6  ;;  %v19356_v50 = vunpack.i.l.bf16 %v19355_v38  ;;  %v15134_v23 = vpop.permute.xlu1 %11170  ;;  %v15136_v43 = vpop.permute.xlu0 %11165  ;;  %v2478_v49 = vsel %vm2417_vm7, %v10437_v55, %v19359_v12  ;;  %v19360_v44 = vld [vmem:[#allocation134_spill] sm:$0xff]  ;;  %v19363_v38 = vld [vmem:[#allocation155_spill] sm:$0xff] }
 0x31e   :  { %2678 = vmatprep.mubr.f32.mxu0 %v18962_v21  ;;  %19357 = vst [vmem:[#allocation166_spill] sm:$0xff] %v15134_v23  ;;  %v19362_v7 = vpack.c.bf16 %v19360_v44, %v19361_v57  ;;  %v19369_v55 = vld [vmem:[#allocation95_spill] sm:$0xff]  ;;  %v11027_v23 = vunpack.i.l.bf16 %v14486_v9  ;;  %v19445_v9 = vld [vmem:[#allocation105_spill] sm:$0xff] }
 0x31f   :  { %v2488_v16 = vsel %vm2417_vm7, %v11058_v18, %v19356_v50  ;;  %v19370_v12 = vld [vmem:[#allocation163_spill] sm:$0xff] }
 0x320   :  { %9478 = vmatpush1.bf16.msra.mxu0 %v9477_v31  ;;  %4800 = vrot.lane.b32.xlu1 %v19358_v45, %s12296_s6  ;;  %v9481_v18 = vpack.c.bf16 %v2488_v16, %v2478_v49  ;;  %v19366_v31 = vld [vmem:[#allocation145_spill] sm:$0xff]  ;;  %v19371_v44 = vunpack.i.l.bf16 %v19370_v12  ;;  %v19372_v16 = vld [vmem:[#allocation83_spill] sm:$0xff]  ;;  %v19380_v12 = vld [vmem:[#allocation168_spill] sm:$0xff] }
 0x321   :  { %9480 = vmatprep.subr.bf16.mxu0 %v19362_v7  ;;  %11375 = vrot.lane.b32.xlu0 %v19363_v38, %s12297_s7  ;;  %v15148_v50 = vpop.permute.xlu1 %3993  ;;  %v15150_v46 = vpop.permute.xlu0 %3991  ;;  %v2499_v45 = vsel %vm2417_vm7, %v19367_v2, %v19366_v31  ;;  %v19373_v49 = vunpack.i.h.bf16 %v19372_v16  ;;  %v19374_v7 = vld [vmem:[#allocation61_spill] sm:$0xff] }
 0x322   :  { %19364 = vst [vmem:[#allocation165_spill] sm:$0xff] %v15148_v50  ;;  %19365 = vst [vmem:[#allocation180_spill] sm:$0xff] %v15150_v46  ;;  %v2498_v38 = vsel %vm2417_vm7, %v19374_v7, %v19367_v2  ;;  %v19383_v2 = vld [vmem:[#allocation13_spill] sm:$0xff] }
 0x323   :  { %v2432_v57 = vsel %vm2417_vm7, %v19373_v49, %v19371_v44  ;;  %v19381_v44 = vld [vmem:[#allocation167_spill] sm:$0xff]  ;;  %v19384_v7 = vld [vmem:[#allocation181_spill] sm:$0xff] }
 0x324   :  { %9482 = vmatpush1.bf16.msra.mxu0 %v9481_v18  ;;  %11385 = vrot.lane.b32.xlu1 %v19368_v22, %s12297_s7  ;;  %v19377_v22 = vld [vmem:[#allocation32_spill] sm:$0xff]  ;;  %v19382_v16 = vpack.c.bf16 %v19380_v12, %v19381_v44  ;;  %v19416_v50 = vld [vmem:[#allocation141_spill] sm:$0xff] }
 0x325   :  { %9158 = vmatprep.subr.msk.mxu0 %vm1813_vm12, %v2499_v45  ;;  %11380 = vrot.lane.b32.xlu0 %v19369_v55, %s12297_s7  ;;  %v15168_v18 = vpop.permute.xlu1 %11175  ;;  %v15170_v31 = vpop.permute.xlu0 %3989  ;;  %v19378_v29 = vunpack.i.h.bf16 %v19377_v22  ;;  %v19379_v45 = vunpack.i.l.bf16 %v19377_v22  ;;  %v19394_v44 = vld [vmem:[#allocation184_spill] sm:$0xff]  ;;  %v19417_v62 = vunpack.i.h.bf16 %v19416_v50  ;;  %v19426_v50 = vld [vmem:[#allocation17_spill] sm:$0xff] }
 0x326   :  { %19375 = vst [vmem:[#allocation104_spill] sm:$0xff] %v15168_v18  ;;  %19376 = vst [vmem:[#allocation55_spill] sm:$0xff] %v15170_v31  ;;  %v19385_v18 = vunpack.i.l.bf16 %v19384_v7  ;;  %v19387_v31 = vunpack.i.h.bf16 %v19386_v63  ;;  %v19396_v63 = vld [vmem:[#allocation15_spill] sm:$0xff]  ;;  %v19399_v7 = vld [vmem:[#allocation198_spill] sm:$0xff] }
 0x327   :  { %v2422_v55 = vsel %vm2417_vm7, %v19379_v45, %v19378_v29  ;;  %v19388_v29 = vld [vmem:[#allocation221_spill] sm:$0xff] }
 0x328   :  { %9159 = vmatpush1.msk.msra.mxu0 %vm1813_vm12, %v2498_v38  ;;  %11395 = vrot.lane.b32.xlu1 %v14407_v52, %s12297_s7  ;;  %v9501_v49 = vpack.c.bf16 %v2432_v57, %v2422_v55  ;;  %v2452_v22 = vsel %vm2417_vm7, %v19387_v31, %v19385_v18  ;;  %v19390_v52 = vld [vmem:[#allocation38_spill] sm:$0xff]  ;;  %v19393_v55 = vld [vmem:[#allocation185_spill] sm:$0xff] }
 0x329   :  { %9500 = vmatprep.subr.bf16.mxu0 %v19382_v16  ;;  %11390 = vrot.lane.b32.xlu0 %v19383_v2, %s12297_s7  ;;  %v15192_v38 = vpop.permute.xlu1 %11185  ;;  %v19391_v45 = vunpack.i.h.bf16 %v19390_v52  ;;  %v19392_v12 = vunpack.i.l.bf16 %v19390_v52  ;;  %v19395_v16 = vpack.c.bf16 %v19393_v55, %v19394_v44  ;;  %v15205_v18 = vpop.permute.xlu0 %11180  ;;  %v19398_v31 = vld [vmem:[#allocation14_spill] sm:$0xff]  ;;  %v19404_v44 = vld [vmem:[#allocation40_spill] sm:$0xff] }
 0x32a   :  { %9160 = vmatmul.mubr.msk.f32.vlgmr.msra.gmra.mrb[34].mxu0 %vm1806_vm13, %v19388_v29  ;;  %19389 = vst [vmem:[#allocation62_spill] sm:$0xff] %v15192_v38  ;;  %19397 = vst [vmem:[#allocation183_spill] sm:$0xff] %v15205_v18  ;;  %v19400_v29 = vunpack.i.l.bf16 %v19399_v7  ;;  %v19401_v38 = vld [vmem:[#allocation122_spill] sm:$0xff] }
 0x32b   :  { %9502 = vmatpush1.bf16.msra.mxu0 %v9501_v49  ;;  %2684 = vmatprep.mubr.f32.mxu0 %v18962_v21  ;;  %v2442_v57 = vsel %vm2417_vm7, %v19392_v12, %v19391_v45  ;;  %v19402_v47 = vunpack.i.h.bf16 %v19401_v38  ;;  %v12127_v45 = vld [vmem:[#allocation2 + $0x280] sm:$0xff] }
 0x32c   :  { %9504 = vmatprep.subr.bf16.mxu0 %v19395_v16  ;;  %11405 = vrot.lane.b32.xlu1 %v19396_v63, %s12297_s7  ;;  %v9505_v49 = vpack.c.bf16 %v2452_v22, %v2442_v57  ;;  %v15214_v12 = vld [vmem:[#allocation2 + $0x2a0] sm:$0xff]  ;;  %v19406_v22 = vld [vmem:[#allocation51_spill] sm:$0xff] }
 0x32d   :  { %11400 = vrot.lane.b32.xlu0 %v19398_v31, %s12297_s7  ;;  %v2472_v52 = vsel %vm2417_vm7, %v19402_v47, %v19400_v29  ;;  %19403 = vst [vmem:[#allocation182_spill] sm:$0xff] %v15214_v12  ;;  %v11414_v55 = vpack.i.bf16 %v15214_v12, %v12127_v45  ;;  %v15219_v16 = vpop.permute.xlu1 %4001  ;;  %v19407_v57 = vunpack.i.h.bf16 %v19406_v22  ;;  %v19408_v7 = vunpack.i.l.bf16 %v19406_v22  ;;  %v19409_v47 = vld [vmem:[#allocation201_spill] sm:$0xff]  ;;  %v19410_v29 = vld [vmem:[#allocation200_spill] sm:$0xff]  ;;  %v15231_v45 = vpop.permute.xlu0 %3999 }
 0x32e   :  { %9161 = vmatmul.mubr.msk.f32.gmra.mrb[36].mxu0 %vm1806_vm13, %v19404_v44  ;;  %19405 = vst [vmem:[#allocation71_spill] sm:$0xff] %v15219_v16  ;;  %v19411_v18 = vpack.c.bf16 %v19409_v47, %v19410_v29  ;;  %19412 = vst [vmem:[#allocation125_spill] sm:$0xff] %v15231_v45  ;;  %v19414_v16 = vld [vmem:[#allocation208_spill] sm:$0xff]  ;;  %v19434_v31 = vld [vmem:[#allocation85_spill] sm:$0xff] }
 0x32f   :  { %9506 = vmatpush1.bf16.msra.mxu0 %v9505_v49  ;;  %2832 = vmatprep.mubr.f32.mxu0 %v18962_v21  ;;  %v2462_v38 = vsel %vm2417_vm7, %v19408_v7, %v19407_v57  ;;  %v19413_v49 = vld [vmem:[#allocation162_spill] sm:$0xff]  ;;  %v19415_v46 = vunpack.i.l.bf16 %v19414_v16  ;;  %v10973_v57 = vunpack.i.h.bf16 %v19418_v25  ;;  %v10972_v7 = vunpack.i.l.bf16 %v19418_v25 }
 0x330   :  { %9508 = vmatprep.subr.bf16.mxu0 %v19411_v18  ;;  %11415 = vrot.lane.b32.xlu1 %v11414_v55, %s12295_s30  ;;  %v9509_v44 = vpack.c.bf16 %v2472_v52, %v2462_v38  ;;  %v19420_v55 = vld [vmem:[#allocation56_spill] sm:$0xff]  ;;  %v19424_v38 = vld [vmem:[#allocation211_spill] sm:$0xff]  ;;  %v19428_v25 = vld [vmem:[#allocation114_spill] sm:$0xff]  ;;  %v10533_v63 = vunpack.i.h.bf16 %v19434_v31 }
 0x331   :  { %11410 = vrot.lane.b32.xlu0 %v19413_v49, %s12297_s7  ;;  %v2492_v22 = vsel %vm2417_vm7, %v19417_v62, %v19415_v46  ;;  %v15242_v18 = vpop.permute.xlu1 %11195  ;;  %v19421_v47 = vunpack.i.h.bf16 %v19420_v55  ;;  %v19422_v29 = vunpack.i.l.bf16 %v19420_v55  ;;  %v19423_v52 = vld [vmem:[#allocation212_spill] sm:$0xff]  ;;  %v15254_v46 = vpop.permute.xlu0 %11190  ;;  %v10952_v62 = vunpack.i.l.bf16 %v14276_v51 }
 0x332   :  { %19419 = vst [vmem:[#allocation195_spill] sm:$0xff] %v15242_v18  ;;  %v19425_v16 = vpack.c.bf16 %v19423_v52, %v19424_v38  ;;  %19427 = vst [vmem:[#allocation117_spill] sm:$0xff] %v15254_v46  ;;  %v11012_v45 = vunpack.i.l.bf16 %v19428_v25  ;;  %v19429_v18 = vld [vmem:[#allocation18_spill] sm:$0xff]  ;;  %v10992_v52 = vunpack.i.l.bf16 %v14402_v19  ;;  %v2437_v46 = vsel %vm2417_vm7, %v10972_v7, %v10973_v57 }
 0x333   :  { %9510 = vmatpush1.bf16.msra.mxu0 %v9509_v44  ;;  %v2482_v49 = vsel %vm2417_vm7, %v19422_v29, %v19421_v47  ;;  %v11013_v44 = vunpack.i.h.bf16 %v19428_v25  ;;  %v19430_v47 = vld [vmem:[#allocation65_spill] sm:$0xff]  ;;  %v19431_v38 = vld [vmem:[#allocation218_spill] sm:$0xff] }
 0x334   :  { %9512 = vmatprep.subr.bf16.mxu0 %v19425_v16  ;;  %11425 = vrot.lane.b32.xlu1 %v19426_v50, %s12297_s7  ;;  %v9513_v55 = vpack.c.bf16 %v2492_v22, %v2482_v49  ;;  %v10463_v29 = vunpack.i.h.bf16 %v19430_v47  ;;  %v19432_v16 = vld [vmem:[#allocation158_spill] sm:$0xff]  ;;  %v15274_v22 = vld [vmem:[#allocation2 + $0x2d8] sm:$0x1] }
 0x335   :  { %11420 = vrot.lane.b32.xlu0 %v19429_v18, %s12297_s7  ;;  %v2503_v50 = vsel %vm2417_vm7, %v19432_v16, %v19431_v38  ;;  %v15267_v51 = vpop.permute.xlu1 %11200  ;;  %v19435_v25 = vld [vmem:[#allocation174_spill] sm:$0xff]  ;;  %v15278_v19 = vpop.permute.xlu0 %3997 }
 0x336   :  { %19433 = vst [vmem:[#allocation84_spill] sm:$0xff] %v15267_v51  ;;  %v19436_v4 = vunpack.i.h.bf16 %v19435_v25  ;;  %19437 = vst [vmem:[#allocation90_spill] sm:$0xff] %v15278_v19  ;;  %v19438_v49 = vld [vmem:[#allocation110_spill] sm:$0xff]  ;;  %v2427_v25 = vsel %vm2417_vm7, %v10463_v29, %v10952_v62  ;;  %v19441_v51 = vld [vmem:[#allocation151_spill] sm:$0xff] }
 0x337   :  { %9514 = vmatpush1.bf16.msra.mxu0 %v9513_v55  ;;  %v11043_v55 = vunpack.i.h.bf16 %v19438_v49  ;;  %v11042_v57 = vunpack.i.l.bf16 %v19438_v49  ;;  %v19439_v38 = vld [vmem:[#allocation222_spill] sm:$0xff]  ;;  %v2502_v12 = vsel %vm2417_vm7, %v19441_v51, %v19432_v16  ;;  %v9531_v19 = vpack.c.bf16 %v2437_v46, %v2427_v25  ;;  %v19447_v25 = vld [vmem:[#allocation24_spill] sm:$0xff] }
 0x338   :  { %v2436_v18 = vsel %vm2417_vm7, %v19436_v4, %v10972_v7  ;;  %9166 = vmatprep.subr.msk.mxu0 %vm1813_vm12, %v2503_v50  ;;  %3987 = vrot.lane.b32.xlu1 %v15274_v22, %s12295_s30  ;;  %v2457_v4 = vsel %vm2417_vm7, %v11012_v45, %v11013_v44  ;;  %v19440_v7 = vunpack.i.l.bf16 %v19430_v47  ;;  %v19442_v62 = vld [vmem:[#allocation190_spill] sm:$0xff] }
 0x339   :  { %11430 = vrot.lane.b32.xlu0 %v19439_v38, %s12297_s7  ;;  %v2447_v38 = vsel %vm2417_vm7, %v10533_v63, %v10992_v52  ;;  %v15295_v41 = vpop.permute.xlu1 %11210  ;;  %v19443_v44 = vunpack.i.h.bf16 %v19442_v62  ;;  %v15304_v16 = vpop.permute.xlu0 %11205 }
 0x33a   :  { %v2426_v50 = vsel %vm2417_vm7, %v19440_v7, %v10463_v29  ;;  %v15300_v29 = vld [vmem:[#allocation3] sm:$0xff]  ;;  %v9535_v46 = vpack.c.bf16 %v2457_v4, %v2447_v38  ;;  %19444 = vst [vmem:[#allocation197_spill] sm:$0xff] %v15304_v16  ;;  %v19449_v4 = vld [vmem:[#allocation70_spill] sm:$0xff] }
 0x33b   :  { %9167 = vmatpush1.msk.msra.mxu0 %vm1813_vm12, %v2502_v12  ;;  %v9533_v49 = vpack.c.bf16 %v2436_v18, %v2426_v50  ;;  %v2456_v47 = vsel %vm2417_vm7, %v19443_v44, %v11012_v45  ;;  %v10613_v12 = vunpack.i.h.bf16 %v19445_v9  ;;  %v19446_v18 = vld [vmem:[#allocation129_spill] sm:$0xff]  ;;  %v2477_v45 = vsel %vm2417_vm7, %v11042_v57, %v11043_v55 }
 0x33c   :  { %9532 = vmatprep.subr.bf16.mxu0 %v9531_v19  ;;  %9168 = vmatmul.mubr.msk.f32.vlgmr.msra.gmra.mrb[38].mxu0 %vm1806_vm13, %v15300_v29  ;;  %v11073_v51 = vunpack.i.h.bf16 %v19446_v18  ;;  %v11072_v52 = vunpack.i.l.bf16 %v19446_v18  ;;  %v19448_v19 = vunpack.i.l.bf16 %v19434_v31  ;;  %v11057_v50 = vunpack.i.l.bf16 %v14617_v3  ;;  %v15329_v3 = vld [vmem:[#allocation2 + $0x2d0] sm:$0x1] }
 0x33d   :  { %9534 = vmatpush1.bf16.msra.mxu0 %v9533_v49  ;;  %11440 = vrot.lane.b32.xlu1 %v19447_v25, %s12297_s7  ;;  %v2467_v62 = vsel %vm2417_vm7, %v10613_v12, %v11027_v23  ;;  %v15319_v44 = vpop.permute.xlu1 %11220  ;;  %v19451_v49 = vld [vmem:[#allocation205_spill] sm:$0xff]  ;;  %v15325_v16 = vpop.permute.xlu0 %11215  ;;  %19454 = vst [vmem:[#allocation207_spill] sm:$0xff] %v15329_v3 }
 0x33e   :  { %v2446_v7 = vsel %vm2417_vm7, %v19448_v19, %v10533_v63  ;;  %9536 = vmatprep.subr.bf16.mxu0 %v9535_v46  ;;  %11435 = vrot.lane.b32.xlu0 %v19449_v4, %s12297_s7  ;;  %19450 = vst [vmem:[#allocation196_spill] sm:$0xff] %v15319_v44  ;;  %v19452_v18 = vunpack.i.h.bf16 %v19451_v49  ;;  %v9539_v31 = vpack.c.bf16 %v2477_v45, %v2467_v62  ;;  %v12131_v63 = vld [vmem:[#allocation3 + $0x8] sm:$0x1]  ;;  %v15337_v45 = vld [vmem:[#allocation2 + $0x2c8] sm:$0x1]  ;;  %v19475_v44 = vld [vmem:[#allocation131_spill] sm:$0xff] }
 0x33f   :  { %v9537_v38 = vpack.c.bf16 %v2456_v47, %v2446_v7  ;;  %2838 = vmatprep.mubr.f32.mxu0 %v18962_v21  ;;  %v19453_v46 = vld [vmem:[#allocation124_spill] sm:$0xff]  ;;  %v2497_v23 = vsel %vm2417_vm7, %v11072_v52, %v11073_v51  ;;  %v19455_v47 = vunpack.i.l.bf16 %v19445_v9 }
 0x340   :  { %v2476_v55 = vsel %vm2417_vm7, %v19452_v18, %v11042_v57  ;;  %9169 = vmatmul.mubr.msk.f32.gmra.mrb[40].mxu0 %vm1806_vm13, %v12131_v63  ;;  %v10678_v19 = vunpack.i.h.bf16 %v19453_v46  ;;  %v19457_v62 = vld [vmem:[#allocation216_spill] sm:$0xff] }
 0x341   :  { %9538 = vmatpush1.bf16.msra.mxu0 %v9537_v38  ;;  %5591 = vrot.lane.b32.xlu1 %v15329_v3, %s12297_s7  ;;  %v2466_v57 = vsel %vm2417_vm7, %v19455_v47, %v10613_v12  ;;  %v15342_v38 = vpop.permute.xlu1 %11230  ;;  %v19458_v49 = vunpack.i.h.bf16 %v19457_v62  ;;  %v15348_v18 = vpop.permute.xlu0 %11225  ;;  %v15350_v12 = vld [vmem:[#allocation2 + $0x2c0] sm:$0x1]  ;;  %v19483_v3 = vld [vmem:[#allocation53_spill] sm:$0xff] }
 0x342   :  { %9540 = vmatprep.subr.bf16.mxu0 %v9539_v31  ;;  %5589 = vrot.lane.b32.xlu0 %v15337_v45, %s12297_s7  ;;  %v9541_v7 = vpack.c.bf16 %v2476_v55, %v2466_v57  ;;  %v2487_v4 = vsel %vm2417_vm7, %v10678_v19, %v11057_v50  ;;  %19456 = vst [vmem:[#allocation140_spill] sm:$0xff] %v15342_v38  ;;  %19459 = vst [vmem:[#allocation210_spill] sm:$0xff] %v15348_v18  ;;  %v19461_v55 = vunpack.i.l.bf16 %v19453_v46  ;;  %v19462_v31 = vld [vmem:[#allocation9_spill] sm:$0xff]  ;;  %v19463_v47 = vld [vmem:[#allocation72_spill] sm:$0xff] }
 0x343   :  { %2986 = vmatprep.mubr.f32.mxu0 %v18962_v21  ;;  %v2496_v51 = vsel %vm2417_vm7, %v19458_v49, %v11072_v52  ;;  %v9543_v9 = vpack.c.bf16 %v2497_v23, %v2487_v4  ;;  %19460 = vst [vmem:[#allocation209_spill] sm:$0xff] %v15350_v12  ;;  %v10958_v57 = vunpack.i.h.bf16 %v19463_v47  ;;  %v19467_v49 = vld [vmem:[#allocation160_spill] sm:$0xff]  ;;  %v19468_v38 = vld [vmem:[#allocation142_spill] sm:$0xff]  ;;  %v19469_v46 = vld [vmem:[#allocation25_spill] sm:$0xff] }
 0x344   :  { %v2486_v50 = vsel %vm2417_vm7, %v19461_v55, %v10678_v19  ;;  %v19470_v19 = vld [vmem:[#allocation112_spill] sm:$0xff]  ;;  %v19478_v18 = vld [vmem:[#allocation45_spill] sm:$0xff] }
 0x345   :  { %9542 = vmatpush1.bf16.msra.mxu0 %v9541_v7  ;;  %5587 = vrot.lane.b32.xlu1 %v15350_v12, %s12297_s7  ;;  %v9545_v52 = vpack.c.bf16 %v2496_v51, %v2486_v50  ;;  %v15360_v23 = vpop.permute.xlu1 %11240  ;;  %v15362_v4 = vpop.permute.xlu0 %11235  ;;  %v19466_v7 = vld [vmem:[#allocation31_spill] sm:$0xff]  ;;  %v2507_v12 = vsel %vm2417_vm7, %v19468_v38, %v19467_v49  ;;  %v19471_v51 = vld [vmem:[#allocation77_spill] sm:$0xff]  ;;  %v19473_v50 = vld [vmem:[#allocation92_spill] sm:$0xff] }
 0x346   :  { %9544 = vmatprep.subr.bf16.mxu0 %v9543_v9  ;;  %11445 = vrot.lane.b32.xlu0 %v19462_v31, %s12297_s7  ;;  %19464 = vst [vmem:[#allocation43_spill] sm:$0xff] %v15360_v23  ;;  %19465 = vst [vmem:[#allocation153_spill] sm:$0xff] %v15362_v4  ;;  %v10337_v62 = vunpack.i.l.bf16 %v19466_v7  ;;  %v19472_v9 = vunpack.i.l.bf16 %v19471_v51  ;;  %v10998_v4 = vunpack.i.h.bf16 %v19473_v50  ;;  %v19480_v51 = vld [vmem:[#allocation79_spill] sm:$0xff] }
 0x348   :  { %v3211_v55 = vsel %vm3200_vm8, %v10958_v57, %v19472_v9  ;;  %v19479_v57 = vld [vmem:[#allocation130_spill] sm:$0xff] }
 0x349   :  { %9546 = vmatpush1.bf16.msra.mxu0 %v9545_v52  ;;  %11455 = vrot.lane.b32.xlu1 %v19469_v46, %s12297_s7  ;;  %v15377_v23 = vpop.permute.xlu1 %11250  ;;  %v2506_v52 = vsel %vm2417_vm7, %v19475_v44, %v19468_v38  ;;  %v15382_v49 = vpop.permute.xlu0 %11245  ;;  %v19477_v46 = vunpack.i.h.bf16 %v19466_v7  ;;  %v19481_v9 = vld [vmem:[#allocation78_spill] sm:$0xff]  ;;  %v19484_v38 = vld [vmem:[#allocation97_spill] sm:$0xff]  ;;  %vm17947_vm7 = vmpackc.low %vm1813_vm12, %vm12300_vm6 }
 0x34a   :  { %9174 = vmatprep.subr.msk.mxu0 %vm1813_vm12, %v2507_v12  ;;  %11450 = vrot.lane.b32.xlu0 %v19470_v19, %s12297_s7  ;;  %19474 = vst [vmem:[#allocation173_spill] sm:$0xff] %v15377_v23  ;;  %19476 = vst [vmem:[#allocation106_spill] sm:$0xff] %v15382_v49  ;;  %v10377_v19 = vunpack.i.l.bf16 %v19478_v18  ;;  %v19482_v23 = vpack.c.bf16 %v19480_v51, %v19481_v9  ;;  %v19485_v49 = vunpack.i.l.bf16 %v19484_v38  ;;  %v19491_v51 = vld [vmem:[#allocation99_spill] sm:$0xff]  ;;  %v19496_v38 = vld [vmem:[#allocation118_spill] sm:$0xff] }
 0x34b   :  { %v3201_v12 = vsel %vm3200_vm8, %v10337_v62, %v19477_v46  ;;  %v19486_v62 = vld [vmem:[#allocation91_spill] sm:$0xff] }
 0x34c   :  { %v9549_v44 = vpack.c.bf16 %v3211_v55, %v3201_v12  ;;  %v3231_v7 = vsel %vm3200_vm8, %v10998_v4, %v19485_v49  ;;  %v11033_v46 = vunpack.i.h.bf16 %v19486_v62  ;;  %v19490_v12 = vld [vmem:[#allocation100_spill] sm:$0xff]  ;;  %v19493_v4 = vld [vmem:[#allocation10_spill] sm:$0xff] }
 0x34d   :  { %9175 = vmatpush1.msk.msra.mxu0 %vm1813_vm12, %v2506_v52  ;;  %11465 = vrot.lane.b32.xlu1 %v19479_v57, %s12297_s7  ;;  %v15402_v52 = vpop.permute.xlu1 %4786  ;;  %v19492_v9 = vpack.c.bf16 %v19490_v12, %v19491_v51  ;;  %v15414_v49 = vpop.permute.xlu0 %11255  ;;  %v12135_v12 = vld [vmem:[#allocation2 + $0x238] sm:$0xff]  ;;  %v12136_v51 = vld [vmem:[#allocation2 + $0x240] sm:$0xff] }
 0x34e   :  { %9548 = vmatprep.subr.bf16.mxu0 %v19482_v23  ;;  %11460 = vrot.lane.b32.xlu0 %v19483_v3, %s12297_s7  ;;  %19487 = vst [vmem:[#allocation219_spill] sm:$0xff] %v15402_v52  ;;  %v19488_v23 = vunpack.i.h.bf16 %v19478_v18  ;;  %v19489_v3 = vld [vmem:[#allocation50_spill] sm:$0xff]  ;;  %19494 = vst [vmem:[#allocation69_spill] sm:$0xff] %v15414_v49  ;;  %v19497_v52 = vunpack.i.l.bf16 %v19496_v38 }
 0x34f   :  { %9176 = vmatmul.mubr.msk.f32.vlgmr.msra.gmra.mrb[42].mxu0 %vm1806_vm13, %v15300_v29  ;;  %v10417_v55 = vunpack.i.l.bf16 %v19489_v3  ;;  %v19495_v29 = vld [vmem:[#allocation26_spill] sm:$0xff] }
 0x350   :  { %9550 = vmatpush1.bf16.msra.mxu0 %v9549_v44  ;;  %2992 = vmatprep.mubr.f32.mxu0 %v18962_v21  ;;  %v3221_v57 = vsel %vm3200_vm8, %v10377_v19, %v19488_v23  ;;  %v3251_v18 = vsel %vm3200_vm8, %v11033_v46, %v19497_v52  ;;  %v19498_v19 = vld [vmem:[#allocation126_spill] sm:$0xff]  ;;  %v19503_v46 = vld [vmem:[#allocation120_spill] sm:$0xff]  ;;  %v19504_v52 = vld [vmem:[#allocation119_spill] sm:$0xff] }
 0x351   :  { %9552 = vmatprep.subr.bf16.mxu0 %v19492_v9  ;;  %11475 = vrot.lane.b32.xlu1 %v19493_v4, %s12297_s7  ;;  %v9553_v44 = vpack.c.bf16 %v3231_v7, %v3221_v57  ;;  %v11063_v23 = vunpack.i.h.bf16 %v19498_v19  ;;  %v15423_v9 = vpack.i.bf16 %v12136_v51, %v12135_v12  ;;  %v15425_v4 = vpop.permute.xlu1 %11260  ;;  %v19502_v57 = vld [vmem:[#allocation57_spill] sm:$0xff]  ;;  %v19505_v49 = vpack.c.bf16 %v19503_v46, %v19504_v52  ;;  %v19507_v12 = vld [vmem:[#allocation135_spill] sm:$0xff]  ;;  %v19511_v46 = vld [vmem:[#allocation138_spill] sm:$0xff] }
 0x352   :  { %11470 = vrot.lane.b32.xlu0 %v19495_v29, %s12297_s7  ;;  %19500 = vst [vmem:[#allocation191_spill] sm:$0xff] %v15425_v4  ;;  %v19501_v29 = vunpack.i.h.bf16 %v19489_v3  ;;  %v10447_v38 = vunpack.i.l.bf16 %v19502_v57  ;;  %v19508_v51 = vunpack.i.l.bf16 %v19507_v12  ;;  %v19512_v52 = vld [vmem:[#allocation137_spill] sm:$0xff]  ;;  %v19518_v12 = vld [vmem:[#allocation170_spill] sm:$0xff] }
 0x353   :  { %9177 = vmatmul.mubr.msk.f32.gmra.mrb[44].mxu0 %vm1806_vm13, %v12131_v63  ;;  %19499 = vst [vmem:[#allocation152_spill] sm:$0xff] %v15423_v9  ;;  %v15437_v63 = vpop.permute.xlu0 %4788 }
 0x354   :  { %9554 = vmatpush1.bf16.msra.mxu0 %v9553_v44  ;;  %3461 = vmatprep.mubr.f32.mxu0 %v18962_v21  ;;  %v3241_v7 = vsel %vm3200_vm8, %v10417_v55, %v19501_v29  ;;  %19506 = vst [vmem:[#allocation204_spill] sm:$0xff] %v15437_v63  ;;  %v3271_v3 = vsel %vm3200_vm8, %v11063_v23, %v19508_v51  ;;  %v19510_v29 = vunpack.i.h.bf16 %v19502_v57  ;;  %v15452_v63 = vld [vmem:[#allocation2 + $0x2f8] sm:$0x1]  ;;  %v19520_v51 = vld [vmem:[#allocation86_spill] sm:$0xff] }
 0x355   :  { %9556 = vmatprep.subr.bf16.mxu0 %v19505_v49  ;;  %11485 = vrot.lane.b32.xlu1 %v19274_v8, %s12297_s7  ;;  %v9557_v44 = vpack.c.bf16 %v3251_v18, %v3241_v7  ;;  %v15444_v55 = vpop.permute.xlu1 %11265  ;;  %v19513_v8 = vpack.c.bf16 %v19511_v46, %v19512_v52  ;;  %v19515_v7 = vld [vmem:[#allocation148_spill] sm:$0xff]  ;;  %v19516_v57 = vld [vmem:[#allocation67_spill] sm:$0xff] }
 0x356   :  { %11480 = vrot.lane.b32.xlu0 %v15423_v9, %s12297_s7  ;;  %19509 = vst [vmem:[#allocation121_spill] sm:$0xff] %v15444_v55  ;;  %v3261_v49 = vsel %vm3200_vm8, %v10447_v38, %v19510_v29  ;;  %v3282_v38 = vsel %vm3200_vm8, %v19516_v57, %v19515_v7  ;;  %v19521_v29 = vunpack.i.h.bf16 %v19520_v51  ;;  %v19531_v9 = vld [vmem:[#allocation108_spill] sm:$0xff] }
 0x357   :  { %v15456_v18 = vpop.permute.xlu0 %4784  ;;  %v9561_v23 = vpack.c.bf16 %v3271_v3, %v3261_v49  ;;  %v19523_v3 = vld [vmem:[#allocation12_spill] sm:$0xff]  ;;  %v19524_v49 = vld [vmem:[#allocation33_spill] sm:$0xff] }
 0x358   :  { %9558 = vmatpush1.bf16.msra.mxu0 %v9557_v44  ;;  %19514 = vst [vmem:[#allocation213_spill] sm:$0xff] %v15456_v18  ;;  %v19525_v52 = vunpack.i.h.bf16 %v19524_v49  ;;  %v19532_v18 = vunpack.i.h.bf16 %v19531_v9 }
 0x359   :  { %9560 = vmatprep.subr.bf16.mxu0 %v19513_v8  ;;  %3995 = vrot.lane.b32.xlu1 %v15452_v63, %s12295_s30  ;;  %v15463_v44 = vpop.permute.xlu1 %11275  ;;  %v19519_v8 = vunpack.i.l.bf16 %v19518_v12  ;;  %v19527_v12 = vld [vmem:[#allocation60_spill] sm:$0xff] }
 0x35a   :  { %11490 = vrot.lane.b32.xlu0 %v14628_v5, %s12297_s7  ;;  %19517 = vst [vmem:[#allocation30_spill] sm:$0xff] %v15463_v44  ;;  %v19534_v44 = vld [vmem:[#allocation171_spill] sm:$0xff] }
 0x35b   :  { %v3215_v46 = vsel %vm3200_vm8, %v19521_v29, %v19519_v8  ;;  %v15473_v5 = vpop.permute.xlu0 %11270  ;;  %v3281_v8 = vsel %vm3200_vm8, %v19527_v12, %v19516_v57  ;;  %v12138_v57 = vld [vmem:[#allocation2 + $0x2e8] sm:$0x1]  ;;  %v19541_v12 = vld [vmem:[#allocation188_spill] sm:$0xff] }
 0x35c   :  { %9562 = vmatpush1.bf16.msra.mxu0 %v9561_v23  ;;  %19522 = vst [vmem:[#allocation139_spill] sm:$0xff] %v15473_v5  ;;  %v19526_v23 = vunpack.i.l.bf16 %v19524_v49  ;;  %v19533_v5 = vld [vmem:[#allocation172_spill] sm:$0xff] }
 0x35d   :  { %9178 = vmatprep.subr.msk.mxu0 %vm1813_vm12, %v3282_v38  ;;  %11500 = vrot.lane.b32.xlu1 %v14639_v35, %s12297_s7  ;;  %v15486_v51 = vpop.permute.xlu1 %11285  ;;  %v19529_v35 = vld [vmem:[#allocation186_spill] sm:$0xff]  ;;  %v19535_v49 = vpack.c.bf16 %v19533_v5, %v19534_v44  ;;  %v19543_v44 = vld [vmem:[#allocation199_spill] sm:$0xff] }
 0x35e   :  { %11495 = vrot.lane.b32.xlu0 %v19523_v3, %s12296_s6  ;;  %v3205_v7 = vsel %vm3200_vm8, %v19526_v23, %v19525_v52  ;;  %19528 = vst [vmem:[#allocation36_spill] sm:$0xff] %v15486_v51  ;;  %v19530_v29 = vunpack.i.l.bf16 %v19529_v35  ;;  %v19544_v5 = vunpack.i.l.bf16 %v19543_v44  ;;  %v19556_v44 = vld [vmem:[#allocation144_spill] sm:$0xff] }
 0x35f   :  { %v9581_v38 = vpack.c.bf16 %v3215_v46, %v3205_v7  ;;  %v15498_v52 = vpop.permute.xlu0 %11280  ;;  %v19537_v46 = vld [vmem:[#allocation48_spill] sm:$0xff] }
 0x360   :  { %9179 = vmatpush1.msk.msra.mxu0 %vm1813_vm12, %v3281_v8  ;;  %v3235_v55 = vsel %vm3200_vm8, %v19532_v18, %v19530_v29  ;;  %19536 = vst [vmem:[#allocation128_spill] sm:$0xff] %v15498_v52  ;;  %v19538_v23 = vunpack.i.h.bf16 %v19537_v46  ;;  %v19539_v7 = vunpack.i.l.bf16 %v19537_v46  ;;  %v19540_v18 = vld [vmem:[#allocation189_spill] sm:$0xff] }
 0x361   :  { %9580 = vmatprep.subr.bf16.mxu0 %v19535_v49  ;;  %9180 = vmatmul.mubr.msk.f32.vlgmr.msra.gmra.mrb[34].mxu0 %vm1806_vm13, %v14685_v26  ;;  %v19542_v8 = vpack.c.bf16 %v19540_v18, %v19541_v12  ;;  %v15517_v49 = vpop.permute.xlu1 %11295  ;;  %v19553_v18 = vld [vmem:[#allocation202_spill] sm:$0xff] }
 0x362   :  { %9582 = vmatpush1.bf16.msra.mxu0 %v9581_v38  ;;  %5597 = vrot.lane.b32.xlu1 %v12138_v57, %s12297_s7  ;;  %v3225_v9 = vsel %vm3200_vm8, %v19539_v7, %v19538_v23  ;;  %v19545_v38 = vld [vmem:[#allocation123_spill] sm:$0xff]  ;;  %19547 = vst [vmem:[#allocation220_spill] sm:$0xff] %v15517_v49 }
 0x363   :  { %9584 = vmatprep.subr.bf16.mxu0 %v19542_v8  ;;  %11505 = vrot.lane.b32.xlu0 %v19287_v14, %s12297_s7  ;;  %v9585_v26 = vpack.c.bf16 %v3235_v55, %v3225_v9  ;;  %v19546_v35 = vunpack.i.h.bf16 %v19545_v38  ;;  %v15523_v57 = vpop.permute.xlu0 %11290  ;;  %v19549_v55 = vld [vmem:[#allocation52_spill] sm:$0xff]  ;;  %v19552_v9 = vld [vmem:[#allocation203_spill] sm:$0xff] }
 0x364   :  { %3467 = vmatprep.mubr.f32.mxu0 %v18962_v21  ;;  %19548 = vst [vmem:[#allocation75_spill] sm:$0xff] %v15523_v57  ;;  %v19550_v46 = vunpack.i.h.bf16 %v19549_v55  ;;  %v19551_v23 = vunpack.i.l.bf16 %v19549_v55  ;;  %v19554_v12 = vpack.c.bf16 %v19552_v9, %v19553_v18  ;;  %v19560_v9 = vld [vmem:[#allocation21_spill] sm:$0xff] }
 0x365   :  { %v3255_v29 = vsel %vm3200_vm8, %v19546_v35, %v19544_v5  ;;  %9181 = vmatmul.mubr.msk.f32.gmra.mrb[36].mxu0 %vm1806_vm13, %v14789_v15  ;;  %v19557_v5 = vunpack.i.h.bf16 %v19556_v44  ;;  %v19558_v35 = vld [vmem:[#allocation177_spill] sm:$0xff]  ;;  %v19566_v44 = vld [vmem:[#allocation214_spill] sm:$0xff] }
 0x366   :  { %9586 = vmatpush1.bf16.msra.mxu0 %v9585_v26  ;;  %11510 = vrot.lane.b32.xlu1 %v19312_v36, %s12297_s7  ;;  %v3245_v7 = vsel %vm3200_vm8, %v19551_v23, %v19550_v46  ;;  %v19555_v26 = vunpack.i.l.bf16 %v14142_v61  ;;  %v10978_v55 = vunpack.i.h.bf16 %v19558_v35  ;;  %v10977_v46 = vunpack.i.l.bf16 %v19558_v35  ;;  %v15543_v23 = vpop.permute.xlu1 %11305  ;;  %v12139_v35 = vld [vmem:[#allocation2 + $0x2e0] sm:$0x1]  ;;  %v19568_v36 = vld [vmem:[#allocation66_spill] sm:$0xff] }
 0x367   :  { %9588 = vmatprep.subr.bf16.mxu0 %v19554_v12  ;;  %5599 = vrot.lane.b32.xlu0 %v14916_v11, %s12297_s7  ;;  %v9589_v8 = vpack.c.bf16 %v3255_v29, %v3245_v7  ;;  %19559 = vst [vmem:[#allocation74_spill] sm:$0xff] %v15543_v23  ;;  %v15547_v11 = vpop.permute.xlu0 %11300  ;;  %v19562_v29 = vld [vmem:[#allocation59_spill] sm:$0xff]  ;;  %v10957_v12 = vunpack.i.l.bf16 %v19463_v47  ;;  %v10468_v14 = vunpack.i.h.bf16 %v19568_v36  ;;  %v19569_v23 = vld [vmem:[#allocation113_spill] sm:$0xff] }
 0x368   :  { %3615 = vmatprep.mubr.f32.mxu0 %v18962_v21  ;;  %v3275_v38 = vsel %vm3200_vm8, %v19557_v5, %v19555_v26  ;;  %19561 = vst [vmem:[#allocation49_spill] sm:$0xff] %v15547_v11  ;;  %v19563_v7 = vunpack.i.h.bf16 %v19562_v29  ;;  %v19564_v61 = vunpack.i.l.bf16 %v19562_v29  ;;  %v19565_v26 = vld [vmem:[#allocation215_spill] sm:$0xff]  ;;  %v11018_v49 = vunpack.i.h.bf16 %v19569_v23  ;;  %v19571_v47 = vld [vmem:[#allocation157_spill] sm:$0xff] }
 0x369   :  { %v19567_v5 = vpack.c.bf16 %v19565_v26, %v19566_v44  ;;  %v11017_v11 = vunpack.i.l.bf16 %v19569_v23  ;;  %v3220_v29 = vsel %vm3200_vm8, %v10977_v46, %v10978_v55  ;;  %v3210_v23 = vsel %vm3200_vm8, %v10468_v14, %v10957_v12  ;;  %v19573_v55 = vld [vmem:[#allocation88_spill] sm:$0xff]  ;;  %v19574_v26 = vld [vmem:[#allocation154_spill] sm:$0xff]  ;;  %v19575_v44 = vld [vmem:[#allocation175_spill] sm:$0xff] }
 0x36a   :  { %9590 = vmatpush1.bf16.msra.mxu0 %v9589_v8  ;;  %11515 = vrot.lane.b32.xlu1 %v19560_v9, %s12296_s6  ;;  %v3265_v18 = vsel %vm3200_vm8, %v19564_v61, %v19563_v7  ;;  %v15562_v57 = vpop.permute.xlu1 %11315  ;;  %v3286_v7 = vsel %vm3200_vm8, %v19571_v47, %v19302_v34  ;;  %v3285_v34 = vsel %vm3200_vm8, %v19574_v26, %v19571_v47  ;;  %v19580_v47 = vld [vmem:[#allocation22_spill] sm:$0xff] }
 0x36b   :  { %9592 = vmatprep.subr.bf16.mxu0 %v19567_v5  ;;  %5595 = vrot.lane.b32.xlu0 %v12139_v35, %s12297_s7  ;;  %v9593_v8 = vpack.c.bf16 %v3275_v38, %v3265_v18  ;;  %19570 = vst [vmem:[#allocation96_spill] sm:$0xff] %v15562_v57  ;;  %v15570_v61 = vpop.permute.xlu0 %11310  ;;  %v10997_v38 = vunpack.i.l.bf16 %v19473_v50  ;;  %v10543_v18 = vunpack.i.h.bf16 %v19573_v55  ;;  %v19576_v5 = vunpack.i.h.bf16 %v19575_v44 }
 0x36c   :  { %19572 = vst [vmem:[#allocation94_spill] sm:$0xff] %v15570_v61  ;;  %v11032_v50 = vunpack.i.l.bf16 %v19486_v62  ;;  %v19579_v57 = vunpack.i.l.bf16 %v19568_v36  ;;  %v19582_v62 = vld [vmem:[#allocation109_spill] sm:$0xff] }
 0x36d   :  { %v3219_v35 = vsel %vm3200_vm8, %v19576_v5, %v10977_v46 }
 0x36e   :  { %9594 = vmatpush1.bf16.msra.mxu0 %v9593_v8  ;;  %11525 = vrot.lane.b32.xlu1 %v19315_v42, %s12297_s7  ;;  %v9611_v8 = vpack.c.bf16 %v3220_v29, %v3210_v23  ;;  %v19577_v42 = vld [vmem:[#allocation46_spill] sm:$0xff]  ;;  %v15588_v12 = vpop.permute.xlu1 %4796  ;;  %v3209_v52 = vsel %vm3200_vm8, %v19579_v57, %v10468_v14  ;;  %v10623_v29 = vunpack.i.h.bf16 %v19582_v62  ;;  %v19583_v23 = vld [vmem:[#allocation193_spill] sm:$0xff]  ;;  %v15605_v57 = vld [vmem:[#allocation3 + $0x20] sm:$0xff] }
 0x36f   :  { %9186 = vmatprep.subr.msk.mxu0 %vm1813_vm12, %v3286_v7  ;;  %11520 = vrot.lane.b32.xlu0 %v14650_v53, %s12297_s7  ;;  %v11048_v7 = vunpack.i.h.bf16 %v19577_v42  ;;  %v11047_v61 = vunpack.i.l.bf16 %v19577_v42  ;;  %v3240_v53 = vsel %vm3200_vm8, %v11017_v11, %v11018_v49  ;;  %19578 = vst [vmem:[#allocation111_spill] sm:$0xff] %v15588_v12  ;;  %v9613_v42 = vpack.c.bf16 %v3219_v35, %v3209_v52 }
 0x370   :  { %v3230_v49 = vsel %vm3200_vm8, %v10543_v18, %v10997_v38  ;;  %v19584_v36 = vunpack.i.h.bf16 %v19583_v23  ;;  %v19586_v38 = vunpack.i.l.bf16 %v19573_v55 }
 0x371   :  { %v15596_v46 = vpop.permute.xlu0 %4794  ;;  %v9615_v26 = vpack.c.bf16 %v3240_v53, %v3230_v49  ;;  %v3260_v52 = vsel %vm3200_vm8, %v11047_v61, %v11048_v7  ;;  %v11062_v53 = vunpack.i.l.bf16 %v19498_v19  ;;  %v19589_v7 = vld [vmem:[#allocation206_spill] sm:$0xff] }
 0x372   :  { %9187 = vmatpush1.msk.msra.mxu0 %vm1813_vm12, %v3285_v34  ;;  %11535 = vrot.lane.b32.xlu1 %v19580_v47, %s12296_s6  ;;  %19581 = vst [vmem:[#allocation73_spill] sm:$0xff] %v15596_v46  ;;  %v3239_v14 = vsel %vm3200_vm8, %v19584_v36, %v11017_v11  ;;  %v19585_v34 = vld [vmem:[#allocation127_spill] sm:$0xff]  ;;  %v3229_v11 = vsel %vm3200_vm8, %v19586_v38, %v10543_v18  ;;  %v19590_v49 = vunpack.i.h.bf16 %v19589_v7  ;;  %v10688_v18 = vunpack.i.h.bf16 %v19253_v6  ;;  %v12142_v38 = vld [vmem:[#allocation2 + $0x260] sm:$0xff] }
 0x373   :  { %9612 = vmatprep.subr.bf16.mxu0 %v9611_v8  ;;  %11530 = vrot.lane.b32.xlu0 %v19325_v56, %s12297_s7  ;;  %v11078_v44 = vunpack.i.h.bf16 %v19585_v34  ;;  %v11077_v5 = vunpack.i.l.bf16 %v19585_v34  ;;  %v3250_v8 = vsel %vm3200_vm8, %v10623_v29, %v11032_v50  ;;  %v9617_v50 = vpack.c.bf16 %v3239_v14, %v3229_v11  ;;  %v19592_v14 = vld [vmem:[#allocation23_spill] sm:$0xff] }
 0x374   :  { %9188 = vmatmul.mubr.msk.f32.vlgmr.msra.gmra.mrb[38].mxu0 %vm1806_vm13, %v15605_v57  ;;  %v3259_v55 = vsel %vm3200_vm8, %v19590_v49, %v11047_v61  ;;  %v9619_v23 = vpack.c.bf16 %v3260_v52, %v3250_v8  ;;  %v19598_v49 = vld [vmem:[#allocation29_spill] sm:$0xff] }
 0x375   :  { %9614 = vmatpush1.bf16.msra.mxu0 %v9613_v42  ;;  %3621 = vmatprep.mubr.f32.mxu0 %v18962_v21  ;;  %v15619_v35 = vpop.permute.xlu1 %4792  ;;  %v15624_v42 = vpop.permute.xlu0 %11320  ;;  %v3280_v36 = vsel %vm3200_vm8, %v11077_v5, %v11078_v44  ;;  %v19595_v44 = vld [vmem:[#allocation217_spill] sm:$0xff] }
 0x376   :  { %9616 = vmatprep.subr.bf16.mxu0 %v9615_v26  ;;  %11545 = vrot.lane.b32.xlu1 %v19329_v1, %s12297_s7  ;;  %19587 = vst [vmem:[#allocation54_spill] sm:$0xff] %v15619_v35  ;;  %19588 = vst [vmem:[#allocation116_spill] sm:$0xff] %v15624_v42  ;;  %v3270_v26 = vsel %vm3200_vm8, %v10688_v18, %v11062_v53  ;;  %v19596_v8 = vunpack.i.h.bf16 %v19595_v44  ;;  %v19616_v1 = vld [vmem:[#allocation80_spill] sm:$0xff]  ;;  %v19674_v35 = vld [vmem:[#allocation15_spill] sm:$0xff] }
 0x377   :  { %11540 = vrot.lane.b32.xlu0 %v14702_v10, %s12297_s7  ;;  %v19591_v10 = vunpack.i.l.bf16 %v19582_v62  ;;  %v9623_v52 = vpack.c.bf16 %v3280_v36, %v3270_v26  ;;  %v19601_v36 = vld [vmem:[#allocation35_spill] sm:$0xff] }
 0x378   :  { %9189 = vmatmul.mubr.msk.f32.gmra.mrb[40].mxu0 %vm1806_vm13, %v14789_v15  ;;  %v3279_v62 = vsel %vm3200_vm8, %v19596_v8, %v11077_v5  ;;  %v19604_v26 = vld [vmem:[#allocation143_spill] sm:$0xff]  ;;  %v19605_v8 = vld [vmem:[#allocation76_spill] sm:$0xff] }
 0x379   :  { %9618 = vmatpush1.bf16.msra.mxu0 %v9617_v50  ;;  %3769 = vmatprep.mubr.f32.mxu0 %v18962_v21  ;;  %v3249_v19 = vsel %vm3200_vm8, %v19591_v10, %v10623_v29  ;;  %v15639_v61 = vpop.permute.xlu1 %11330  ;;  %v15644_v34 = vpop.permute.xlu0 %11325  ;;  %v12141_v29 = vld [vmem:[#allocation2 + $0x258] sm:$0xff]  ;;  %v19597_v50 = vunpack.i.l.bf16 %v19253_v6  ;;  %v10347_v10 = vunpack.i.l.bf16 %v19601_v36 }
 0x37a   :  { %9620 = vmatprep.subr.bf16.mxu0 %v9619_v23  ;;  %11555 = vrot.lane.b32.xlu1 %v19592_v14, %s12296_s6  ;;  %19593 = vst [vmem:[#allocation115_spill] sm:$0xff] %v15639_v61  ;;  %v9621_v15 = vpack.c.bf16 %v3259_v55, %v3249_v19  ;;  %19594 = vst [vmem:[#allocation132_spill] sm:$0xff] %v15644_v34  ;;  %v11559_v11 = vpack.i.bf16 %v12142_v38, %v12141_v29  ;;  %v10963_v23 = vunpack.i.h.bf16 %v19598_v49  ;;  %v12143_v19 = vld [vmem:[#allocation2 + $0x38] sm:$0xff]  ;;  %v19607_v38 = vld [vmem:[#allocation156_spill] sm:$0xff] }
 0x37b   :  { %11550 = vrot.lane.b32.xlu0 %v19327_v13, %s12297_s7  ;;  %v3269_v7 = vsel %vm3200_vm8, %v19597_v50, %v10688_v18  ;;  %v19603_v18 = vld [vmem:[#allocation28_spill] sm:$0xff]  ;;  %v19615_v13 = vld [vmem:[#allocation81_spill] sm:$0xff]  ;;  %v19682_v14 = vld [vmem:[#allocation146_spill] sm:$0xff] }
 0x37c   :  { %v9625_v5 = vpack.c.bf16 %v3279_v62, %v3269_v7  ;;  %v3290_v44 = vsel %vm3200_vm8, %v19604_v26, %v19603_v18  ;;  %v19610_v7 = vunpack.i.h.bf16 %v19601_v36  ;;  %v19617_v36 = vpack.c.bf16 %v19615_v13, %v19616_v1  ;;  %v19621_v1 = vld [vmem:[#allocation102_spill] sm:$0xff]  ;;  %v19680_v61 = vld [vmem:[#allocation192_spill] sm:$0xff] }
 0x37d   :  { %9622 = vmatpush1.bf16.msra.mxu0 %v9621_v15  ;;  %v15655_v53 = vpop.permute.xlu1 %11340  ;;  %v12144_v15 = vld [vmem:[#allocation2 + $0x90] sm:$0xff]  ;;  %v11087_v13 = vunpack.i.l.bf16 %v14813_v30  ;;  %v10853_v42 = vunpack.i.h.bf16 %v19680_v61 }
 0x37e   :  { %9624 = vmatprep.subr.bf16.mxu0 %v9623_v52  ;;  %11565 = vrot.lane.b32.xlu1 %v19069_v28, %s12297_s7  ;;  %19599 = vst [vmem:[#allocation93_spill] sm:$0xff] %v15655_v53  ;;  %v15658_v55 = vpop.permute.xlu0 %11335  ;;  %v15661_v6 = vpack.i.bf16 %v12144_v15, %v12143_v19  ;;  %v19606_v52 = vunpack.i.l.bf16 %v19605_v8  ;;  %v19611_v19 = vld [vmem:[#allocation41_spill] sm:$0xff]  ;;  %v19612_v15 = vld [vmem:[#allocation136_spill] sm:$0xff]  ;;  %v19613_v8 = vld [vmem:[#allocation98_spill] sm:$0xff] }
 0x37f   :  { %11560 = vrot.lane.b32.xlu0 %v11559_v11, %s12297_s7  ;;  %19600 = vst [vmem:[#allocation134_spill] sm:$0xff] %v15658_v55  ;;  %v11003_v11 = vunpack.i.h.bf16 %v19607_v38  ;;  %v3289_v18 = vsel %vm3200_vm8, %v19612_v15, %v19604_v26  ;;  %v18668_v26 = vunpack.i.l.bf16 %v15068_v37  ;;  %v19622_v15 = vld [vmem:[#allocation101_spill] sm:$0xff]  ;;  %v19663_v53 = vld [vmem:[#allocation166_spill] sm:$0xff]  ;;  %vm8416_vm8 = vcmask 72704  }
 0x380   :  { %19602 = vst [vmem:[#allocation133_spill] sm:$0xff] %v15661_v6  ;;  %v4014_v29 = vsel %vm4003_vm9, %v10963_v23, %v19606_v52  ;;  %v10387_v23 = vunpack.i.l.bf16 %v19611_v19  ;;  %v19614_v52 = vunpack.i.l.bf16 %v19613_v8  ;;  %v19677_v55 = vld [vmem:[#allocation150_spill] sm:$0xff] }
 0x381   :  { %9626 = vmatpush1.bf16.msra.mxu0 %v9625_v5  ;;  %v15673_v62 = vpop.permute.xlu1 %11350  ;;  %v4004_v5 = vsel %vm4003_vm9, %v10347_v10, %v19610_v7  ;;  %v12145_v7 = vld [vmem:[#allocation2 + $0x308] sm:$0x1]  ;;  %v10982_v34 = vunpack.i.l.bf16 %v19677_v55 }
 0x382   :  { %9194 = vmatprep.subr.msk.mxu0 %vm1813_vm12, %v3290_v44  ;;  %11575 = vrot.lane.b32.xlu1 %v15661_v6, %s12296_s6  ;;  %19608 = vst [vmem:[#allocation155_spill] sm:$0xff] %v15673_v62  ;;  %v15677_v50 = vpop.permute.xlu0 %11345  ;;  %v9629_v44 = vpack.c.bf16 %v4014_v29, %v4004_v5  ;;  %v4034_v28 = vsel %vm4003_vm9, %v11003_v11, %v19614_v52  ;;  %v19620_v11 = vunpack.i.h.bf16 %v19611_v19  ;;  %v11148_v52 = vunpack.i.h.bf16 %v15046_v59 }
 0x383   :  { %11570 = vrot.lane.b32.xlu0 %v19345_v58, %s12297_s7  ;;  %19609 = vst [vmem:[#allocation145_spill] sm:$0xff] %v15677_v50  ;;  %v11113_v58 = vunpack.i.h.bf16 %v14959_v24  ;;  %v11143_v19 = vunpack.i.h.bf16 %v15048_v0  ;;  %v10983_v6 = vunpack.i.h.bf16 %v19677_v55  ;;  %v10962_v55 = vunpack.i.l.bf16 %v19598_v49 }
 0x384   :  { %v4024_v5 = vsel %vm4003_vm9, %v10387_v23, %v19620_v11  ;;  %v19624_v23 = vunpack.i.l.bf16 %v14957_v39  ;;  %v19627_v39 = vunpack.i.h.bf16 %v14813_v30 }
 0x385   :  { %9195 = vmatpush1.msk.msra.mxu0 %vm1813_vm12, %v3289_v18  ;;  %v15696_v10 = vpop.permute.xlu1 %11360  ;;  %v19623_v18 = vpack.c.bf16 %v19621_v1, %v19622_v15  ;;  %v11153_v1 = vunpack.i.h.bf16 %v15068_v37 }
 0x386   :  { %9628 = vmatprep.subr.bf16.mxu0 %v19617_v36  ;;  %9196 = vmatmul.mubr.msk.f32.vlgmr.msra.gmra.mrb[42].mxu0 %vm1806_vm13, %v15605_v57  ;;  %19618 = vst [vmem:[#allocation64_spill] sm:$0xff] %v15696_v10  ;;  %v15700_v29 = vpop.permute.xlu0 %11355  ;;  %v12146_v57 = vld [vmem:[#allocation2 + $0x8] sm:$0xff]  ;;  %v18669_v36 = vunpack.i.l.bf16 %v15046_v59  ;;  %v4054_v11 = vsel %vm4003_vm9, %v11113_v58, %v19624_v23  ;;  %v4044_v58 = vsel %vm4003_vm9, %v11087_v13, %v19627_v39  ;;  %v12149_v13 = vld [vmem:[#allocation2 + $0x60] sm:$0xff]  ;;  %v19652_v10 = vld [vmem:[#allocation107_spill] sm:$0xff] }
 0x387   :  { %9630 = vmatpush1.bf16.msra.mxu0 %v9629_v44  ;;  %5605 = vrot.lane.b32.xlu1 %v12145_v7, %s12297_s7  ;;  %19619 = vst [vmem:[#allocation147_spill] sm:$0xff] %v15700_v29  ;;  %v12147_v44 = vld [vmem:[#allocation2 + $0x10] sm:$0xff]  ;;  %v9633_v7 = vpack.c.bf16 %v4034_v28, %v4024_v5  ;;  %v4075_v28 = vsel %vm4003_vm9, %v11148_v52, %v18668_v26  ;;  %v11142_v5 = vunpack.i.l.bf16 %v15048_v0  ;;  %v12150_v23 = vld [vmem:[#allocation2 + $0x68] sm:$0xff] }
 0x388   :  { %9632 = vmatprep.subr.bf16.mxu0 %v19623_v18  ;;  %4790 = vrot.lane.b32.xlu0 %v15274_v22, %s12296_s6  ;;  %v11579_v8 = vpack.i.bf16 %v12147_v44, %v12146_v57  ;;  %v12148_v22 = vld [vmem:[#allocation3 + $0x28] sm:$0x1]  ;;  %v19628_v57 = vpack.c.bf16 %v14987_v17, %v14982_v33  ;;  %v9637_v44 = vpack.c.bf16 %v4054_v11, %v4044_v58  ;;  %v19630_v33 = vld [vmem:[#allocation169_spill] sm:$0xff] }
 0x389   :  { %3775 = vmatprep.mubr.f32.mxu0 %v18962_v21  ;;  %v4074_v30 = vsel %vm4003_vm9, %v11153_v1, %v11148_v52  ;;  %v11584_v0 = vpack.i.bf16 %v12150_v23, %v12149_v13  ;;  %v10772_v39 = vunpack.i.l.bf16 %v19630_v33  ;;  %v4064_v58 = vsel %vm4003_vm9, %v11142_v5, %v11143_v19  ;;  %v19632_v52 = vld [vmem:[#allocation161_spill] sm:$0xff]  ;;  %v19634_v23 = vld [vmem:[#allocation187_spill] sm:$0xff] }
 0x38a   :  { %v15719_v15 = vpop.permute.xlu1 %4802  ;;  %9197 = vmatmul.mubr.msk.f32.gmra.mrb[44].mxu0 %vm1806_vm13, %v12148_v22  ;;  %v19640_v1 = vld [vmem:[#allocation87_spill] sm:$0xff] }
 0x38b   :  { %19625 = vst [vmem:[#allocation95_spill] sm:$0xff] %v15719_v15  ;;  %9634 = vmatpush1.bf16.msra.mxu0 %v9633_v7  ;;  %11580 = vrot.lane.b32.xlu1 %v11579_v8, %s12298_s8  ;;  %v15723_v18 = vpop.permute.xlu0 %11365  ;;  %v4065_v8 = vsel %vm4003_vm9, %v11143_v19, %v18669_v36  ;;  %v12154_v36 = vld [vmem:[#allocation2] sm:$0xff]  ;;  %v19636_v19 = vld [vmem:[#allocation37_spill] sm:$0xff] }
 0x38c   :  { %19626 = vst [vmem:[#allocation163_spill] sm:$0xff] %v15723_v18  ;;  %9636 = vmatprep.subr.bf16.mxu0 %v19628_v57  ;;  %5607 = vrot.lane.b32.xlu0 %v15126_v27, %s12297_s7  ;;  %v9639_v7 = vpack.c.bf16 %v4075_v28, %v4065_v8  ;;  %v12151_v27 = vld [vmem:[#allocation2 + $0x300] sm:$0x1]  ;;  %v9641_v28 = vpack.c.bf16 %v4074_v30, %v4064_v58  ;;  %v12152_v57 = vld [vmem:[#allocation2 + $0xe8] sm:$0xff]  ;;  %v10353_v5 = vunpack.i.h.bf16 %v19636_v19  ;;  %v19638_v58 = vunpack.i.h.bf16 %v19630_v33 }
 0x38d   :  { %4264 = vmatprep.mubr.f32.mxu0 %v18962_v21  ;;  %v12153_v8 = vld [vmem:[#allocation2 + $0x140] sm:$0xff]  ;;  %v4085_v30 = vsel %vm4003_vm9, %v15066_v20, %v15093_v54 }
 0x38e   :  { %v15742_v22 = vpop.permute.xlu1 %11370  ;;  %v15752_v13 = vpack.i.bf16 %v12153_v8, %v12152_v57  ;;  %v19639_v57 = vld [vmem:[#allocation178_spill] sm:$0xff]  ;;  %v15779_v18 = vld [vmem:[#allocation2 + $0x160] sm:$0xff]  ;;  %v15781_v8 = vld [vmem:[#allocation2 + $0x1b8] sm:$0xff] }
 0x38f   :  { %19629 = vst [vmem:[#allocation83_spill] sm:$0xff] %v15742_v22  ;;  %9638 = vmatpush1.bf16.msra.mxu0 %v9637_v44  ;;  %5603 = vrot.lane.b32.xlu1 %v12151_v27, %s12297_s7  ;;  %v15747_v11 = vpop.permute.xlu0 %4804  ;;  %v10832_v44 = vunpack.i.l.bf16 %v19634_v23  ;;  %v12155_v27 = vld [vmem:[#allocation2 + $0x58] sm:$0xff] }
 0x390   :  { %19631 = vst [vmem:[#allocation61_spill] sm:$0xff] %v15747_v11  ;;  %9640 = vmatprep.subr.bf16.mxu0 %v9639_v7  ;;  %11585 = vrot.lane.b32.xlu0 %v11584_v0, %s12298_s8  ;;  %19633 = vst [vmem:[#allocation32_spill] sm:$0xff] %v15752_v13  ;;  %v11589_v17 = vpack.i.bf16 %v12155_v27, %v12154_v36  ;;  %v10393_v7 = vunpack.i.h.bf16 %v19293_v40  ;;  %v4019_v36 = vsel %vm4003_vm9, %v10772_v39, %v19638_v58  ;;  %v12157_v27 = vld [vmem:[#allocation2 + $0x108] sm:$0xff] }
 0x391   :  { %v19642_v11 = vunpack.i.l.bf16 %v19632_v52 }
 0x392   :  { %v15756_v56 = vpop.permute.xlu1 %4800 }
 0x393   :  { %19635 = vst [vmem:[#allocation168_spill] sm:$0xff] %v15756_v56  ;;  %9642 = vmatpush1.bf16.msra.mxu0 %v9641_v28  ;;  %11595 = vrot.lane.b32.xlu1 %v15752_v13, %s12296_s6  ;;  %v15765_v0 = vpop.permute.xlu0 %11375  ;;  %v12156_v28 = vld [vmem:[#allocation2 + $0xb0] sm:$0xff]  ;;  %v19641_v56 = vunpack.i.h.bf16 %v19640_v1  ;;  %v4009_v22 = vsel %vm4003_vm9, %v10353_v5, %v19642_v11  ;;  %v12159_v13 = vld [vmem:[#allocation2 + $0xc0] sm:$0xff]  ;;  %v15789_v1 = vld [vmem:[#allocation3 + $0x30] sm:$0xff]  ;;  %v19643_v11 = vunpack.i.h.bf16 %v19634_v23 }
 0x394   :  { %19637 = vst [vmem:[#allocation167_spill] sm:$0xff] %v15765_v0  ;;  %9198 = vmatprep.subr.msk.mxu0 %vm1813_vm12, %v4085_v30  ;;  %11590 = vrot.lane.b32.xlu0 %v11589_v17, %s12298_s8  ;;  %v11609_v26 = vpack.i.bf16 %v12157_v27, %v12156_v28  ;;  %v12158_v0 = vld [vmem:[#allocation2 + $0xb8] sm:$0xff]  ;;  %v19645_v28 = vunpack.i.l.bf16 %v19636_v19  ;;  %v19646_v17 = vunpack.i.l.bf16 %v19293_v40  ;;  %v19653_v19 = vunpack.i.h.bf16 %v19652_v10 }
 0x395   :  { %v4018_v15 = vsel %vm4003_vm9, %v19641_v56, %v10772_v39  ;;  %v11599_v58 = vpack.i.bf16 %v12159_v13, %v12158_v0  ;;  %v4084_v56 = vsel %vm4003_vm9, %v15091_v32, %v15066_v20  ;;  %v9659_v39 = vpack.c.bf16 %v4019_v36, %v4009_v22  ;;  %v15807_v32 = vld [vmem:[#allocation2 + $0x210] sm:$0xff]  ;;  %v15809_v22 = vld [vmem:[#allocation2 + $0x268] sm:$0xff]  ;;  %v19648_v36 = vld [vmem:[#allocation179_spill] sm:$0xff] }
 0x396   :  { %v4039_v13 = vsel %vm4003_vm9, %v10832_v44, %v19643_v11  ;;  %v15794_v0 = vpop.permute.xlu1 %11385  ;;  %v4008_v27 = vsel %vm4003_vm9, %v19645_v28, %v10353_v5  ;;  %v4028_v30 = vsel %vm4003_vm9, %v19646_v17, %v10393_v7  ;;  %v19649_v17 = vunpack.i.l.bf16 %v19639_v57  ;;  %v12164_v11 = vld [vmem:[#allocation2 + $0x198] sm:$0xff]  ;;  %v12165_v28 = vld [vmem:[#allocation2 + $0x1f0] sm:$0xff] }
 0x397   :  { %19644 = vst [vmem:[#allocation181_spill] sm:$0xff] %v15794_v0  ;;  %9199 = vmatpush1.msk.msra.mxu0 %vm1813_vm12, %v4084_v56  ;;  %11605 = vrot.lane.b32.xlu1 %v19383_v2, %s12298_s8  ;;  %v15805_v20 = vpop.permute.xlu0 %11380  ;;  %v9661_v40 = vpack.c.bf16 %v4018_v15, %v4008_v27  ;;  %v15818_v2 = vpack.i.bf16 %v12165_v28, %v12164_v11  ;;  %v19651_v0 = vld [vmem:[#allocation176_spill] sm:$0xff]  ;;  %v11167_v27 = vunpack.i.l.bf16 %v15136_v43  ;;  %v19656_v11 = vunpack.i.l.bf16 %v14993_v60 }
 0x398   :  { %19647 = vst [vmem:[#allocation103_spill] sm:$0xff] %v15805_v20  ;;  %9660 = vmatprep.subr.bf16.mxu0 %v9659_v39  ;;  %11600 = vrot.lane.b32.xlu0 %v11599_v58, %s12298_s8  ;;  %v4029_v56 = vsel %vm4003_vm9, %v10393_v7, %v19649_v17  ;;  %v10792_v29 = vunpack.i.l.bf16 %v19651_v0  ;;  %v4038_v5 = vsel %vm4003_vm9, %v19653_v19, %v10832_v44  ;;  %v19654_v58 = vld [vmem:[#allocation68_spill] sm:$0xff]  ;;  %v19655_v17 = vunpack.i.h.bf16 %v14993_v60  ;;  %v15838_v44 = vld [vmem:[#allocation3 + $0x38] sm:$0x1]  ;;  %v19658_v19 = vld [vmem:[#allocation89_spill] sm:$0xff] }
 0x399   :  { %19650 = vst [vmem:[#allocation221_spill] sm:$0xff] %v15818_v2  ;;  %9200 = vmatmul.mubr.msk.f32.vlgmr.msra.gmra.mrb[34].mxu0 %vm1806_vm13, %v15789_v1  ;;  %v9663_v15 = vpack.c.bf16 %v4039_v13, %v4029_v56  ;;  %v10472_v13 = vunpack.i.l.bf16 %v19654_v58  ;;  %v9665_v20 = vpack.c.bf16 %v4038_v5, %v4028_v30  ;;  %v19661_v56 = vld [vmem:[#allocation63_spill] sm:$0xff]  ;;  %v19664_v30 = vunpack.i.h.bf16 %v19651_v0 }
 0x39a   :  { %9662 = vmatpush1.bf16.msra.mxu0 %v9661_v40  ;;  %v4059_v28 = vsel %vm4003_vm9, %v19656_v11, %v19655_v17  ;;  %v15835_v10 = vpop.permute.xlu1 %11395  ;;  %4270 = vmatprep.mubr.f32.mxu0 %v18962_v21  ;;  %v10753_v40 = vunpack.i.h.bf16 %v19632_v52  ;;  %v11162_v11 = vunpack.i.l.bf16 %v15111_v48  ;;  %v19662_v62 = vunpack.i.h.bf16 %v19661_v56  ;;  %v15861_v17 = vld [vmem:[#allocation2 + $0x30] sm:$0xff] }
 0x39b   :  { %19657 = vst [vmem:[#allocation38_spill] sm:$0xff] %v15835_v10  ;;  %9664 = vmatprep.subr.bf16.mxu0 %v9663_v15  ;;  %11615 = vrot.lane.b32.xlu1 %v15818_v2, %s12296_s6  ;;  %v15846_v7 = vpop.permute.xlu0 %11390  ;;  %v19660_v10 = vunpack.i.l.bf16 %v19648_v36  ;;  %v11172_v15 = vunpack.i.l.bf16 %v19663_v53  ;;  %v15859_v2 = vld [vmem:[#allocation2 + $0x28] sm:$0xff]  ;;  %v15868_v5 = vsel %vm4003_vm9, %v10792_v29, %v19664_v30  ;;  %v19670_v30 = vunpack.i.h.bf16 %v19654_v58 }
 0x39c   :  { %19659 = vst [vmem:[#allocation185_spill] sm:$0xff] %v15846_v7  ;;  %11610 = vrot.lane.b32.xlu0 %v11609_v26, %s12298_s8  ;;  %v15880_v7 = vld [vmem:[#allocation2 + $0x248] sm:$0xff]  ;;  %v19669_v26 = vld [vmem:[#allocation182_spill] sm:$0xff] }
 0x39d   :  { %v4049_v39 = vsel %vm4003_vm9, %v19662_v62, %v19660_v10  ;;  %9201 = vmatmul.mubr.msk.f32.gmra.mrb[36].mxu0 %vm1806_vm13, %v15838_v44  ;;  %v19665_v62 = vunpack.i.h.bf16 %v19630_v33  ;;  %19668 = vst [vmem:[#allocation198_spill] sm:$0xff] %v15880_v7  ;;  %v11634_v12 = vpack.i.bf16 %v19669_v26, %v15880_v7  ;;  %v15888_v33 = vsel %vm4003_vm9, %v10472_v13, %v19670_v30 }
 0x39e   :  { %v9667_v50 = vpack.c.bf16 %v4059_v28, %v4049_v39  ;;  %9666 = vmatpush1.bf16.msra.mxu0 %v9665_v20  ;;  %v19666_v39 = vunpack.i.h.bf16 %v15136_v43  ;;  %v15878_v56 = vpop.permute.xlu1 %11405  ;;  %4418 = vmatprep.mubr.f32.mxu0 %v18962_v21  ;;  %v19672_v20 = vunpack.i.l.bf16 %v19658_v19  ;;  %v15903_v7 = vsel %vm4003_vm9, %v10753_v40, %v10472_v13 }
 0x39f   :  { %v15873_v10 = vsel %vm4003_vm9, %v19665_v62, %v10792_v29  ;;  %19667 = vst [vmem:[#allocation184_spill] sm:$0xff] %v15878_v56  ;;  %v19671_v29 = vunpack.i.h.bf16 %v19658_v19  ;;  %11625 = vrot.lane.b32.xlu1 %v19674_v35, %s12298_s8  ;;  %v15900_v26 = vpop.permute.xlu0 %11400  ;;  %v19676_v30 = vunpack.i.l.bf16 %v19632_v52 }
 0x3a0   :  { %v4079_v28 = vsel %vm4003_vm9, %v11167_v27, %v19666_v39  ;;  %v19673_v39 = vld [vmem:[#allocation194_spill] sm:$0xff]  ;;  %9668 = vmatprep.subr.bf16.mxu0 %v9667_v50  ;;  %19675 = vst [vmem:[#allocation122_spill] sm:$0xff] %v15900_v26  ;;  %v19679_v50 = vunpack.i.h.bf16 %v15111_v48  ;;  %v4078_v26 = vsel %vm4003_vm9, %v11172_v15, %v11167_v27 }
 0x3a1   :  { %v15895_v62 = vsel %vm4003_vm9, %v19672_v20, %v19671_v29  ;;  %v11158_v56 = vunpack.i.h.bf16 %v19673_v39  ;;  %v15908_v46 = vsel %vm4003_vm9, %v19676_v30, %v10753_v40  ;;  %v19678_v29 = vld [vmem:[#allocation14_spill] sm:$0xff]  ;;  %v11157_v13 = vunpack.i.l.bf16 %v19673_v39  ;;  %v19684_v39 = vld [vmem:[#allocation149_spill] sm:$0xff] }
 0x3a2   :  { %11620 = vrot.lane.b32.xlu0 %v19678_v29, %s12298_s8  ;;  %v4069_v20 = vsel %vm4003_vm9, %v11162_v11, %v19679_v50  ;;  %v10852_v29 = vunpack.i.l.bf16 %v19680_v61  ;;  %v19681_v50 = vld [vmem:[#allocation164_spill] sm:$0xff]  ;;  %v15929_v35 = vpop.permute.xlu1 %11415  ;;  %v11083_v27 = vunpack.i.h.bf16 %v19684_v39  ;;  %v19689_v30 = vunpack.i.l.bf16 %v15068_v37 }
 0x3a3   :  { %v9671_v52 = vpack.c.bf16 %v4079_v28, %v4069_v20  ;;  %v19683_v51 = vpack.c.bf16 %v19681_v50, %v19682_v14  ;;  %v11082_v28 = vunpack.i.l.bf16 %v19684_v39  ;;  %v4068_v20 = vsel %vm4003_vm9, %v11158_v56, %v11162_v11  ;;  %11635 = vrot.lane.b32.xlu1 %v11634_v12, %s12296_s6  ;;  %v15936_v61 = vpop.permute.xlu0 %11410 }
 0x3a4   :  { %v11417_v40 = vunpack.i.l.bf16 %v15929_v35  ;;  %19685 = vst [vmem:[#allocation40_spill] sm:$0xff] %v15936_v61  ;;  %v19686_v14 = vunpack.i.h.bf16 %v19651_v0  ;;  %v11002_v50 = vunpack.i.l.bf16 %v19607_v38  ;;  %v19687_v39 = vpack.i.bf16 %v15781_v8, %v15779_v18  ;;  %v19690_v38 = vld [vmem:[#allocation165_spill] sm:$0xff]  ;;  %v19691_v61 = vld [vmem:[#allocation180_spill] sm:$0xff] }
 0x3a5   :  { %9670 = vmatpush1.bf16.msra.mxu0 %v19683_v51  ;;  %v9673_v11 = vpack.c.bf16 %v4078_v26, %v4068_v20  ;;  %v19688_v12 = vunpack.i.l.bf16 %v15046_v59  ;;  %v4067_v0 = vsel %vm4003_vm9, %v11157_v13, %v11158_v56  ;;  %v4089_v4 = vsel %vm4003_vm9, %v19691_v61, %v19690_v38 }
 0x3a6   :  { %9672 = vmatprep.subr.bf16.mxu0 %v9671_v52  ;;  %v4022_v51 = vsel %vm4003_vm9, %v19686_v14, %v10982_v34  ;;  %11630 = vrot.lane.b32.xlu0 %v19687_v39, %s12298_s8  ;;  %v4076_v49 = vsel %vm4003_vm9, %v19689_v30, %v11417_v40  ;;  %v4077_v14 = vsel %vm4003_vm9, %v11417_v40, %v11172_v15  ;;  %v15959_v8 = vpop.permute.xlu1 %11425  ;;  %v19692_v20 = vunpack.i.h.bf16 %v19634_v23  ;;  %v19693_v15 = vld [vmem:[#allocation17_spill] sm:$0xff]  ;;  %v19696_v23 = vld [vmem:[#allocation82_spill] sm:$0xff] }
 0x3a7   :  { %v4066_v52 = vsel %vm4003_vm9, %v19688_v12, %v11157_v13  ;;  %v4023_v18 = vsel %vm4003_vm9, %v10982_v34, %v10983_v6  ;;  %v9655_v59 = vpack.c.bf16 %v4077_v14, %v4067_v0  ;;  %11645 = vrot.lane.b32.xlu1 %v19693_v15, %s12298_s8  ;;  %v15969_v56 = vpop.permute.xlu0 %11420  ;;  %v4043_v13 = vsel %vm4003_vm9, %v11082_v28, %v11083_v27 }
 0x3a8   :  { %v9657_v26 = vpack.c.bf16 %v4076_v49, %v4066_v52  ;;  %v15964_v37 = vsel %vm4003_vm9, %v19692_v20, %v10852_v29  ;;  %v19694_v34 = vunpack.i.l.bf16 %v19658_v19  ;;  %v19695_v6 = vunpack.i.h.bf16 %v19639_v57  ;;  %v19699_v52 = vld [vmem:[#allocation55_spill] sm:$0xff] }
 0x3a9   :  { %9674 = vmatpush1.bf16.msra.mxu0 %v9673_v11  ;;  %v11138_v30 = vunpack.i.h.bf16 %v19696_v23  ;;  %v11137_v39 = vunpack.i.l.bf16 %v19696_v23  ;;  %v19698_v11 = vunpack.i.h.bf16 %v19654_v58  ;;  %9656 = vmatprep.subr.bf16.mxu1 %v9655_v59  ;;  %v15987_v27 = vsel %vm4003_vm9, %v10852_v29, %v10853_v42  ;;  %v19701_v59 = vld [vmem:[#allocation42_spill] sm:$0xff] }
 0x3aa   :  { %9206 = vmatprep.subr.msk.mxu0 %vm1813_vm12, %v4089_v4  ;;  %v15977_v40 = vsel %vm4003_vm9, %v19695_v6, %v19694_v34  ;;  %v19697_v4 = vld [vmem:[#allocation18_spill] sm:$0xff]  ;;  %v4088_v49 = vsel %vm4003_vm9, %v19699_v52, %v19691_v61  ;;  %v9693_v14 = vpack.c.bf16 %v4022_v51, %v15888_v33  ;;  %v19700_v20 = vunpack.i.h.bf16 %v19658_v19  ;;  %9658 = vmatpush1.bf16.msra.mxu1 %v9657_v26  ;;  %v3988_v23 = vpop.permute.xlu1 %3987 }
 0x3ab   :  { %11640 = vrot.lane.b32.xlu0 %v19697_v4, %s12298_s8  ;;  %v4013_v12 = vsel %vm4003_vm9, %v19698_v11, %v10962_v55  ;;  %v4042_v58 = vsel %vm4003_vm9, %v10853_v42, %v11082_v28  ;;  %v11112_v55 = vunpack.i.l.bf16 %v14959_v24  ;;  %v11133_v6 = vunpack.i.h.bf16 %v19701_v59  ;;  %v19702_v11 = vld [vmem:[#allocation58_spill] sm:$0xff]  ;;  %v16005_v19 = vpop.permute.xlu0 %11430  ;;  %v19703_v42 = vld [vmem:[#allocation183_spill] sm:$0xff]  ;;  %4798 = vrot.lane.b32.xlu1 %v15452_v63, %s12296_s6 }
 0x3ac   :  { %v9691_v0 = vpack.c.bf16 %v4023_v18, %v4013_v12  ;;  %v4033_v34 = vsel %vm4003_vm9, %v19700_v20, %v11002_v50  ;;  %v11108_v61 = vunpack.i.h.bf16 %v19702_v11  ;;  %v11107_v18 = vunpack.i.l.bf16 %v19702_v11 }
 0x3ad   :  { %9207 = vmatpush1.msk.msra.mxu0 %vm1813_vm12, %v4088_v49  ;;  %v9695_v29 = vpack.c.bf16 %v4043_v13, %v4033_v34  ;;  %v11132_v33 = vunpack.i.l.bf16 %v19701_v59  ;;  %v4087_v24 = vsel %vm4003_vm9, %v3988_v23, %v19699_v52  ;;  %v11183_v28 = vunpack.i.h.bf16 %v19703_v42  ;;  %v19706_v52 = vld [vmem:[#allocation104_spill] sm:$0xff]  ;;  %v19708_v34 = vld [vmem:[#allocation62_spill] sm:$0xff] }
 0x3ae   :  { %9692 = vmatprep.subr.bf16.mxu0 %v9691_v0  ;;  %9208 = vmatmul.mubr.msk.f32.vlgmr.msra.gmra.mrb[38].mxu0 %vm1806_vm13, %v15789_v1  ;;  %v11182_v51 = vunpack.i.l.bf16 %v19703_v42  ;;  %v4086_v50 = vsel %vm4003_vm9, %v15093_v54, %v3988_v23  ;;  %v4063_v26 = vsel %vm4003_vm9, %v11137_v39, %v11138_v30  ;;  %v19704_v13 = vunpack.i.h.bf16 %v19639_v57 }
 0x3af   :  { %9694 = vmatpush1.bf16.msra.mxu0 %v9693_v14  ;;  %v19705_v12 = vunpack.i.l.bf16 %v19639_v57  ;;  %v11178_v0 = vunpack.i.h.bf16 %v19706_v52  ;;  %v11177_v20 = vunpack.i.l.bf16 %v19706_v52  ;;  %v19707_v63 = vpack.i.bf16 %v15809_v22, %v15807_v32  ;;  %9202 = vmatprep.subr.msk.mxu1 %vm1813_vm12, %v4087_v24  ;;  %v16039_v32 = vpop.permute.xlu1 %11440 }
 0x3b0   :  { %9696 = vmatprep.subr.bf16.mxu0 %v9695_v29  ;;  %v9679_v54 = vpack.c.bf16 %v15987_v27, %v15977_v40  ;;  %v4062_v30 = vsel %vm4003_vm9, %v11133_v6, %v11137_v39  ;;  %v9697_v57 = vpack.c.bf16 %v4042_v58, %v15895_v62  ;;  %v4053_v14 = vsel %vm4003_vm9, %v11108_v61, %v11112_v55 }
 0x3b1   :  { %v16021_v49 = vsel %vm4003_vm9, %v19705_v12, %v19704_v13  ;;  %11650 = vrot.lane.b32.xlu0 %v19707_v63, %s12298_s8  ;;  %4424 = vmatprep.mubr.f32.mxu0 %v18962_v21  ;;  %v11188_v59 = vunpack.i.h.bf16 %v19708_v34  ;;  %v11187_v29 = vunpack.i.l.bf16 %v19708_v34  ;;  %v9699_v23 = vpack.c.bf16 %v4063_v26, %v4053_v14 }
 0x3b2   :  { %9203 = vmatpush1.msk.msra.mxu1 %vm1813_vm12, %v4086_v50  ;;  %v9681_v22 = vpack.c.bf16 %v15964_v37, %v16021_v49  ;;  %9209 = vmatmul.mubr.msk.f32.gmra.mrb[40].mxu0 %vm1806_vm13, %v15838_v44  ;;  %v4052_v62 = vsel %vm4003_vm9, %v11107_v18, %v11108_v61  ;;  %v11103_v40 = vunpack.i.h.bf16 %v19648_v36  ;;  %v19709_v39 = vunpack.i.h.bf16 %v14993_v60  ;;  %v16058_v37 = vpop.permute.xlu0 %11435  ;;  %v19711_v50 = vld [vmem:[#allocation195_spill] sm:$0xff] }
 0x3b3   :  { %9698 = vmatpush1.bf16.msra.mxu0 %v9697_v57  ;;  %v19710_v58 = vpack.i.bf16 %v15861_v17, %v15859_v2  ;;  %v4083_v55 = vsel %vm4003_vm9, %v11182_v51, %v11183_v28  ;;  %v11173_v24 = vunpack.i.h.bf16 %v19663_v53  ;;  %v9701_v60 = vpack.c.bf16 %v4062_v30, %v4052_v62  ;;  %v19712_v17 = vld [vmem:[#allocation117_spill] sm:$0xff]  ;;  %9204 = vmatmul.mubr.msk.f32.vlgmr.msra.gmra.mrb[74].mxu1 %vm1806_vm13, %v15789_v1  ;;  %v16084_v52 = vpop.permute.xlu1 %5591 }
 0x3b4   :  { %v16052_v27 = vsel %vm4003_vm9, %v19709_v39, %v11132_v33  ;;  %9700 = vmatprep.subr.bf16.mxu0 %v9699_v23  ;;  %v4073_v61 = vsel %vm4003_vm9, %v11177_v20, %v11178_v0  ;;  %v4061_v42 = vsel %vm4003_vm9, %v11132_v33, %v11133_v6  ;;  %v18709_v26 = vunpack.i.h.bf16 %v19711_v50  ;;  %19715 = vst [vmem:[#allocation51_spill] sm:$0xff] %v16084_v52  ;;  %v19717_v0 = vld [vmem:[#allocation84_spill] sm:$0xff]  ;;  %v19719_v23 = vld [vmem:[#allocation197_spill] sm:$0xff] }
 0x3b5   :  { %11660 = vrot.lane.b32.xlu1 %v19710_v58, %s12298_s8  ;;  %11655 = vrot.lane.b32.xlu0 %v19523_v3, %s12297_s7  ;;  %v11197_v2 = vunpack.i.l.bf16 %v19711_v50  ;;  %v18708_v13 = vunpack.i.h.bf16 %v19712_v17  ;;  %v11192_v12 = vunpack.i.l.bf16 %v19712_v17  ;;  %v19713_v53 = vpack.c.bf16 %v15868_v5, %v15903_v7 }
 0x3b6   :  { %v4072_v28 = vsel %vm4003_vm9, %v11187_v29, %v11177_v20  ;;  %v4082_v6 = vsel %vm4003_vm9, %v11188_v59, %v11182_v51  ;;  %v19714_v33 = vpack.c.bf16 %v15873_v10, %v15908_v46  ;;  %v9703_v49 = vpack.c.bf16 %v4083_v55, %v4073_v61  ;;  %4572 = vmatprep.mubr.f32.mxu0 %v18962_v21  ;;  %v16094_v51 = vpop.permute.xlu0 %5589  ;;  %v19721_v55 = vld [vmem:[#allocation71_spill] sm:$0xff] }
 0x3b7   :  { %9676 = vmatprep.subr.bf16.mxu1 %v19713_v53  ;;  %v19716_v7 = vunpack.i.l.bf16 %v19648_v36  ;;  %v11203_v20 = vunpack.i.h.bf16 %v19717_v0  ;;  %v11202_v63 = vunpack.i.l.bf16 %v19717_v0  ;;  %9702 = vmatpush1.bf16.msra.mxu0 %v9701_v60  ;;  %v4051_v46 = vsel %vm4003_vm9, %v11103_v40, %v11107_v18  ;;  %v19722_v60 = vld [vmem:[#allocation125_spill] sm:$0xff] }
 0x3b8   :  { %9678 = vmatpush1.bf16.msra.mxu1 %v19714_v33  ;;  %v19718_v10 = vunpack.i.h.bf16 %v15111_v48  ;;  %v11418_v30 = vunpack.i.h.bf16 %v15929_v35  ;;  %9704 = vmatprep.subr.bf16.mxu0 %v9703_v49  ;;  %v9683_v57 = vpack.c.bf16 %v4061_v42, %v4051_v46  ;;  %v9705_v14 = vpack.c.bf16 %v4082_v6, %v4072_v28  ;;  %v19724_v6 = vld [vmem:[#allocation90_spill] sm:$0xff] }
 0x3b9   :  { %v4050_v5 = vsel %vm4003_vm9, %v19716_v7, %v11103_v40  ;;  %6392 = vrot.lane.b32.xlu1 %v15337_v45, %s12298_s8  ;;  %11665 = vrot.lane.b32.xlu0 %v19447_v25, %s12298_s8  ;;  %v4808_v11 = vsel %vm4806_vm14, %v11192_v12, %v18708_v13  ;;  %v4818_v48 = vsel %vm4806_vm14, %v11197_v2, %v18709_v26  ;;  %v18706_v35 = vunpack.i.h.bf16 %v15295_v41  ;;  %v19725_v49 = vld [vmem:[#allocation210_spill] sm:$0xff]  ;;  %v19742_v13 = vld [vmem:[#allocation139_spill] sm:$0xff] }
 0x3ba   :  { %v16102_v36 = vsel %vm4003_vm9, %v19718_v10, %v11173_v24  ;;  %v9685_v45 = vpack.c.bf16 %v16052_v27, %v4050_v5  ;;  %9680 = vmatprep.subr.bf16.mxu1 %v9679_v54  ;;  %4347 = vmatprep.mubr.f32.mxu1 %v18962_v21  ;;  %v11212_v18 = vunpack.i.l.bf16 %v15295_v41  ;;  %v18707_v62 = vunpack.i.h.bf16 %v19719_v23  ;;  %v16119_v54 = vpop.permute.xlu1 %5587  ;;  %v16129_v42 = vpop.permute.xlu0 %11445 }
 0x3bb   :  { %v11207_v40 = vunpack.i.l.bf16 %v19719_v23  ;;  %19720 = vst [vmem:[#allocation201_spill] sm:$0xff] %v16119_v54  ;;  %v4807_v39 = vsel %vm4806_vm14, %v11202_v63, %v11192_v12  ;;  %v4817_v27 = vsel %vm4806_vm14, %v11203_v20, %v11197_v2  ;;  %v11218_v58 = vunpack.i.h.bf16 %v15325_v16  ;;  %9706 = vmatpush1.bf16.msra.mxu0 %v9705_v14  ;;  %v19723_v12 = vld [vmem:[#allocation207_spill] sm:$0xff]  ;;  %9205 = vmatmul.mubr.msk.f32.gmra.mrb[76].mxu1 %vm1806_vm13, %v15838_v44 }
 0x3bc   :  { %9682 = vmatpush1.bf16.msra.mxu1 %v9681_v22  ;;  %v4093_v61 = vsel %vm4003_vm9, %v19722_v60, %v19721_v55  ;;  %v11217_v22 = vunpack.i.l.bf16 %v15325_v16  ;;  %v9707_v2 = vpack.c.bf16 %v4818_v48, %v4808_v11  ;;  %v4071_v53 = vsel %vm4003_vm9, %v11173_v24, %v11187_v29  ;;  %4495 = vmatprep.mubr.f32.mxu1 %v18962_v21  ;;  %v19731_v48 = vld [vmem:[#allocation209_spill] sm:$0xff] }
 0x3bd   :  { %11670 = vrot.lane.b32.xlu1 %v19462_v31, %s12298_s8  ;;  %9214 = vmatprep.subr.msk.mxu0 %vm1813_vm12, %v4093_v61  ;;  %v4081_v28 = vsel %vm4003_vm9, %v11418_v30, %v11188_v59  ;;  %v4092_v33 = vsel %vm4003_vm9, %v19724_v6, %v19722_v60  ;;  %v18704_v16 = vunpack.i.h.bf16 %v19725_v49  ;;  %v11227_v7 = vunpack.i.l.bf16 %v19725_v49  ;;  %v19732_v60 = vld [vmem:[#allocation43_spill] sm:$0xff] }
 0x3be   :  { %6394 = vrot.lane.b32.xlu0 %v19723_v12, %s12298_s8  ;;  %v19726_v5 = vunpack.i.h.bf16 %v15136_v43  ;;  %9684 = vmatprep.subr.bf16.mxu1 %v9683_v57  ;;  %v9709_v34 = vpack.c.bf16 %v4817_v27, %v4807_v39  ;;  %v4828_v59 = vsel %vm4806_vm14, %v11207_v40, %v18707_v62  ;;  %v4838_v29 = vsel %vm4806_vm14, %v11212_v18, %v18706_v35  ;;  %v16157_v24 = vpop.permute.xlu1 %11455  ;;  %v19728_v43 = vld [vmem:[#allocation196_spill] sm:$0xff]  ;;  %v12169_v27 = vld [vmem:[#allocation2 + $0xd8] sm:$0xff]  ;;  %v19733_v12 = vld [vmem:[#allocation153_spill] sm:$0xff] }
 0x3bf   :  { %19727 = vst [vmem:[#allocation200_spill] sm:$0xff] %v16157_v24  ;;  %v18705_v20 = vunpack.i.h.bf16 %v19728_v43  ;;  %v11222_v63 = vunpack.i.l.bf16 %v19728_v43  ;;  %v4837_v46 = vsel %vm4806_vm14, %v11218_v58, %v11212_v18  ;;  %9215 = vmatpush1.msk.msra.mxu0 %vm1813_vm12, %v4092_v33  ;;  %v9687_v10 = vpack.c.bf16 %v4081_v28, %v4071_v53  ;;  %v12170_v58 = vld [vmem:[#allocation2 + $0xe0] sm:$0xff]  ;;  %v19735_v28 = vld [vmem:[#allocation25_spill] sm:$0xff] }
 0x3c0   :  { %v4080_v0 = vsel %vm4003_vm9, %v19726_v5, %v11418_v30  ;;  %9686 = vmatpush1.bf16.msra.mxu1 %v9685_v45  ;;  %v16166_v30 = vpop.permute.xlu0 %11450  ;;  %v4827_v57 = vsel %vm4806_vm14, %v11217_v22, %v11207_v40  ;;  %v19730_v45 = vld [vmem:[#allocation140_spill] sm:$0xff]  ;;  %9708 = vmatprep.subr.bf16.mxu0 %v9707_v2  ;;  %v9711_v39 = vpack.c.bf16 %v4838_v29, %v4828_v59  ;;  %v18702_v61 = vunpack.i.h.bf16 %v19732_v60 }
 0x3c1   :  { %11675 = vrot.lane.b32.xlu1 %v19560_v9, %s12297_s7  ;;  %19729 = vst [vmem:[#allocation162_spill] sm:$0xff] %v16166_v30  ;;  %v11233_v14 = vunpack.i.h.bf16 %v19730_v45  ;;  %v11232_v11 = vunpack.i.l.bf16 %v19730_v45  ;;  %v9689_v18 = vpack.c.bf16 %v4080_v0, %v16102_v36  ;;  %9688 = vmatprep.subr.bf16.mxu1 %v9687_v10  ;;  %v11679_v55 = vpack.i.bf16 %v12170_v58, %v12169_v27  ;;  %v19736_v10 = vld [vmem:[#allocation106_spill] sm:$0xff]  ;;  %v19748_v62 = vld [vmem:[#allocation128_spill] sm:$0xff]  ;;  %v19757_v9 = vld [vmem:[#allocation75_spill] sm:$0xff] }
 0x3c2   :  { %6390 = vrot.lane.b32.xlu0 %v19731_v48, %s12298_s8  ;;  %9216 = vmatmul.mubr.msk.f32.vlgmr.msra.gmra.mrb[42].mxu0 %vm1806_vm13, %v15789_v1  ;;  %v4858_v40 = vsel %vm4806_vm14, %v11227_v7, %v18704_v16  ;;  %v11242_v22 = vunpack.i.l.bf16 %v19732_v60  ;;  %v18703_v2 = vunpack.i.h.bf16 %v19733_v12  ;;  %v11237_v36 = vunpack.i.l.bf16 %v19733_v12  ;;  %v16183_v53 = vpop.permute.xlu1 %11465 }
 0x3c3   :  { %9710 = vmatpush1.bf16.msra.mxu0 %v9709_v34  ;;  %19734 = vst [vmem:[#allocation208_spill] sm:$0xff] %v16183_v53  ;;  %v9713_v33 = vpack.c.bf16 %v4837_v46, %v4827_v57  ;;  %v4848_v5 = vsel %vm4806_vm14, %v11222_v63, %v18705_v20  ;;  %v4847_v59 = vsel %vm4806_vm14, %v11232_v11, %v11222_v63  ;;  %v11248_v34 = vunpack.i.h.bf16 %v19736_v10  ;;  %v12171_v46 = vld [vmem:[#allocation2 + $0xd0] sm:$0xff]  ;;  %v12172_v57 = vld [vmem:[#allocation2 + $0x128] sm:$0xff] }
 0x3c4   :  { %9690 = vmatpush1.bf16.msra.mxu1 %v9689_v18  ;;  %9712 = vmatprep.subr.bf16.mxu0 %v9711_v39  ;;  %v16190_v0 = vpop.permute.xlu0 %11460  ;;  %v4857_v29 = vsel %vm4806_vm14, %v11233_v14, %v11227_v7  ;;  %v11247_v45 = vunpack.i.l.bf16 %v19736_v10  ;;  %v9715_v48 = vpack.c.bf16 %v4858_v40, %v4848_v5  ;;  %v11689_v18 = vpack.i.bf16 %v12172_v57, %v12171_v46  ;;  %v16209_v11 = vld [vmem:[#allocation2 + $0x230] sm:$0xff]  ;;  %v16211_v39 = vld [vmem:[#allocation2 + $0x288] sm:$0xff] }
 0x3c5   :  { %11685 = vrot.lane.b32.xlu1 %v19735_v28, %s12298_s8  ;;  %4578 = vmatprep.mubr.f32.mxu0 %v18962_v21  ;;  %v4868_v7 = vsel %vm4806_vm14, %v11237_v36, %v18703_v2  ;;  %v4878_v63 = vsel %vm4806_vm14, %v11242_v22, %v18702_v61  ;;  %v9717_v58 = vpack.c.bf16 %v4857_v29, %v4847_v59  ;;  %v12175_v40 = vld [vmem:[#allocation2 + $0x188] sm:$0xff]  ;;  %v19740_v59 = vld [vmem:[#allocation191_spill] sm:$0xff]  ;;  %v11272_v26 = vunpack.i.l.bf16 %v19742_v13  ;;  %v19747_v29 = vld [vmem:[#allocation36_spill] sm:$0xff] }
 0x3c6   :  { %11680 = vrot.lane.b32.xlu0 %v11679_v55, %s12298_s8  ;;  %9217 = vmatmul.mubr.msk.f32.gmra.mrb[44].mxu0 %vm1806_vm13, %v15838_v44  ;;  %v16206_v14 = vpop.permute.xlu1 %11475  ;;  %v19738_v10 = vld [vmem:[#allocation173_spill] sm:$0xff]  ;;  %v4877_v61 = vsel %vm4806_vm14, %v11248_v34, %v11242_v22  ;;  %v4867_v2 = vsel %vm4806_vm14, %v11247_v45, %v11237_v36  ;;  %v9719_v35 = vpack.c.bf16 %v4878_v63, %v4868_v7  ;;  %v11287_v27 = vunpack.i.l.bf16 %v19747_v29  ;;  %v19749_v45 = vld [vmem:[#allocation204_spill] sm:$0xff] }
 0x3c7   :  { %9714 = vmatpush1.bf16.msra.mxu0 %v9713_v33  ;;  %5067 = vmatprep.mubr.f32.mxu0 %v18962_v21  ;;  %v12176_v33 = vld [vmem:[#allocation2 + $0x190] sm:$0xff]  ;;  %v11252_v57 = vunpack.i.l.bf16 %v19738_v10  ;;  %v19744_v36 = vld [vmem:[#allocation121_spill] sm:$0xff]  ;;  %v9721_v7 = vpack.c.bf16 %v4877_v61, %v4867_v2  ;;  %v19751_v61 = vunpack.i.h.bf16 %v19738_v10  ;;  %v19753_v16 = vunpack.i.l.bf16 %v19740_v59 }
 0x3c8   :  { %9716 = vmatprep.subr.bf16.mxu0 %v9715_v48  ;;  %v16217_v55 = vpop.permute.xlu0 %11470  ;;  %v11699_v5 = vpack.i.bf16 %v12176_v33, %v12175_v40  ;;  %v19739_v48 = vld [vmem:[#allocation69_spill] sm:$0xff]  ;;  %v19741_v40 = vld [vmem:[#allocation30_spill] sm:$0xff]  ;;  %v11267_v34 = vunpack.i.l.bf16 %v19744_v36 }
 0x3c9   :  { %11695 = vrot.lane.b32.xlu1 %v19580_v47, %s12297_s7  ;;  %19737 = vst [vmem:[#allocation141_spill] sm:$0xff] %v16217_v55  ;;  %v11257_v20 = vunpack.i.l.bf16 %v19739_v48  ;;  %v4812_v2 = vsel %vm4806_vm14, %v11252_v57, %v19751_v61  ;;  %v19752_v33 = vunpack.i.h.bf16 %v19739_v48  ;;  %v4811_v31 = vsel %vm4806_vm14, %v19753_v16, %v11252_v57  ;;  %v19758_v16 = vld [vmem:[#allocation23_spill] sm:$0xff] }
 0x3ca   :  { %11690 = vrot.lane.b32.xlu0 %v11689_v18, %s12298_s8  ;;  %v16231_v22 = vpop.permute.xlu1 %11485  ;;  %v19745_v18 = vld [vmem:[#allocation26_spill] sm:$0xff]  ;;  %v19755_v25 = vunpack.i.l.bf16 %v19741_v40  ;;  %v19756_v15 = vunpack.i.h.bf16 %v19741_v40 }
 0x3cb   :  { %9718 = vmatpush1.bf16.msra.mxu0 %v9717_v58  ;;  %19743 = vst [vmem:[#allocation159_spill] sm:$0xff] %v16231_v22  ;;  %v11282_v58 = vunpack.i.l.bf16 %v19748_v62 }
 0x3cc   :  { %9720 = vmatprep.subr.bf16.mxu0 %v9719_v35  ;;  %v16237_v63 = vpop.permute.xlu0 %11480  ;;  %v19750_v35 = vld [vmem:[#allocation219_spill] sm:$0xff]  ;;  %v4831_v4 = vsel %vm4806_vm14, %v19755_v25, %v11267_v34  ;;  %v4841_v61 = vsel %vm4806_vm14, %v19756_v15, %v11272_v26  ;;  %v19760_v25 = vunpack.i.h.bf16 %v19742_v13 }
 0x3cd   :  { %11705 = vrot.lane.b32.xlu1 %v19745_v18, %s12298_s8  ;;  %19746 = vst [vmem:[#allocation56_spill] sm:$0xff] %v16237_v63  ;;  %v4888_v28 = vsel %vm4806_vm14, %v19750_v35, %v19749_v45  ;;  %v4822_v18 = vsel %vm4806_vm14, %v11257_v20, %v19752_v33  ;;  %v19761_v33 = vld [vmem:[#allocation10_spill] sm:$0xff]  ;;  %v16282_v63 = vld [vmem:[#allocation3 + $0x40] sm:$0xff] }
 0x3ce   :  { %11700 = vrot.lane.b32.xlu0 %v11699_v5, %s12298_s8  ;;  %v19754_v5 = vunpack.i.h.bf16 %v19740_v59  ;;  %v3996_v47 = vpop.permute.xlu1 %3995 }
 0x3cf   :  { %9722 = vmatpush1.bf16.msra.mxu0 %v9721_v7  ;;  %v4091_v15 = vsel %vm4003_vm9, %v3996_v47, %v19724_v6 }
 0x3d0   :  { %v4821_v46 = vsel %vm4806_vm14, %v19754_v5, %v11257_v20  ;;  %9218 = vmatprep.subr.msk.mxu0 %vm1813_vm12, %v4888_v28  ;;  %v4090_v20 = vsel %vm4003_vm9, %v19690_v38, %v3996_v47  ;;  %v16272_v57 = vpop.permute.xlu0 %11490  ;;  %v4842_v5 = vsel %vm4806_vm14, %v11272_v26, %v19760_v25  ;;  %v9739_v28 = vpack.c.bf16 %v4822_v18, %v4812_v2  ;;  %v19764_v47 = vld [vmem:[#allocation213_spill] sm:$0xff] }
 0x3d1   :  { %11715 = vrot.lane.b32.xlu1 %v19758_v16, %s12297_s7  ;;  %19759 = vst [vmem:[#allocation212_spill] sm:$0xff] %v16272_v57  ;;  %9210 = vmatprep.subr.msk.mxu1 %vm1813_vm12, %v4091_v15  ;;  %v19762_v38 = vunpack.i.h.bf16 %v19748_v62  ;;  %v19763_v57 = vunpack.i.h.bf16 %v19747_v29  ;;  %v4887_v6 = vsel %vm4806_vm14, %v19764_v47, %v19750_v35  ;;  %v19765_v25 = vld [vmem:[#allocation49_spill] sm:$0xff]  ;;  %v19766_v2 = vunpack.i.h.bf16 %v19744_v36  ;;  %v19768_v35 = vld [vmem:[#allocation220_spill] sm:$0xff]  ;;  %v19811_v36 = vld [vmem:[#allocation147_spill] sm:$0xff] }
 0x3d2   :  { %11710 = vrot.lane.b32.xlu0 %v19761_v33, %s12298_s8  ;;  %v11302_v18 = vunpack.i.l.bf16 %v19765_v25  ;;  %9211 = vmatpush1.msk.msra.mxu1 %vm1813_vm12, %v4090_v20  ;;  %v16301_v29 = vpop.permute.xlu1 %11500  ;;  %v11297_v7 = vunpack.i.l.bf16 %v19768_v35  ;;  %v19769_v62 = vunpack.i.h.bf16 %v19757_v9  ;;  %v19770_v20 = vunpack.i.l.bf16 %v19757_v9 }
 0x3d3   :  { %v4852_v16 = vsel %vm4806_vm14, %v11282_v58, %v19762_v38  ;;  %v4862_v26 = vsel %vm4806_vm14, %v11287_v27, %v19763_v57  ;;  %v4832_v15 = vsel %vm4806_vm14, %v11267_v34, %v19766_v2  ;;  %9219 = vmatpush1.msk.msra.mxu0 %vm1813_vm12, %v4887_v6  ;;  %v9741_v38 = vpack.c.bf16 %v4821_v46, %v4811_v31 }
 0x3d4   :  { %v9743_v33 = vpack.c.bf16 %v4842_v5, %v4832_v15  ;;  %19767 = vst [vmem:[#allocation211_spill] sm:$0xff] %v16301_v29  ;;  %v9745_v57 = vpack.c.bf16 %v4841_v61, %v4831_v4  ;;  %9212 = vmatmul.mubr.msk.f32.vlgmr.msra.gmra.mrb[78].mxu1 %vm1806_vm13, %v15789_v1  ;;  %v4861_v34 = vsel %vm4806_vm14, %v19769_v62, %v11287_v27  ;;  %v11496_v31 = vpop.permute.xlu0 %11495  ;;  %v19771_v61 = vld [vmem:[#allocation74_spill] sm:$0xff]  ;;  %v19772_v5 = vld [vmem:[#allocation27_spill] sm:$0xff]  ;;  %v16318_v15 = vld [vmem:[#allocation3 + $0x48] sm:$0x1]  ;;  %v19777_v1 = vunpack.i.h.bf16 %v19712_v17 }
 0x3d5   :  { %9740 = vmatprep.subr.bf16.mxu0 %v9739_v28  ;;  %9220 = vmatmul.mubr.msk.f32.vlgmr.msra.gmra.mrb[34].mxu0 %vm1806_vm13, %v16282_v63  ;;  %v9747_v46 = vpack.c.bf16 %v4862_v26, %v4852_v16  ;;  %v4851_v4 = vsel %vm4806_vm14, %v19770_v20, %v11282_v58  ;;  %v11498_v6 = vunpack.i.h.bf16 %v11496_v31  ;;  %v11497_v2 = vunpack.i.l.bf16 %v11496_v31  ;;  %v19773_v27 = vld [vmem:[#allocation96_spill] sm:$0xff] }
 0x3d6   :  { %9742 = vmatpush1.bf16.msra.mxu0 %v9741_v38  ;;  %11725 = vrot.lane.b32.xlu1 %v19772_v5, %s12298_s8  ;;  %v11318_v28 = vunpack.i.h.bf16 %v19773_v27  ;;  %v11317_v16 = vunpack.i.l.bf16 %v19773_v27  ;;  %v19774_v26 = vld [vmem:[#allocation152_spill] sm:$0xff]  ;;  %v19775_v58 = vunpack.i.h.bf16 %v19765_v25  ;;  %v19776_v20 = vunpack.i.h.bf16 %v19711_v50  ;;  %v19780_v5 = vld [vmem:[#allocation94_spill] sm:$0xff]  ;;  %v16343_v25 = vpop.permute.xlu1 %5597 }
 0x3d7   :  { %9744 = vmatprep.subr.bf16.mxu0 %v9743_v33  ;;  %11720 = vrot.lane.b32.xlu0 %v19774_v26, %s12298_s8  ;;  %v4809_v47 = vsel %vm4806_vm14, %v19777_v1, %v11497_v2  ;;  %v19778_v62 = vunpack.i.l.bf16 %v19740_v59  ;;  %v19779_v33 = vunpack.i.h.bf16 %v19740_v59  ;;  %v11312_v50 = vunpack.i.l.bf16 %v19780_v5  ;;  %19781 = vst [vmem:[#allocation114_spill] sm:$0xff] %v16343_v25  ;;  %v19782_v59 = vld [vmem:[#allocation133_spill] sm:$0xff] }
 0x3d8   :  { %v4882_v38 = vsel %vm4806_vm14, %v11302_v18, %v19775_v58  ;;  %v4819_v31 = vsel %vm4806_vm14, %v19776_v20, %v11498_v6  ;;  %5073 = vmatprep.mubr.f32.mxu0 %v18962_v21  ;;  %v11313_v58 = vunpack.i.h.bf16 %v19780_v5  ;;  %4501 = vmatprep.mubr.f32.mxu1 %v18962_v21  ;;  %v16350_v1 = vpop.permute.xlu0 %11505  ;;  %v19784_v5 = vunpack.i.l.bf16 %v19771_v61 }
 0x3d9   :  { %v4810_v27 = vsel %vm4806_vm14, %v11497_v2, %v19778_v62  ;;  %v4820_v26 = vsel %vm4806_vm14, %v11498_v6, %v19779_v33  ;;  %v9725_v17 = vpack.c.bf16 %v4819_v31, %v4809_v47  ;;  %9221 = vmatmul.mubr.msk.f32.gmra.mrb[36].mxu0 %vm1806_vm13, %v16318_v15  ;;  %19783 = vst [vmem:[#allocation65_spill] sm:$0xff] %v16350_v1  ;;  %v12177_v6 = vld [vmem:[#allocation2 + $0x48] sm:$0xff]  ;;  %v12178_v2 = vld [vmem:[#allocation2 + $0x50] sm:$0xff]  ;;  %v11358_v54 = vunpack.i.h.bf16 %v19811_v36 }
 0x3da   :  { %v9723_v20 = vpack.c.bf16 %v4820_v26, %v4810_v27  ;;  %9746 = vmatpush1.bf16.msra.mxu0 %v9745_v57  ;;  %11735 = vrot.lane.b32.xlu1 %v19782_v59, %s12297_s7  ;;  %v11739_v62 = vpack.i.bf16 %v12178_v2, %v12177_v6  ;;  %v4871_v33 = vsel %vm4806_vm14, %v19784_v5, %v11297_v7  ;;  %v19786_v57 = vunpack.i.h.bf16 %v19768_v35  ;;  %v19788_v6 = vld [vmem:[#allocation116_spill] sm:$0xff] }
 0x3db   :  { %9748 = vmatprep.subr.bf16.mxu0 %v9747_v46  ;;  %v19785_v47 = vpack.i.bf16 %v16211_v39, %v16209_v11  ;;  %v9749_v31 = vpack.c.bf16 %v4861_v34, %v4851_v4  ;;  %v19787_v26 = vunpack.i.h.bf16 %v19771_v61  ;;  %v18724_v2 = vunpack.i.h.bf16 %v19788_v6  ;;  %5221 = vmatprep.mubr.f32.mxu0 %v18962_v21  ;;  %v19789_v39 = vld [vmem:[#allocation115_spill] sm:$0xff]  ;;  %v19791_v5 = vld [vmem:[#allocation132_spill] sm:$0xff] }
 0x3dc   :  { %v4872_v27 = vsel %vm4806_vm14, %v11297_v7, %v19786_v57  ;;  %9724 = vmatprep.subr.bf16.mxu1 %v9723_v20  ;;  %v16368_v46 = vsel %vm4806_vm14, %v11317_v16, %v11318_v28  ;;  %v11333_v34 = vunpack.i.h.bf16 %v19789_v39  ;;  %v11332_v4 = vunpack.i.l.bf16 %v19789_v39  ;;  %v16373_v7 = vpop.permute.xlu1 %11510  ;;  %v16379_v28 = vpop.permute.xlu0 %5599  ;;  %v19793_v20 = vld [vmem:[#allocation134_spill] sm:$0xff]  ;;  %v16389_v39 = vld [vmem:[#allocation2 + $0x100] sm:$0xff]  ;;  %9213 = vmatmul.mubr.msk.f32.gmra.mrb[80].mxu1 %vm1806_vm13, %v15838_v44 }
 0x3dd   :  { %11730 = vrot.lane.b32.xlu0 %v19785_v47, %s12298_s8  ;;  %v4881_v59 = vsel %vm4806_vm14, %v19787_v26, %v11302_v18  ;;  %v9751_v25 = vpack.c.bf16 %v4882_v38, %v4872_v27  ;;  %9726 = vmatpush1.bf16.msra.mxu1 %v9725_v17  ;;  %19790 = vst [vmem:[#allocation218_spill] sm:$0xff] %v16373_v7  ;;  %v11328_v47 = vunpack.i.h.bf16 %v19791_v5  ;;  %v11327_v38 = vunpack.i.l.bf16 %v19791_v5  ;;  %v16383_v26 = vld [vmem:[#allocation2 + $0x2d8] sm:$0x1]  ;;  %v19796_v5 = vld [vmem:[#allocation54_spill] sm:$0xff] }
 0x3de   :  { %v4816_v18 = vsel %vm4806_vm14, %v11312_v50, %v11313_v58  ;;  %9750 = vmatpush1.bf16.msra.mxu0 %v9749_v31  ;;  %11740 = vrot.lane.b32.xlu1 %v11739_v62, %s12298_s8  ;;  %19792 = vst [vmem:[#allocation158_spill] sm:$0xff] %v16379_v28  ;;  %19794 = vst [vmem:[#allocation85_spill] sm:$0xff] %v16383_v26  ;;  %v9753_v58 = vpack.c.bf16 %v4881_v59, %v4871_v33  ;;  %v16387_v17 = vld [vmem:[#allocation2 + $0xf8] sm:$0xff]  ;;  %v19795_v31 = vld [vmem:[#allocation73_spill] sm:$0xff]  ;;  %v19798_v59 = vunpack.i.l.bf16 %v19788_v6 }
 0x3df   :  { %9752 = vmatprep.subr.bf16.mxu0 %v9751_v25  ;;  %v4891_v57 = vsel %vm4806_vm14, %v19796_v5, %v19795_v31  ;;  %v4825_v25 = vsel %vm4806_vm14, %v18724_v2, %v11317_v16  ;;  %v19797_v27 = vld [vmem:[#allocation111_spill] sm:$0xff]  ;;  %v9771_v33 = vpack.c.bf16 %v16368_v46, %v4816_v18  ;;  %v4846_v16 = vsel %vm4806_vm14, %v11332_v4, %v11333_v34  ;;  %v19800_v2 = vld [vmem:[#allocation93_spill] sm:$0xff] }
 0x3e0   :  { %v4892_v11 = vsel %vm4806_vm14, %v19795_v31, %v19797_v27  ;;  %v4815_v62 = vsel %vm4806_vm14, %v19798_v59, %v11312_v50  ;;  %v11516_v29 = vpop.permute.xlu1 %11515  ;;  %5144 = vmatprep.mubr.f32.mxu1 %v18962_v21  ;;  %v11343_v31 = vunpack.i.h.bf16 %v19800_v2  ;;  %v12182_v46 = vld [vmem:[#allocation2 + $0x2e8] sm:$0x1]  ;;  %v16414_v27 = vpop.permute.xlu0 %5595  ;;  %v4836_v50 = vsel %vm4806_vm14, %v11327_v38, %v11328_v47 }
 0x3e1   :  { %5593 = vrot.lane.b32.xlu0 %v16383_v26, %s12297_s7  ;;  %v19799_v26 = vld [vmem:[#allocation145_spill] sm:$0xff]  ;;  %v11518_v44 = vunpack.i.h.bf16 %v11516_v29  ;;  %v11517_v18 = vunpack.i.l.bf16 %v11516_v29  ;;  %19801 = vst [vmem:[#allocation174_spill] sm:$0xff] %v16414_v27  ;;  %v11342_v59 = vunpack.i.l.bf16 %v19800_v2  ;;  %v19803_v7 = vunpack.i.l.bf16 %v19793_v20  ;;  %v19805_v29 = vld [vmem:[#allocation34_spill] sm:$0xff] }
 0x3e2   :  { %v11348_v35 = vunpack.i.h.bf16 %v19799_v26  ;;  %v11347_v28 = vunpack.i.l.bf16 %v19799_v26  ;;  %9754 = vmatpush1.bf16.msra.mxu0 %v9753_v58  ;;  %6400 = vrot.lane.b32.xlu1 %v12182_v46, %s12298_s8  ;;  %v19802_v26 = vunpack.i.h.bf16 %v19793_v20  ;;  %v19804_v58 = vld [vmem:[#allocation155_spill] sm:$0xff]  ;;  %v19806_v46 = vunpack.i.h.bf16 %v19719_v23  ;;  %v19810_v20 = vld [vmem:[#allocation64_spill] sm:$0xff] }
 0x3e3   :  { %v4835_v1 = vsel %vm4806_vm14, %v19803_v7, %v11327_v38  ;;  %9226 = vmatprep.subr.msk.mxu0 %vm1813_vm12, %v4892_v11  ;;  %v19807_v2 = vunpack.i.h.bf16 %v15295_v41  ;;  %v19809_v7 = vunpack.i.h.bf16 %v19741_v40  ;;  %v18733_v11 = vunpack.i.l.bf16 %v19804_v58 }
 0x3e4   :  { %v4845_v34 = vsel %vm4806_vm14, %v19802_v26, %v11332_v4  ;;  %v4829_v47 = vsel %vm4806_vm14, %v19806_v46, %v11517_v18  ;;  %v19808_v4 = vunpack.i.l.bf16 %v19741_v40  ;;  %v16441_v13 = vpop.permute.xlu1 %11525  ;;  %v4866_v46 = vsel %vm4806_vm14, %v11347_v28, %v11348_v35  ;;  %v19812_v40 = vld [vmem:[#allocation11_spill] sm:$0xff]  ;;  %v12183_v35 = vld [vmem:[#allocation2 + $0x2f0] sm:$0x1] }
 0x3e5   :  { %11745 = vrot.lane.b32.xlu0 %v19805_v29, %s12298_s8  ;;  %v4839_v27 = vsel %vm4806_vm14, %v19807_v2, %v11518_v44  ;;  %v4840_v38 = vsel %vm4806_vm14, %v11518_v44, %v19809_v7  ;;  %v11363_v41 = vunpack.i.h.bf16 %v19810_v20  ;;  %v11362_v2 = vunpack.i.l.bf16 %v19810_v20  ;;  %v16451_v44 = vpop.permute.xlu0 %11520 }
 0x3e6   :  { %v4830_v26 = vsel %vm4806_vm14, %v11517_v18, %v19808_v4  ;;  %v9729_v23 = vpack.c.bf16 %v4839_v27, %v4829_v47  ;;  %v11357_v18 = vunpack.i.l.bf16 %v19811_v36  ;;  %9227 = vmatpush1.msk.msra.mxu0 %vm1813_vm12, %v4891_v57  ;;  %11750 = vrot.lane.b32.xlu1 %v19812_v40, %s12298_s8  ;;  %v19813_v4 = vld [vmem:[#allocation163_spill] sm:$0xff]  ;;  %v9773_v20 = vpack.c.bf16 %v4825_v25, %v4815_v62  ;;  %v19815_v25 = vld [vmem:[#allocation32_spill] sm:$0xff] }
 0x3e7   :  { %v9727_v29 = vpack.c.bf16 %v4840_v38, %v4830_v26  ;;  %v18731_v26 = vunpack.i.h.bf16 %v19813_v4  ;;  %v18732_v27 = vunpack.i.l.bf16 %v19813_v4  ;;  %9772 = vmatprep.subr.bf16.mxu0 %v9771_v33  ;;  %9228 = vmatmul.mubr.msk.f32.vlgmr.msra.gmra.mrb[38].mxu0 %vm1806_vm13, %v16282_v63  ;;  %v9775_v36 = vpack.c.bf16 %v4846_v16, %v4836_v50 }
 0x3e8   :  { %v9777_v57 = vpack.c.bf16 %v4845_v34, %v4835_v1  ;;  %v4856_v47 = vsel %vm4806_vm14, %v11342_v59, %v11343_v31  ;;  %v4855_v7 = vsel %vm4806_vm14, %v18733_v11, %v11342_v59  ;;  %v19814_v38 = vunpack.i.h.bf16 %v19804_v58  ;;  %9774 = vmatpush1.bf16.msra.mxu0 %v9773_v20  ;;  %v11536_v62 = vpop.permute.xlu1 %11535  ;;  %v12184_v20 = vld [vmem:[#allocation2 + $0x2e0] sm:$0x1]  ;;  %5227 = vmatprep.mubr.f32.mxu0 %v18962_v21 }
 0x3e9   :  { %6402 = vrot.lane.b32.xlu0 %v12183_v35, %s12298_s8  ;;  %9728 = vmatprep.subr.bf16.mxu1 %v9727_v29  ;;  %v9779_v35 = vpack.c.bf16 %v4866_v46, %v4856_v47  ;;  %v11538_v16 = vunpack.i.h.bf16 %v11536_v62  ;;  %v11537_v1 = vunpack.i.l.bf16 %v11536_v62  ;;  %v16467_v50 = vpop.permute.xlu0 %11530  ;;  %v4876_v31 = vsel %vm4806_vm14, %v11357_v18, %v11358_v54  ;;  %v19817_v29 = vld [vmem:[#allocation167_spill] sm:$0xff] }
 0x3ea   :  { %v4865_v33 = vsel %vm4806_vm14, %v19814_v38, %v11347_v28  ;;  %9730 = vmatpush1.bf16.msra.mxu1 %v9729_v23  ;;  %9776 = vmatprep.subr.bf16.mxu0 %v9775_v36  ;;  %19816 = vst [vmem:[#allocation110_spill] sm:$0xff] %v16467_v50  ;;  %v4886_v59 = vsel %vm4806_vm14, %v11362_v2, %v11363_v41  ;;  %v18734_v23 = vunpack.i.h.bf16 %v19817_v29  ;;  %v11377_v46 = vunpack.i.l.bf16 %v19817_v29  ;;  %v19839_v29 = vld [vmem:[#allocation122_spill] sm:$0xff] }
 0x3eb   :  { %11755 = vrot.lane.b32.xlu1 %v19815_v25, %s12297_s7  ;;  %v4885_v28 = vsel %vm4806_vm14, %v18731_v26, %v11362_v2  ;;  %v4875_v34 = vsel %vm4806_vm14, %v18732_v27, %v11357_v18  ;;  %v19818_v54 = vunpack.i.h.bf16 %v19728_v43  ;;  %v19819_v36 = vunpack.i.h.bf16 %v19725_v49  ;;  %9229 = vmatmul.mubr.msk.f32.gmra.mrb[40].mxu0 %vm1806_vm13, %v16318_v15  ;;  %v19822_v25 = vld [vmem:[#allocation103_spill] sm:$0xff] }
 0x3ec   :  { %v19820_v47 = vunpack.i.l.bf16 %v19757_v9  ;;  %v19821_v38 = vunpack.i.h.bf16 %v19757_v9  ;;  %v11382_v43 = vunpack.i.l.bf16 %v19822_v25  ;;  %9778 = vmatpush1.bf16.msra.mxu0 %v9777_v57  ;;  %v19823_v26 = vld [vmem:[#allocation39_spill] sm:$0xff]  ;;  %v12185_v9 = vld [vmem:[#allocation2 + $0x1a8] sm:$0xff]  ;;  %v19825_v57 = vpack.i.bf16 %v16389_v39, %v16387_v17  ;;  %5375 = vmatprep.mubr.f32.mxu0 %v18962_v21 }
 0x3ed   :  { %6398 = vrot.lane.b32.xlu0 %v12184_v20, %s12298_s8  ;;  %v4849_v41 = vsel %vm4806_vm14, %v19818_v54, %v11537_v1  ;;  %v4859_v2 = vsel %vm4806_vm14, %v19819_v36, %v11538_v16  ;;  %v11383_v20 = vunpack.i.h.bf16 %v19822_v25  ;;  %v16497_v54 = vpop.permute.xlu1 %11545  ;;  %9780 = vmatprep.subr.bf16.mxu0 %v9779_v35  ;;  %v9781_v25 = vpack.c.bf16 %v4865_v33, %v4855_v7  ;;  %v19833_v35 = vld [vmem:[#allocation184_spill] sm:$0xff] }
 0x3ee   :  { %v4850_v18 = vsel %vm4806_vm14, %v11537_v1, %v19820_v47  ;;  %v4860_v62 = vsel %vm4806_vm14, %v11538_v16, %v19821_v38  ;;  %v9733_v36 = vpack.c.bf16 %v4859_v2, %v4849_v41  ;;  %v16501_v1 = vpop.permute.xlu0 %11540  ;;  %v12186_v16 = vld [vmem:[#allocation2 + $0x1b0] sm:$0xff]  ;;  %v19824_v38 = vld [vmem:[#allocation83_spill] sm:$0xff]  ;;  %v19826_v41 = vld [vmem:[#allocation61_spill] sm:$0xff]  ;;  %v9785_v11 = vpack.c.bf16 %v4885_v28, %v4875_v34 }
 0x3ef   :  { %v9731_v49 = vpack.c.bf16 %v4860_v62, %v4850_v18  ;;  %11765 = vrot.lane.b32.xlu1 %v19823_v26, %s12298_s8  ;;  %v11779_v47 = vpack.i.bf16 %v12186_v16, %v12185_v9  ;;  %v11372_v27 = vunpack.i.l.bf16 %v19824_v38  ;;  %v9783_v18 = vpack.c.bf16 %v4886_v59, %v4876_v31  ;;  %v19827_v2 = vld [vmem:[#allocation95_spill] sm:$0xff]  ;;  %v19828_v16 = vld [vmem:[#allocation181_spill] sm:$0xff] }
 0x3f0   :  { %v4896_v62 = vsel %vm4806_vm14, %v19827_v2, %v19826_v41  ;;  %v5621_v9 = vsel %vm5609_vm15, %v11377_v46, %v18734_v23  ;;  %v11387_v39 = vunpack.i.l.bf16 %v19828_v16  ;;  %v5620_v33 = vsel %vm5609_vm15, %v11383_v20, %v11377_v46  ;;  %9782 = vmatpush1.bf16.msra.mxu0 %v9781_v25  ;;  %v19829_v59 = vld [vmem:[#allocation185_spill] sm:$0xff]  ;;  %v19832_v23 = vld [vmem:[#allocation38_spill] sm:$0xff]  ;;  %v19834_v25 = vld [vmem:[#allocation19_spill] sm:$0xff] }
 0x3f1   :  { %11760 = vrot.lane.b32.xlu0 %v19825_v57, %s12298_s8  ;;  %9732 = vmatprep.subr.bf16.mxu1 %v9731_v49  ;;  %v5610_v7 = vsel %vm5609_vm15, %v11382_v43, %v11372_v27  ;;  %v11556_v31 = vpop.permute.xlu1 %11555  ;;  %v11392_v28 = vunpack.i.l.bf16 %v19829_v59  ;;  %v19830_v34 = vld [vmem:[#allocation221_spill] sm:$0xff]  ;;  %v11398_v17 = vunpack.i.h.bf16 %v19832_v23  ;;  %v11397_v43 = vunpack.i.l.bf16 %v19832_v23 }
 0x3f2   :  { %9734 = vmatpush1.bf16.msra.mxu1 %v9733_v36  ;;  %9784 = vmatprep.subr.bf16.mxu0 %v9783_v18  ;;  %v11558_v36 = vunpack.i.h.bf16 %v11556_v31  ;;  %v11557_v57 = vunpack.i.l.bf16 %v11556_v31  ;;  %v16524_v41 = vpop.permute.xlu0 %11550  ;;  %v11407_v20 = vunpack.i.l.bf16 %v19833_v35  ;;  %v19835_v18 = vunpack.i.h.bf16 %v19733_v12 }
 0x3f3   :  { %11775 = vrot.lane.b32.xlu1 %v19830_v34, %s12297_s7  ;;  %19831 = vst [vmem:[#allocation222_spill] sm:$0xff] %v16524_v41  ;;  %v19836_v34 = vunpack.i.h.bf16 %v19732_v60  ;;  %v19837_v26 = vunpack.i.l.bf16 %v19771_v61  ;;  %v19838_v23 = vunpack.i.h.bf16 %v19771_v61  ;;  %v19840_v60 = vld [vmem:[#allocation44_spill] sm:$0xff] }
 0x3f4   :  { %v4869_v49 = vsel %vm4806_vm14, %v19835_v18, %v11557_v57  ;;  %9786 = vmatpush1.bf16.msra.mxu0 %v9785_v11  ;;  %v16559_v11 = vld [vmem:[#allocation2 + $0x2a0] sm:$0xff] }
 0x3f5   :  { %11770 = vrot.lane.b32.xlu0 %v19834_v25, %s12298_s8  ;;  %v4879_v31 = vsel %vm4806_vm14, %v19836_v34, %v11558_v36  ;;  %v4870_v40 = vsel %vm4806_vm14, %v11557_v57, %v19837_v26  ;;  %v4880_v46 = vsel %vm4806_vm14, %v11558_v36, %v19838_v23  ;;  %v11402_v25 = vunpack.i.l.bf16 %v19839_v29  ;;  %v16546_v12 = vpop.permute.xlu1 %11565  ;;  %9234 = vmatprep.subr.msk.mxu0 %vm1813_vm12, %v4896_v62  ;;  %v19844_v23 = vld [vmem:[#allocation198_spill] sm:$0xff]  ;;  %v19845_v62 = vld [vmem:[#allocation168_spill] sm:$0xff] }
 0x3f6   :  { %v9735_v18 = vpack.c.bf16 %v4880_v46, %v4870_v40  ;;  %v9737_v41 = vpack.c.bf16 %v4879_v31, %v4869_v49  ;;  %v19841_v26 = vunpack.i.h.bf16 %v19824_v38  ;;  %v16554_v57 = vpop.permute.xlu0 %11560  ;;  %v19842_v36 = vunpack.i.h.bf16 %v19829_v59  ;;  %19843 = vst [vmem:[#allocation151_spill] sm:$0xff] %v16559_v11  ;;  %v19846_v46 = vld [vmem:[#allocation40_spill] sm:$0xff] }
 0x3f7   :  { %11785 = vrot.lane.b32.xlu1 %v19840_v60, %s12298_s8  ;;  %v11794_v40 = vpack.i.bf16 %v16559_v11, %v19844_v23  ;;  %v4895_v49 = vsel %vm4806_vm14, %v19845_v62, %v19827_v2  ;;  %v11413_v31 = vunpack.i.h.bf16 %v19846_v46  ;;  %v11412_v4 = vunpack.i.l.bf16 %v19846_v46  ;;  %v12189_v2 = vld [vmem:[#allocation2 + $0x260] sm:$0xff] }
 0x3f8   :  { %v5611_v61 = vsel %vm5609_vm15, %v11372_v27, %v19841_v26  ;;  %v5641_v34 = vsel %vm5609_vm15, %v11392_v28, %v19842_v36  ;;  %9736 = vmatprep.subr.bf16.mxu1 %v9735_v18  ;;  %v5630_v26 = vsel %vm5609_vm15, %v11397_v43, %v11387_v39  ;;  %v5640_v36 = vsel %vm5609_vm15, %v11398_v17, %v11392_v28 }
 0x3f9   :  { %11780 = vrot.lane.b32.xlu0 %v11779_v47, %s12298_s8  ;;  %v9787_v27 = vpack.c.bf16 %v5621_v9, %v5611_v61  ;;  %v9789_v60 = vpack.c.bf16 %v5620_v33, %v5610_v7  ;;  %v19847_v59 = vunpack.i.h.bf16 %v19828_v16  ;;  %9738 = vmatpush1.bf16.msra.mxu1 %v9737_v41  ;;  %v11576_v46 = vpop.permute.xlu1 %11575  ;;  %v19848_v47 = vunpack.i.h.bf16 %v19839_v29 }
 0x3fa   :  { %9235 = vmatpush1.msk.msra.mxu0 %vm1813_vm12, %v4895_v49  ;;  %v19849_v43 = vunpack.i.h.bf16 %v19833_v35  ;;  %v11427_v7 = vunpack.i.l.bf16 %v15959_v8  ;;  %v16588_v28 = vpop.permute.xlu0 %11570  ;;  %v5660_v41 = vsel %vm5609_vm15, %v11413_v31, %v11407_v20  ;;  %v5650_v18 = vsel %vm5609_vm15, %v11412_v4, %v11402_v25  ;;  %v19850_v49 = vld [vmem:[#allocation20_spill] sm:$0xff] }
 0x3fb   :  { %v5631_v23 = vsel %vm5609_vm15, %v11387_v39, %v19847_v59  ;;  %v5651_v9 = vsel %vm5609_vm15, %v11402_v25, %v19848_v47  ;;  %v11422_v39 = vunpack.i.l.bf16 %v15969_v56  ;;  %v11433_v59 = vunpack.i.h.bf16 %v16005_v19  ;;  %9788 = vmatprep.subr.bf16.mxu0 %v9787_v27  ;;  %9236 = vmatmul.mubr.msk.f32.vlgmr.msra.gmra.mrb[42].mxu0 %vm1806_vm13, %v16282_v63 }
 0x3fc   :  { %v9791_v11 = vpack.c.bf16 %v5641_v34, %v5631_v23  ;;  %v5661_v17 = vsel %vm5609_vm15, %v11407_v20, %v19849_v43  ;;  %v11432_v61 = vunpack.i.l.bf16 %v16005_v19  ;;  %9790 = vmatpush1.bf16.msra.mxu0 %v9789_v60  ;;  %11795 = vrot.lane.b32.xlu1 %v11794_v40, %s12297_s7  ;;  %v11577_v34 = vunpack.i.l.bf16 %v11576_v46  ;;  %v12188_v43 = vld [vmem:[#allocation2 + $0x258] sm:$0xff] }
 0x3fd   :  { %11790 = vrot.lane.b32.xlu0 %v19850_v49, %s12298_s8  ;;  %v11578_v27 = vunpack.i.h.bf16 %v11576_v46  ;;  %v9793_v23 = vpack.c.bf16 %v5640_v36, %v5630_v26  ;;  %v9795_v47 = vpack.c.bf16 %v5661_v17, %v5651_v9  ;;  %v11799_v33 = vpack.i.bf16 %v12189_v2, %v12188_v43  ;;  %5381 = vmatprep.mubr.f32.mxu0 %v18962_v21  ;;  %v16598_v20 = vpop.permute.xlu1 %5605  ;;  %v19853_v2 = vld [vmem:[#allocation47_spill] sm:$0xff] }
 0x3fe   :  { %9792 = vmatprep.subr.bf16.mxu0 %v9791_v11  ;;  %v5680_v4 = vsel %vm5609_vm15, %v11433_v59, %v11427_v7  ;;  %v9797_v19 = vpack.c.bf16 %v5660_v41, %v5650_v18  ;;  %v19851_v25 = vunpack.i.h.bf16 %v15969_v56  ;;  %v19852_v11 = vunpack.i.h.bf16 %v15959_v8  ;;  %v4791_v46 = vpop.permute.xlu0 %4790 }
 0x3ff   :  { %9237 = vmatmul.mubr.msk.f32.gmra.mrb[44].mxu0 %vm1806_vm13, %v16318_v15  ;;  %v5670_v31 = vsel %vm5609_vm15, %v11432_v61, %v11422_v39  ;;  %v18740_v26 = vunpack.i.h.bf16 %v16039_v32  ;;  %v11442_v36 = vunpack.i.l.bf16 %v16039_v32  ;;  %v19854_v9 = vunpack.i.l.bf16 %v19788_v6 }
 0x400   :  { %v5671_v60 = vsel %vm5609_vm15, %v11422_v39, %v19851_v25  ;;  %v5681_v40 = vsel %vm5609_vm15, %v11427_v7, %v19852_v11  ;;  %9794 = vmatpush1.bf16.msra.mxu0 %v9793_v23  ;;  %11805 = vrot.lane.b32.xlu1 %v19853_v2, %s12298_s8  ;;  %v18741_v7 = vunpack.i.h.bf16 %v16058_v37  ;;  %v4889_v39 = vsel %vm4806_vm14, %v19749_v45, %v4791_v46  ;;  %v19870_v2 = vld [vmem:[#allocation134_spill] sm:$0xff] }
 0x401   :  { %v4814_v17 = vsel %vm4806_vm14, %v11577_v34, %v19854_v9  ;;  %9796 = vmatprep.subr.bf16.mxu0 %v9795_v47  ;;  %11800 = vrot.lane.b32.xlu0 %v11799_v33, %s12298_s8  ;;  %v4890_v59 = vsel %vm4806_vm14, %v4791_v46, %v19796_v5  ;;  %v19855_v41 = vunpack.i.h.bf16 %v19788_v6  ;;  %v11437_v61 = vunpack.i.l.bf16 %v16058_v37  ;;  %v16638_v11 = vpop.permute.xlu1 %11580  ;;  %v12191_v46 = vld [vmem:[#allocation2 + $0x10] sm:$0xff] }
 0x402   :  { %v18742_v23 = vunpack.i.h.bf16 %v16129_v42  ;;  %v19856_v43 = vunpack.i.h.bf16 %v19738_v10  ;;  %v19857_v33 = vunpack.i.h.bf16 %v19739_v48  ;;  %9222 = vmatprep.subr.msk.mxu1 %vm1813_vm12, %v4890_v59  ;;  %5870 = vmatprep.mubr.f32.mxu0 %v18962_v21  ;;  %v18744_v45 = vunpack.i.l.bf16 %v16129_v42  ;;  %v12190_v10 = vld [vmem:[#allocation2 + $0x8] sm:$0xff]  ;;  %v16643_v59 = vld [vmem:[#allocation2 + $0x2f8] sm:$0x1] }
 0x403   :  { %v4824_v18 = vsel %vm4806_vm14, %v11578_v27, %v19855_v41  ;;  %v18745_v6 = vunpack.i.h.bf16 %v16157_v24  ;;  %v9799_v5 = vpack.c.bf16 %v5681_v40, %v5671_v60  ;;  %9223 = vmatpush1.msk.msra.mxu1 %vm1813_vm12, %v4889_v39  ;;  %v11457_v48 = vunpack.i.l.bf16 %v16157_v24  ;;  %19858 = vst [vmem:[#allocation190_spill] sm:$0xff] %v16643_v59  ;;  %v16647_v60 = vpop.permute.xlu0 %5607  ;;  %v19859_v39 = vld [vmem:[#allocation16_spill] sm:$0xff] }
 0x404   :  { %v4813_v47 = vsel %vm4806_vm14, %v19856_v43, %v11577_v34  ;;  %v4823_v25 = vsel %vm4806_vm14, %v19857_v33, %v11578_v27  ;;  %v11819_v34 = vpack.i.bf16 %v12191_v46, %v12190_v10  ;;  %v18743_v27 = vunpack.i.h.bf16 %v16166_v30  ;;  %9798 = vmatpush1.bf16.msra.mxu0 %v9797_v19  ;;  %5601 = vrot.lane.b32.xlu1 %v16643_v59, %s12297_s7  ;;  %v12193_v46 = vld [vmem:[#allocation2 + $0x308] sm:$0x1]  ;;  %v19875_v59 = vld [vmem:[#allocation218_spill] sm:$0xff] }
 0x405   :  { %v11452_v9 = vunpack.i.l.bf16 %v16166_v30  ;;  %v9755_v40 = vpack.c.bf16 %v4824_v18, %v4814_v17  ;;  %9800 = vmatprep.subr.bf16.mxu0 %v9799_v5  ;;  %11810 = vrot.lane.b32.xlu0 %v19859_v39, %s12298_s8  ;;  %v9801_v41 = vpack.c.bf16 %v5680_v4, %v5670_v31  ;;  %v9757_v43 = vpack.c.bf16 %v4823_v25, %v4813_v47  ;;  %v16671_v25 = vpop.permute.xlu1 %5603  ;;  %v12195_v47 = vld [vmem:[#allocation2 + $0x68] sm:$0xff] }
 0x406   :  { %v5625_v33 = vsel %vm5609_vm15, %v11442_v36, %v18740_v26  ;;  %v5624_v19 = vsel %vm5609_vm15, %v18742_v23, %v11442_v36  ;;  %9224 = vmatmul.mubr.msk.f32.vlgmr.msra.gmra.mrb[74].mxu1 %vm1806_vm13, %v16282_v63  ;;  %v5691_v17 = vsel %vm5609_vm15, %v16094_v51, %v16084_v52  ;;  %v5615_v4 = vsel %vm5609_vm15, %v11437_v61, %v18741_v7 }
 0x407   :  { %9756 = vmatprep.subr.bf16.mxu1 %v9755_v40  ;;  %v5614_v31 = vsel %vm5609_vm15, %v18744_v45, %v11437_v61  ;;  %v18746_v18 = vunpack.i.h.bf16 %v16190_v0  ;;  %v18747_v36 = vunpack.i.l.bf16 %v16190_v0  ;;  %5150 = vmatprep.mubr.f32.mxu1 %v18962_v21  ;;  %v18748_v5 = vunpack.i.l.bf16 %v16183_v53  ;;  %v16677_v61 = vpop.permute.xlu0 %11585 }
 0x408   :  { %9758 = vmatpush1.bf16.msra.mxu1 %v9757_v43  ;;  %9802 = vmatpush1.bf16.msra.mxu0 %v9801_v41  ;;  %v5635_v40 = vsel %vm5609_vm15, %v11452_v9, %v18743_v27  ;;  %v5645_v43 = vsel %vm5609_vm15, %v11457_v48, %v18745_v6  ;;  %v11472_v7 = vunpack.i.l.bf16 %v16217_v55  ;;  %v18749_v23 = vunpack.i.h.bf16 %v16231_v22  ;;  %v12194_v6 = vld [vmem:[#allocation2 + $0x60] sm:$0xff] }
 0x409   :  { %6408 = vrot.lane.b32.xlu1 %v12193_v46, %s12298_s8  ;;  %9238 = vmatprep.subr.msk.mxu0 %vm1813_vm12, %v5691_v17  ;;  %v19860_v46 = vld [vmem:[#allocation201_spill] sm:$0xff]  ;;  %v9819_v45 = vpack.c.bf16 %v5625_v33, %v5615_v4  ;;  %v9821_v10 = vpack.c.bf16 %v5624_v19, %v5614_v31  ;;  %v11824_v26 = vpack.i.bf16 %v12195_v47, %v12194_v6  ;;  %v11596_v4 = vpop.permute.xlu1 %11595  ;;  %v19862_v31 = vld [vmem:[#allocation56_spill] sm:$0xff]  ;;  %v19868_v47 = vld [vmem:[#allocation139_spill] sm:$0xff]  ;;  %v19872_v49 = vunpack.i.h.bf16 %v19870_v2 }
 0x40a   :  { %11815 = vrot.lane.b32.xlu0 %v19523_v3, %s12298_s8  ;;  %v5690_v27 = vsel %vm5609_vm15, %v19860_v46, %v16094_v51  ;;  %9225 = vmatmul.mubr.msk.f32.gmra.mrb[76].mxu1 %vm1806_vm13, %v16318_v15  ;;  %v5644_v41 = vsel %vm5609_vm15, %v18746_v18, %v11457_v48  ;;  %v5634_v17 = vsel %vm5609_vm15, %v18747_v36, %v11452_v9  ;;  %v19861_v51 = vunpack.i.l.bf16 %v16206_v14  ;;  %v16710_v19 = vld [vmem:[#allocation3 + $0x50] sm:$0xff]  ;;  %v12196_v36 = vld [vmem:[#allocation2 + $0x310] sm:$0x1] }
 0x40b   :  { %v9823_v6 = vpack.c.bf16 %v5645_v43, %v5635_v40  ;;  %5298 = vmatprep.mubr.f32.mxu1 %v18962_v21  ;;  %v11482_v48 = vunpack.i.l.bf16 %v19862_v31  ;;  %v11598_v9 = vunpack.i.h.bf16 %v11596_v4  ;;  %v11597_v46 = vunpack.i.l.bf16 %v11596_v4  ;;  %v16717_v18 = vpop.permute.xlu0 %11590 }
 0x40c   :  { %v16708_v33 = vsel %vm5609_vm15, %v19861_v51, %v18748_v5  ;;  %9239 = vmatpush1.msk.msra.mxu0 %vm1813_vm12, %v5690_v27  ;;  %v19863_v40 = vunpack.i.h.bf16 %v16206_v14  ;;  %v19864_v27 = vunpack.i.h.bf16 %v16217_v55 }
 0x40d   :  { %11820 = vrot.lane.b32.xlu1 %v11819_v34, %s12299_s9  ;;  %9820 = vmatprep.subr.bf16.mxu0 %v9819_v45  ;;  %v19865_v34 = vunpack.i.l.bf16 %v16231_v22 }
 0x40e   :  { %v16723_v43 = vsel %vm5609_vm15, %v19863_v40, %v11472_v7  ;;  %6410 = vrot.lane.b32.xlu0 %v12196_v36, %s12298_s8  ;;  %v5665_v5 = vsel %vm5609_vm15, %v11472_v7, %v19864_v27  ;;  %9240 = vmatmul.mubr.msk.f32.vlgmr.msra.gmra.mrb[34].mxu0 %vm1806_vm13, %v16710_v19  ;;  %v19866_v40 = vld [vmem:[#allocation121_spill] sm:$0xff]  ;;  %v19869_v36 = vunpack.i.h.bf16 %v19868_v47  ;;  %v19871_v7 = vunpack.i.l.bf16 %v19870_v2 }
 0x40f   :  { %v16734_v4 = vsel %vm5609_vm15, %v19865_v34, %v18749_v23  ;;  %v19867_v51 = vunpack.i.h.bf16 %v19866_v40  ;;  %v4844_v34 = vsel %vm4806_vm14, %v11598_v9, %v19872_v49  ;;  %v19873_v23 = vld [vmem:[#allocation212_spill] sm:$0xff]  ;;  %9822 = vmatpush1.bf16.msra.mxu0 %v9821_v10  ;;  %v16752_v40 = vpop.permute.xlu1 %11605  ;;  %v19874_v47 = vld [vmem:[#allocation65_spill] sm:$0xff]  ;;  %v16758_v49 = vpop.permute.xlu0 %11600  ;;  %v19876_v2 = vunpack.i.h.bf16 %v19862_v31  ;;  %5876 = vmatprep.mubr.f32.mxu0 %v18962_v21 }
 0x410   :  { %v4843_v39 = vsel %vm4806_vm14, %v19869_v36, %v11598_v9  ;;  %v4834_v27 = vsel %vm4806_vm14, %v11597_v46, %v19871_v7  ;;  %v18756_v55 = vunpack.i.h.bf16 %v19873_v23  ;;  %v11508_v3 = vunpack.i.h.bf16 %v19874_v47  ;;  %9824 = vmatprep.subr.bf16.mxu0 %v9823_v6  ;;  %v12200_v9 = vld [vmem:[#allocation2 + $0xb8] sm:$0xff] }
 0x411   :  { %v4833_v45 = vsel %vm4806_vm14, %v19867_v51, %v11597_v46  ;;  %v9759_v51 = vpack.c.bf16 %v4844_v34, %v4834_v27  ;;  %v11507_v36 = vunpack.i.l.bf16 %v19874_v47  ;;  %v12197_v46 = vld [vmem:[#allocation2 + $0x300] sm:$0x1]  ;;  %v5675_v10 = vsel %vm5609_vm15, %v11482_v48, %v19876_v2  ;;  %v12199_v34 = vld [vmem:[#allocation2 + $0x58] sm:$0xff] }
 0x412   :  { %v9761_v30 = vpack.c.bf16 %v4843_v39, %v4833_v45  ;;  %6406 = vrot.lane.b32.xlu1 %v12197_v46, %s12298_s8  ;;  %11825 = vrot.lane.b32.xlu0 %v11824_v26, %s12299_s9  ;;  %v9825_v39 = vpack.c.bf16 %v5644_v41, %v5634_v17  ;;  %v19877_v45 = vunpack.i.h.bf16 %v16183_v53  ;;  %v19878_v7 = vunpack.i.l.bf16 %v16183_v53  ;;  %v12198_v27 = vld [vmem:[#allocation2] sm:$0xff]  ;;  %v19879_v46 = vld [vmem:[#allocation211_spill] sm:$0xff]  ;;  %v16774_v17 = vld [vmem:[#allocation3 + $0x58] sm:$0x1] }
 0x413   :  { %v11829_v47 = vpack.i.bf16 %v12199_v34, %v12198_v27  ;;  %9760 = vmatprep.subr.bf16.mxu1 %v9759_v51  ;;  %v11502_v52 = vunpack.i.l.bf16 %v19879_v46  ;;  %v9829_v2 = vpack.c.bf16 %v16723_v43, %v16708_v33  ;;  %v12201_v26 = vld [vmem:[#allocation2 + $0xc0] sm:$0xff]  ;;  %v11503_v33 = vunpack.i.h.bf16 %v19879_v46  ;;  %v11616_v43 = vpop.permute.xlu1 %11615  ;;  %v19883_v27 = vld [vmem:[#allocation21_spill] sm:$0xff]  ;;  %9241 = vmatmul.mubr.msk.f32.gmra.mrb[36].mxu0 %vm1806_vm13, %v16774_v17 }
 0x414   :  { %v5655_v6 = vsel %vm5609_vm15, %v19878_v7, %v19877_v45  ;;  %9762 = vmatpush1.bf16.msra.mxu1 %v9761_v30  ;;  %v11839_v41 = vpack.i.bf16 %v12201_v26, %v12200_v9  ;;  %v19880_v45 = vunpack.i.l.bf16 %v16231_v22  ;;  %v19881_v7 = vunpack.i.l.bf16 %v19873_v23  ;;  %9826 = vmatpush1.bf16.msra.mxu0 %v9825_v39 }
 0x415   :  { %v9827_v24 = vpack.c.bf16 %v5665_v5, %v5655_v6  ;;  %v9831_v30 = vpack.c.bf16 %v16734_v4, %v5675_v10  ;;  %v19882_v9 = vunpack.i.l.bf16 %v19875_v59  ;;  %v11618_v34 = vunpack.i.h.bf16 %v11616_v43  ;;  %6024 = vmatprep.mubr.f32.mxu0 %v18962_v21 }
 0x416   :  { %v5684_v51 = vsel %vm5609_vm15, %v18756_v55, %v19880_v45  ;;  %v5674_v5 = vsel %vm5609_vm15, %v19881_v7, %v11482_v48  ;;  %11835 = vrot.lane.b32.xlu1 %v19883_v27, %s12298_s8  ;;  %v11617_v26 = vunpack.i.l.bf16 %v11616_v43  ;;  %v16793_v45 = vpop.permute.xlu0 %11610  ;;  %v16796_v48 = vsel %vm5609_vm15, %v11507_v36, %v11508_v3  ;;  %11830 = vrot.lane.b32.xlu0 %v11829_v47, %s12299_s9  ;;  %v19885_v7 = vld [vmem:[#allocation128_spill] sm:$0xff] }
 0x417   :  { %v16789_v6 = vsel %vm5609_vm15, %v19882_v9, %v11502_v52  ;;  %9828 = vmatprep.subr.bf16.mxu0 %v9827_v24  ;;  %v19884_v39 = vunpack.i.h.bf16 %v19875_v59  ;;  %v11528_v10 = vunpack.i.h.bf16 %v16441_v13  ;;  %v11527_v46 = vunpack.i.l.bf16 %v16441_v13  ;;  %v19887_v9 = vld [vmem:[#allocation36_spill] sm:$0xff] }
 0x418   :  { %v11523_v24 = vunpack.i.h.bf16 %v16451_v44  ;;  %v19886_v43 = vunpack.i.h.bf16 %v19885_v7  ;;  %v19888_v55 = vunpack.i.h.bf16 %v19887_v9  ;;  %v19890_v13 = vunpack.i.h.bf16 %v19804_v58  ;;  %9830 = vmatpush1.bf16.msra.mxu0 %v9829_v2 }
 0x419   :  { %v16801_v4 = vsel %vm5609_vm15, %v19884_v39, %v11507_v36  ;;  %v19889_v39 = vunpack.i.l.bf16 %v19804_v58  ;;  %v11522_v47 = vunpack.i.l.bf16 %v16451_v44  ;;  %v18760_v7 = vunpack.i.h.bf16 %v16467_v50  ;;  %9832 = vmatprep.subr.bf16.mxu0 %v9831_v30  ;;  %v19891_v58 = vld [vmem:[#allocation13_spill] sm:$0xff]  ;;  %v12202_v30 = vld [vmem:[#allocation2 + $0xb0] sm:$0xff] }
 0x41a   :  { %v4853_v3 = vsel %vm4806_vm14, %v19886_v43, %v11617_v26  ;;  %v4863_v36 = vsel %vm4806_vm14, %v19888_v55, %v11618_v34  ;;  %v4864_v31 = vsel %vm4806_vm14, %v11618_v34, %v19890_v13  ;;  %v16824_v43 = vpop.permute.xlu1 %11625  ;;  %v11548_v27 = vunpack.i.h.bf16 %v16497_v54  ;;  %11845 = vrot.lane.b32.xlu1 %v19891_v58, %s12299_s9  ;;  %v16831_v34 = vpop.permute.xlu0 %11620  ;;  %11840 = vrot.lane.b32.xlu0 %v11839_v41, %s12299_s9 }
 0x41b   :  { %v4854_v22 = vsel %vm4806_vm14, %v11617_v26, %v19889_v39  ;;  %v9765_v53 = vpack.c.bf16 %v4863_v36, %v4853_v3  ;;  %v11547_v26 = vunpack.i.l.bf16 %v16497_v54  ;;  %v11543_v44 = vunpack.i.h.bf16 %v16501_v1  ;;  %v19892_v3 = vld [vmem:[#allocation158_spill] sm:$0xff]  ;;  %v12203_v39 = vld [vmem:[#allocation2 + $0x108] sm:$0xff] }
 0x41c   :  { %v9763_v9 = vpack.c.bf16 %v4864_v31, %v4854_v22  ;;  %v11542_v2 = vunpack.i.l.bf16 %v16501_v1  ;;  %v9833_v22 = vpack.c.bf16 %v5684_v51, %v5674_v5  ;;  %v5619_v31 = vsel %vm5609_vm15, %v11502_v52, %v11503_v33  ;;  %v19893_v36 = vld [vmem:[#allocation114_spill] sm:$0xff] }
 0x41d   :  { %v5695_v54 = vsel %vm5609_vm15, %v19893_v36, %v19892_v3  ;;  %v11849_v13 = vpack.i.bf16 %v12203_v39, %v12202_v30  ;;  %v9851_v58 = vpack.c.bf16 %v16796_v48, %v5619_v31  ;;  %v9853_v55 = vpack.c.bf16 %v16801_v4, %v16789_v6  ;;  %v19894_v1 = vld [vmem:[#allocation174_spill] sm:$0xff]  ;;  %v19902_v3 = vld [vmem:[#allocation163_spill] sm:$0xff] }
 0x41e   :  { %9764 = vmatprep.subr.bf16.mxu1 %v9763_v9  ;;  %v5694_v41 = vsel %vm5609_vm15, %v19894_v1, %v19893_v36  ;;  %v5648_v52 = vsel %vm5609_vm15, %v18760_v7, %v11527_v46  ;;  %9834 = vmatpush1.bf16.msra.mxu0 %v9833_v22  ;;  %v11636_v51 = vpop.permute.xlu1 %11635  ;;  %v5639_v5 = vsel %vm5609_vm15, %v11522_v47, %v11523_v24  ;;  %v19896_v6 = vld [vmem:[#allocation22_spill] sm:$0xff]  ;;  %v16857_v31 = vpop.permute.xlu0 %11630  ;;  %v19904_v24 = vunpack.i.h.bf16 %v19902_v3 }
 0x41f   :  { %9766 = vmatpush1.bf16.msra.mxu1 %v9765_v53  ;;  %v5649_v33 = vsel %vm5609_vm15, %v11527_v46, %v11528_v10  ;;  %v19895_v53 = vunpack.i.l.bf16 %v16467_v50  ;;  %9246 = vmatprep.subr.msk.mxu0 %vm1813_vm12, %v5695_v54  ;;  %v11638_v4 = vunpack.i.h.bf16 %v11636_v51  ;;  %v11637_v9 = vunpack.i.l.bf16 %v11636_v51  ;;  %v19897_v36 = vld [vmem:[#allocation222_spill] sm:$0xff] }
 0x420   :  { %11855 = vrot.lane.b32.xlu1 %v19896_v6, %s12298_s8  ;;  %v5669_v22 = vsel %vm5609_vm15, %v11547_v26, %v11548_v27  ;;  %v11568_v10 = vunpack.i.h.bf16 %v16546_v12  ;;  %11850 = vrot.lane.b32.xlu0 %v11849_v13, %s12299_s9  ;;  %v5659_v46 = vsel %vm5609_vm15, %v11542_v2, %v11543_v44  ;;  %v19903_v27 = vunpack.i.l.bf16 %v19902_v3 }
 0x421   :  { %v5638_v48 = vsel %vm5609_vm15, %v19895_v53, %v11522_v47  ;;  %v19898_v47 = vld [vmem:[#allocation220_spill] sm:$0xff]  ;;  %v19900_v53 = vld [vmem:[#allocation49_spill] sm:$0xff]  ;;  %v4884_v6 = vsel %vm4806_vm14, %v11638_v4, %v19904_v24  ;;  %v11567_v13 = vunpack.i.l.bf16 %v16546_v12  ;;  %v11563_v44 = vunpack.i.h.bf16 %v16554_v57 }
 0x422   :  { %v19899_v54 = vunpack.i.h.bf16 %v19898_v47  ;;  %v19901_v51 = vunpack.i.h.bf16 %v19900_v53  ;;  %v4874_v30 = vsel %vm4806_vm14, %v11637_v9, %v19903_v27  ;;  %v11562_v47 = vunpack.i.l.bf16 %v16554_v57  ;;  %9247 = vmatpush1.msk.msra.mxu0 %vm1813_vm12, %v5694_v41  ;;  %v19905_v57 = vld [vmem:[#allocation15_spill] sm:$0xff]  ;;  %v12204_v41 = vld [vmem:[#allocation2 + $0x160] sm:$0xff] }
 0x423   :  { %v9767_v53 = vpack.c.bf16 %v4884_v6, %v4874_v30  ;;  %v11572_v50 = vunpack.i.l.bf16 %v16588_v28  ;;  %9852 = vmatprep.subr.bf16.mxu0 %v9851_v58  ;;  %9248 = vmatmul.mubr.msk.f32.vlgmr.msra.gmra.mrb[38].mxu0 %vm1806_vm13, %v16710_v19  ;;  %v9855_v3 = vpack.c.bf16 %v5649_v33, %v5639_v5  ;;  %v19906_v6 = vunpack.i.h.bf16 %v19897_v36  ;;  %v19907_v58 = vld [vmem:[#allocation14_spill] sm:$0xff] }
 0x424   :  { %v4873_v39 = vsel %vm4806_vm14, %v19899_v54, %v11637_v9  ;;  %v4883_v7 = vsel %vm4806_vm14, %v19901_v51, %v11638_v4  ;;  %v16881_v54 = vpop.permute.xlu1 %11645  ;;  %v18765_v51 = vunpack.i.h.bf16 %v16588_v28  ;;  %v16887_v4 = vpop.permute.xlu0 %11640  ;;  %9854 = vmatpush1.bf16.msra.mxu0 %v9853_v55  ;;  %11865 = vrot.lane.b32.xlu1 %v19905_v57, %s12299_s9  ;;  %v12205_v9 = vld [vmem:[#allocation2 + $0x1b8] sm:$0xff]  ;;  %v9857_v27 = vpack.c.bf16 %v5648_v52, %v5638_v48  ;;  %v12206_v57 = vld [vmem:[#allocation2 + $0x210] sm:$0xff] }
 0x425   :  { %v9769_v12 = vpack.c.bf16 %v4883_v7, %v4873_v39  ;;  %v11869_v24 = vpack.i.bf16 %v12205_v9, %v12204_v41  ;;  %v5668_v30 = vsel %vm5609_vm15, %v19906_v6, %v11547_v26  ;;  %9856 = vmatprep.subr.bf16.mxu0 %v9855_v3  ;;  %11860 = vrot.lane.b32.xlu0 %v19907_v58, %s12299_s9  ;;  %v19908_v33 = vunpack.i.l.bf16 %v19897_v36  ;;  %v12207_v41 = vld [vmem:[#allocation2 + $0x268] sm:$0xff] }
 0x426   :  { %v9859_v5 = vpack.c.bf16 %v5669_v22, %v5659_v46  ;;  %9768 = vmatprep.subr.bf16.mxu1 %v9767_v53  ;;  %v5679_v55 = vsel %vm5609_vm15, %v11562_v47, %v11563_v44  ;;  %v5689_v39 = vsel %vm5609_vm15, %v11567_v13, %v11568_v10  ;;  %6030 = vmatprep.mubr.f32.mxu0 %v18962_v21  ;;  %v18764_v48 = vunpack.i.h.bf16 %v16638_v11  ;;  %v19910_v44 = vld [vmem:[#allocation111_spill] sm:$0xff] }
 0x427   :  { %v5658_v7 = vsel %vm5609_vm15, %v19908_v33, %v11542_v2  ;;  %v5688_v26 = vsel %vm5609_vm15, %v18765_v51, %v11567_v13  ;;  %v5678_v52 = vsel %vm5609_vm15, %v11572_v50, %v11562_v47  ;;  %v11582_v22 = vunpack.i.l.bf16 %v16638_v11  ;;  %9770 = vmatpush1.bf16.msra.mxu1 %v9769_v12  ;;  %9249 = vmatmul.mubr.msk.f32.gmra.mrb[40].mxu0 %vm1806_vm13, %v16774_v17  ;;  %v19909_v13 = vld [vmem:[#allocation23_spill] sm:$0xff] }
 0x428   :  { %v4799_v2 = vpop.permute.xlu1 %4798  ;;  %v18763_v10 = vunpack.i.h.bf16 %v16677_v61  ;;  %v11587_v46 = vunpack.i.l.bf16 %v16677_v61  ;;  %9858 = vmatpush1.bf16.msra.mxu0 %v9857_v27  ;;  %11875 = vrot.lane.b32.xlu1 %v19909_v13, %s12298_s8  ;;  %v16918_v53 = vpop.permute.xlu0 %11650  ;;  %v9861_v12 = vpack.c.bf16 %v5668_v30, %v5658_v7  ;;  %v11889_v9 = vpack.i.bf16 %v12207_v41, %v12206_v57  ;;  %v12208_v33 = vld [vmem:[#allocation2 + $0x38] sm:$0xff] }
 0x429   :  { %v4893_v47 = vsel %vm4806_vm14, %v19910_v44, %v4799_v2  ;;  %v4894_v3 = vsel %vm4806_vm14, %v4799_v2, %v19845_v62  ;;  %9860 = vmatprep.subr.bf16.mxu0 %v9859_v5  ;;  %11870 = vrot.lane.b32.xlu0 %v11869_v24, %s12299_s9  ;;  %v9863_v6 = vpack.c.bf16 %v5689_v39, %v5679_v55  ;;  %v12209_v62 = vld [vmem:[#allocation2 + $0x90] sm:$0xff]  ;;  %v12210_v5 = vld [vmem:[#allocation2 + $0x28] sm:$0xff]  ;;  %v18770_v57 = vunpack.i.h.bf16 %v16752_v40 }
 0x42a   :  { %9230 = vmatprep.subr.msk.mxu1 %vm1813_vm12, %v4894_v3  ;;  %6178 = vmatprep.mubr.f32.mxu0 %v18962_v21  ;;  %v9865_v27 = vpack.c.bf16 %v5688_v26, %v5678_v52  ;;  %v16928_v2 = vpack.i.bf16 %v12209_v62, %v12208_v33  ;;  %v12211_v24 = vld [vmem:[#allocation2 + $0x30] sm:$0xff]  ;;  %v5699_v7 = vsel %vm5609_vm15, %v16598_v20, %v16647_v60  ;;  %v19911_v44 = vld [vmem:[#allocation17_spill] sm:$0xff]  ;;  %v11593_v52 = vunpack.i.h.bf16 %v16717_v18 }
 0x42b   :  { %9231 = vmatpush1.msk.msra.mxu1 %vm1813_vm12, %v4893_v47  ;;  %v11899_v30 = vpack.i.bf16 %v12211_v24, %v12210_v5  ;;  %v6414_v39 = vsel %vm6412_vm0, %v11582_v22, %v18764_v48  ;;  %v6424_v26 = vsel %vm6412_vm0, %v11587_v46, %v18763_v10  ;;  %v11592_v47 = vunpack.i.l.bf16 %v16717_v18  ;;  %v19912_v60 = vld [vmem:[#allocation18_spill] sm:$0xff] }
 0x42c   :  { %v16926_v58 = vpop.permute.xlu1 %11660  ;;  %9862 = vmatpush1.bf16.msra.mxu0 %v9861_v12  ;;  %11885 = vrot.lane.b32.xlu1 %v19911_v44, %s12299_s9  ;;  %v11656_v55 = vpop.permute.xlu0 %11655  ;;  %v11607_v41 = vunpack.i.l.bf16 %v16752_v40  ;;  %v18771_v33 = vunpack.i.h.bf16 %v16758_v49  ;;  %v11602_v62 = vunpack.i.l.bf16 %v16758_v49  ;;  %v19913_v5 = vunpack.i.h.bf16 %v19824_v38 }
 0x42d   :  { %9864 = vmatprep.subr.bf16.mxu0 %v9863_v6  ;;  %11880 = vrot.lane.b32.xlu0 %v19912_v60, %s12299_s9  ;;  %v11658_v3 = vunpack.i.h.bf16 %v11656_v55  ;;  %v11657_v12 = vunpack.i.l.bf16 %v11656_v55  ;;  %v19914_v6 = vld [vmem:[#allocation167_spill] sm:$0xff]  ;;  %v19916_v60 = vunpack.i.l.bf16 %v16129_v42  ;;  %v19917_v48 = vunpack.i.h.bf16 %v16129_v42 }
 0x42e   :  { %9232 = vmatmul.mubr.msk.f32.vlgmr.msra.gmra.mrb[78].mxu1 %vm1806_vm13, %v16282_v63  ;;  %v19915_v24 = vunpack.i.h.bf16 %v19914_v6  ;;  %v11613_v63 = vunpack.i.h.bf16 %v16793_v45  ;;  %v11612_v38 = vunpack.i.l.bf16 %v16793_v45  ;;  %v5698_v42 = vsel %vm5609_vm15, %v16671_v25, %v16598_v20 }
 0x42f   :  { %v5612_v18 = vsel %vm5609_vm15, %v19913_v5, %v11657_v12  ;;  %v5613_v10 = vsel %vm5609_vm15, %v11657_v12, %v19916_v60  ;;  %v5623_v51 = vsel %vm5609_vm15, %v11658_v3, %v19917_v48  ;;  %5304 = vmatprep.mubr.f32.mxu1 %v18962_v21  ;;  %v6413_v48 = vsel %vm6412_vm0, %v11592_v47, %v11582_v22 }
 0x430   :  { %v5622_v44 = vsel %vm5609_vm15, %v19915_v24, %v11658_v3  ;;  %v16957_v55 = vpop.permute.xlu1 %6392  ;;  %9866 = vmatpush1.bf16.msra.mxu0 %v9865_v27  ;;  %11895 = vrot.lane.b32.xlu1 %v16928_v2, %s12298_s8  ;;  %v16970_v5 = vpop.permute.xlu0 %11665  ;;  %v9803_v6 = vpack.c.bf16 %v5623_v51, %v5613_v10  ;;  %v6423_v3 = vsel %vm6412_vm0, %v11593_v52, %v11587_v46  ;;  %v18768_v45 = vunpack.i.h.bf16 %v16824_v43 }
 0x431   :  { %v9805_v24 = vpack.c.bf16 %v5622_v44, %v5612_v18  ;;  %9254 = vmatprep.subr.msk.mxu0 %vm1813_vm12, %v5699_v7  ;;  %11890 = vrot.lane.b32.xlu0 %v11889_v9, %s12299_s9  ;;  %v11627_v27 = vunpack.i.l.bf16 %v16824_v43  ;;  %v18769_v12 = vunpack.i.h.bf16 %v16831_v34  ;;  %v11622_v51 = vunpack.i.l.bf16 %v16831_v34 }
 0x432   :  { %9804 = vmatprep.subr.bf16.mxu1 %v9803_v6  ;;  %9233 = vmatmul.mubr.msk.f32.gmra.mrb[80].mxu1 %vm1806_vm13, %v16318_v15  ;;  %v9867_v20 = vpack.c.bf16 %v6424_v26, %v6414_v39  ;;  %v6434_v22 = vsel %vm6412_vm0, %v11602_v62, %v18771_v33  ;;  %v6444_v10 = vsel %vm6412_vm0, %v11607_v41, %v18770_v57  ;;  %v11633_v26 = vunpack.i.h.bf16 %v16857_v31 }
 0x433   :  { %9806 = vmatpush1.bf16.msra.mxu1 %v9805_v24  ;;  %5947 = vmatprep.mubr.f32.mxu1 %v18962_v21  ;;  %v6443_v9 = vsel %vm6412_vm0, %v11613_v63, %v11607_v41  ;;  %v6433_v7 = vsel %vm6412_vm0, %v11612_v38, %v11602_v62  ;;  %v9869_v15 = vpack.c.bf16 %v6423_v3, %v6413_v48  ;;  %v11632_v52 = vunpack.i.l.bf16 %v16857_v31  ;;  %v19918_v41 = vld [vmem:[#allocation85_spill] sm:$0xff] }
 0x434   :  { %v16991_v46 = vpop.permute.xlu1 %11670  ;;  %9255 = vmatpush1.msk.msra.mxu0 %vm1813_vm12, %v5698_v42  ;;  %11900 = vrot.lane.b32.xlu1 %v11899_v30, %s12299_s9  ;;  %v16998_v39 = vpop.permute.xlu0 %6394  ;;  %v18766_v47 = vunpack.i.h.bf16 %v16881_v54  ;;  %v11647_v18 = vunpack.i.l.bf16 %v16881_v54  ;;  %v9871_v62 = vpack.c.bf16 %v6444_v10, %v6434_v22  ;;  %v6454_v30 = vsel %vm6412_vm0, %v11622_v51, %v18769_v12  ;;  %v12212_v42 = vld [vmem:[#allocation2 + $0x2c8] sm:$0x1] }
 0x435   :  { %9868 = vmatprep.subr.bf16.mxu0 %v9867_v20  ;;  %6396 = vrot.lane.b32.xlu0 %v19918_v41, %s12298_s8  ;;  %v6464_v31 = vsel %vm6412_vm0, %v11627_v27, %v18768_v45  ;;  %v18767_v44 = vunpack.i.h.bf16 %v16887_v4  ;;  %v11642_v60 = vunpack.i.l.bf16 %v16887_v4  ;;  %v9873_v63 = vpack.c.bf16 %v6443_v9, %v6433_v7  ;;  %v19919_v9 = vld [vmem:[#allocation24_spill] sm:$0xff] }
 0x436   :  { %9256 = vmatmul.mubr.msk.f32.vlgmr.msra.gmra.mrb[42].mxu0 %vm1806_vm13, %v16710_v19  ;;  %v11653_v6 = vunpack.i.h.bf16 %v16918_v53  ;;  %v11652_v24 = vunpack.i.l.bf16 %v16918_v53  ;;  %v6463_v22 = vsel %vm6412_vm0, %v11633_v26, %v11627_v27  ;;  %v6453_v10 = vsel %vm6412_vm0, %v11632_v52, %v11622_v51 }
 0x437   :  { %9870 = vmatpush1.bf16.msra.mxu0 %v9869_v15  ;;  %6184 = vmatprep.mubr.f32.mxu0 %v18962_v21  ;;  %v9875_v7 = vpack.c.bf16 %v6464_v31, %v6454_v30  ;;  %v6484_v53 = vsel %vm6412_vm0, %v11647_v18, %v18766_v47  ;;  %v19920_v15 = vunpack.i.h.bf16 %v19828_v16  ;;  %v19923_v27 = vunpack.i.l.bf16 %v16190_v0 }
 0x438   :  { %v11676_v38 = vpop.permute.xlu1 %11675  ;;  %9872 = vmatprep.subr.bf16.mxu0 %v9871_v62  ;;  %7195 = vrot.lane.b32.xlu1 %v12212_v42, %s12299_s9  ;;  %v17020_v20 = vpop.permute.xlu0 %6390  ;;  %v19921_v62 = vld [vmem:[#allocation185_spill] sm:$0xff]  ;;  %v19924_v26 = vunpack.i.h.bf16 %v16190_v0  ;;  %v6474_v16 = vsel %vm6412_vm0, %v11642_v60, %v18767_v44  ;;  %v6473_v0 = vsel %vm6412_vm0, %v11652_v24, %v11642_v60  ;;  %v12215_v24 = vld [vmem:[#allocation2 + $0x140] sm:$0xff]  ;;  %v19927_v47 = vunpack.i.h.bf16 %v19833_v35 }
 0x439   :  { %v11678_v48 = vunpack.i.h.bf16 %v11676_v38  ;;  %v11677_v3 = vunpack.i.l.bf16 %v11676_v38  ;;  %11905 = vrot.lane.b32.xlu0 %v19919_v9, %s12299_s9  ;;  %v19922_v38 = vunpack.i.h.bf16 %v19921_v62  ;;  %v18775_v62 = vunpack.i.h.bf16 %v16970_v5 }
 0x43a   :  { %9257 = vmatmul.mubr.msk.f32.gmra.mrb[44].mxu0 %vm1806_vm13, %v16774_v17  ;;  %v9879_v60 = vpack.c.bf16 %v6484_v53, %v6474_v16  ;;  %v18776_v53 = vunpack.i.h.bf16 %v16926_v58  ;;  %v19928_v45 = vunpack.i.l.bf16 %v16206_v14  ;;  %v19929_v12 = vunpack.i.h.bf16 %v16206_v14 }
 0x43b   :  { %v5632_v41 = vsel %vm5609_vm15, %v19920_v15, %v11677_v3  ;;  %v5642_v42 = vsel %vm5609_vm15, %v19922_v38, %v11678_v48  ;;  %v5633_v51 = vsel %vm5609_vm15, %v11677_v3, %v19923_v27  ;;  %v5643_v52 = vsel %vm5609_vm15, %v11678_v48, %v19924_v26  ;;  %9874 = vmatpush1.bf16.msra.mxu0 %v9873_v63  ;;  %v19925_v48 = vld [vmem:[#allocation9_spill] sm:$0xff] }
 0x43c   :  { %v17046_v30 = vpop.permute.xlu1 %11685  ;;  %v9807_v31 = vpack.c.bf16 %v5643_v52, %v5633_v51  ;;  %v9809_v9 = vpack.c.bf16 %v5642_v42, %v5632_v41  ;;  %6673 = vmatprep.mubr.f32.mxu0 %v18962_v21  ;;  %v6483_v3 = vsel %vm6412_vm0, %v11653_v6, %v11647_v18  ;;  %9876 = vmatprep.subr.bf16.mxu0 %v9875_v7  ;;  %v17053_v63 = vpop.permute.xlu0 %11680  ;;  %v11667_v38 = vunpack.i.l.bf16 %v16970_v5  ;;  %v12213_v42 = vld [vmem:[#allocation2 + $0x2d0] sm:$0x1]  ;;  %v12214_v6 = vld [vmem:[#allocation2 + $0xe8] sm:$0xff]  ;;  %v12217_v7 = vld [vmem:[#allocation2 + $0xe0] sm:$0xff] }
 0x43d   :  { %11910 = vrot.lane.b32.xlu1 %v19925_v48, %s12299_s9  ;;  %v9877_v15 = vpack.c.bf16 %v6463_v22, %v6453_v10  ;;  %v18772_v27 = vunpack.i.h.bf16 %v16991_v46  ;;  %v18777_v41 = vunpack.i.l.bf16 %v16991_v46  ;;  %7197 = vrot.lane.b32.xlu0 %v12213_v42, %s12299_s9  ;;  %v11662_v18 = vunpack.i.l.bf16 %v16926_v58  ;;  %v12216_v10 = vld [vmem:[#allocation2 + $0xd8] sm:$0xff] }
 0x43e   :  { %9808 = vmatprep.subr.bf16.mxu1 %v9807_v31  ;;  %v17061_v22 = vpack.i.bf16 %v12215_v24, %v12214_v6  ;;  %v11919_v51 = vpack.i.bf16 %v12217_v7, %v12216_v10  ;;  %v18773_v26 = vunpack.i.h.bf16 %v17046_v30  ;;  %v11687_v52 = vunpack.i.l.bf16 %v17046_v30  ;;  %v12218_v7 = vld [vmem:[#allocation2 + $0x2c0] sm:$0x1] }
 0x43f   :  { %9810 = vmatpush1.bf16.msra.mxu1 %v9809_v9  ;;  %9878 = vmatpush1.bf16.msra.mxu0 %v9877_v15  ;;  %v18774_v48 = vunpack.i.h.bf16 %v17053_v63  ;;  %v11682_v31 = vunpack.i.l.bf16 %v17053_v63  ;;  %v9881_v16 = vpack.c.bf16 %v6483_v3, %v6473_v0  ;;  %v6417_v15 = vsel %vm6412_vm0, %v18777_v41, %v11662_v18 }
 0x440   :  { %v11696_v42 = vpop.permute.xlu1 %11695  ;;  %9880 = vmatprep.subr.bf16.mxu0 %v9879_v60  ;;  %v17070_v24 = vpop.permute.xlu0 %11690  ;;  %v6427_v10 = vsel %vm6412_vm0, %v18772_v27, %v11667_v38  ;;  %v6494_v60 = vsel %vm6412_vm0, %v16957_v55, %v16998_v39  ;;  %v6428_v3 = vsel %vm6412_vm0, %v11667_v38, %v18775_v62  ;;  %v19926_v0 = vunpack.i.h.bf16 %v19839_v29  ;;  %v12221_v62 = vld [vmem:[#allocation2 + $0x198] sm:$0xff] }
 0x441   :  { %11915 = vrot.lane.b32.xlu1 %v17061_v22, %s12298_s8  ;;  %v11698_v9 = vunpack.i.h.bf16 %v11696_v42  ;;  %v11697_v6 = vunpack.i.l.bf16 %v11696_v42  ;;  %7193 = vrot.lane.b32.xlu0 %v12218_v7, %s12299_s9  ;;  %v6438_v29 = vsel %vm6412_vm0, %v11682_v31, %v18774_v48  ;;  %v6448_v35 = vsel %vm6412_vm0, %v11687_v52, %v18773_v26 }
 0x442   :  { %v11692_v14 = vunpack.i.l.bf16 %v17070_v24  ;;  %v9903_v48 = vpack.c.bf16 %v6448_v35, %v6438_v29  ;;  %v17148_v29 = vld [vmem:[#allocation3 + $0x68] sm:$0x1]  ;;  %v19932_v35 = vunpack.i.h.bf16 %v15959_v8 }
 0x443   :  { %v5652_v42 = vsel %vm5609_vm15, %v19926_v0, %v11697_v6  ;;  %v5662_v44 = vsel %vm5609_vm15, %v19927_v47, %v11698_v9  ;;  %v5653_v7 = vsel %vm5609_vm15, %v11697_v6, %v19928_v45  ;;  %v5663_v57 = vsel %vm5609_vm15, %v11698_v9, %v19929_v12  ;;  %9882 = vmatpush1.bf16.msra.mxu0 %v9881_v16  ;;  %v19930_v12 = vld [vmem:[#allocation25_spill] sm:$0xff] }
 0x444   :  { %v9813_v33 = vpack.c.bf16 %v5662_v44, %v5652_v42  ;;  %v17097_v27 = vpop.permute.xlu1 %11705  ;;  %v9811_v47 = vpack.c.bf16 %v5663_v57, %v5653_v7  ;;  %9258 = vmatprep.subr.msk.mxu0 %vm1813_vm12, %v6494_v60  ;;  %v11693_v45 = vunpack.i.h.bf16 %v17070_v24  ;;  %v17112_v16 = vpop.permute.xlu0 %11700  ;;  %v6418_v57 = vsel %vm6412_vm0, %v11662_v18, %v18776_v53  ;;  %v17120_v60 = vld [vmem:[#allocation3 + $0x60] sm:$0xff]  ;;  %v12219_v7 = vld [vmem:[#allocation2 + $0xd0] sm:$0xff] }
 0x445   :  { %11925 = vrot.lane.b32.xlu1 %v19930_v12, %s12299_s9  ;;  %v18780_v44 = vunpack.i.h.bf16 %v17097_v27  ;;  %v11707_v38 = vunpack.i.l.bf16 %v17097_v27  ;;  %11920 = vrot.lane.b32.xlu0 %v11919_v51, %s12299_s9  ;;  %v18781_v9 = vunpack.i.h.bf16 %v17112_v16  ;;  %v11702_v6 = vunpack.i.l.bf16 %v17112_v16  ;;  %v12220_v12 = vld [vmem:[#allocation2 + $0x128] sm:$0xff]  ;;  %v12222_v53 = vld [vmem:[#allocation2 + $0x1f0] sm:$0xff] }
 0x446   :  { %9812 = vmatprep.subr.bf16.mxu1 %v9811_v47  ;;  %v6493_v0 = vsel %vm6412_vm0, %v17020_v20, %v16957_v55  ;;  %v9899_v42 = vpack.c.bf16 %v6428_v3, %v6418_v57  ;;  %v11929_v26 = vpack.i.bf16 %v12220_v12, %v12219_v7  ;;  %v9901_v51 = vpack.c.bf16 %v6427_v10, %v6417_v15 }
 0x447   :  { %9814 = vmatpush1.bf16.msra.mxu1 %v9813_v33  ;;  %v6468_v18 = vsel %vm6412_vm0, %v11707_v38, %v18780_v44  ;;  %9259 = vmatpush1.msk.msra.mxu0 %vm1813_vm12, %v6493_v0  ;;  %v17129_v47 = vpack.i.bf16 %v12222_v53, %v12221_v62  ;;  %v6458_v55 = vsel %vm6412_vm0, %v11702_v6, %v18781_v9  ;;  %v19933_v0 = vunpack.i.l.bf16 %v19873_v23  ;;  %v19949_v44 = vld [vmem:[#allocation200_spill] sm:$0xff]  ;;  %v19951_v9 = vld [vmem:[#allocation110_spill] sm:$0xff] }
 0x448   :  { %v11716_v41 = vpop.permute.xlu1 %11715  ;;  %v6447_v33 = vsel %vm6412_vm0, %v11693_v45, %v11687_v52  ;;  %v6437_v20 = vsel %vm6412_vm0, %v11692_v14, %v11682_v31  ;;  %9900 = vmatprep.subr.bf16.mxu0 %v9899_v42  ;;  %9260 = vmatmul.mubr.msk.f32.vlgmr.msra.gmra.mrb[34].mxu0 %vm1806_vm13, %v17120_v60  ;;  %v17142_v53 = vpop.permute.xlu0 %11710  ;;  %v9907_v3 = vpack.c.bf16 %v6468_v18, %v6458_v55  ;;  %v19931_v31 = vunpack.i.h.bf16 %v15969_v56  ;;  %v12223_v18 = vld [vmem:[#allocation2 + $0x188] sm:$0xff] }
 0x449   :  { %v11718_v15 = vunpack.i.h.bf16 %v11716_v41  ;;  %v11717_v62 = vunpack.i.l.bf16 %v11716_v41  ;;  %9902 = vmatpush1.bf16.msra.mxu0 %v9901_v51  ;;  %11935 = vrot.lane.b32.xlu1 %v17129_v47, %s12298_s8  ;;  %v11713_v10 = vunpack.i.h.bf16 %v17142_v53  ;;  %v11712_v52 = vunpack.i.l.bf16 %v17142_v53  ;;  %v12224_v51 = vld [vmem:[#allocation2 + $0x190] sm:$0xff] }
 0x44a   :  { %9904 = vmatprep.subr.bf16.mxu0 %v9903_v48  ;;  %11930 = vrot.lane.b32.xlu0 %v11929_v26, %s12299_s9  ;;  %v9905_v7 = vpack.c.bf16 %v6447_v33, %v6437_v20  ;;  %v19934_v56 = vunpack.i.h.bf16 %v19873_v23  ;;  %v11939_v55 = vpack.i.bf16 %v12224_v51, %v12223_v18  ;;  %v19937_v18 = vld [vmem:[#allocation10_spill] sm:$0xff] }
 0x44b   :  { %v5672_v41 = vsel %vm5609_vm15, %v19931_v31, %v11717_v62  ;;  %v5682_v57 = vsel %vm5609_vm15, %v19932_v35, %v11718_v15  ;;  %v5673_v42 = vsel %vm5609_vm15, %v11717_v62, %v19933_v0  ;;  %v6467_v12 = vsel %vm6412_vm0, %v11713_v10, %v11707_v38  ;;  %6679 = vmatprep.mubr.f32.mxu0 %v18962_v21  ;;  %v17183_v35 = vld [vmem:[#allocation2 + $0x248] sm:$0xff] }
 0x44c   :  { %v6457_v26 = vsel %vm6412_vm0, %v11712_v52, %v11702_v6  ;;  %v5683_v48 = vsel %vm5609_vm15, %v11718_v15, %v19934_v56  ;;  %v9817_v8 = vpack.c.bf16 %v5682_v57, %v5672_v41  ;;  %v17170_v62 = vpop.permute.xlu1 %11725  ;;  %9261 = vmatmul.mubr.msk.f32.gmra.mrb[36].mxu0 %vm1806_vm13, %v17148_v29  ;;  %v19935_v6 = vld [vmem:[#allocation26_spill] sm:$0xff]  ;;  %v17178_v15 = vpop.permute.xlu0 %11720  ;;  %v19936_v57 = vld [vmem:[#allocation151_spill] sm:$0xff] }
 0x44d   :  { %v9815_v33 = vpack.c.bf16 %v5683_v48, %v5673_v42  ;;  %v9909_v38 = vpack.c.bf16 %v6467_v12, %v6457_v26  ;;  %9906 = vmatpush1.bf16.msra.mxu0 %v9905_v7  ;;  %11945 = vrot.lane.b32.xlu1 %v19935_v6, %s12299_s9  ;;  %v18778_v23 = vunpack.i.h.bf16 %v17170_v62  ;;  %v11727_v20 = vunpack.i.l.bf16 %v17170_v62 }
 0x44e   :  { %11940 = vrot.lane.b32.xlu0 %v11939_v55, %s12299_s9  ;;  %9908 = vmatprep.subr.bf16.mxu0 %v9907_v3  ;;  %v18779_v31 = vunpack.i.h.bf16 %v17178_v15  ;;  %v11722_v41 = vunpack.i.l.bf16 %v17178_v15  ;;  %v11954_v0 = vpack.i.bf16 %v19936_v57, %v17183_v35  ;;  %v12226_v55 = vld [vmem:[#allocation2 + $0x238] sm:$0xff] }
 0x44f   :  { %9816 = vmatprep.subr.bf16.mxu1 %v9815_v33  ;;  %v6488_v42 = vsel %vm6412_vm0, %v11727_v20, %v18778_v23  ;;  %6827 = vmatprep.mubr.f32.mxu0 %v18962_v21  ;;  %v12227_v33 = vld [vmem:[#allocation2 + $0x240] sm:$0xff] }
 0x450   :  { %9818 = vmatpush1.bf16.msra.mxu1 %v9817_v8  ;;  %v11736_v7 = vpop.permute.xlu1 %11735  ;;  %v6478_v3 = vsel %vm6412_vm0, %v11722_v41, %v18779_v31  ;;  %v17195_v56 = vpop.permute.xlu0 %11730  ;;  %v11959_v6 = vpack.i.bf16 %v12227_v33, %v12226_v55 }
 0x451   :  { %11955 = vrot.lane.b32.xlu1 %v11954_v0, %s12298_s8  ;;  %9910 = vmatpush1.bf16.msra.mxu0 %v9909_v38  ;;  %v11738_v12 = vunpack.i.h.bf16 %v11736_v7  ;;  %v11737_v26 = vunpack.i.l.bf16 %v11736_v7  ;;  %v9911_v48 = vpack.c.bf16 %v6488_v42, %v6478_v3  ;;  %v11733_v51 = vunpack.i.h.bf16 %v17195_v56 }
 0x452   :  { %11950 = vrot.lane.b32.xlu0 %v19937_v18, %s12299_s9  ;;  %v11732_v8 = vunpack.i.l.bf16 %v17195_v56  ;;  %v19938_v42 = vunpack.i.l.bf16 %v19875_v59  ;;  %v19939_v3 = vunpack.i.h.bf16 %v19875_v59 }
 0x453   :  { %9912 = vmatprep.subr.bf16.mxu0 %v9911_v48  ;;  %v6487_v38 = vsel %vm6412_vm0, %v11733_v51, %v11727_v20  ;;  %v19940_v48 = vld [vmem:[#allocation27_spill] sm:$0xff]  ;;  %v19941_v20 = vunpack.i.h.bf16 %v16058_v37  ;;  %v12229_v37 = vld [vmem:[#allocation2 + $0x288] sm:$0xff] }
 0x454   :  { %v6477_v57 = vsel %vm6412_vm0, %v11732_v8, %v11722_v41  ;;  %v11741_v0 = vpop.permute.xlu1 %11740  ;;  %v5617_v7 = vsel %vm5609_vm15, %v11737_v26, %v19938_v42  ;;  %v5627_v18 = vsel %vm5609_vm15, %v11738_v12, %v19939_v3  ;;  %v5594_v55 = vpop.permute.xlu0 %5593  ;;  %v19942_v41 = vunpack.i.h.bf16 %v16039_v32  ;;  %v19943_v42 = vld [vmem:[#allocation51_spill] sm:$0xff]  ;;  %v12228_v3 = vld [vmem:[#allocation2 + $0x230] sm:$0xff] }
 0x455   :  { %v9913_v23 = vpack.c.bf16 %v6487_v38, %v6477_v57  ;;  %11965 = vrot.lane.b32.xlu1 %v19940_v48, %s12299_s9  ;;  %v5616_v33 = vsel %vm5609_vm15, %v19941_v20, %v11737_v26  ;;  %v5692_v59 = vsel %vm5609_vm15, %v19943_v42, %v5594_v55  ;;  %v5693_v38 = vsel %vm5609_vm15, %v5594_v55, %v19894_v1 }
 0x456   :  { %v5626_v31 = vsel %vm5609_vm15, %v19942_v41, %v11738_v12  ;;  %11960 = vrot.lane.b32.xlu0 %v11959_v6, %s12299_s9  ;;  %9242 = vmatprep.subr.msk.mxu1 %vm1813_vm12, %v5693_v38  ;;  %v9835_v57 = vpack.c.bf16 %v5627_v18, %v5617_v7  ;;  %v11969_v48 = vpack.i.bf16 %v12229_v37, %v12228_v3  ;;  %v19944_v12 = vld [vmem:[#allocation190_spill] sm:$0xff]  ;;  %v12230_v7 = vld [vmem:[#allocation2 + $0x48] sm:$0xff] }
 0x457   :  { %9914 = vmatpush1.bf16.msra.mxu0 %v9913_v23  ;;  %9243 = vmatpush1.msk.msra.mxu1 %vm1813_vm12, %v5692_v59  ;;  %v9837_v26 = vpack.c.bf16 %v5626_v31, %v5616_v33  ;;  %v12231_v18 = vld [vmem:[#allocation2 + $0x50] sm:$0xff]  ;;  %v11743_v31 = vunpack.i.h.bf16 %v11741_v0  ;;  %v11742_v33 = vunpack.i.l.bf16 %v11741_v0 }
 0x458   :  { %v6401_v32 = vpop.permute.xlu1 %6400  ;;  %v11746_v6 = vpop.permute.xlu0 %11745  ;;  %9836 = vmatprep.subr.bf16.mxu1 %v9835_v57  ;;  %9244 = vmatmul.mubr.msk.f32.vlgmr.msra.gmra.mrb[74].mxu1 %vm1806_vm13, %v16710_v19  ;;  %v11979_v55 = vpack.i.bf16 %v12231_v18, %v12230_v7  ;;  %v19945_v19 = vld [vmem:[#allocation12_spill] sm:$0xff]  ;;  %v19946_v18 = vld [vmem:[#allocation34_spill] sm:$0xff] }
 0x459   :  { %6404 = vrot.lane.b32.xlu1 %v19944_v12, %s12298_s8  ;;  %v11748_v1 = vunpack.i.h.bf16 %v11746_v6  ;;  %v11747_v23 = vunpack.i.l.bf16 %v11746_v6  ;;  %9838 = vmatpush1.bf16.msra.mxu1 %v9837_v26  ;;  %v6422_v6 = vsel %vm6412_vm0, %v11742_v33, %v11743_v31  ;;  %v19952_v31 = vunpack.i.l.bf16 %v19951_v9 }
 0x45a   :  { %11970 = vrot.lane.b32.xlu0 %v11969_v48, %s12299_s9  ;;  %5953 = vmatprep.mubr.f32.mxu1 %v18962_v21  ;;  %v12232_v48 = vld [vmem:[#allocation2 + $0x2e8] sm:$0x1] }
 0x45b   :  { %v6432_v3 = vsel %vm6412_vm0, %v11747_v23, %v11748_v1 }
 0x45c   :  { %v17234_v20 = vpop.permute.xlu1 %11750  ;;  %v17239_v59 = vpop.permute.xlu0 %6402  ;;  %9245 = vmatmul.mubr.msk.f32.gmra.mrb[76].mxu1 %vm1806_vm13, %v16774_v17  ;;  %v9931_v1 = vpack.c.bf16 %v6432_v3, %v6422_v6 }
 0x45d   :  { %11980 = vrot.lane.b32.xlu1 %v11979_v55, %s12299_s9  ;;  %v18782_v41 = vunpack.i.h.bf16 %v17234_v20  ;;  %v18783_v42 = vunpack.i.l.bf16 %v17234_v20  ;;  %v6498_v38 = vsel %vm6412_vm0, %v6401_v32, %v17239_v59  ;;  %6101 = vmatprep.mubr.f32.mxu1 %v18962_v21 }
 0x45e   :  { %11975 = vrot.lane.b32.xlu0 %v19945_v19, %s12299_s9  ;;  %9266 = vmatprep.subr.msk.mxu0 %vm1813_vm12, %v6498_v38 }
 0x45f   :  { %v6421_v0 = vsel %vm6412_vm0, %v18783_v42, %v11742_v33  ;;  %v6431_v57 = vsel %vm6412_vm0, %v18782_v41, %v11747_v23  ;;  %v19947_v23 = vld [vmem:[#allocation162_spill] sm:$0xff] }
 0x460   :  { %v11756_v37 = vpop.permute.xlu1 %11755  ;;  %v17257_v12 = vpop.permute.xlu0 %6398  ;;  %v9933_v7 = vpack.c.bf16 %v6431_v57, %v6421_v0  ;;  %v19948_v19 = vunpack.i.h.bf16 %v19947_v23  ;;  %v19953_v0 = vunpack.i.h.bf16 %v19951_v9 }
 0x461   :  { %7203 = vrot.lane.b32.xlu1 %v12232_v48, %s12299_s9  ;;  %v11758_v26 = vunpack.i.h.bf16 %v11756_v37  ;;  %v11757_v17 = vunpack.i.l.bf16 %v11756_v37  ;;  %v6497_v55 = vsel %vm6412_vm0, %v17257_v12, %v6401_v32  ;;  %v19950_v48 = vunpack.i.h.bf16 %v19949_v44  ;;  %v19954_v44 = vld [vmem:[#allocation11_spill] sm:$0xff] }
 0x462   :  { %11985 = vrot.lane.b32.xlu0 %v19946_v18, %s12299_s9  ;;  %9267 = vmatpush1.msk.msra.mxu0 %vm1813_vm12, %v6497_v55 }
 0x463   :  { %v5636_v38 = vsel %vm5609_vm15, %v19948_v19, %v11757_v17  ;;  %v5646_v37 = vsel %vm5609_vm15, %v19950_v48, %v11758_v26  ;;  %v5637_v33 = vsel %vm5609_vm15, %v11757_v17, %v19952_v31  ;;  %v5647_v57 = vsel %vm5609_vm15, %v11758_v26, %v19953_v0  ;;  %9932 = vmatprep.subr.bf16.mxu0 %v9931_v1  ;;  %v12233_v19 = vld [vmem:[#allocation2 + $0x2f0] sm:$0x1]  ;;  %v19955_v48 = vld [vmem:[#allocation21_spill] sm:$0xff]  ;;  %v12234_v0 = vld [vmem:[#allocation2 + $0x2e0] sm:$0x1] }
 0x464   :  { %v9841_v32 = vpack.c.bf16 %v5646_v37, %v5636_v38  ;;  %v11766_v3 = vpop.permute.xlu1 %11765  ;;  %9268 = vmatmul.mubr.msk.f32.vlgmr.msra.gmra.mrb[38].mxu0 %vm1806_vm13, %v17120_v60  ;;  %v9839_v6 = vpack.c.bf16 %v5647_v57, %v5637_v33  ;;  %v11761_v23 = vpop.permute.xlu0 %11760 }
 0x465   :  { %11990 = vrot.lane.b32.xlu1 %v19954_v44, %s12299_s9  ;;  %v11768_v18 = vunpack.i.h.bf16 %v11766_v3  ;;  %v11767_v55 = vunpack.i.l.bf16 %v11766_v3  ;;  %9934 = vmatpush1.bf16.msra.mxu0 %v9933_v7  ;;  %v11763_v9 = vunpack.i.h.bf16 %v11761_v23  ;;  %v11762_v17 = vunpack.i.l.bf16 %v11761_v23  ;;  %v12235_v3 = vld [vmem:[#allocation2 + $0xf8] sm:$0xff] }
 0x466   :  { %7205 = vrot.lane.b32.xlu0 %v12233_v19, %s12299_s9  ;;  %9840 = vmatprep.subr.bf16.mxu1 %v9839_v6  ;;  %v12236_v6 = vld [vmem:[#allocation2 + $0x100] sm:$0xff] }
 0x467   :  { %9842 = vmatpush1.bf16.msra.mxu1 %v9841_v32  ;;  %v6452_v26 = vsel %vm6412_vm0, %v11767_v55, %v11768_v18  ;;  %6833 = vmatprep.mubr.f32.mxu0 %v18962_v21  ;;  %v6442_v38 = vsel %vm6412_vm0, %v11762_v17, %v11763_v9  ;;  %v11999_v44 = vpack.i.bf16 %v12236_v6, %v12235_v3  ;;  %v19956_v18 = vld [vmem:[#allocation208_spill] sm:$0xff]  ;;  %v19958_v9 = vld [vmem:[#allocation141_spill] sm:$0xff] }
 0x468   :  { %v11776_v1 = vpop.permute.xlu1 %11775  ;;  %9269 = vmatmul.mubr.msk.f32.gmra.mrb[40].mxu0 %vm1806_vm13, %v17148_v29  ;;  %v17289_v31 = vpop.permute.xlu0 %11770  ;;  %v9935_v33 = vpack.c.bf16 %v6452_v26, %v6442_v38  ;;  %v19957_v23 = vunpack.i.h.bf16 %v19956_v18  ;;  %v19960_v38 = vunpack.i.l.bf16 %v19897_v36 }
 0x469   :  { %11995 = vrot.lane.b32.xlu1 %v19955_v48, %s12299_s9  ;;  %v11778_v7 = vunpack.i.h.bf16 %v11776_v1  ;;  %v11777_v37 = vunpack.i.l.bf16 %v11776_v1  ;;  %6981 = vmatprep.mubr.f32.mxu0 %v18962_v21  ;;  %v18784_v57 = vunpack.i.h.bf16 %v17289_v31  ;;  %v11772_v32 = vunpack.i.l.bf16 %v17289_v31 }
 0x46a   :  { %7201 = vrot.lane.b32.xlu0 %v12234_v0, %s12299_s9  ;;  %v19959_v1 = vunpack.i.h.bf16 %v19958_v9  ;;  %9936 = vmatprep.subr.bf16.mxu0 %v9935_v33  ;;  %v19961_v0 = vunpack.i.h.bf16 %v19897_v36  ;;  %v19962_v9 = vld [vmem:[#allocation39_spill] sm:$0xff] }
 0x46b   :  { %v5656_v19 = vsel %vm5609_vm15, %v19957_v23, %v11777_v37  ;;  %v5657_v48 = vsel %vm5609_vm15, %v11777_v37, %v19960_v38  ;;  %v6451_v3 = vsel %vm6412_vm0, %v18784_v57, %v11767_v55  ;;  %v6441_v6 = vsel %vm6412_vm0, %v11772_v32, %v11762_v17 }
 0x46c   :  { %v5666_v26 = vsel %vm5609_vm15, %v19959_v1, %v11778_v7  ;;  %v5667_v41 = vsel %vm5609_vm15, %v11778_v7, %v19961_v0  ;;  %v11786_v18 = vpop.permute.xlu1 %11785  ;;  %v9937_v33 = vpack.c.bf16 %v6451_v3, %v6441_v6  ;;  %v11781_v36 = vpop.permute.xlu0 %11780 }
 0x46d   :  { %v9845_v42 = vpack.c.bf16 %v5666_v26, %v5656_v19  ;;  %v9843_v23 = vpack.c.bf16 %v5667_v41, %v5657_v48  ;;  %12005 = vrot.lane.b32.xlu1 %v19962_v9, %s12299_s9  ;;  %v11788_v37 = vunpack.i.h.bf16 %v11786_v18  ;;  %v11787_v1 = vunpack.i.l.bf16 %v11786_v18  ;;  %v19963_v41 = vld [vmem:[#allocation22_spill] sm:$0xff]  ;;  %v19964_v48 = vld [vmem:[#allocation19_spill] sm:$0xff]  ;;  %v12237_v18 = vld [vmem:[#allocation2 + $0x1a8] sm:$0xff] }
 0x46e   :  { %12000 = vrot.lane.b32.xlu0 %v11999_v44, %s12299_s9  ;;  %v11783_v7 = vunpack.i.h.bf16 %v11781_v36  ;;  %v11782_v19 = vunpack.i.l.bf16 %v11781_v36  ;;  %9938 = vmatpush1.bf16.msra.mxu0 %v9937_v33  ;;  %v19965_v9 = vld [vmem:[#allocation56_spill] sm:$0xff] }
 0x46f   :  { %9844 = vmatprep.subr.bf16.mxu1 %v9843_v23  ;;  %v6472_v55 = vsel %vm6412_vm0, %v11787_v1, %v11788_v37  ;;  %v12238_v23 = vld [vmem:[#allocation2 + $0x1b0] sm:$0xff]  ;;  %v19966_v37 = vunpack.i.h.bf16 %v19965_v9 }
 0x470   :  { %9846 = vmatpush1.bf16.msra.mxu1 %v9845_v42  ;;  %v6462_v17 = vsel %vm6412_vm0, %v11782_v19, %v11783_v7  ;;  %v11796_v26 = vpop.permute.xlu1 %11795  ;;  %v17322_v44 = vpop.permute.xlu0 %11790  ;;  %v12019_v33 = vpack.i.bf16 %v12238_v23, %v12237_v18  ;;  %v19967_v7 = vld [vmem:[#allocation159_spill] sm:$0xff]  ;;  %v19970_v23 = vld [vmem:[#allocation44_spill] sm:$0xff] }
 0x471   :  { %12015 = vrot.lane.b32.xlu1 %v19963_v41, %s12299_s9  ;;  %v9939_v38 = vpack.c.bf16 %v6472_v55, %v6462_v17  ;;  %v11798_v0 = vunpack.i.h.bf16 %v11796_v26  ;;  %v11797_v3 = vunpack.i.l.bf16 %v11796_v26  ;;  %v11793_v6 = vunpack.i.h.bf16 %v17322_v44 }
 0x472   :  { %12010 = vrot.lane.b32.xlu0 %v19964_v48, %s12299_s9  ;;  %v11792_v42 = vunpack.i.l.bf16 %v17322_v44  ;;  %v19968_v55 = vunpack.i.h.bf16 %v19967_v7  ;;  %v19969_v26 = vunpack.i.h.bf16 %v16588_v28 }
 0x473   :  { %9940 = vmatprep.subr.bf16.mxu0 %v9939_v38  ;;  %v5676_v36 = vsel %vm5609_vm15, %v19966_v37, %v11797_v3  ;;  %v5677_v41 = vsel %vm5609_vm15, %v11797_v3, %v11572_v50  ;;  %v6471_v38 = vsel %vm6412_vm0, %v11793_v6, %v11787_v1 }
 0x474   :  { %v5686_v17 = vsel %vm5609_vm15, %v19968_v55, %v11798_v0  ;;  %v5687_v48 = vsel %vm5609_vm15, %v11798_v0, %v19969_v26  ;;  %v6461_v18 = vsel %vm6412_vm0, %v11792_v42, %v11782_v19  ;;  %v11806_v9 = vpop.permute.xlu1 %11805  ;;  %v11801_v0 = vpop.permute.xlu0 %11800 }
 0x475   :  { %v9849_v57 = vpack.c.bf16 %v5686_v17, %v5676_v36  ;;  %12025 = vrot.lane.b32.xlu1 %v19970_v23, %s12299_s9  ;;  %v9847_v37 = vpack.c.bf16 %v5687_v48, %v5677_v41  ;;  %v9941_v7 = vpack.c.bf16 %v6471_v38, %v6461_v18  ;;  %v11808_v50 = vunpack.i.h.bf16 %v11806_v9  ;;  %v19971_v17 = vld [vmem:[#allocation20_spill] sm:$0xff] }
 0x476   :  { %12020 = vrot.lane.b32.xlu0 %v12019_v33, %s12299_s9  ;;  %v11807_v28 = vunpack.i.l.bf16 %v11806_v9  ;;  %v11803_v3 = vunpack.i.h.bf16 %v11801_v0  ;;  %v11802_v36 = vunpack.i.l.bf16 %v11801_v0  ;;  %v19972_v33 = vld [vmem:[#allocation158_spill] sm:$0xff]  ;;  %v12240_v23 = vld [vmem:[#allocation2 + $0x260] sm:$0xff]  ;;  %v12241_v0 = vld [vmem:[#allocation3 + $0x50] sm:$0xff] }
 0x477   :  { %9848 = vmatprep.subr.bf16.mxu1 %v9847_v37  ;;  %9942 = vmatpush1.bf16.msra.mxu0 %v9941_v7  ;;  %v19973_v7 = vld [vmem:[#allocation47_spill] sm:$0xff] }
 0x478   :  { %9850 = vmatpush1.bf16.msra.mxu1 %v9849_v57  ;;  %v6492_v1 = vsel %vm6412_vm0, %v11807_v28, %v11808_v50  ;;  %v5602_v19 = vpop.permute.xlu1 %5601  ;;  %v6482_v55 = vsel %vm6412_vm0, %v11802_v36, %v11803_v3  ;;  %v17357_v48 = vpop.permute.xlu0 %11810 }
 0x479   :  { %12035 = vrot.lane.b32.xlu1 %v19909_v13, %s12299_s9  ;;  %v5696_v41 = vsel %vm5609_vm15, %v19972_v33, %v5602_v19  ;;  %v5697_v26 = vsel %vm5609_vm15, %v5602_v19, %v16671_v25  ;;  %v9943_v57 = vpack.c.bf16 %v6492_v1, %v6482_v55  ;;  %v11813_v38 = vunpack.i.h.bf16 %v17357_v48  ;;  %v12239_v13 = vld [vmem:[#allocation2 + $0x258] sm:$0xff] }
 0x47a   :  { %12030 = vrot.lane.b32.xlu0 %v19971_v17, %s12299_s9  ;;  %v11812_v18 = vunpack.i.l.bf16 %v17357_v48  ;;  %9250 = vmatprep.subr.msk.mxu1 %vm1813_vm12, %v5697_v26  ;;  %v12039_v9 = vpack.i.bf16 %v12240_v23, %v12239_v13  ;;  %v19975_v17 = vunpack.i.h.bf16 %v16677_v61  ;;  %v19976_v26 = vunpack.i.l.bf16 %v16991_v46 }
 0x47b   :  { %9944 = vmatprep.subr.bf16.mxu0 %v9943_v57  ;;  %v6491_v37 = vsel %vm6412_vm0, %v11813_v38, %v11807_v28  ;;  %v19974_v28 = vunpack.i.h.bf16 %v16638_v11  ;;  %v19977_v13 = vunpack.i.h.bf16 %v16991_v46 }
 0x47c   :  { %9251 = vmatpush1.msk.msra.mxu1 %vm1813_vm12, %v5696_v41  ;;  %v6481_v25 = vsel %vm6412_vm0, %v11812_v18, %v11802_v36  ;;  %v6409_v50 = vpop.permute.xlu1 %6408  ;;  %v11816_v1 = vpop.permute.xlu0 %11815 }
 0x47d   :  { %12045 = vrot.lane.b32.xlu1 %v19973_v7, %s12299_s9  ;;  %9252 = vmatmul.mubr.msk.f32.vlgmr.msra.gmra.mrb[78].mxu1 %vm1806_vm13, %v12241_v0  ;;  %v9945_v3 = vpack.c.bf16 %v6491_v37, %v6481_v25  ;;  %v11818_v19 = vunpack.i.h.bf16 %v11816_v1  ;;  %v11817_v55 = vunpack.i.l.bf16 %v11816_v1  ;;  %v12242_v25 = vld [vmem:[#allocation3 + $0x58] sm:$0x1]  ;;  %v12243_v0 = vld [vmem:[#allocation2 + $0x308] sm:$0x1]  ;;  %v12244_v1 = vld [vmem:[#allocation2 + $0x2d8] sm:$0x1] }
 0x47e   :  { %12040 = vrot.lane.b32.xlu0 %v12039_v9, %s12299_s9  ;;  %6107 = vmatprep.mubr.f32.mxu1 %v18962_v21  ;;  %v19978_v9 = vld [vmem:[#allocation16_spill] sm:$0xff] }
 0x47f   :  { %9946 = vmatpush1.bf16.msra.mxu0 %v9945_v3  ;;  %v6415_v36 = vsel %vm6412_vm0, %v19974_v28, %v11817_v55  ;;  %v6425_v33 = vsel %vm6412_vm0, %v19975_v17, %v11818_v19  ;;  %v6416_v57 = vsel %vm6412_vm0, %v11817_v55, %v19976_v26  ;;  %v6426_v23 = vsel %vm6412_vm0, %v11818_v19, %v19977_v13  ;;  %v12245_v17 = vld [vmem:[#allocation2 + $0x300] sm:$0x1] }
 0x480   :  { %v17382_v41 = vpop.permute.xlu1 %11820  ;;  %v9885_v11 = vpack.c.bf16 %v6425_v33, %v6415_v36  ;;  %v6411_v61 = vpop.permute.xlu0 %6410  ;;  %v9883_v37 = vpack.c.bf16 %v6426_v23, %v6416_v57  ;;  %v12246_v57 = vld [vmem:[#allocation2 + $0x310] sm:$0x1] }
 0x481   :  { %12055 = vrot.lane.b32.xlu1 %v16928_v2, %s12299_s9  ;;  %9253 = vmatmul.mubr.msk.f32.gmra.mrb[80].mxu1 %vm1806_vm13, %v12242_v25  ;;  %v6502_v2 = vsel %vm6412_vm0, %v6409_v50, %v6411_v61  ;;  %v11823_v46 = vunpack.i.h.bf16 %v17382_v41  ;;  %v11822_v7 = vunpack.i.l.bf16 %v17382_v41  ;;  %v19979_v25 = vunpack.i.h.bf16 %v16758_v49 }
 0x482   :  { %12050 = vrot.lane.b32.xlu0 %v19978_v9, %s12299_s9  ;;  %6750 = vmatprep.mubr.f32.mxu1 %v18962_v21 }
 0x483   :  { %9884 = vmatprep.subr.bf16.mxu1 %v9883_v37  ;;  %9274 = vmatprep.subr.msk.mxu0 %vm1813_vm12, %v6502_v2 }
 0x484   :  { %9886 = vmatpush1.bf16.msra.mxu1 %v9885_v11  ;;  %v17399_v3 = vpop.permute.xlu1 %6406  ;;  %v17404_v55 = vpop.permute.xlu0 %11825 }
 0x485   :  { %7211 = vrot.lane.b32.xlu1 %v12243_v0, %s12299_s9  ;;  %v6501_v19 = vsel %vm6412_vm0, %v17399_v3, %v6409_v50  ;;  %v11828_v28 = vunpack.i.h.bf16 %v17404_v55  ;;  %v11827_v36 = vunpack.i.l.bf16 %v17404_v55  ;;  %v7217_v50 = vsel %vm7215_vm1, %v11822_v7, %v11823_v46 }
 0x486   :  { %7199 = vrot.lane.b32.xlu0 %v12244_v1, %s12299_s9  ;;  %9275 = vmatpush1.msk.msra.mxu0 %vm1813_vm12, %v6501_v19  ;;  %v19980_v0 = vunpack.i.h.bf16 %v16752_v40 }
 0x487   :  { %9276 = vmatmul.mubr.msk.f32.vlgmr.msra.gmra.mrb[42].mxu0 %vm1806_vm13, %v17120_v60  ;;  %v7227_v26 = vsel %vm7215_vm1, %v11827_v36, %v11828_v28 }
 0x488   :  { %v11836_v33 = vpop.permute.xlu1 %11835  ;;  %6987 = vmatprep.mubr.f32.mxu0 %v18962_v21  ;;  %v11831_v11 = vpop.permute.xlu0 %11830  ;;  %v9947_v9 = vpack.c.bf16 %v7227_v26, %v7217_v50 }
 0x489   :  { %7209 = vrot.lane.b32.xlu1 %v12245_v17, %s12299_s9  ;;  %v11838_v13 = vunpack.i.h.bf16 %v11836_v33  ;;  %v11837_v23 = vunpack.i.l.bf16 %v11836_v33  ;;  %v11833_v61 = vunpack.i.h.bf16 %v11831_v11  ;;  %v11832_v37 = vunpack.i.l.bf16 %v11831_v11 }
 0x48a   :  { %7213 = vrot.lane.b32.xlu0 %v12246_v57, %s12299_s9  ;;  %9948 = vmatprep.subr.bf16.mxu0 %v9947_v9 }
 0x48b   :  { %v6435_v2 = vsel %vm6412_vm0, %v19979_v25, %v11837_v23  ;;  %v6445_v1 = vsel %vm6412_vm0, %v19980_v0, %v11838_v13  ;;  %v6436_v19 = vsel %vm6412_vm0, %v11837_v23, %v11692_v14  ;;  %v6446_v17 = vsel %vm6412_vm0, %v11838_v13, %v11693_v45  ;;  %9277 = vmatmul.mubr.msk.f32.gmra.mrb[44].mxu0 %vm1806_vm13, %v17148_v29  ;;  %v12248_v23 = vld [vmem:[#allocation2 + $0x2f8] sm:$0x1] }
 0x48c   :  { %v9889_v33 = vpack.c.bf16 %v6445_v1, %v6435_v2  ;;  %v7216_v50 = vsel %vm7215_vm1, %v11832_v37, %v11822_v7  ;;  %v7226_v49 = vsel %vm7215_vm1, %v11833_v61, %v11827_v36  ;;  %v17436_v40 = vpop.permute.xlu1 %11845  ;;  %v9887_v26 = vpack.c.bf16 %v6446_v17, %v6436_v19  ;;  %v17442_v45 = vpop.permute.xlu0 %11840  ;;  %7476 = vmatprep.mubr.f32.mxu0 %v18962_v21  ;;  %v12247_v36 = vld [vmem:[#allocation2 + $0x2a0] sm:$0xff] }
 0x48d   :  { %12065 = vrot.lane.b32.xlu1 %v17129_v47, %s12299_s9  ;;  %v9949_v57 = vpack.c.bf16 %v7226_v49, %v7216_v50  ;;  %v11848_v14 = vunpack.i.h.bf16 %v17436_v40  ;;  %v11847_v24 = vunpack.i.l.bf16 %v17436_v40  ;;  %v11843_v7 = vunpack.i.h.bf16 %v17442_v45 }
 0x48e   :  { %12060 = vrot.lane.b32.xlu0 %v17061_v22, %s12299_s9  ;;  %v11842_v47 = vunpack.i.l.bf16 %v17442_v45  ;;  %9888 = vmatprep.subr.bf16.mxu1 %v9887_v26  ;;  %v12069_v13 = vpack.i.bf16 %v12247_v36, %v17183_v35  ;;  %v19981_v1 = vunpack.i.h.bf16 %v16831_v34  ;;  %v19982_v17 = vunpack.i.h.bf16 %v16824_v43 }
 0x48f   :  { %9950 = vmatpush1.bf16.msra.mxu0 %v9949_v57  ;;  %9890 = vmatpush1.bf16.msra.mxu1 %v9889_v33  ;;  %v7247_v22 = vsel %vm7215_vm1, %v11847_v24, %v11848_v14 }
 0x490   :  { %v7237_v9 = vsel %vm7215_vm1, %v11842_v47, %v11843_v7 }
 0x491   :  { %7207 = vrot.lane.b32.xlu1 %v12248_v23, %s12299_s9  ;;  %v9951_v35 = vpack.c.bf16 %v7247_v22, %v7237_v9 }
 0x492   :  { %v11856_v11 = vpop.permute.xlu1 %11855  ;;  %12070 = vrot.lane.b32.xlu0 %v12069_v13, %s12299_s9  ;;  %v11851_v25 = vpop.permute.xlu0 %11850 }
 0x493   :  { %v11858_v61 = vunpack.i.h.bf16 %v11856_v11  ;;  %v11857_v37 = vunpack.i.l.bf16 %v11856_v11  ;;  %v11853_v2 = vunpack.i.h.bf16 %v11851_v25  ;;  %v11852_v0 = vunpack.i.l.bf16 %v11851_v25  ;;  %9952 = vmatprep.subr.bf16.mxu0 %v9951_v35 }
 0x495   :  { %v6455_v19 = vsel %vm6412_vm0, %v19981_v1, %v11857_v37  ;;  %v6465_v33 = vsel %vm6412_vm0, %v19982_v17, %v11858_v61  ;;  %v6456_v50 = vsel %vm6412_vm0, %v11857_v37, %v11712_v52  ;;  %v6466_v49 = vsel %vm6412_vm0, %v11858_v61, %v11713_v10 }
 0x496   :  { %v9893_v26 = vpack.c.bf16 %v6465_v33, %v6455_v19  ;;  %v7246_v57 = vsel %vm7215_vm1, %v11853_v2, %v11847_v24  ;;  %v7236_v34 = vsel %vm7215_vm1, %v11852_v0, %v11842_v47  ;;  %v9891_v36 = vpack.c.bf16 %v6466_v49, %v6456_v50  ;;  %v17472_v22 = vpop.permute.xlu1 %11865 }
 0x497   :  { %v9953_v13 = vpack.c.bf16 %v7246_v57, %v7236_v34  ;;  %v11868_v43 = vunpack.i.h.bf16 %v17472_v22  ;;  %v11867_v23 = vunpack.i.l.bf16 %v17472_v22  ;;  %v17476_v11 = vpop.permute.xlu0 %11860  ;;  %v19983_v0 = vunpack.i.h.bf16 %v16887_v4 }
 0x498   :  { %9892 = vmatprep.subr.bf16.mxu1 %v9891_v36  ;;  %v11863_v53 = vunpack.i.h.bf16 %v17476_v11  ;;  %v11862_v10 = vunpack.i.l.bf16 %v17476_v11  ;;  %v19984_v19 = vunpack.i.h.bf16 %v16881_v54 }
 0x499   :  { %9954 = vmatpush1.bf16.msra.mxu0 %v9953_v13  ;;  %9894 = vmatpush1.bf16.msra.mxu1 %v9893_v26  ;;  %v7267_v52 = vsel %vm7215_vm1, %v11867_v23, %v11868_v43 }
 0x49a   :  { %v11876_v24 = vpop.permute.xlu1 %11875  ;;  %v7257_v47 = vsel %vm7215_vm1, %v11862_v10, %v11863_v53 }
 0x49b   :  { %v11878_v9 = vunpack.i.h.bf16 %v11876_v24  ;;  %v11877_v61 = vunpack.i.l.bf16 %v11876_v24  ;;  %v11871_v37 = vpop.permute.xlu0 %11870  ;;  %v9955_v25 = vpack.c.bf16 %v7267_v52, %v7257_v47 }
 0x49c   :  { %v11873_v35 = vunpack.i.h.bf16 %v11871_v37  ;;  %v11872_v2 = vunpack.i.l.bf16 %v11871_v37 }
 0x49d   :  { %v6475_v1 = vsel %vm6412_vm0, %v19983_v0, %v11877_v61  ;;  %v6485_v17 = vsel %vm6412_vm0, %v19984_v19, %v11878_v9  ;;  %9956 = vmatprep.subr.bf16.mxu0 %v9955_v25  ;;  %v6476_v33 = vsel %vm6412_vm0, %v11877_v61, %v11732_v8  ;;  %v6486_v50 = vsel %vm6412_vm0, %v11878_v9, %v11733_v51 }
 0x49e   :  { %v9897_v49 = vpack.c.bf16 %v6485_v17, %v6475_v1  ;;  %v7266_v26 = vsel %vm7215_vm1, %v11873_v35, %v11867_v23  ;;  %v7256_v4 = vsel %vm7215_vm1, %v11872_v2, %v11862_v10  ;;  %v17500_v57 = vpop.permute.xlu1 %11885  ;;  %v9895_v34 = vpack.c.bf16 %v6486_v50, %v6476_v33 }
 0x49f   :  { %v9957_v54 = vpack.c.bf16 %v7266_v26, %v7256_v4  ;;  %v11888_v36 = vunpack.i.h.bf16 %v17500_v57  ;;  %v11887_v13 = vunpack.i.l.bf16 %v17500_v57  ;;  %v17504_v52 = vpop.permute.xlu0 %11880  ;;  %v19985_v1 = vunpack.i.l.bf16 %v17234_v20 }
 0x4a0   :  { %v11883_v8 = vunpack.i.h.bf16 %v17504_v52  ;;  %v11882_v56 = vunpack.i.l.bf16 %v17504_v52  ;;  %9896 = vmatprep.subr.bf16.mxu1 %v9895_v34  ;;  %v19986_v17 = vunpack.i.h.bf16 %v17234_v20  ;;  %v19987_v50 = vunpack.i.h.bf16 %v16926_v58 }
 0x4a1   :  { %9958 = vmatpush1.bf16.msra.mxu0 %v9957_v54  ;;  %9898 = vmatpush1.bf16.msra.mxu1 %v9897_v49  ;;  %v7287_v51 = vsel %vm7215_vm1, %v11887_v13, %v11888_v36  ;;  %v19988_v26 = vunpack.i.h.bf16 %v16970_v5 }
 0x4a2   :  { %v11896_v23 = vpop.permute.xlu1 %11895  ;;  %v7277_v10 = vsel %vm7215_vm1, %v11882_v56, %v11883_v8 }
 0x4a3   :  { %v11898_v24 = vunpack.i.h.bf16 %v11896_v23  ;;  %v11897_v47 = vunpack.i.l.bf16 %v11896_v23  ;;  %v11891_v9 = vpop.permute.xlu0 %11890  ;;  %v9959_v61 = vpack.c.bf16 %v7287_v51, %v7277_v10 }
 0x4a4   :  { %v11893_v37 = vunpack.i.h.bf16 %v11891_v9  ;;  %v11892_v25 = vunpack.i.l.bf16 %v11891_v9 }
 0x4a5   :  { %9960 = vmatprep.subr.bf16.mxu0 %v9959_v61  ;;  %v6420_v19 = vsel %vm6412_vm0, %v11897_v47, %v19985_v1  ;;  %v6430_v33 = vsel %vm6412_vm0, %v11898_v24, %v19986_v17  ;;  %v6419_v49 = vsel %vm6412_vm0, %v19987_v50, %v11897_v47  ;;  %v6429_v4 = vsel %vm6412_vm0, %v19988_v26, %v11898_v24  ;;  %v17569_v50 = vld [vmem:[#allocation3 + $0x70] sm:$0xff] }
 0x4a6   :  { %v7286_v35 = vsel %vm7215_vm1, %v11893_v37, %v11887_v13  ;;  %v7276_v2 = vsel %vm7215_vm1, %v11892_v25, %v11882_v56  ;;  %v17516_v0 = vpop.permute.xlu1 %11900  ;;  %v9915_v20 = vpack.c.bf16 %v6430_v33, %v6420_v19  ;;  %v9917_v51 = vpack.c.bf16 %v6429_v4, %v6419_v49 }
 0x4a7   :  { %v9961_v34 = vpack.c.bf16 %v7286_v35, %v7276_v2  ;;  %v6397_v54 = vpop.permute.xlu0 %6396  ;;  %v11903_v10 = vunpack.i.h.bf16 %v17516_v0  ;;  %v11902_v24 = vunpack.i.l.bf16 %v17516_v0 }
 0x4a8   :  { %v6495_v13 = vsel %vm6412_vm0, %v16998_v39, %v6397_v54  ;;  %v6496_v56 = vsel %vm6412_vm0, %v6397_v54, %v17257_v12 }
 0x4a9   :  { %9262 = vmatprep.subr.msk.mxu1 %vm1813_vm12, %v6496_v56  ;;  %9962 = vmatpush1.bf16.msra.mxu0 %v9961_v34  ;;  %v7221_v33 = vsel %vm7215_vm1, %v11902_v24, %v11903_v10  ;;  %v19989_v34 = vunpack.i.h.bf16 %v17053_v63 }
 0x4aa   :  { %9263 = vmatpush1.msk.msra.mxu1 %vm1813_vm12, %v6495_v13  ;;  %v7196_v58 = vpop.permute.xlu1 %7195  ;;  %v19990_v13 = vunpack.i.h.bf16 %v17046_v30 }
 0x4ab   :  { %v17536_v23 = vpop.permute.xlu0 %11905  ;;  %9916 = vmatprep.subr.bf16.mxu1 %v9915_v20  ;;  %9264 = vmatmul.mubr.msk.f32.vlgmr.msra.gmra.mrb[74].mxu1 %vm1806_vm13, %v17120_v60 }
 0x4ac   :  { %9918 = vmatpush1.bf16.msra.mxu1 %v9917_v51  ;;  %6756 = vmatprep.mubr.f32.mxu1 %v18962_v21  ;;  %v11908_v5 = vunpack.i.h.bf16 %v17536_v23  ;;  %v11907_v39 = vunpack.i.l.bf16 %v17536_v23  ;;  %v19991_v51 = vunpack.i.h.bf16 %v17289_v31  ;;  %v17594_v31 = vld [vmem:[#allocation3 + $0x78] sm:$0x1]  ;;  %v7831_v23 = vld [vmem:[#allocation2 + $0x60] sm:$0xff] }
 0x4ae   :  { %v7231_v35 = vsel %vm7215_vm1, %v11907_v39, %v11908_v5 }
 0x4af   :  { %v17543_v12 = vpop.permute.xlu1 %11910  ;;  %v17549_v61 = vpop.permute.xlu0 %7197  ;;  %9265 = vmatmul.mubr.msk.f32.gmra.mrb[76].mxu1 %vm1806_vm13, %v17148_v29  ;;  %v9979_v4 = vpack.c.bf16 %v7231_v35, %v7221_v33 }
 0x4b0   :  { %v11913_v47 = vunpack.i.h.bf16 %v17543_v12  ;;  %v11912_v9 = vunpack.i.l.bf16 %v17543_v12  ;;  %v7297_v60 = vsel %vm7215_vm1, %v7196_v58, %v17549_v61  ;;  %6904 = vmatprep.mubr.f32.mxu1 %v18962_v21 }
 0x4b1   :  { %9278 = vmatprep.subr.msk.mxu0 %vm1813_vm12, %v7297_v60 }
 0x4b2   :  { %v7220_v37 = vsel %vm7215_vm1, %v11912_v9, %v11902_v24  ;;  %v7230_v25 = vsel %vm7215_vm1, %v11913_v47, %v11907_v39 }
 0x4b3   :  { %v11916_v2 = vpop.permute.xlu1 %11915  ;;  %v7194_v17 = vpop.permute.xlu0 %7193  ;;  %v9981_v49 = vpack.c.bf16 %v7230_v25, %v7220_v37 }
 0x4b4   :  { %v11918_v1 = vunpack.i.h.bf16 %v11916_v2  ;;  %v11917_v19 = vunpack.i.l.bf16 %v11916_v2  ;;  %v7296_v26 = vsel %vm7215_vm1, %v7194_v17, %v7196_v58 }
 0x4b5   :  { %9279 = vmatpush1.msk.msra.mxu0 %vm1813_vm12, %v7296_v26 }
 0x4b6   :  { %v6439_v54 = vsel %vm6412_vm0, %v19989_v34, %v11917_v19  ;;  %v6449_v56 = vsel %vm6412_vm0, %v19990_v13, %v11918_v1  ;;  %v6440_v20 = vsel %vm6412_vm0, %v11917_v19, %v11772_v32  ;;  %v6450_v39 = vsel %vm6412_vm0, %v11918_v1, %v19991_v51  ;;  %9980 = vmatprep.subr.bf16.mxu0 %v9979_v4 }
 0x4b7   :  { %v9921_v58 = vpack.c.bf16 %v6449_v56, %v6439_v54  ;;  %v17585_v24 = vpop.permute.xlu1 %11925  ;;  %9280 = vmatmul.mubr.msk.f32.vlgmr.msra.gmra.mrb[34].mxu0 %vm1806_vm13, %v17569_v50  ;;  %v9919_v30 = vpack.c.bf16 %v6450_v39, %v6440_v20  ;;  %v17591_v37 = vpop.permute.xlu0 %11920  ;;  %v19992_v34 = vunpack.i.h.bf16 %v17112_v16  ;;  %v19993_v13 = vunpack.i.h.bf16 %v17097_v27 }
 0x4b8   :  { %v11928_v63 = vunpack.i.h.bf16 %v17585_v24  ;;  %v11927_v60 = vunpack.i.l.bf16 %v17585_v24  ;;  %9982 = vmatpush1.bf16.msra.mxu0 %v9981_v49  ;;  %7482 = vmatprep.mubr.f32.mxu0 %v18962_v21  ;;  %v11923_v32 = vunpack.i.h.bf16 %v17591_v37  ;;  %v11922_v25 = vunpack.i.l.bf16 %v17591_v37  ;;  %v7860_v37 = vld [vmem:[#allocation2 + $0x160] sm:$0xff] }
 0x4b9   :  { %9920 = vmatprep.subr.bf16.mxu1 %v9919_v30 }
 0x4ba   :  { %9922 = vmatpush1.bf16.msra.mxu1 %v9921_v58  ;;  %v7251_v35 = vsel %vm7215_vm1, %v11927_v60, %v11928_v63  ;;  %v7241_v2 = vsel %vm7215_vm1, %v11922_v25, %v11923_v32 }
 0x4bb   :  { %9281 = vmatmul.mubr.msk.f32.gmra.mrb[36].mxu0 %vm1806_vm13, %v17594_v31  ;;  %v11936_v1 = vpop.permute.xlu1 %11935  ;;  %v9983_v19 = vpack.c.bf16 %v7251_v35, %v7241_v2 }
 0x4bc   :  { %7630 = vmatprep.mubr.f32.mxu0 %v18962_v21  ;;  %v11938_v17 = vunpack.i.h.bf16 %v11936_v1  ;;  %v11937_v33 = vunpack.i.l.bf16 %v11936_v1  ;;  %v17607_v49 = vpop.permute.xlu0 %11930 }
 0x4bd   :  { %v11933_v26 = vunpack.i.h.bf16 %v17607_v49  ;;  %v11932_v4 = vunpack.i.l.bf16 %v17607_v49  ;;  %9984 = vmatprep.subr.bf16.mxu0 %v9983_v19 }
 0x4be   :  { %v6459_v54 = vsel %vm6412_vm0, %v19992_v34, %v11937_v33  ;;  %v6469_v56 = vsel %vm6412_vm0, %v19993_v13, %v11938_v17  ;;  %v6460_v20 = vsel %vm6412_vm0, %v11937_v33, %v11792_v42  ;;  %v6470_v51 = vsel %vm6412_vm0, %v11938_v17, %v11793_v6 }
 0x4bf   :  { %v9925_v39 = vpack.c.bf16 %v6469_v56, %v6459_v54  ;;  %v7250_v58 = vsel %vm7215_vm1, %v11933_v26, %v11927_v60  ;;  %v7240_v16 = vsel %vm7215_vm1, %v11932_v4, %v11922_v25  ;;  %v17629_v27 = vpop.permute.xlu1 %11945  ;;  %v9923_v30 = vpack.c.bf16 %v6470_v51, %v6460_v20 }
 0x4c0   :  { %v9985_v35 = vpack.c.bf16 %v7250_v58, %v7240_v16  ;;  %v11948_v2 = vunpack.i.h.bf16 %v17629_v27  ;;  %v11947_v42 = vunpack.i.l.bf16 %v17629_v27  ;;  %v17633_v44 = vpop.permute.xlu0 %11940  ;;  %v19994_v20 = vunpack.i.h.bf16 %v17178_v15 }
 0x4c1   :  { %v11943_v6 = vunpack.i.h.bf16 %v17633_v44  ;;  %v11942_v1 = vunpack.i.l.bf16 %v17633_v44  ;;  %9924 = vmatprep.subr.bf16.mxu1 %v9923_v30 }
 0x4c2   :  { %9986 = vmatpush1.bf16.msra.mxu0 %v9985_v35  ;;  %9926 = vmatpush1.bf16.msra.mxu1 %v9925_v39  ;;  %v7271_v60 = vsel %vm7215_vm1, %v11947_v42, %v11948_v2  ;;  %v19995_v39 = vunpack.i.h.bf16 %v17170_v62 }
 0x4c3   :  { %v11956_v25 = vpop.permute.xlu1 %11955  ;;  %v7261_v19 = vsel %vm7215_vm1, %v11942_v1, %v11943_v6 }
 0x4c4   :  { %v11958_v17 = vunpack.i.h.bf16 %v11956_v25  ;;  %v11957_v33 = vunpack.i.l.bf16 %v11956_v25  ;;  %v17643_v34 = vpop.permute.xlu0 %11950  ;;  %v9987_v54 = vpack.c.bf16 %v7271_v60, %v7261_v19 }
 0x4c5   :  { %v11953_v13 = vunpack.i.h.bf16 %v17643_v34  ;;  %v11952_v56 = vunpack.i.l.bf16 %v17643_v34 }
 0x4c6   :  { %v6479_v51 = vsel %vm6412_vm0, %v19994_v20, %v11957_v33  ;;  %v6489_v58 = vsel %vm6412_vm0, %v19995_v39, %v11958_v17  ;;  %9988 = vmatprep.subr.bf16.mxu0 %v9987_v54  ;;  %v6480_v16 = vsel %vm6412_vm0, %v11957_v33, %v11812_v18  ;;  %v6490_v30 = vsel %vm6412_vm0, %v11958_v17, %v11813_v38 }
 0x4c7   :  { %v9929_v35 = vpack.c.bf16 %v6489_v58, %v6479_v51  ;;  %v7270_v15 = vsel %vm7215_vm1, %v11953_v13, %v11947_v42  ;;  %v7260_v62 = vsel %vm7215_vm1, %v11952_v56, %v11942_v1  ;;  %v17665_v60 = vpop.permute.xlu1 %11965  ;;  %v9927_v25 = vpack.c.bf16 %v6490_v30, %v6480_v16 }
 0x4c8   :  { %v9989_v19 = vpack.c.bf16 %v7270_v15, %v7260_v62  ;;  %v11968_v54 = vunpack.i.h.bf16 %v17665_v60  ;;  %v11967_v18 = vunpack.i.l.bf16 %v17665_v60  ;;  %v17669_v48 = vpop.permute.xlu0 %11960  ;;  %v12249_v15 = vld [vmem:[#allocation3 + $0x60] sm:$0xff] }
 0x4c9   :  { %v11963_v38 = vunpack.i.h.bf16 %v17669_v48  ;;  %v11962_v17 = vunpack.i.l.bf16 %v17669_v48  ;;  %9928 = vmatprep.subr.bf16.mxu1 %v9927_v25 }
 0x4ca   :  { %9990 = vmatpush1.bf16.msra.mxu0 %v9989_v19  ;;  %9930 = vmatpush1.bf16.msra.mxu1 %v9929_v35  ;;  %v7291_v42 = vsel %vm7215_vm1, %v11967_v18, %v11968_v54 }
 0x4cb   :  { %v6405_v1 = vpop.permute.xlu1 %6404  ;;  %v7281_v33 = vsel %vm7215_vm1, %v11962_v17, %v11963_v38 }
 0x4cc   :  { %v6499_v20 = vsel %vm6412_vm0, %v17239_v59, %v6405_v1  ;;  %v6500_v51 = vsel %vm6412_vm0, %v6405_v1, %v17399_v3  ;;  %v17683_v39 = vpop.permute.xlu0 %11970  ;;  %v9991_v58 = vpack.c.bf16 %v7291_v42, %v7281_v33 }
 0x4cd   :  { %v11973_v16 = vunpack.i.h.bf16 %v17683_v39  ;;  %v11972_v30 = vunpack.i.l.bf16 %v17683_v39  ;;  %9270 = vmatprep.subr.msk.mxu1 %vm1813_vm12, %v6500_v51 }
 0x4ce   :  { %9992 = vmatprep.subr.bf16.mxu0 %v9991_v58  ;;  %9271 = vmatpush1.msk.msra.mxu1 %vm1813_vm12, %v6499_v20 }
 0x4cf   :  { %v7290_v35 = vsel %vm7215_vm1, %v11973_v16, %v11967_v18  ;;  %v7280_v59 = vsel %vm7215_vm1, %v11972_v30, %v11962_v17  ;;  %v11981_v3 = vpop.permute.xlu1 %11980  ;;  %9272 = vmatmul.mubr.msk.f32.vlgmr.msra.gmra.mrb[78].mxu1 %vm1806_vm13, %v12249_v15 }
 0x4d0   :  { %v9993_v62 = vpack.c.bf16 %v7290_v35, %v7280_v59  ;;  %v11976_v25 = vpop.permute.xlu0 %11975  ;;  %6910 = vmatprep.mubr.f32.mxu1 %v18962_v21  ;;  %v11983_v35 = vunpack.i.h.bf16 %v11981_v3 }
 0x4d1   :  { %v11978_v19 = vunpack.i.h.bf16 %v11976_v25  ;;  %v11977_v42 = vunpack.i.l.bf16 %v11976_v25 }
 0x4d2   :  { %9994 = vmatpush1.bf16.msra.mxu0 %v9993_v62 }
 0x4d3   :  { %v7218_v1 = vsel %vm7215_vm1, %v11823_v46, %v11977_v42  ;;  %v7228_v18 = vsel %vm7215_vm1, %v11828_v28, %v11978_v19  ;;  %v7204_v17 = vpop.permute.xlu1 %7203  ;;  %v7219_v33 = vsel %vm7215_vm1, %v11977_v42, %v11912_v9  ;;  %v7229_v20 = vsel %vm7215_vm1, %v11978_v19, %v11913_v47  ;;  %9273 = vmatmul.mubr.msk.f32.gmra.mrb[80].mxu1 %vm1806_vm13, %v17148_v29 }
 0x4d4   :  { %v9965_v51 = vpack.c.bf16 %v7228_v18, %v7218_v1  ;;  %v11986_v41 = vpop.permute.xlu0 %11985  ;;  %v9963_v58 = vpack.c.bf16 %v7229_v20, %v7219_v33  ;;  %7553 = vmatprep.mubr.f32.mxu1 %v18962_v21  ;;  %v11982_v9 = vunpack.i.l.bf16 %v11981_v3 }
 0x4d5   :  { %v11988_v46 = vunpack.i.h.bf16 %v11986_v41  ;;  %v11987_v55 = vunpack.i.l.bf16 %v11986_v41 }
 0x4d6   :  { %9964 = vmatprep.subr.bf16.mxu1 %v9963_v58  ;;  %v7225_v18 = vsel %vm7215_vm1, %v11982_v9, %v11983_v35 }
 0x4d7   :  { %9966 = vmatpush1.bf16.msra.mxu1 %v9965_v51  ;;  %v17712_v28 = vpop.permute.xlu1 %11990  ;;  %v7235_v3 = vsel %vm7215_vm1, %v11987_v55, %v11988_v46 }
 0x4d8   :  { %v11993_v12 = vunpack.i.h.bf16 %v17712_v28  ;;  %v11992_v47 = vunpack.i.l.bf16 %v17712_v28  ;;  %v17716_v59 = vpop.permute.xlu0 %7205  ;;  %v10011_v51 = vpack.c.bf16 %v7235_v3, %v7225_v18 }
 0x4d9   :  { %v7301_v29 = vsel %vm7215_vm1, %v7204_v17, %v17716_v59 }
 0x4da   :  { %v7224_v15 = vsel %vm7215_vm1, %v11992_v47, %v11982_v9  ;;  %v7234_v62 = vsel %vm7215_vm1, %v11993_v12, %v11987_v55  ;;  %9286 = vmatprep.subr.msk.mxu0 %vm1813_vm12, %v7301_v29 }
 0x4db   :  { %v11996_v25 = vpop.permute.xlu1 %11995  ;;  %v10013_v33 = vpack.c.bf16 %v7234_v62, %v7224_v15 }
 0x4dc   :  { %v11998_v19 = vunpack.i.h.bf16 %v11996_v25  ;;  %v11997_v42 = vunpack.i.l.bf16 %v11996_v25  ;;  %v17728_v1 = vpop.permute.xlu0 %7201 }
 0x4dd   :  { %v7300_v20 = vsel %vm7215_vm1, %v17728_v1, %v7204_v17 }
 0x4de   :  { %v7238_v41 = vsel %vm7215_vm1, %v11843_v7, %v11997_v42  ;;  %v7248_v58 = vsel %vm7215_vm1, %v11848_v14, %v11998_v19  ;;  %9287 = vmatpush1.msk.msra.mxu0 %vm1813_vm12, %v7300_v20  ;;  %v7239_v46 = vsel %vm7215_vm1, %v11997_v42, %v11932_v4  ;;  %v7249_v55 = vsel %vm7215_vm1, %v11998_v19, %v11933_v26 }
 0x4df   :  { %v9969_v17 = vpack.c.bf16 %v7248_v58, %v7238_v41  ;;  %10012 = vmatprep.subr.bf16.mxu0 %v10011_v51  ;;  %v12006_v35 = vpop.permute.xlu1 %12005  ;;  %9288 = vmatmul.mubr.msk.f32.vlgmr.msra.gmra.mrb[38].mxu0 %vm1806_vm13, %v17569_v50  ;;  %v9967_v45 = vpack.c.bf16 %v7249_v55, %v7239_v46 }
 0x4e0   :  { %v12008_v40 = vunpack.i.h.bf16 %v12006_v35  ;;  %v12007_v7 = vunpack.i.l.bf16 %v12006_v35  ;;  %v12001_v14 = vpop.permute.xlu0 %12000  ;;  %10014 = vmatpush1.bf16.msra.mxu0 %v10013_v33  ;;  %7636 = vmatprep.mubr.f32.mxu0 %v18962_v21 }
 0x4e1   :  { %v12003_v9 = vunpack.i.h.bf16 %v12001_v14  ;;  %v12002_v29 = vunpack.i.l.bf16 %v12001_v14  ;;  %9968 = vmatprep.subr.bf16.mxu1 %v9967_v45 }
 0x4e2   :  { %9970 = vmatpush1.bf16.msra.mxu1 %v9969_v17  ;;  %v7255_v49 = vsel %vm7215_vm1, %v12007_v7, %v12008_v40 }
 0x4e3   :  { %v12016_v26 = vpop.permute.xlu1 %12015  ;;  %v7245_v4 = vsel %vm7215_vm1, %v12002_v29, %v12003_v9  ;;  %9289 = vmatmul.mubr.msk.f32.gmra.mrb[40].mxu0 %vm1806_vm13, %v17594_v31 }
 0x4e4   :  { %v12018_v15 = vunpack.i.h.bf16 %v12016_v26  ;;  %v12017_v62 = vunpack.i.l.bf16 %v12016_v26  ;;  %v17753_v3 = vpop.permute.xlu0 %12010  ;;  %v10015_v25 = vpack.c.bf16 %v7255_v49, %v7245_v4  ;;  %7784 = vmatprep.mubr.f32.mxu0 %v18962_v21 }
 0x4e5   :  { %v12013_v19 = vunpack.i.h.bf16 %v17753_v3  ;;  %v12012_v42 = vunpack.i.l.bf16 %v17753_v3  ;;  %v7881_v3 = vld [vmem:[#allocation2 + $0x218] sm:$0xff] }
 0x4e6   :  { %v7258_v18 = vsel %vm7215_vm1, %v11863_v53, %v12017_v62  ;;  %v7268_v33 = vsel %vm7215_vm1, %v11868_v43, %v12018_v15  ;;  %10016 = vmatprep.subr.bf16.mxu0 %v10015_v25  ;;  %v7259_v20 = vsel %vm7215_vm1, %v12017_v62, %v11952_v56  ;;  %v7269_v51 = vsel %vm7215_vm1, %v12018_v15, %v11953_v13 }
 0x4e7   :  { %v9973_v41 = vpack.c.bf16 %v7268_v33, %v7258_v18  ;;  %v7254_v11 = vsel %vm7215_vm1, %v12013_v19, %v12007_v7  ;;  %v7244_v22 = vsel %vm7215_vm1, %v12012_v42, %v12002_v29  ;;  %v12026_v53 = vpop.permute.xlu1 %12025  ;;  %v9971_v43 = vpack.c.bf16 %v7269_v51, %v7259_v20 }
 0x4e8   :  { %v10017_v58 = vpack.c.bf16 %v7254_v11, %v7244_v22  ;;  %v12028_v46 = vunpack.i.h.bf16 %v12026_v53  ;;  %v12027_v55 = vunpack.i.l.bf16 %v12026_v53  ;;  %v12021_v17 = vpop.permute.xlu0 %12020 }
 0x4e9   :  { %v12023_v56 = vunpack.i.h.bf16 %v12021_v17  ;;  %v12022_v35 = vunpack.i.l.bf16 %v12021_v17  ;;  %9972 = vmatprep.subr.bf16.mxu1 %v9971_v43 }
 0x4ea   :  { %10018 = vmatpush1.bf16.msra.mxu0 %v10017_v58  ;;  %9974 = vmatpush1.bf16.msra.mxu1 %v9973_v41  ;;  %v7275_v34 = vsel %vm7215_vm1, %v12027_v55, %v12028_v46 }
 0x4eb   :  { %v12036_v13 = vpop.permute.xlu1 %12035  ;;  %v7265_v45 = vsel %vm7215_vm1, %v12022_v35, %v12023_v56 }
 0x4ec   :  { %v12038_v40 = vunpack.i.h.bf16 %v12036_v13  ;;  %v12037_v7 = vunpack.i.l.bf16 %v12036_v13  ;;  %v17778_v14 = vpop.permute.xlu0 %12030  ;;  %v10019_v9 = vpack.c.bf16 %v7275_v34, %v7265_v45 }
 0x4ed   :  { %v12033_v29 = vunpack.i.h.bf16 %v17778_v14  ;;  %v12032_v49 = vunpack.i.l.bf16 %v17778_v14 }
 0x4ee   :  { %v7278_v26 = vsel %vm7215_vm1, %v11883_v8, %v12037_v7  ;;  %v7288_v4 = vsel %vm7215_vm1, %v11888_v36, %v12038_v40  ;;  %10020 = vmatprep.subr.bf16.mxu0 %v10019_v9  ;;  %v7279_v15 = vsel %vm7215_vm1, %v12037_v7, %v11972_v30  ;;  %v7289_v62 = vsel %vm7215_vm1, %v12038_v40, %v11973_v16 }
 0x4ef   :  { %v9977_v25 = vpack.c.bf16 %v7288_v4, %v7278_v26  ;;  %v7274_v52 = vsel %vm7215_vm1, %v12033_v29, %v12027_v55  ;;  %v7264_v57 = vsel %vm7215_vm1, %v12032_v49, %v12022_v35  ;;  %v12046_v8 = vpop.permute.xlu1 %12045  ;;  %v9975_v36 = vpack.c.bf16 %v7289_v62, %v7279_v15  ;;  %v7821_v4 = vld [vmem:[#allocation2 + $0x8] sm:$0xff]  ;;  %v7851_v15 = vld [vmem:[#allocation2 + $0x110] sm:$0xff] }
 0x4f0   :  { %v10021_v18 = vpack.c.bf16 %v7274_v52, %v7264_v57  ;;  %v12048_v33 = vunpack.i.h.bf16 %v12046_v8  ;;  %v12047_v20 = vunpack.i.l.bf16 %v12046_v8  ;;  %v12041_v51 = vpop.permute.xlu0 %12040  ;;  %v10027_v62 = vpack.c.bf16 %v7831_v23, %v7821_v4  ;;  %v7841_v52 = vld [vmem:[#allocation2 + $0xb8] sm:$0xff]  ;;  %v7835_v23 = vld [vmem:[#allocation2 + $0x80] sm:$0xff] }
 0x4f1   :  { %v12043_v30 = vunpack.i.h.bf16 %v12041_v51  ;;  %v12042_v41 = vunpack.i.l.bf16 %v12041_v51  ;;  %9976 = vmatprep.subr.bf16.mxu1 %v9975_v36  ;;  %v7850_v36 = vld [vmem:[#allocation2 + $0x108] sm:$0xff]  ;;  %v7900_v4 = vld [vmem:[#allocation2 + $0x2c0] sm:$0x1] }
 0x4f2   :  { %10022 = vmatpush1.bf16.msra.mxu0 %v10021_v18  ;;  %9978 = vmatpush1.bf16.msra.mxu1 %v9977_v25  ;;  %v7295_v39 = vsel %vm7215_vm1, %v12047_v20, %v12048_v33  ;;  %v7820_v25 = vld [vmem:[#allocation2] sm:$0xff]  ;;  %v7861_v18 = vld [vmem:[#allocation2 + $0x168] sm:$0xff] }
 0x4f3   :  { %v12056_v16 = vpop.permute.xlu1 %12055  ;;  %v7285_v11 = vsel %vm7215_vm1, %v12042_v41, %v12043_v30  ;;  %v7871_v33 = vld [vmem:[#allocation2 + $0x1c0] sm:$0xff] }
 0x4f4   :  { %v12058_v22 = vunpack.i.h.bf16 %v12056_v16  ;;  %v12057_v53 = vunpack.i.l.bf16 %v12056_v16  ;;  %v17802_v43 = vpop.permute.xlu0 %12050  ;;  %v10023_v58 = vpack.c.bf16 %v7295_v39, %v7285_v11  ;;  %v7840_v11 = vld [vmem:[#allocation2 + $0xb0] sm:$0xff] }
 0x4f5   :  { %v12053_v46 = vunpack.i.h.bf16 %v17802_v43  ;;  %v12052_v55 = vunpack.i.l.bf16 %v17802_v43  ;;  %v7834_v43 = vld [vmem:[#allocation2 + $0x78] sm:$0xff] }
 0x4f6   :  { %10024 = vmatprep.subr.bf16.mxu0 %v10023_v58  ;;  %v7223_v34 = vsel %vm7215_vm1, %v12057_v53, %v11992_v47  ;;  %v7233_v13 = vsel %vm7215_vm1, %v12058_v22, %v11993_v12  ;;  %v7222_v45 = vsel %vm7215_vm1, %v11903_v10, %v12057_v53  ;;  %v7232_v40 = vsel %vm7215_vm1, %v11908_v5, %v12058_v22 }
 0x4f7   :  { %v7294_v17 = vsel %vm7215_vm1, %v12053_v46, %v12047_v20  ;;  %v7284_v56 = vsel %vm7215_vm1, %v12052_v55, %v12042_v41  ;;  %v7212_v35 = vpop.permute.xlu1 %7211  ;;  %v9995_v28 = vpack.c.bf16 %v7233_v13, %v7223_v34  ;;  %v9997_v12 = vpack.c.bf16 %v7232_v40, %v7222_v45  ;;  %v7891_v40 = vld [vmem:[#allocation2 + $0x270] sm:$0xff] }
 0x4f8   :  { %v10025_v7 = vpack.c.bf16 %v7294_v17, %v7284_v56  ;;  %v7200_v9 = vpop.permute.xlu0 %7199  ;;  %v10031_v41 = vpack.c.bf16 %v7851_v15, %v7841_v52  ;;  %v10033_v58 = vpack.c.bf16 %v7850_v36, %v7840_v11  ;;  %v10035_v17 = vpack.c.bf16 %v7871_v33, %v7861_v18  ;;  %v7844_v36 = vld [vmem:[#allocation2 + $0xd0] sm:$0xff]  ;;  %v7843_v33 = vld [vmem:[#allocation2 + $0xc8] sm:$0xff] }
 0x4f9   :  { %v7298_v26 = vsel %vm7215_vm1, %v17549_v61, %v7200_v9  ;;  %v7299_v47 = vsel %vm7215_vm1, %v7200_v9, %v17728_v1  ;;  %v7830_v61 = vld [vmem:[#allocation2 + $0x58] sm:$0xff]  ;;  %v10039_v9 = vpack.c.bf16 %v7891_v40, %v7881_v3  ;;  %v7894_v3 = vld [vmem:[#allocation2 + $0x288] sm:$0xff] }
 0x4fa   :  { %9282 = vmatprep.subr.msk.mxu1 %vm1813_vm12, %v7299_v47  ;;  %10026 = vmatpush1.bf16.msra.mxu0 %v10025_v7  ;;  %v10029_v8 = vpack.c.bf16 %v7830_v61, %v7820_v25  ;;  %v7880_v47 = vld [vmem:[#allocation2 + $0x210] sm:$0xff] }
 0x4fb   :  { %9283 = vmatpush1.msk.msra.mxu1 %vm1813_vm12, %v7298_v26  ;;  %v17830_v0 = vpop.permute.xlu1 %7209  ;;  %v7855_v61 = vld [vmem:[#allocation2 + $0x130] sm:$0xff] }
 0x4fc   :  { %v7304_v5 = vsel %vm7215_vm1, %v17830_v0, %v7212_v35  ;;  %v7214_v10 = vpop.permute.xlu0 %7213  ;;  %9996 = vmatprep.subr.bf16.mxu1 %v9995_v28  ;;  %9284 = vmatmul.mubr.msk.f32.vlgmr.msra.gmra.mrb[74].mxu1 %vm1806_vm13, %v17569_v50  ;;  %v7833_v25 = vld [vmem:[#allocation2 + $0x70] sm:$0xff] }
 0x4fd   :  { %v7305_v1 = vsel %vm7215_vm1, %v7212_v35, %v7214_v10  ;;  %9998 = vmatpush1.bf16.msra.mxu1 %v9997_v12  ;;  %7559 = vmatprep.mubr.f32.mxu1 %v18962_v21  ;;  %v7901_v12 = vld [vmem:[#allocation2 + $0x2c8] sm:$0x1]  ;;  %v17886_v10 = vld [vmem:[#allocation3 + $0x80] sm:$0xff] }
 0x4fe   :  { %9294 = vmatprep.subr.msk.mxu0 %vm1813_vm12, %v7305_v1 }
 0x4ff   :  { %9295 = vmatpush1.msk.msra.mxu0 %vm1813_vm12, %v7304_v5  ;;  %v12066_v57 = vpop.permute.xlu1 %12065  ;;  %v7824_v5 = vld [vmem:[#allocation2 + $0x20] sm:$0xff] }
 0x500   :  { %v12068_v20 = vunpack.i.h.bf16 %v12066_v57  ;;  %v12067_v51 = vunpack.i.l.bf16 %v12066_v57  ;;  %v12061_v30 = vpop.permute.xlu0 %12060  ;;  %10028 = vmatprep.subr.bf16.mxu0 %v10027_v62  ;;  %9296 = vmatmul.mubr.msk.f32.vlgmr.msra.gmra.mrb[42].mxu0 %vm1806_vm13, %v17569_v50  ;;  %v7823_v62 = vld [vmem:[#allocation2 + $0x18] sm:$0xff]  ;;  %v10061_v52 = vpack.c.bf16 %v7834_v43, %v7824_v5  ;;  %v7822_v57 = vld [vmem:[#allocation2 + $0x10] sm:$0xff] }
 0x501   :  { %v12063_v39 = vunpack.i.h.bf16 %v12061_v30  ;;  %v12062_v16 = vunpack.i.l.bf16 %v12061_v30  ;;  %10030 = vmatpush1.bf16.msra.mxu0 %v10029_v8  ;;  %7790 = vmatprep.mubr.f32.mxu0 %v18962_v21  ;;  %v7832_v8 = vld [vmem:[#allocation2 + $0x68] sm:$0xff]  ;;  %v10043_v30 = vpack.c.bf16 %v7833_v25, %v7823_v62  ;;  %v7826_v43 = vld [vmem:[#allocation2 + $0x30] sm:$0xff] }
 0x502   :  { %v7262_v22 = vsel %vm7215_vm1, %v11943_v6, %v12067_v51  ;;  %v7272_v53 = vsel %vm7215_vm1, %v11948_v2, %v12068_v20  ;;  %10032 = vmatprep.subr.bf16.mxu0 %v10031_v41  ;;  %9285 = vmatmul.mubr.msk.f32.gmra.mrb[76].mxu1 %vm1806_vm13, %v17594_v31  ;;  %v7263_v24 = vsel %vm7215_vm1, %v12067_v51, %v12032_v49  ;;  %v17897_v41 = vld [vmem:[#allocation3 + $0x88] sm:$0x1]  ;;  %v7848_v25 = vld [vmem:[#allocation2 + $0xf0] sm:$0xff] }
 0x503   :  { %v10005_v56 = vpack.c.bf16 %v7272_v53, %v7262_v22  ;;  %v7252_v35 = vsel %vm7215_vm1, %v11928_v63, %v12063_v39  ;;  %v7242_v34 = vsel %vm7215_vm1, %v11923_v32, %v12062_v16  ;;  %v7243_v44 = vsel %vm7215_vm1, %v12062_v16, %v12012_v42  ;;  %v7870_v32 = vld [vmem:[#allocation2 + $0x1b8] sm:$0xff]  ;;  %7707 = vmatprep.mubr.f32.mxu1 %v18962_v21  ;;  %v7208_v28 = vpop.permute.xlu1 %7207  ;;  %v7875_v16 = vld [vmem:[#allocation2 + $0x1e0] sm:$0xff] }
 0x504   :  { %v10001_v27 = vpack.c.bf16 %v7252_v35, %v7242_v34  ;;  %v12071_v2 = vpop.permute.xlu0 %12070  ;;  %v7253_v6 = vsel %vm7215_vm1, %v12063_v39, %v12013_v19  ;;  %v7273_v63 = vsel %vm7215_vm1, %v12068_v20, %v12033_v29  ;;  %9297 = vmatmul.mubr.msk.f32.gmra.mrb[44].mxu0 %vm1806_vm13, %v17594_v31  ;;  %v10037_v49 = vpack.c.bf16 %v7870_v32, %v7860_v37  ;;  %v7854_v20 = vld [vmem:[#allocation2 + $0x128] sm:$0xff]  ;;  %v7863_v35 = vld [vmem:[#allocation2 + $0x178] sm:$0xff]  ;;  %v7873_v34 = vld [vmem:[#allocation2 + $0x1d0] sm:$0xff] }
 0x505   :  { %v12073_v42 = vunpack.i.h.bf16 %v12071_v2  ;;  %v12072_v13 = vunpack.i.l.bf16 %v12071_v2  ;;  %10034 = vmatpush1.bf16.msra.mxu0 %v10033_v58  ;;  %v9999_v45 = vpack.c.bf16 %v7253_v6, %v7243_v44  ;;  %8010 = vmatprep.mubr.f32.mxu0 %v18962_v21  ;;  %v10003_v29 = vpack.c.bf16 %v7273_v63, %v7263_v24  ;;  %v7865_v39 = vld [vmem:[#allocation2 + $0x188] sm:$0xff]  ;;  %v7842_v58 = vld [vmem:[#allocation2 + $0xc0] sm:$0xff]  ;;  %v7874_v44 = vld [vmem:[#allocation2 + $0x1d8] sm:$0xff] }
 0x506   :  { %10036 = vmatprep.subr.bf16.mxu0 %v10035_v17  ;;  %v7303_v1 = vsel %vm7215_vm1, %v7208_v28, %v17830_v0  ;;  %v7853_v0 = vld [vmem:[#allocation2 + $0x120] sm:$0xff]  ;;  %v7302_v51 = vsel %vm7215_vm1, %v17716_v59, %v7208_v28  ;;  %v10045_v11 = vpack.c.bf16 %v7832_v8, %v7822_v57  ;;  %v10065_v53 = vpack.c.bf16 %v7854_v20, %v7844_v36  ;;  %v7852_v59 = vld [vmem:[#allocation2 + $0x118] sm:$0xff]  ;;  %v7895_v2 = vld [vmem:[#allocation2 + $0x290] sm:$0xff] }
 0x507   :  { %v7292_v19 = vsel %vm7215_vm1, %v11968_v54, %v12073_v42  ;;  %v7282_v14 = vsel %vm7215_vm1, %v11963_v38, %v12072_v13  ;;  %10000 = vmatprep.subr.bf16.mxu1 %v9999_v45  ;;  %v7283_v26 = vsel %vm7215_vm1, %v12072_v13, %v12052_v55  ;;  %v7293_v60 = vsel %vm7215_vm1, %v12073_v42, %v12053_v46  ;;  %v7890_v54 = vld [vmem:[#allocation2 + $0x268] sm:$0xff]  ;;  %v7845_v46 = vld [vmem:[#allocation2 + $0xd8] sm:$0xff]  ;;  %v7864_v17 = vld [vmem:[#allocation2 + $0x180] sm:$0xff] }
 0x508   :  { %v10009_v7 = vpack.c.bf16 %v7292_v19, %v7282_v14  ;;  %10002 = vmatpush1.bf16.msra.mxu1 %v10001_v27  ;;  %v10007_v48 = vpack.c.bf16 %v7293_v60, %v7283_v26  ;;  %v10041_v38 = vpack.c.bf16 %v7890_v54, %v7880_v47  ;;  %v7825_v55 = vld [vmem:[#allocation2 + $0x28] sm:$0xff]  ;;  %v10063_v18 = vpack.c.bf16 %v7855_v61, %v7845_v46  ;;  %v7885_v27 = vld [vmem:[#allocation2 + $0x238] sm:$0xff]  ;;  %v7862_v63 = vld [vmem:[#allocation2 + $0x170] sm:$0xff] }
 0x509   :  { %10004 = vmatprep.subr.bf16.mxu1 %v10003_v29  ;;  %10038 = vmatpush1.bf16.msra.mxu0 %v10037_v49  ;;  %v10059_v15 = vpack.c.bf16 %v7835_v23, %v7825_v55  ;;  %v10047_v22 = vpack.c.bf16 %v7853_v0, %v7843_v33  ;;  %v10049_v6 = vpack.c.bf16 %v7852_v59, %v7842_v58  ;;  %v7872_v37 = vld [vmem:[#allocation2 + $0x1c8] sm:$0xff]  ;;  %v7884_v32 = vld [vmem:[#allocation2 + $0x230] sm:$0xff]  ;;  %v7893_v45 = vld [vmem:[#allocation2 + $0x280] sm:$0xff] }
 0x50a   :  { %10040 = vmatprep.subr.bf16.mxu0 %v10039_v9  ;;  %v10069_v24 = vpack.c.bf16 %v7874_v44, %v7864_v17  ;;  %v10071_v42 = vpack.c.bf16 %v7895_v2, %v7885_v27  ;;  %v7883_v13 = vld [vmem:[#allocation2 + $0x228] sm:$0xff]  ;;  %v10053_v40 = vpack.c.bf16 %v7872_v37, %v7862_v63  ;;  %v10073_v14 = vpack.c.bf16 %v7894_v3, %v7884_v32  ;;  %v7882_v29 = vld [vmem:[#allocation2 + $0x220] sm:$0xff]  ;;  %v7892_v49 = vld [vmem:[#allocation2 + $0x278] sm:$0xff] }
 0x50b   :  { %v10055_v19 = vpack.c.bf16 %v7893_v45, %v7883_v13  ;;  %v7839_v9 = vld [vmem:[#allocation2 + $0xa0] sm:$0xff]  ;;  %v10057_v26 = vpack.c.bf16 %v7892_v49, %v7882_v29  ;;  %v7838_v47 = vld [vmem:[#allocation2 + $0x98] sm:$0xff]  ;;  %v7837_v55 = vld [vmem:[#allocation2 + $0x90] sm:$0xff] }
 0x50c   :  { %10006 = vmatpush1.bf16.msra.mxu1 %v10005_v56  ;;  %v10067_v56 = vpack.c.bf16 %v7875_v16, %v7865_v39  ;;  %v7828_v60 = vld [vmem:[#allocation2 + $0x40] sm:$0xff]  ;;  %v7903_v54 = vld [vmem:[#allocation2 + $0x2d8] sm:$0x1]  ;;  %v7836_v46 = vld [vmem:[#allocation2 + $0x88] sm:$0xff] }
 0x50d   :  { %10008 = vmatprep.subr.bf16.mxu1 %v10007_v48  ;;  %10042 = vmatpush1.bf16.msra.mxu0 %v10041_v38  ;;  %v7849_v48 = vld [vmem:[#allocation2 + $0xf8] sm:$0xff]  ;;  %v7859_v38 = vld [vmem:[#allocation2 + $0x150] sm:$0xff]  ;;  %v7904_v28 = vld [vmem:[#allocation2 + $0x2e0] sm:$0x1]  ;;  %v10093_v5 = vpack.c.bf16 %v7838_v47, %v7828_v60  ;;  %v10077_v57 = vpack.c.bf16 %v7836_v46, %v7826_v43 }
 0x50e   :  { %9298 = vmatprep.subr.msk.mxu0 %vm1813_vm12, %v7901_v12  ;;  %v7827_v23 = vld [vmem:[#allocation2 + $0x38] sm:$0xff]  ;;  %v10095_v61 = vpack.c.bf16 %v7859_v38, %v7849_v48  ;;  %v7869_v8 = vld [vmem:[#allocation2 + $0x1a8] sm:$0xff]  ;;  %v7879_v36 = vld [vmem:[#allocation2 + $0x200] sm:$0xff] }
 0x50f   :  { %v10075_v62 = vpack.c.bf16 %v7837_v55, %v7827_v23  ;;  %v7846_v33 = vld [vmem:[#allocation2 + $0xe0] sm:$0xff]  ;;  %v7856_v0 = vld [vmem:[#allocation2 + $0x138] sm:$0xff]  ;;  %v10099_v39 = vpack.c.bf16 %v7879_v36, %v7869_v8  ;;  %v7899_v58 = vld [vmem:[#allocation2 + $0x2b0] sm:$0xff] }
 0x510   :  { %10010 = vmatpush1.bf16.msra.mxu1 %v10009_v7  ;;  %v7829_v7 = vld [vmem:[#allocation2 + $0x48] sm:$0xff]  ;;  %v7868_v16 = vld [vmem:[#allocation2 + $0x1a0] sm:$0xff]  ;;  %v7866_v17 = vld [vmem:[#allocation2 + $0x190] sm:$0xff] }
 0x511   :  { %9290 = vmatprep.subr.msk.mxu1 %vm1813_vm12, %v7303_v1  ;;  %9299 = vmatpush1.msk.msra.mxu0 %vm1813_vm12, %v7900_v4  ;;  %v10091_v12 = vpack.c.bf16 %v7839_v9, %v7829_v7  ;;  %v7847_v1 = vld [vmem:[#allocation2 + $0xe8] sm:$0xff]  ;;  %v7857_v4 = vld [vmem:[#allocation2 + $0x140] sm:$0xff]  ;;  %v7888_v2 = vld [vmem:[#allocation2 + $0x250] sm:$0xff] }
 0x512   :  { %9300 = vmatmul.mubr.msk.f32.vlgmr.msra.gmra.mrb[34].mxu0 %vm1806_vm13, %v17886_v10  ;;  %10060 = vmatprep.subr.bf16.mxu0 %v10059_v15  ;;  %v7902_v15 = vld [vmem:[#allocation2 + $0x2d0] sm:$0x1]  ;;  %v7897_v44 = vld [vmem:[#allocation2 + $0x2a0] sm:$0xff]  ;;  %v7896_v37 = vld [vmem:[#allocation2 + $0x298] sm:$0xff] }
 0x513   :  { %10062 = vmatpush1.bf16.msra.mxu0 %v10061_v52  ;;  %8016 = vmatprep.mubr.f32.mxu0 %v18962_v21  ;;  %v7858_v52 = vld [vmem:[#allocation2 + $0x148] sm:$0xff]  ;;  %v7886_v63 = vld [vmem:[#allocation2 + $0x240] sm:$0xff]  ;;  %v7907_v45 = vld [vmem:[#allocation2 + $0x2f8] sm:$0x1] }
 0x514   :  { %9291 = vmatpush1.msk.msra.mxu1 %vm1813_vm12, %v7302_v51  ;;  %10064 = vmatprep.subr.bf16.mxu0 %v10063_v18  ;;  %v10079_v18 = vpack.c.bf16 %v7857_v4, %v7847_v1  ;;  %v10097_v20 = vpack.c.bf16 %v7858_v52, %v7848_v25  ;;  %v7867_v51 = vld [vmem:[#allocation2 + $0x198] sm:$0xff]  ;;  %v10089_v13 = vpack.c.bf16 %v7896_v37, %v7886_v63  ;;  %v7908_v3 = vld [vmem:[#allocation2 + $0x300] sm:$0x1]  ;;  %v17966_v23 = vld [vmem:[%s18233_s3 + $0x8] sm:$0xff] }
 0x515   :  { %10044 = vmatprep.subr.bf16.mxu1 %v10043_v30  ;;  %9292 = vmatmul.mubr.msk.f32.vlgmr.msra.gmra.mrb[78].mxu1 %vm1806_vm13, %v17569_v50  ;;  %v10051_v50 = vpack.c.bf16 %v7873_v34, %v7863_v35  ;;  %v7877_v30 = vld [vmem:[#allocation2 + $0x1f0] sm:$0xff]  ;;  %v7887_v34 = vld [vmem:[#allocation2 + $0x248] sm:$0xff] }
 0x516   :  { %10046 = vmatpush1.bf16.msra.mxu1 %v10045_v11  ;;  %9301 = vmatmul.mubr.msk.f32.gmra.mrb[36].mxu0 %vm1806_vm13, %v17897_v41  ;;  %v7878_v11 = vld [vmem:[#allocation2 + $0x1f8] sm:$0xff]  ;;  %v10083_v59 = vpack.c.bf16 %v7877_v30, %v7867_v51 }
 0x517   :  { %10048 = vmatprep.subr.bf16.mxu1 %v10047_v22  ;;  %10066 = vmatpush1.bf16.msra.mxu0 %v10065_v53  ;;  %v10081_v22 = vpack.c.bf16 %v7856_v0, %v7846_v33  ;;  %v7889_v53 = vld [vmem:[#allocation2 + $0x258] sm:$0xff]  ;;  %v10101_v35 = vpack.c.bf16 %v7878_v11, %v7868_v16 }
 0x518   :  { %10068 = vmatprep.subr.bf16.mxu0 %v10067_v56  ;;  %7713 = vmatprep.mubr.f32.mxu1 %v18962_v21  ;;  %v7876_v56 = vld [vmem:[#allocation2 + $0x1e8] sm:$0xff]  ;;  %v10103_v27 = vpack.c.bf16 %v7899_v58, %v7889_v53 }
 0x519   :  { %9293 = vmatmul.mubr.msk.f32.gmra.mrb[80].mxu1 %vm1806_vm13, %v17594_v31  ;;  %8164 = vmatprep.mubr.f32.mxu0 %v18962_v21  ;;  %v7905_v31 = vld [vmem:[#allocation2 + $0x2e8] sm:$0x1] }
 0x51a   :  { %10050 = vmatpush1.bf16.msra.mxu1 %v10049_v6  ;;  %8087 = vmatprep.mubr.f32.mxu1 %v18962_v21  ;;  %v7898_v6 = vld [vmem:[#allocation2 + $0x2a8] sm:$0xff] }
 0x51b   :  { %10052 = vmatprep.subr.bf16.mxu1 %v10051_v50  ;;  %10070 = vmatpush1.bf16.msra.mxu0 %v10069_v24  ;;  %v10085_v50 = vpack.c.bf16 %v7876_v56, %v7866_v17  ;;  %v10087_v24 = vpack.c.bf16 %v7897_v44, %v7887_v34  ;;  %v10105_v32 = vpack.c.bf16 %v7898_v6, %v7888_v2 }
 0x51c   :  { %10072 = vmatprep.subr.bf16.mxu0 %v10071_v42  ;;  %v7909_v42 = vld [vmem:[#allocation2 + $0x308] sm:$0x1] }
 0x51e   :  { %10054 = vmatpush1.bf16.msra.mxu1 %v10053_v40  ;;  %v7906_v40 = vld [vmem:[#allocation2 + $0x2f0] sm:$0x1] }
 0x51f   :  { %10056 = vmatprep.subr.bf16.mxu1 %v10055_v19  ;;  %10074 = vmatpush1.bf16.msra.mxu0 %v10073_v14  ;;  %v17940_v14 = vstv %s9071_s10 }
 0x520   :  { %9306 = vmatprep.subr.msk.mxu0 %vm1813_vm12, %v7905_v31 }
 0x522   :  { %10058 = vmatpush1.bf16.msra.mxu1 %v10057_v26 }
 0x523   :  { %9302 = vmatprep.subr.msk.mxu1 %vm1813_vm12, %v7903_v54  ;;  %9307 = vmatpush1.msk.msra.mxu0 %vm1813_vm12, %v7904_v28 }
 0x524   :  { %9308 = vmatmul.mubr.msk.f32.vlgmr.msra.gmra.mrb[38].mxu0 %vm1806_vm13, %v17886_v10  ;;  %10092 = vmatprep.subr.bf16.mxu0 %v10091_v12  ;;  %v17958_v12 = vld [vmem:[%s18233_s3] sm:$0xff] }
 0x525   :  { %10094 = vmatpush1.bf16.msra.mxu0 %v10093_v5  ;;  %8170 = vmatprep.mubr.f32.mxu0 %v18962_v21 }
 0x526   :  { %9303 = vmatpush1.msk.msra.mxu1 %vm1813_vm12, %v7902_v15  ;;  %10096 = vmatprep.subr.bf16.mxu0 %v10095_v61  ;;  %v17976_v61 = vld [vmem:[%s18233_s3 + $0x10] sm:$0xff] }
 0x527   :  { %9304 = vmatmul.mubr.msk.f32.vlgmr.msra.gmra.mrb[74].mxu1 %vm1806_vm13, %v17886_v10  ;;  %10076 = vmatprep.subr.bf16.mxu1 %v10075_v62 }
 0x528   :  { %10078 = vmatpush1.bf16.msra.mxu1 %v10077_v57  ;;  %9309 = vmatmul.mubr.msk.f32.gmra.mrb[40].mxu0 %vm1806_vm13, %v17897_v41 }
 0x529   :  { %10080 = vmatprep.subr.bf16.mxu1 %v10079_v18  ;;  %8093 = vmatprep.mubr.f32.mxu1 %v18962_v21  ;;  %v17987_v18 = vld [vmem:[%s18233_s3 + $0x18] sm:$0xff]  ;;  %s9072_s3 = sld [smem:[#allocation6 + $0x2]] }
 0x52a   :  { %10098 = vmatpush1.bf16.msra.mxu0 %v10097_v20  ;;  %8318 = vmatprep.mubr.f32.mxu0 %v18962_v21 }
 0x52b   :  { %9305 = vmatmul.mubr.msk.f32.gmra.mrb[76].mxu1 %vm1806_vm13, %v17897_v41  ;;  %10100 = vmatprep.subr.bf16.mxu0 %v10099_v39 }
 0x52c   :  { %10082 = vmatpush1.bf16.msra.mxu1 %v10081_v22  ;;  %8241 = vmatprep.mubr.f32.mxu1 %v18962_v21 }
 0x52d   :  { %10084 = vmatprep.subr.bf16.mxu1 %v10083_v59 }
 0x52e   :  { %10102 = vmatpush1.bf16.msra.mxu0 %v10101_v35 }
 0x52f   :  { %10104 = vmatprep.subr.bf16.mxu0 %v10103_v27 }
 0x530   :  { %10086 = vmatpush1.bf16.msra.mxu1 %v10085_v50 }
 0x531   :  { %10088 = vmatprep.subr.bf16.mxu1 %v10087_v24 }
 0x532   :  { %10106 = vmatpush1.bf16.msra.mxu0 %v10105_v32 }
 0x533   :  { %9314 = vmatprep.subr.msk.mxu0 %vm1813_vm12, %v7909_v42 }
 0x534   :  { %10090 = vmatpush1.bf16.msra.mxu1 %v10089_v13 }
 0x535   :  { %9310 = vmatprep.subr.msk.mxu1 %vm1813_vm12, %v7907_v45 }
 0x536   :  { %9315 = vmatpush1.msk.msra.mxu0 %vm1813_vm12, %v7908_v3 }
 0x537   :  { %9316 = vmatmul.mubr.msk.f32.vlgmr.msra.gmra.mrb[42].mxu0 %vm1806_vm13, %v17886_v10 }
 0x538   :  { %9311 = vmatpush1.msk.msra.mxu1 %vm1813_vm12, %v7906_v40  ;;  %8324 = vmatprep.mubr.f32.mxu0 %v18962_v21 }
 0x539   :  { %9312 = vmatmul.mubr.msk.f32.vlgmr.msra.gmra.mrb[78].mxu1 %vm1806_vm13, %v17886_v10 }
 0x53a   :  { %8247 = vmatprep.mubr.f32.mxu1 %v18962_v21 }
 0x53b   :  { %9317 = vmatmul.mubr.msk.f32.gmra.mrb[44].mxu0 %vm1806_vm13, %v17897_v41 }
 0x53d   :  { %9313 = vmatmul.mubr.msk.f32.gmra.mrb[80].mxu1 %vm1806_vm13, %v17897_v41 }
 0x53e   :  { %8523 = vmatprep.mubr.f32.mxu1 %v18962_v21 }
 0x5e5   :  { %v8012_v19 = vpop.f32.mrb[34].mxu0 }
 0x5e6   :  { %v8014_v29 = vpop.f32.mrb[35].mxu0  ;;  %v8372_v49 = vmul.f32 %v17940_v14, %v8012_v19  ;;  %vm8351_vm2 = vcmp.ge.f32.partialorder %v8012_v19, 0.0 }
 0x5e7   :  { %v8373_v10 = vmul.f32 %v17940_v14, %v8014_v29  ;;  %vm8352_vm3 = vcmp.ge.f32.partialorder %v8014_v29, 0.0 }
 0x5e8   :  { %v8392_v26 = vsel %vm8351_vm2, %v8012_v19, %v8372_v49 }
 0x5e9   :  { %v8018_v31 = vpop.f32.mrb[36].mxu0  ;;  %v8393_v47 = vsel %vm8352_vm3, %v8014_v29, %v8373_v10 }
 0x5ea   :  { %vm8361_vm4 = vcmp.ge.f32.partialorder %v8018_v31, 0.0  ;;  %v8382_v7 = vmul.f32 %v17940_v14, %v8018_v31  ;;  %v8020_v9 = vpop.f32.mrb[37].mxu0 }
 0x5eb   :  { %vm8362_vm5 = vcmp.ge.f32.partialorder %v8020_v9, 0.0  ;;  %v8383_v41 = vmul.f32 %v17940_v14, %v8020_v9 }
 0x5ec   :  { %v8402_v60 = vsel %vm8361_vm4, %v8018_v31, %v8382_v7 }
 0x5ed   :  { %v10110_v54 = vpack.c.bf16 %v8402_v60, %v8392_v26  ;;  %v8403_v48 = vsel %vm8362_vm5, %v8020_v9, %v8383_v41 }
 0x5ee   :  { %v10107_v28 = vpack.c.bf16 %v8403_v48, %v8393_v47 }
 0x5f0   :  { %10109 = vmatprep.subr.msk.bf16.mxu1 %vm17947_vm7, %v10107_v28 }
 0x5f1   :  { %10112 = vmatpush1.bf16.msk.msra.mxu1 %vm17947_vm7, %v10110_v54 }
 0x5f4   :  { %9320 = vmatmul.mubr.msk.f32.vlgmr.msra.gmra.mrb[82].mxu1 %vm8416_vm8, %v17958_v12 }
 0x5f5   :  { %8529 = vmatprep.mubr.f32.mxu1 %v18962_v21 }
 0x5f7   :  { %v8166_v55 = vpop.f32.mrb[38].mxu0 }
 0x5f8   :  { %v8376_v5 = vmul.f32 %v17940_v14, %v8166_v55  ;;  %v8168_v43 = vpop.f32.mrb[39].mxu0  ;;  %9321 = vmatmul.mubr.msk.f32.gmra.mrb[84].mxu1 %vm8416_vm8, %v17966_v23  ;;  %vm8355_vm9 = vcmp.ge.f32.partialorder %v8166_v55, 0.0 }
 0x5f9   :  { %v8377_v46 = vmul.f32 %v17940_v14, %v8168_v43  ;;  %8535 = vmatprep.mubr.f32.mxu1 %v18962_v21  ;;  %vm8356_vm10 = vcmp.ge.f32.partialorder %v8168_v43, 0.0 }
 0x5fa   :  { %v8089_v1 = vpop.f32.mrb[74].mxu1  ;;  %v8396_v62 = vsel %vm8355_vm9, %v8166_v55, %v8376_v5 }
 0x5fb   :  { %v8091_v4 = vpop.f32.mrb[75].mxu1  ;;  %v8172_v15 = vpop.f32.mrb[40].mxu0  ;;  %v8397_v57 = vsel %vm8356_vm10, %v8168_v43, %v8377_v46  ;;  %v8374_v8 = vmul.f32 %v17940_v14, %v8089_v1  ;;  %vm8353_vm13 = vcmp.ge.f32.partialorder %v8089_v1, 0.0 }
 0x5fc   :  { %vm8365_vm11 = vcmp.ge.f32.partialorder %v8172_v15, 0.0  ;;  %v8386_v25 = vmul.f32 %v17940_v14, %v8172_v15  ;;  %v8174_v52 = vpop.f32.mrb[41].mxu0  ;;  %9322 = vmatmul.mubr.msk.f32.gmra.mrb[86].mxu1 %vm8416_vm8, %v17976_v61  ;;  %vm8354_vm14 = vcmp.ge.f32.partialorder %v8091_v4, 0.0  ;;  %v8375_v33 = vmul.f32 %v17940_v14, %v8091_v4 }
 0x5fd   :  { %vm8366_vm12 = vcmp.ge.f32.partialorder %v8174_v52, 0.0  ;;  %v8387_v36 = vmul.f32 %v17940_v14, %v8174_v52  ;;  %8541 = vmatprep.mubr.f32.mxu1 %v18962_v21  ;;  %v8394_v53 = vsel %vm8353_vm13, %v8089_v1, %v8374_v8 }
 0x5fe   :  { %v8406_v0 = vsel %vm8365_vm11, %v8172_v15, %v8386_v25  ;;  %v8095_v20 = vpop.f32.mrb[76].mxu1  ;;  %v8395_v59 = vsel %vm8354_vm14, %v8091_v4, %v8375_v33 }
 0x5ff   :  { %v10122_v51 = vpack.c.bf16 %v8406_v0, %v8396_v62  ;;  %v8407_v30 = vsel %vm8366_vm12, %v8174_v52, %v8387_v36  ;;  %vm8363_vm15 = vcmp.ge.f32.partialorder %v8095_v20, 0.0  ;;  %v8384_v39 = vmul.f32 %v17940_v14, %v8095_v20  ;;  %v8097_v16 = vpop.f32.mrb[77].mxu1 }
 0x600   :  { %v10119_v11 = vpack.c.bf16 %v8407_v30, %v8397_v57  ;;  %vm8364_vm0 = vcmp.ge.f32.partialorder %v8097_v16, 0.0  ;;  %v8385_v22 = vmul.f32 %v17940_v14, %v8097_v16  ;;  %9323 = vmatmul.mubr.msk.f32.gmra.mrb[88].mxu1 %vm8416_vm8, %v17987_v18 }
 0x601   :  { %v8404_v58 = vsel %vm8363_vm15, %v8095_v20, %v8384_v39  ;;  %8612 = vmatprep.mubr.f32.mxu1 %v18962_v21 }
 0x602   :  { %v10116_v17 = vpack.c.bf16 %v8404_v58, %v8394_v53  ;;  %v8405_v56 = vsel %vm8364_vm0, %v8097_v16, %v8385_v22 }
 0x603   :  { %v10113_v35 = vpack.c.bf16 %v8405_v56, %v8395_v59 }
 0x605   :  { %10115 = vmatprep.subr.msk.bf16.mxu1 %vm17947_vm7, %v10113_v35 }
 0x606   :  { %10118 = vmatpush1.bf16.msk.msra.mxu1 %vm17947_vm7, %v10116_v17 }
 0x607   :  { %10121 = vmatprep.subr.msk.bf16.mxu1 %vm17947_vm7, %v10119_v11 }
 0x609   :  { %9326 = vmatmul.mubr.msk.f32.vlgmr.msra.gmra.mrb[90].mxu1 %vm8416_vm8, %v17958_v12 }
 0x60a   :  { %v8320_v34 = vpop.f32.mrb[42].mxu0  ;;  %10124 = vmatpush1.bf16.msk.msra.mxu1 %vm17947_vm7, %v10122_v51  ;;  %8618 = vmatprep.mubr.f32.mxu1 %v18962_v21 }
 0x60b   :  { %vm8359_vm1 = vcmp.ge.f32.partialorder %v8320_v34, 0.0  ;;  %v8380_v44 = vmul.f32 %v17940_v14, %v8320_v34  ;;  %v8322_v27 = vpop.f32.mrb[43].mxu0 }
 0x60c   :  { %v8381_v2 = vmul.f32 %v17940_v14, %v8322_v27  ;;  %v8243_v6 = vpop.f32.mrb[78].mxu1  ;;  %vm8360_vm2 = vcmp.ge.f32.partialorder %v8322_v27, 0.0 }
 0x60d   :  { %v8245_v50 = vpop.f32.mrb[79].mxu1  ;;  %9327 = vmatmul.mubr.msk.f32.gmra.mrb[92].mxu1 %vm8416_vm8, %v17966_v23  ;;  %v8400_v24 = vsel %vm8359_vm1, %v8320_v34, %v8380_v44  ;;  %vm8357_vm3 = vcmp.ge.f32.partialorder %v8243_v6, 0.0  ;;  %v8378_v37 = vmul.f32 %v17940_v14, %v8243_v6 }
 0x60e   :  { %v8326_v63 = vpop.f32.mrb[44].mxu0  ;;  %8624 = vmatprep.mubr.f32.mxu1 %v18962_v21  ;;  %v8401_v13 = vsel %vm8360_vm2, %v8322_v27, %v8381_v2  ;;  %v8379_v45 = vmul.f32 %v17940_v14, %v8245_v50  ;;  %vm8358_vm6 = vcmp.ge.f32.partialorder %v8245_v50, 0.0 }
 0x60f   :  { %vm8369_vm4 = vcmp.ge.f32.partialorder %v8326_v63, 0.0  ;;  %v8390_v32 = vmul.f32 %v17940_v14, %v8326_v63  ;;  %v8328_v42 = vpop.f32.mrb[45].mxu0  ;;  %v8398_v9 = vsel %vm8357_vm3, %v8243_v6, %v8378_v37 }
 0x610   :  { %vm8370_vm5 = vcmp.ge.f32.partialorder %v8328_v42, 0.0  ;;  %v8391_v3 = vmul.f32 %v17940_v14, %v8328_v42  ;;  %v8249_v40 = vpop.f32.mrb[80].mxu1  ;;  %v8399_v60 = vsel %vm8358_vm6, %v8245_v50, %v8379_v45 }
 0x611   :  { %v8410_v19 = vsel %vm8369_vm4, %v8326_v63, %v8390_v32  ;;  %vm8367_vm9 = vcmp.ge.f32.partialorder %v8249_v40, 0.0  ;;  %v8388_v29 = vmul.f32 %v17940_v14, %v8249_v40  ;;  %v8251_v49 = vpop.f32.mrb[81].mxu1  ;;  %9328 = vmatmul.mubr.msk.f32.gmra.mrb[94].mxu1 %vm8416_vm8, %v17976_v61 }
 0x612   :  { %v10134_v10 = vpack.c.bf16 %v8410_v19, %v8400_v24  ;;  %v8411_v31 = vsel %vm8370_vm5, %v8328_v42, %v8391_v3  ;;  %vm8368_vm10 = vcmp.ge.f32.partialorder %v8251_v49, 0.0  ;;  %v8389_v7 = vmul.f32 %v17940_v14, %v8251_v49  ;;  %8630 = vmatprep.mubr.f32.mxu1 %v18962_v21 }
 0x613   :  { %v10131_v41 = vpack.c.bf16 %v8411_v31, %v8401_v13  ;;  %v8408_v26 = vsel %vm8367_vm9, %v8249_v40, %v8388_v29  ;;  %v18068_v14 = vstv %s9072_s3 }
 0x614   :  { %v10128_v47 = vpack.c.bf16 %v8408_v26, %v8398_v9  ;;  %v8409_v54 = vsel %vm8368_vm10, %v8251_v49, %v8389_v7 }
 0x615   :  { %v10125_v48 = vpack.c.bf16 %v8409_v54, %v8399_v60  ;;  %9329 = vmatmul.mubr.msk.f32.gmra.mrb[96].mxu1 %vm8416_vm8, %v17987_v18 }
 0x616   :  { %8701 = vmatprep.mubr.f32.mxu1 %v18962_v21 }
 0x617   :  { %10127 = vmatprep.subr.msk.bf16.mxu1 %vm17947_vm7, %v10125_v48 }
 0x619   :  { %9332 = vmatmul.mubr.msk.f32.vlgmr.msra.gmra.mrb[98].mxu1 %vm8416_vm8, %v17958_v12 }
 0x61a   :  { %10130 = vmatpush1.bf16.msk.msra.mxu1 %vm17947_vm7, %v10128_v47  ;;  %8707 = vmatprep.mubr.f32.mxu1 %v18962_v21 }
 0x61b   :  { %10133 = vmatprep.subr.msk.bf16.mxu1 %vm17947_vm7, %v10131_v41 }
 0x61d   :  { %9333 = vmatmul.mubr.msk.f32.gmra.mrb[100].mxu1 %vm8416_vm8, %v17966_v23 }
 0x61e   :  { %8713 = vmatprep.mubr.f32.mxu1 %v18962_v21 }
 0x621   :  { %9334 = vmatmul.mubr.msk.f32.gmra.mrb[102].mxu1 %vm8416_vm8, %v17976_v61 }
 0x622   :  { %8719 = vmatprep.mubr.f32.mxu1 %v18962_v21 }
 0x625   :  { %9335 = vmatmul.mubr.msk.f32.gmra.mrb[104].mxu1 %vm8416_vm8, %v17987_v18 }
 0x626   :  { %8790 = vmatprep.mubr.f32.mxu1 %v18962_v21 }
 0x629   :  { %9338 = vmatmul.mubr.msk.f32.vlgmr.msra.gmra.mrb[106].mxu1 %vm8416_vm8, %v17958_v12 }
 0x62a   :  { %10136 = vmatpush1.bf16.msk.msra.mxu1 %vm17947_vm7, %v10134_v10  ;;  %8796 = vmatprep.mubr.f32.mxu1 %v18962_v21 }
 0x62d   :  { %9339 = vmatmul.mubr.msk.f32.gmra.mrb[108].mxu1 %vm8416_vm8, %v17966_v23 }
 0x62e   :  { %8802 = vmatprep.mubr.f32.mxu1 %v18962_v21 }
 0x631   :  { %9340 = vmatmul.mubr.msk.f32.gmra.mrb[110].mxu1 %vm8416_vm8, %v17976_v61 }
 0x632   :  { %8808 = vmatprep.mubr.f32.mxu1 %v18962_v21 }
 0x635   :  { %9341 = vmatmul.mubr.msk.f32.gmra.mrb[112].mxu1 %vm8416_vm8, %v17987_v18 }
 0x636   :  { %8879 = vmatprep.mubr.f32.mxu1 %v18962_v21 }
 0x639   :  { %9344 = vmatmul.mubr.msk.f32.vlgmr.msra.gmra.mrb[114].mxu1 %vm8416_vm8, %v17958_v12 }
 0x63a   :  { %8885 = vmatprep.mubr.f32.mxu1 %v18962_v21 }
 0x63d   :  { %9345 = vmatmul.mubr.msk.f32.gmra.mrb[116].mxu1 %vm8416_vm8, %v17966_v23 }
 0x63e   :  { %8891 = vmatprep.mubr.f32.mxu1 %v18962_v21 }
 0x641   :  { %9346 = vmatmul.mubr.msk.f32.gmra.mrb[118].mxu1 %vm8416_vm8, %v17976_v61 }
 0x642   :  { %8897 = vmatprep.mubr.f32.mxu1 %v18962_v21 }
 0x645   :  { %9347 = vmatmul.mubr.msk.f32.gmra.mrb[120].mxu1 %vm8416_vm8, %v17987_v18 }
 0x6c7   :  { %v8525_v38 = vpop.f32.mrb[82].mxu1 }
 0x6c8   :  { %vm8904_vm7 = vcmp.ge.f32.partialorder %v8525_v38, 0.0  ;;  %v8945_v28 = vmul.f32 %v18068_v14, %v8525_v38  ;;  %v8527_v12 = vpop.f32.mrb[83].mxu1 }
 0x6c9   :  { %vm8905_vm11 = vcmp.ge.f32.partialorder %v8527_v12, 0.0  ;;  %v8946_v23 = vmul.f32 %v18068_v14, %v8527_v12 }
 0x6ca   :  { %v8985_v55 = vsel %vm8904_vm7, %v8525_v38, %v8945_v28 }
 0x6cb   :  { %9025 = vst [vmem:[%s18235_s5] sm:$0xff] %v8985_v55  ;;  %v8986_v21 = vsel %vm8905_vm11, %v8527_v12, %v8946_v23  ;;  %v8531_v5 = vpop.f32.mrb[84].mxu1 }
 0x6cc   :  { %9026 = vst [vmem:[%s18235_s5 + $0x8] sm:$0xff] %v8986_v21  ;;  %vm8914_vm8 = vcmp.ge.f32.partialorder %v8531_v5, 0.0  ;;  %v8955_v43 = vmul.f32 %v18068_v14, %v8531_v5  ;;  %v8533_v46 = vpop.f32.mrb[85].mxu1 }
 0x6cd   :  { %vm8915_vm12 = vcmp.ge.f32.partialorder %v8533_v46, 0.0  ;;  %v8956_v61 = vmul.f32 %v18068_v14, %v8533_v46 }
 0x6ce   :  { %v8995_v1 = vsel %vm8914_vm8, %v8531_v5, %v8955_v43 }
 0x6cf   :  { %9035 = vst [vmem:[%s18235_s5 + $0x50] sm:$0xff] %v8995_v1  ;;  %v8996_v4 = vsel %vm8915_vm12, %v8533_v46, %v8956_v61  ;;  %v8537_v15 = vpop.f32.mrb[86].mxu1 }
 0x6d0   :  { %9036 = vst [vmem:[%s18235_s5 + $0x58] sm:$0xff] %v8996_v4  ;;  %vm8924_vm13 = vcmp.ge.f32.partialorder %v8537_v15, 0.0  ;;  %v8965_v62 = vmul.f32 %v18068_v14, %v8537_v15  ;;  %v8539_v25 = vpop.f32.mrb[87].mxu1 }
 0x6d1   :  { %vm8925_vm14 = vcmp.ge.f32.partialorder %v8539_v25, 0.0  ;;  %v8966_v52 = vmul.f32 %v18068_v14, %v8539_v25 }
 0x6d2   :  { %v9005_v57 = vsel %vm8924_vm13, %v8537_v15, %v8965_v62 }
 0x6d3   :  { %9045 = vst [vmem:[%s18235_s5 + $0xa0] sm:$0xff] %v9005_v57  ;;  %v9006_v8 = vsel %vm8925_vm14, %v8539_v25, %v8966_v52  ;;  %v8543_v36 = vpop.f32.mrb[88].mxu1 }
 0x6d4   :  { %9046 = vst [vmem:[%s18235_s5 + $0xa8] sm:$0xff] %v9006_v8  ;;  %vm8934_vm15 = vcmp.ge.f32.partialorder %v8543_v36, 0.0  ;;  %v8975_v18 = vmul.f32 %v18068_v14, %v8543_v36  ;;  %v8545_v33 = vpop.f32.mrb[89].mxu1 }
 0x6d5   :  { %vm8935_vm0 = vcmp.ge.f32.partialorder %v8545_v33, 0.0  ;;  %v8976_v0 = vmul.f32 %v18068_v14, %v8545_v33 }
 0x6d6   :  { %v9015_v20 = vsel %vm8934_vm15, %v8543_v36, %v8975_v18 }
 0x6d7   :  { %9055 = vst [vmem:[%s18235_s5 + $0xf0] sm:$0xff] %v9015_v20  ;;  %v9016_v51 = vsel %vm8935_vm0, %v8545_v33, %v8976_v0 }
 0x6d8   :  { %9056 = vst [vmem:[%s18235_s5 + $0xf8] sm:$0xff] %v9016_v51 }
 0x6dc   :  { %v8614_v30 = vpop.f32.mrb[90].mxu1 }
 0x6dd   :  { %vm8906_vm1 = vcmp.ge.f32.partialorder %v8614_v30, 0.0  ;;  %v8947_v39 = vmul.f32 %v18068_v14, %v8614_v30  ;;  %v8616_v16 = vpop.f32.mrb[91].mxu1 }
 0x6de   :  { %vm8907_vm2 = vcmp.ge.f32.partialorder %v8616_v16, 0.0  ;;  %v8948_v11 = vmul.f32 %v18068_v14, %v8616_v16 }
 0x6df   :  { %v8987_v22 = vsel %vm8906_vm1, %v8614_v30, %v8947_v39 }
 0x6e0   :  { %9027 = vst [vmem:[%s18235_s5 + $0x10] sm:$0xff] %v8987_v22  ;;  %v8988_v53 = vsel %vm8907_vm2, %v8616_v16, %v8948_v11  ;;  %v8620_v58 = vpop.f32.mrb[92].mxu1 }
 0x6e1   :  { %9028 = vst [vmem:[%s18235_s5 + $0x18] sm:$0xff] %v8988_v53  ;;  %vm8916_vm3 = vcmp.ge.f32.partialorder %v8620_v58, 0.0  ;;  %v8957_v59 = vmul.f32 %v18068_v14, %v8620_v58  ;;  %v8622_v17 = vpop.f32.mrb[93].mxu1 }
 0x6e2   :  { %vm8917_vm4 = vcmp.ge.f32.partialorder %v8622_v17, 0.0  ;;  %v8958_v56 = vmul.f32 %v18068_v14, %v8622_v17 }
 0x6e3   :  { %v8997_v35 = vsel %vm8916_vm3, %v8620_v58, %v8957_v59 }
 0x6e4   :  { %9037 = vst [vmem:[%s18235_s5 + $0x60] sm:$0xff] %v8997_v35  ;;  %v8998_v34 = vsel %vm8917_vm4, %v8622_v17, %v8958_v56  ;;  %v8626_v44 = vpop.f32.mrb[94].mxu1 }
 0x6e5   :  { %9038 = vst [vmem:[%s18235_s5 + $0x68] sm:$0xff] %v8998_v34  ;;  %vm8926_vm5 = vcmp.ge.f32.partialorder %v8626_v44, 0.0  ;;  %v8967_v27 = vmul.f32 %v18068_v14, %v8626_v44  ;;  %v8628_v2 = vpop.f32.mrb[95].mxu1 }
 0x6e6   :  { %vm8927_vm6 = vcmp.ge.f32.partialorder %v8628_v2, 0.0  ;;  %v8968_v6 = vmul.f32 %v18068_v14, %v8628_v2 }
 0x6e7   :  { %v9007_v50 = vsel %vm8926_vm5, %v8626_v44, %v8967_v27 }
 0x6e8   :  { %9047 = vst [vmem:[%s18235_s5 + $0xb0] sm:$0xff] %v9007_v50  ;;  %v9008_v24 = vsel %vm8927_vm6, %v8628_v2, %v8968_v6  ;;  %v8632_v63 = vpop.f32.mrb[96].mxu1 }
 0x6e9   :  { %9048 = vst [vmem:[%s18235_s5 + $0xb8] sm:$0xff] %v9008_v24  ;;  %vm8936_vm9 = vcmp.ge.f32.partialorder %v8632_v63, 0.0  ;;  %v8977_v37 = vmul.f32 %v18068_v14, %v8632_v63  ;;  %v8634_v32 = vpop.f32.mrb[97].mxu1 }
 0x6ea   :  { %vm8937_vm10 = vcmp.ge.f32.partialorder %v8634_v32, 0.0  ;;  %v8978_v42 = vmul.f32 %v18068_v14, %v8634_v32 }
 0x6eb   :  { %v9017_v13 = vsel %vm8936_vm9, %v8632_v63, %v8977_v37 }
 0x6ec   :  { %9057 = vst [vmem:[%s18235_s5 + $0x100] sm:$0xff] %v9017_v13  ;;  %v9018_v45 = vsel %vm8937_vm10, %v8634_v32, %v8978_v42  ;;  %v8703_v3 = vpop.f32.mrb[98].mxu1 }
 0x6ed   :  { %9058 = vst [vmem:[%s18235_s5 + $0x108] sm:$0xff] %v9018_v45  ;;  %vm8908_vm7 = vcmp.ge.f32.partialorder %v8703_v3, 0.0  ;;  %v8949_v40 = vmul.f32 %v18068_v14, %v8703_v3  ;;  %v8705_v19 = vpop.f32.mrb[99].mxu1 }
 0x6ee   :  { %vm8909_vm11 = vcmp.ge.f32.partialorder %v8705_v19, 0.0  ;;  %v8950_v29 = vmul.f32 %v18068_v14, %v8705_v19 }
 0x6ef   :  { %v8989_v49 = vsel %vm8908_vm7, %v8703_v3, %v8949_v40 }
 0x6f0   :  { %9029 = vst [vmem:[%s18235_s5 + $0x20] sm:$0xff] %v8989_v49  ;;  %v8990_v10 = vsel %vm8909_vm11, %v8705_v19, %v8950_v29  ;;  %v8709_v31 = vpop.f32.mrb[100].mxu1 }
 0x6f1   :  { %9030 = vst [vmem:[%s18235_s5 + $0x28] sm:$0xff] %v8990_v10  ;;  %vm8918_vm8 = vcmp.ge.f32.partialorder %v8709_v31, 0.0  ;;  %v8959_v7 = vmul.f32 %v18068_v14, %v8709_v31  ;;  %v8711_v9 = vpop.f32.mrb[101].mxu1 }
 0x6f2   :  { %vm8919_vm12 = vcmp.ge.f32.partialorder %v8711_v9, 0.0  ;;  %v8960_v41 = vmul.f32 %v18068_v14, %v8711_v9 }
 0x6f3   :  { %v8999_v26 = vsel %vm8918_vm8, %v8709_v31, %v8959_v7 }
 0x6f4   :  { %9039 = vst [vmem:[%s18235_s5 + $0x70] sm:$0xff] %v8999_v26  ;;  %v9000_v60 = vsel %vm8919_vm12, %v8711_v9, %v8960_v41  ;;  %v8715_v47 = vpop.f32.mrb[102].mxu1 }
 0x6f5   :  { %9040 = vst [vmem:[%s18235_s5 + $0x78] sm:$0xff] %v9000_v60  ;;  %vm8928_vm13 = vcmp.ge.f32.partialorder %v8715_v47, 0.0  ;;  %v8969_v54 = vmul.f32 %v18068_v14, %v8715_v47  ;;  %v8717_v48 = vpop.f32.mrb[103].mxu1 }
 0x6f6   :  { %vm8929_vm14 = vcmp.ge.f32.partialorder %v8717_v48, 0.0  ;;  %v8970_v38 = vmul.f32 %v18068_v14, %v8717_v48 }
 0x6f7   :  { %v9009_v28 = vsel %vm8928_vm13, %v8715_v47, %v8969_v54 }
 0x6f8   :  { %9049 = vst [vmem:[%s18235_s5 + $0xc0] sm:$0xff] %v9009_v28  ;;  %v9010_v12 = vsel %vm8929_vm14, %v8717_v48, %v8970_v38  ;;  %v8721_v23 = vpop.f32.mrb[104].mxu1 }
 0x6f9   :  { %9050 = vst [vmem:[%s18235_s5 + $0xc8] sm:$0xff] %v9010_v12  ;;  %vm8938_vm15 = vcmp.ge.f32.partialorder %v8721_v23, 0.0  ;;  %v8979_v55 = vmul.f32 %v18068_v14, %v8721_v23  ;;  %v8723_v21 = vpop.f32.mrb[105].mxu1 }
 0x6fa   :  { %vm8939_vm0 = vcmp.ge.f32.partialorder %v8723_v21, 0.0  ;;  %v8980_v5 = vmul.f32 %v18068_v14, %v8723_v21 }
 0x6fb   :  { %v9019_v43 = vsel %vm8938_vm15, %v8721_v23, %v8979_v55 }
 0x6fc   :  { %9059 = vst [vmem:[%s18235_s5 + $0x110] sm:$0xff] %v9019_v43  ;;  %v9020_v46 = vsel %vm8939_vm0, %v8723_v21, %v8980_v5  ;;  %v8792_v61 = vpop.f32.mrb[106].mxu1 }
 0x6fd   :  { %9060 = vst [vmem:[%s18235_s5 + $0x118] sm:$0xff] %v9020_v46  ;;  %vm8910_vm1 = vcmp.ge.f32.partialorder %v8792_v61, 0.0  ;;  %v8951_v1 = vmul.f32 %v18068_v14, %v8792_v61  ;;  %v8794_v4 = vpop.f32.mrb[107].mxu1 }
 0x6fe   :  { %vm8911_vm2 = vcmp.ge.f32.partialorder %v8794_v4, 0.0  ;;  %v8952_v15 = vmul.f32 %v18068_v14, %v8794_v4 }
 0x6ff   :  { %v8991_v62 = vsel %vm8910_vm1, %v8792_v61, %v8951_v1 }
 0x700   :  { %9031 = vst [vmem:[%s18235_s5 + $0x30] sm:$0xff] %v8991_v62  ;;  %v8992_v25 = vsel %vm8911_vm2, %v8794_v4, %v8952_v15  ;;  %v8798_v52 = vpop.f32.mrb[108].mxu1 }
 0x701   :  { %9032 = vst [vmem:[%s18235_s5 + $0x38] sm:$0xff] %v8992_v25  ;;  %vm8920_vm3 = vcmp.ge.f32.partialorder %v8798_v52, 0.0  ;;  %v8961_v57 = vmul.f32 %v18068_v14, %v8798_v52  ;;  %v8800_v8 = vpop.f32.mrb[109].mxu1 }
 0x702   :  { %vm8921_vm4 = vcmp.ge.f32.partialorder %v8800_v8, 0.0  ;;  %v8962_v36 = vmul.f32 %v18068_v14, %v8800_v8 }
 0x703   :  { %v9001_v18 = vsel %vm8920_vm3, %v8798_v52, %v8961_v57 }
 0x704   :  { %9041 = vst [vmem:[%s18235_s5 + $0x80] sm:$0xff] %v9001_v18  ;;  %v9002_v33 = vsel %vm8921_vm4, %v8800_v8, %v8962_v36  ;;  %v8804_v0 = vpop.f32.mrb[110].mxu1 }
 0x705   :  { %9042 = vst [vmem:[%s18235_s5 + $0x88] sm:$0xff] %v9002_v33  ;;  %vm8930_vm5 = vcmp.ge.f32.partialorder %v8804_v0, 0.0  ;;  %v8971_v20 = vmul.f32 %v18068_v14, %v8804_v0  ;;  %v8806_v51 = vpop.f32.mrb[111].mxu1 }
 0x706   :  { %vm8931_vm6 = vcmp.ge.f32.partialorder %v8806_v51, 0.0  ;;  %v8972_v30 = vmul.f32 %v18068_v14, %v8806_v51 }
 0x707   :  { %v9011_v39 = vsel %vm8930_vm5, %v8804_v0, %v8971_v20 }
 0x708   :  { %9051 = vst [vmem:[%s18235_s5 + $0xd0] sm:$0xff] %v9011_v39  ;;  %v9012_v16 = vsel %vm8931_vm6, %v8806_v51, %v8972_v30  ;;  %v8810_v11 = vpop.f32.mrb[112].mxu1 }
 0x709   :  { %9052 = vst [vmem:[%s18235_s5 + $0xd8] sm:$0xff] %v9012_v16  ;;  %vm8940_vm9 = vcmp.ge.f32.partialorder %v8810_v11, 0.0  ;;  %v8981_v22 = vmul.f32 %v18068_v14, %v8810_v11  ;;  %v8812_v53 = vpop.f32.mrb[113].mxu1 }
 0x70a   :  { %vm8941_vm10 = vcmp.ge.f32.partialorder %v8812_v53, 0.0  ;;  %v8982_v58 = vmul.f32 %v18068_v14, %v8812_v53 }
 0x70b   :  { %v9021_v59 = vsel %vm8940_vm9, %v8810_v11, %v8981_v22 }
 0x70c   :  { %9061 = vst [vmem:[%s18235_s5 + $0x120] sm:$0xff] %v9021_v59  ;;  %v9022_v17 = vsel %vm8941_vm10, %v8812_v53, %v8982_v58  ;;  %v8881_v56 = vpop.f32.mrb[114].mxu1 }
 0x70d   :  { %9062 = vst [vmem:[%s18235_s5 + $0x128] sm:$0xff] %v9022_v17  ;;  %vm8912_vm7 = vcmp.ge.f32.partialorder %v8881_v56, 0.0  ;;  %v8953_v35 = vmul.f32 %v18068_v14, %v8881_v56  ;;  %v8883_v34 = vpop.f32.mrb[115].mxu1 }
 0x70e   :  { %vm8913_vm11 = vcmp.ge.f32.partialorder %v8883_v34, 0.0  ;;  %v8954_v44 = vmul.f32 %v18068_v14, %v8883_v34 }
 0x70f   :  { %v8993_v27 = vsel %vm8912_vm7, %v8881_v56, %v8953_v35 }
 0x710   :  { %9033 = vst [vmem:[%s18235_s5 + $0x40] sm:$0xff] %v8993_v27  ;;  %v8994_v2 = vsel %vm8913_vm11, %v8883_v34, %v8954_v44  ;;  %v8887_v6 = vpop.f32.mrb[116].mxu1 }
 0x711   :  { %9034 = vst [vmem:[%s18235_s5 + $0x48] sm:$0xff] %v8994_v2  ;;  %vm8922_vm8 = vcmp.ge.f32.partialorder %v8887_v6, 0.0  ;;  %v8963_v50 = vmul.f32 %v18068_v14, %v8887_v6  ;;  %v8889_v24 = vpop.f32.mrb[117].mxu1 }
 0x712   :  { %vm8923_vm12 = vcmp.ge.f32.partialorder %v8889_v24, 0.0  ;;  %v8964_v63 = vmul.f32 %v18068_v14, %v8889_v24 }
 0x713   :  { %v9003_v37 = vsel %vm8922_vm8, %v8887_v6, %v8963_v50 }
 0x714   :  { %9043 = vst [vmem:[%s18235_s5 + $0x90] sm:$0xff] %v9003_v37  ;;  %v9004_v32 = vsel %vm8923_vm12, %v8889_v24, %v8964_v63  ;;  %v8893_v42 = vpop.f32.mrb[118].mxu1 }
 0x715   :  { %9044 = vst [vmem:[%s18235_s5 + $0x98] sm:$0xff] %v9004_v32  ;;  %vm8932_vm13 = vcmp.ge.f32.partialorder %v8893_v42, 0.0  ;;  %v8973_v13 = vmul.f32 %v18068_v14, %v8893_v42  ;;  %v8895_v45 = vpop.f32.mrb[119].mxu1 }
 0x716   :  { %vm8933_vm14 = vcmp.ge.f32.partialorder %v8895_v45, 0.0  ;;  %v8974_v3 = vmul.f32 %v18068_v14, %v8895_v45 }
 0x717   :  { %v9013_v40 = vsel %vm8932_vm13, %v8893_v42, %v8973_v13 }
 0x718   :  { %9053 = vst [vmem:[%s18235_s5 + $0xe0] sm:$0xff] %v9013_v40  ;;  %v9014_v19 = vsel %vm8933_vm14, %v8895_v45, %v8974_v3  ;;  %v8899_v29 = vpop.f32.mrb[120].mxu1 }
 0x719   :  { %9054 = vst [vmem:[%s18235_s5 + $0xe8] sm:$0xff] %v9014_v19  ;;  %vm8942_vm15 = vcmp.ge.f32.partialorder %v8899_v29, 0.0  ;;  %v8983_v49 = vmul.f32 %v18068_v14, %v8899_v29  ;;  %v8901_v10 = vpop.f32.mrb[121].mxu1 }
 0x71a   :  { %vm8943_vm0 = vcmp.ge.f32.partialorder %v8901_v10, 0.0  ;;  %v8984_v31 = vmul.f32 %v18068_v14, %v8901_v10 }
 0x71b   :  { %v9023_v7 = vsel %vm8942_vm15, %v8899_v29, %v8983_v49 }
 0x71c   :  { %9063 = vst [vmem:[%s18235_s5 + $0x130] sm:$0xff] %v9023_v7  ;;  %v9024_v9 = vsel %vm8943_vm0, %v8901_v10, %v8984_v31 }
 0x71d   :  { %9064 = vst [vmem:[%s18235_s5 + $0x138] sm:$0xff] %v9024_v9 }
 0x71e   :  { %9069 = vsyncpa [#allocation4], 1 }
 0x71f   :  { %9070 = vsyncpa [#allocation5], 1 }

</bundles_post_ra>
